<compile_context>
chip_gen: v5e
topology: v5e:2x2
jax: 0.10.0
libtpu: 0.0.40
codegen_flags: <defaults>
</compile_context>

<pallas_src>
import numpy as np
import jax
import jax.numpy as jnp
from jax.experimental import pallas as pl
from jax.experimental.pallas import tpu as pltpu

NEG_SLOPE = 0.2  # LeakyReLU(0.2)


def _leaky(x):
    return jnp.where(x >= 0, x, NEG_SLOPE * x)


def _make_kernel(H, W, Cin, Cout, downsample, has_ws, gain, compute_dtype):
    HW = H * W

    def _pool2(z):
        # AvgPool2d(kernel_size=2) as reshape + sums (no mask matmul).
        h, w, c = z.shape
        z = z.reshape(h // 2, 2, w, c).sum(axis=1)        # pool H (untiled axis: cheap adds)
        z = z.reshape(h // 2, w // 2, 2, c).sum(axis=2)   # pool W (sublane pairs)
        return z * 0.25

    def _conv3x3(xh, w_ref, b, col_first, col_last):
        # xh: (H+2, W, Ci) f32 with zero rows at 0 and H+1 (H-padding); W unpadded.
        # The dx = -1/+1 taps are sublane rolls (XLU) + edge masks -> no shifted
        # slice reshapes (relayout copies) and no padded scratch.
        Ci = xh.shape[-1]
        left = jnp.where(col_first, 0.0, pltpu.roll(xh, shift=1, axis=1))       # x[.., w-1, :]
        right = jnp.where(col_last, 0.0, pltpu.roll(xh, shift=W - 1, axis=1))   # x[.., w+1, :]
        slabs = (left, xh, right)                                               # dx = 0, 1, 2
        taps = [slabs[dx][dy:dy + H] for dy in range(3) for dx in range(3)]
        patches = jnp.concatenate(taps, axis=-1)          # (H, W, 9*Ci), (dy, dx, ci) order
        p2 = patches.reshape(HW, 9 * Ci).astype(compute_dtype)
        # Single wide-K MXU matmul: (HW, 9*Ci) @ (9*Ci, Co), f32 accumulation.
        y = jnp.dot(p2, w_ref[...], preferred_element_type=jnp.float32)
        return y + b                                      # (HW, Co) f32, bias (1, Co)

    def kernel(xh_ref, w1_ref, b1_ref, w2_ref, b2_ref, *rest):
        if has_ws:
            ws_ref, out_ref = rest
        else:
            (out_ref,) = rest
            ws_ref = None

        xh = xh_ref[0]                                    # (H+2, W, Cin) f32
        col = jax.lax.broadcasted_iota(jnp.int32, (1, W, 1), 1)
        col_first = col == 0
        col_last = col == W - 1

        # ---- residual branch: conv3x3 -> LReLU -> conv3x3 -> LReLU ----
        a1 = _leaky(_conv3x3(xh, w1_ref, b1_ref[...], col_first, col_last))     # (HW, Cin)
        zrow = jnp.zeros((1, W, Cin), jnp.float32)
        a1h = jnp.concatenate([zrow, a1.reshape(H, W, Cin), zrow], axis=0)       # H-pad only
        a2 = _leaky(_conv3x3(a1h, w2_ref, b2_ref[...], col_first, col_last))     # (HW, Cout)
        a2 = a2.reshape(H, W, Cout)

        # ---- shortcut branch (pool *before* the 1x1 matmul: pooling is linear) ----
        x_in = xh[1:H + 1]                                # (H, W, Cin) interior rows
        if downsample:
            a2 = _pool2(a2)                               # (Hh, Wh, Cout)
            x_in = _pool2(x_in)                           # (Hh, Wh, Cin)
        if has_ws:
            ho, wo, _ = x_in.shape
            sc = jnp.dot(x_in.reshape(ho * wo, Cin).astype(compute_dtype), ws_ref[...],
                         preferred_element_type=jnp.float32).reshape(ho, wo, Cout)
        else:
            sc = x_in                                     # identity (Cin == Cout)

        out_ref[0] = (gain * (sc + a2)).astype(out_ref.dtype)

    return kernel


def discriminator_block(x, params, downsample, compute_dtype=jnp.bfloat16):
    """x: (B, H, W, Cin) float32 NHWC. Returns (B, Ho, Wo, Cout)."""
    B, H, W, Cin = x.shape
    Cout = params["w2"].shape[-1]
    has_ws = "ws" in params
    assert has_ws == (Cin != Cout)
    assert W % 8 == 0, "kernel assumes W is a multiple of the sublane tile (8)"
    if downsample:
        assert H % 2 == 0 and W % 16 == 0

    Ho, Wo = (H // 2, W // 2) if downsample else (H, W)
    gain = float(1.0 / np.sqrt(np.float32(2.0)))          # torch.rsqrt(2.0)

    # Glue: zero-pad H only (W-edge taps are handled in-kernel with roll+mask),
    # flatten HWIO conv weights to (9*Cin, Co) for the wide-K im2col matmul,
    # and cast matmul weights to the MXU compute dtype (halves weight DMA).
    xh = jnp.pad(x, ((0, 0), (1, 1), (0, 0), (0, 0)))
    w1f = params["w1"].reshape(9 * Cin, Cin).astype(compute_dtype)
    w2f = params["w2"].reshape(9 * Cin, Cout).astype(compute_dtype)
    b1 = params["b1"].reshape(1, Cin).astype(jnp.float32)
    b2 = params["b2"].reshape(1, Cout).astype(jnp.float32)

    args = [xh, w1f, b1, w2f, b2]
    in_specs = [
        pl.BlockSpec((1, H + 2, W, Cin), lambda b: (b, 0, 0, 0)),
        pl.BlockSpec((9 * Cin, Cin), lambda b: (0, 0)),
        pl.BlockSpec((1, Cin), lambda b: (0, 0)),
        pl.BlockSpec((9 * Cin, Cout), lambda b: (0, 0)),
        pl.BlockSpec((1, Cout), lambda b: (0, 0)),
    ]
    if has_ws:
        args.append(params["ws"].astype(compute_dtype))
        in_specs.append(pl.BlockSpec((Cin, Cout), lambda b: (0, 0)))

    kernel = _make_kernel(H, W, Cin, Cout, downsample, has_ws, gain, compute_dtype)

    # VMEM budget from the actual footprint (double-buffered I/O + im2col
    # patches + branch activations), with headroom, clamped to the smallest
    # physical VMEM (v7x: 64 MiB).
    itemsize = jnp.dtype(compute_dtype).itemsize
    est = ((H + 2) * W * Cin * 4 * 2                       # padded input, double buffered
           + H * W * 9 * Cin * (4 + itemsize)              # im2col patches (f32 build + cast)
           + H * W * (Cin + Cout) * 4 * 3                  # a1 / a2 / shortcut temps
           + Ho * Wo * Cout * 4 * 2)                       # output, double buffered
    vmem_limit = int(min(64 * 2**20, max(32 * 2**20, 2 * est)))

    return pl.pallas_call(
        kernel,
        out_shape=jax.ShapeDtypeStruct((B, Ho, Wo, Cout), x.dtype),
        grid_spec=pltpu.PrefetchScalarGridSpec(
            num_scalar_prefetch=0,
            grid=(B,),
            in_specs=in_specs,
            out_specs=pl.BlockSpec((1, Ho, Wo, Cout), lambda b: (b, 0, 0, 0)),
        ),
        compiler_params=pltpu.CompilerParams(
            dimension_semantics=("parallel",),             # batch elems independent (2 TCs on v7x)
            vmem_limit_bytes=vmem_limit,
        ),
    )(*args)


def init_params(key, Cin, Cout):
    """Deterministic synthetic parameters (HWIO conv weights)."""
    ks = jax.random.split(key, 5)
    p = {
        "w1": 0.1 * jax.random.normal(ks[0], (3, 3, Cin, Cin), jnp.float32),
        "b1": 0.1 * jax.random.normal(ks[1], (Cin,), jnp.float32),
        "w2": 0.1 * jax.random.normal(ks[2], (3, 3, Cin, Cout), jnp.float32),
        "b2": 0.1 * jax.random.normal(ks[3], (Cout,), jnp.float32),
    }
    if Cin != Cout:
        p["ws"] = 0.1 * jax.random.normal(ks[4], (Cin, Cout), jnp.float32)
    return p


def reference_block(x, params, downsample):
    """Pure-JAX reference (mirrors the PyTorch module) for a correctness check."""
    gain = float(1.0 / np.sqrt(np.float32(2.0)))
    dn = ("NHWC", "HWIO", "NHWC")

    def conv3x3(z, w):
        return jax.lax.conv_general_dilated(z, w, (1, 1), ((1, 1), (1, 1)),
                                            dimension_numbers=dn)

    def pool(z):
        B, H, W, C = z.shape
        return z.reshape(B, H // 2, 2, W // 2, 2, C).mean(axis=(2, 4))

    a = conv3x3(x, params["w1"]) + params["b1"]
    a = jnp.where(a >= 0, a, NEG_SLOPE * a)
    a = conv3x3(a, params["w2"]) + params["b2"]
    a = jnp.where(a >= 0, a, NEG_SLOPE * a)
    if downsample:
        a = pool(a)
    s = x if "ws" not in params else jnp.einsum("bhwc,co->bhwo", x, params["ws"])
    if downsample:
        s = pool(s)
    return gain * (s + a)


if __name__ == "__main__":
    key = jax.random.PRNGKey(0)
    kx, kp1, kp2 = jax.random.split(key, 3)

    # NHWC input (B=2, H=W=16, Cin=4)  <=>  PyTorch NCHW (2, 4, 16, 16)
    B, Cin, Cout, H, W = 2, 4, 8, 16, 16
    x = jax.random.normal(kx, (B, H, W, Cin), jnp.float32)

    # Case 1: channel change (4 -> 8) with downsample=True, bf16 MXU compute.
    params = init_params(kp1, Cin, Cout)
    y = discriminator_block(x, params, downsample=True, compute_dtype=jnp.bfloat16)
    jax.block_until_ready(y)
    y_ref = reference_block(x, params, True)
    assert y.shape == (B, H // 2, W // 2, Cout)
    err = float(jnp.max(jnp.abs(y - y_ref)))
    assert err < 3e-2, f"max abs err {err} (bf16 compute)"

    # Case 2: identity shortcut (4 -> 4), downsample=False, f32 compute (tight tol).
    params2 = init_params(kp2, Cin, Cin)
    y2 = discriminator_block(x, params2, downsample=False, compute_dtype=jnp.float32)
    jax.block_until_ready(y2)
    y2_ref = reference_block(x, params2, False)
    err2 = float(jnp.max(jnp.abs(y2 - y2_ref)))
    assert jnp.allclose(y2, y2_ref, atol=1e-4, rtol=1e-4), f"max abs err {err2}"

    print("KERNEL_OK")
</pallas_src>

<mosaic_0001>
module attributes {stable_mosaic.version = 11 : i64} {
  func.func @kernel(%arg0: i32, %arg1: memref<1x18x16x4xf32, #tpu.memory_space<vmem>>, %arg2: memref<36x4xbf16, #tpu.memory_space<vmem>>, %arg3: memref<1x4xf32, #tpu.memory_space<vmem>>, %arg4: memref<36x8xbf16, #tpu.memory_space<vmem>>, %arg5: memref<1x8xf32, #tpu.memory_space<vmem>>, %arg6: memref<4x8xbf16, #tpu.memory_space<vmem>>, %arg7: memref<1x8x8x8xf32, #tpu.memory_space<vmem>>) attributes {dimension_semantics = [#tpu.dimension_semantics<parallel>], iteration_bounds = array<i64: 2>, scalar_prefetch = 0 : i64, scratch_operands = 0 : i64, tpu.core_type = #tpu.core_type<tc>, window_params = [{transform_indices = @transform_0, window_bounds = array<i64: 1, 18, 16, 4>}, {pipeline_mode = #tpu.pipeline_mode<synchronous>, transform_indices = @transform_1, window_bounds = array<i64: 36, 4>}, {pipeline_mode = #tpu.pipeline_mode<synchronous>, transform_indices = @transform_2, window_bounds = array<i64: 1, 4>}, {pipeline_mode = #tpu.pipeline_mode<synchronous>, transform_indices = @transform_3, window_bounds = array<i64: 36, 8>}, {pipeline_mode = #tpu.pipeline_mode<synchronous>, transform_indices = @transform_4, window_bounds = array<i64: 1, 8>}, {pipeline_mode = #tpu.pipeline_mode<synchronous>, transform_indices = @transform_5, window_bounds = array<i64: 4, 8>}, {transform_indices = @transform_6, window_bounds = array<i64: 1, 8, 8, 8>}]} {
    %c0 = arith.constant 0 : index
    %c0_0 = arith.constant 0 : index
    %c0_1 = arith.constant 0 : index
    %c0_2 = arith.constant 0 : index
    %0 = vector.load %arg1[%c0, %c0_0, %c0_1, %c0_2] : memref<1x18x16x4xf32, #tpu.memory_space<vmem>>, vector<1x18x16x4xf32>
    %1 = vector.shape_cast %0 : vector<1x18x16x4xf32> to vector<18x16x4xf32>
    %2 = tpu.iota {dimensions = array<i32: 1>} : vector<1x16x1xi32>
    %c0_i32 = arith.constant 0 : i32
    %3 = vector.broadcast %c0_i32 : i32 to vector<1x16x1xi32>
    %4 = arith.cmpi eq, %2, %3 : vector<1x16x1xi32>
    %c15_i32 = arith.constant 15 : i32
    %5 = vector.broadcast %c15_i32 : i32 to vector<1x16x1xi32>
    %6 = arith.cmpi eq, %2, %5 : vector<1x16x1xi32>
    %c0_3 = arith.constant 0 : index
    %c0_4 = arith.constant 0 : index
    %7 = vector.load %arg3[%c0_3, %c0_4] : memref<1x4xf32, #tpu.memory_space<vmem>>, vector<1x4xf32>
    %c1_i32 = arith.constant 1 : i32
    %8 = tpu.dynamic_rotate %1 by %c1_i32 dim 1 : vector<18x16x4xf32>, i32 -> vector<18x16x4xf32>
    %cst = arith.constant 0.000000e+00 : f32
    %9 = vector.shape_cast %4 : vector<1x16x1xi1> to vector<1x16x1xi1>
    %10 = vector.broadcast %9 : vector<1x16x1xi1> to vector<18x16x4xi1>
    %11 = vector.broadcast %cst : f32 to vector<18x16x4xf32>
    %12 = arith.select %10, %11, %8 : vector<18x16x4xi1>, vector<18x16x4xf32>
    %c15_i32_5 = arith.constant 15 : i32
    %13 = tpu.dynamic_rotate %1 by %c15_i32_5 dim 1 : vector<18x16x4xf32>, i32 -> vector<18x16x4xf32>
    %cst_6 = arith.constant 0.000000e+00 : f32
    %14 = vector.shape_cast %6 : vector<1x16x1xi1> to vector<1x16x1xi1>
    %15 = vector.broadcast %14 : vector<1x16x1xi1> to vector<18x16x4xi1>
    %16 = vector.broadcast %cst_6 : f32 to vector<18x16x4xf32>
    %17 = arith.select %15, %16, %13 : vector<18x16x4xi1>, vector<18x16x4xf32>
    %18 = vector.extract_strided_slice %12 {offsets = [0, 0, 0], sizes = [16, 16, 4], strides = [1, 1, 1]} : vector<18x16x4xf32> to vector<16x16x4xf32>
    %19 = vector.extract_strided_slice %1 {offsets = [0, 0, 0], sizes = [16, 16, 4], strides = [1, 1, 1]} : vector<18x16x4xf32> to vector<16x16x4xf32>
    %20 = vector.extract_strided_slice %17 {offsets = [0, 0, 0], sizes = [16, 16, 4], strides = [1, 1, 1]} : vector<18x16x4xf32> to vector<16x16x4xf32>
    %21 = vector.extract_strided_slice %12 {offsets = [1, 0, 0], sizes = [16, 16, 4], strides = [1, 1, 1]} : vector<18x16x4xf32> to vector<16x16x4xf32>
    %22 = vector.extract_strided_slice %1 {offsets = [1, 0, 0], sizes = [16, 16, 4], strides = [1, 1, 1]} : vector<18x16x4xf32> to vector<16x16x4xf32>
    %23 = vector.extract_strided_slice %17 {offsets = [1, 0, 0], sizes = [16, 16, 4], strides = [1, 1, 1]} : vector<18x16x4xf32> to vector<16x16x4xf32>
    %24 = vector.extract_strided_slice %12 {offsets = [2, 0, 0], sizes = [16, 16, 4], strides = [1, 1, 1]} : vector<18x16x4xf32> to vector<16x16x4xf32>
    %25 = vector.extract_strided_slice %1 {offsets = [2, 0, 0], sizes = [16, 16, 4], strides = [1, 1, 1]} : vector<18x16x4xf32> to vector<16x16x4xf32>
    %26 = vector.extract_strided_slice %17 {offsets = [2, 0, 0], sizes = [16, 16, 4], strides = [1, 1, 1]} : vector<18x16x4xf32> to vector<16x16x4xf32>
    %27 = tpu.concatenate %18, %19, %20, %21, %22, %23, %24, %25, %26 in 2 : vector<16x16x4xf32>, vector<16x16x4xf32>, vector<16x16x4xf32>, vector<16x16x4xf32>, vector<16x16x4xf32>, vector<16x16x4xf32>, vector<16x16x4xf32>, vector<16x16x4xf32>, vector<16x16x4xf32> -> vector<16x16x36xf32>
    %28 = vector.shape_cast %27 : vector<16x16x36xf32> to vector<256x36xf32>
    %29 = arith.truncf %28 : vector<256x36xf32> to vector<256x36xbf16>
    %c0_7 = arith.constant 0 : index
    %c0_8 = arith.constant 0 : index
    %30 = vector.load %arg2[%c0_7, %c0_8] : memref<36x4xbf16, #tpu.memory_space<vmem>>, vector<36x4xbf16>
    %cst_9 = arith.constant dense<0.000000e+00> : vector<256x4xf32>
    %31 = tpu.matmul %29, %30, %cst_9 {dimension_numbers = #tpu.dot_dimension_numbers<[1], [0], [0], [1], [0, 0, 1, 1], [], []>} : vector<256x36xbf16>, vector<36x4xbf16>, vector<256x4xf32> -> vector<256x4xf32>
    %32 = vector.broadcast %7 : vector<1x4xf32> to vector<256x4xf32>
    %33 = arith.addf %31, %32 : vector<256x4xf32>
    %cst_10 = arith.constant 0.000000e+00 : f32
    %34 = vector.broadcast %cst_10 : f32 to vector<256x4xf32>
    %35 = arith.cmpf oge, %33, %34 : vector<256x4xf32>
    %cst_11 = arith.constant 2.000000e-01 : f32
    %36 = vector.broadcast %cst_11 : f32 to vector<256x4xf32>
    %37 = arith.mulf %36, %33 : vector<256x4xf32>
    %38 = arith.select %35, %33, %37 : vector<256x4xi1>, vector<256x4xf32>
    %cst_12 = arith.constant 0.000000e+00 : f32
    %39 = vector.broadcast %cst_12 : f32 to vector<1x16x4xf32>
    %40 = vector.shape_cast %38 : vector<256x4xf32> to vector<16x16x4xf32>
    %41 = tpu.concatenate %39, %40, %39 in 0 : vector<1x16x4xf32>, vector<16x16x4xf32>, vector<1x16x4xf32> -> vector<18x16x4xf32>
    %c0_13 = arith.constant 0 : index
    %c0_14 = arith.constant 0 : index
    %42 = vector.load %arg5[%c0_13, %c0_14] : memref<1x8xf32, #tpu.memory_space<vmem>>, vector<1x8xf32>
    %c1_i32_15 = arith.constant 1 : i32
    %43 = tpu.dynamic_rotate %41 by %c1_i32_15 dim 1 : vector<18x16x4xf32>, i32 -> vector<18x16x4xf32>
    %cst_16 = arith.constant 0.000000e+00 : f32
    %44 = vector.shape_cast %4 : vector<1x16x1xi1> to vector<1x16x1xi1>
    %45 = vector.broadcast %44 : vector<1x16x1xi1> to vector<18x16x4xi1>
    %46 = vector.broadcast %cst_16 : f32 to vector<18x16x4xf32>
    %47 = arith.select %45, %46, %43 : vector<18x16x4xi1>, vector<18x16x4xf32>
    %c15_i32_17 = arith.constant 15 : i32
    %48 = tpu.dynamic_rotate %41 by %c15_i32_17 dim 1 : vector<18x16x4xf32>, i32 -> vector<18x16x4xf32>
    %cst_18 = arith.constant 0.000000e+00 : f32
    %49 = vector.shape_cast %6 : vector<1x16x1xi1> to vector<1x16x1xi1>
    %50 = vector.broadcast %49 : vector<1x16x1xi1> to vector<18x16x4xi1>
    %51 = vector.broadcast %cst_18 : f32 to vector<18x16x4xf32>
    %52 = arith.select %50, %51, %48 : vector<18x16x4xi1>, vector<18x16x4xf32>
    %53 = vector.extract_strided_slice %47 {offsets = [0, 0, 0], sizes = [16, 16, 4], strides = [1, 1, 1]} : vector<18x16x4xf32> to vector<16x16x4xf32>
    %54 = vector.extract_strided_slice %41 {offsets = [0, 0, 0], sizes = [16, 16, 4], strides = [1, 1, 1]} : vector<18x16x4xf32> to vector<16x16x4xf32>
    %55 = vector.extract_strided_slice %52 {offsets = [0, 0, 0], sizes = [16, 16, 4], strides = [1, 1, 1]} : vector<18x16x4xf32> to vector<16x16x4xf32>
    %56 = vector.extract_strided_slice %47 {offsets = [1, 0, 0], sizes = [16, 16, 4], strides = [1, 1, 1]} : vector<18x16x4xf32> to vector<16x16x4xf32>
    %57 = vector.extract_strided_slice %41 {offsets = [1, 0, 0], sizes = [16, 16, 4], strides = [1, 1, 1]} : vector<18x16x4xf32> to vector<16x16x4xf32>
    %58 = vector.extract_strided_slice %52 {offsets = [1, 0, 0], sizes = [16, 16, 4], strides = [1, 1, 1]} : vector<18x16x4xf32> to vector<16x16x4xf32>
    %59 = vector.extract_strided_slice %47 {offsets = [2, 0, 0], sizes = [16, 16, 4], strides = [1, 1, 1]} : vector<18x16x4xf32> to vector<16x16x4xf32>
    %60 = vector.extract_strided_slice %41 {offsets = [2, 0, 0], sizes = [16, 16, 4], strides = [1, 1, 1]} : vector<18x16x4xf32> to vector<16x16x4xf32>
    %61 = vector.extract_strided_slice %52 {offsets = [2, 0, 0], sizes = [16, 16, 4], strides = [1, 1, 1]} : vector<18x16x4xf32> to vector<16x16x4xf32>
    %62 = tpu.concatenate %53, %54, %55, %56, %57, %58, %59, %60, %61 in 2 : vector<16x16x4xf32>, vector<16x16x4xf32>, vector<16x16x4xf32>, vector<16x16x4xf32>, vector<16x16x4xf32>, vector<16x16x4xf32>, vector<16x16x4xf32>, vector<16x16x4xf32>, vector<16x16x4xf32> -> vector<16x16x36xf32>
    %63 = vector.shape_cast %62 : vector<16x16x36xf32> to vector<256x36xf32>
    %64 = arith.truncf %63 : vector<256x36xf32> to vector<256x36xbf16>
    %c0_19 = arith.constant 0 : index
    %c0_20 = arith.constant 0 : index
    %65 = vector.load %arg4[%c0_19, %c0_20] : memref<36x8xbf16, #tpu.memory_space<vmem>>, vector<36x8xbf16>
    %cst_21 = arith.constant dense<0.000000e+00> : vector<256x8xf32>
    %66 = tpu.matmul %64, %65, %cst_21 {dimension_numbers = #tpu.dot_dimension_numbers<[1], [0], [0], [1], [0, 0, 1, 1], [], []>} : vector<256x36xbf16>, vector<36x8xbf16>, vector<256x8xf32> -> vector<256x8xf32>
    %67 = vector.broadcast %42 : vector<1x8xf32> to vector<256x8xf32>
    %68 = arith.addf %66, %67 : vector<256x8xf32>
    %cst_22 = arith.constant 0.000000e+00 : f32
    %69 = vector.broadcast %cst_22 : f32 to vector<256x8xf32>
    %70 = arith.cmpf oge, %68, %69 : vector<256x8xf32>
    %cst_23 = arith.constant 2.000000e-01 : f32
    %71 = vector.broadcast %cst_23 : f32 to vector<256x8xf32>
    %72 = arith.mulf %71, %68 : vector<256x8xf32>
    %73 = arith.select %70, %68, %72 : vector<256x8xi1>, vector<256x8xf32>
    %74 = vector.shape_cast %73 : vector<256x8xf32> to vector<16x16x8xf32>
    %75 = vector.extract_strided_slice %1 {offsets = [1, 0, 0], sizes = [16, 16, 4], strides = [1, 1, 1]} : vector<18x16x4xf32> to vector<16x16x4xf32>
    %76 = vector.shape_cast %74 : vector<16x16x8xf32> to vector<8x2x16x8xf32>
    %cst_24 = arith.constant dense<0.000000e+00> : vector<8x16x8xf32>
    %77 = vector.multi_reduction <add>, %76, %cst_24 [1] : vector<8x2x16x8xf32> to vector<8x16x8xf32>
    %78 = vector.shape_cast %77 : vector<8x16x8xf32> to vector<8x8x2x8xf32>
    %cst_25 = arith.constant dense<0.000000e+00> : vector<8x8x8xf32>
    %79 = vector.multi_reduction <add>, %78, %cst_25 [2] : vector<8x8x2x8xf32> to vector<8x8x8xf32>
    %cst_26 = arith.constant 2.500000e-01 : f32
    %80 = vector.broadcast %cst_26 : f32 to vector<8x8x8xf32>
    %81 = arith.mulf %79, %80 : vector<8x8x8xf32>
    %82 = vector.shape_cast %75 : vector<16x16x4xf32> to vector<8x2x16x4xf32>
    %cst_27 = arith.constant dense<0.000000e+00> : vector<8x16x4xf32>
    %83 = vector.multi_reduction <add>, %82, %cst_27 [1] : vector<8x2x16x4xf32> to vector<8x16x4xf32>
    %84 = vector.shape_cast %83 : vector<8x16x4xf32> to vector<8x8x2x4xf32>
    %cst_28 = arith.constant dense<0.000000e+00> : vector<8x8x4xf32>
    %85 = vector.multi_reduction <add>, %84, %cst_28 [2] : vector<8x8x2x4xf32> to vector<8x8x4xf32>
    %cst_29 = arith.constant 2.500000e-01 : f32
    %86 = vector.broadcast %cst_29 : f32 to vector<8x8x4xf32>
    %87 = arith.mulf %85, %86 : vector<8x8x4xf32>
    %88 = vector.shape_cast %87 : vector<8x8x4xf32> to vector<64x4xf32>
    %89 = arith.truncf %88 : vector<64x4xf32> to vector<64x4xbf16>
    %c0_30 = arith.constant 0 : index
    %c0_31 = arith.constant 0 : index
    %90 = vector.load %arg6[%c0_30, %c0_31] : memref<4x8xbf16, #tpu.memory_space<vmem>>, vector<4x8xbf16>
    %cst_32 = arith.constant dense<0.000000e+00> : vector<64x8xf32>
    %91 = tpu.matmul %89, %90, %cst_32 {dimension_numbers = #tpu.dot_dimension_numbers<[1], [0], [0], [1], [0, 0, 1, 1], [], []>} : vector<64x4xbf16>, vector<4x8xbf16>, vector<64x8xf32> -> vector<64x8xf32>
    %92 = vector.shape_cast %91 : vector<64x8xf32> to vector<8x8x8xf32>
    %93 = arith.addf %92, %81 : vector<8x8x8xf32>
    %cst_33 = arith.constant 0.707106769 : f32
    %94 = vector.broadcast %cst_33 : f32 to vector<8x8x8xf32>
    %95 = arith.mulf %94, %93 : vector<8x8x8xf32>
    %c0_34 = arith.constant 0 : index
    %c0_35 = arith.constant 0 : index
    %c0_36 = arith.constant 0 : index
    %c0_37 = arith.constant 0 : index
    %96 = vector.load %arg7[%c0_34, %c0_35, %c0_36, %c0_37] : memref<1x8x8x8xf32, #tpu.memory_space<vmem>>, vector<1x8x8x8xf32>
    %97 = vector.shape_cast %96 : vector<1x8x8x8xf32> to vector<8x8x8xf32>
    %98 = vector.shape_cast %95 : vector<8x8x8xf32> to vector<1x8x8x8xf32>
    tpu.vector_store %arg7[%c0_34, %c0_35, %c0_36, %c0_37], %98 {strides = array<i32>} : memref<1x8x8x8xf32, #tpu.memory_space<vmem>>, vector<1x8x8x8xf32>,
    return
  }
  func.func @transform_0(%arg0: i32) -> (i32, i32, i32, i32) {
    %c0_i32 = arith.constant 0 : i32
    %c0_i32_0 = arith.constant 0 : i32
    %c0_i32_1 = arith.constant 0 : i32
    %c0_i32_2 = arith.constant 0 : i32
    return %arg0, %c0_i32, %c0_i32_0, %c0_i32_1 : i32, i32, i32, i32
  }
  func.func @transform_1(%arg0: i32) -> (i32, i32) {
    %c0_i32 = arith.constant 0 : i32
    %c0_i32_0 = arith.constant 0 : i32
    %c0_i32_1 = arith.constant 0 : i32
    return %c0_i32, %c0_i32_0 : i32, i32
  }
  func.func @transform_2(%arg0: i32) -> (i32, i32) {
    %c0_i32 = arith.constant 0 : i32
    %c0_i32_0 = arith.constant 0 : i32
    %c0_i32_1 = arith.constant 0 : i32
    return %c0_i32, %c0_i32_0 : i32, i32
  }
  func.func @transform_3(%arg0: i32) -> (i32, i32) {
    %c0_i32 = arith.constant 0 : i32
    %c0_i32_0 = arith.constant 0 : i32
    %c0_i32_1 = arith.constant 0 : i32
    return %c0_i32, %c0_i32_0 : i32, i32
  }
  func.func @transform_4(%arg0: i32) -> (i32, i32) {
    %c0_i32 = arith.constant 0 : i32
    %c0_i32_0 = arith.constant 0 : i32
    %c0_i32_1 = arith.constant 0 : i32
    return %c0_i32, %c0_i32_0 : i32, i32
  }
  func.func @transform_5(%arg0: i32) -> (i32, i32) {
    %c0_i32 = arith.constant 0 : i32
    %c0_i32_0 = arith.constant 0 : i32
    %c0_i32_1 = arith.constant 0 : i32
    return %c0_i32, %c0_i32_0 : i32, i32
  }
  func.func @transform_6(%arg0: i32) -> (i32, i32, i32, i32) {
    %c0_i32 = arith.constant 0 : i32
    %c0_i32_0 = arith.constant 0 : i32
    %c0_i32_1 = arith.constant 0 : i32
    %c0_i32_2 = arith.constant 0 : i32
    return %arg0, %c0_i32, %c0_i32_0, %c0_i32_1 : i32, i32, i32, i32
  }
}

</mosaic_0001>

<bundles_post_ra>
// kernel: tpu_custom_call.1
= control target key start
LH: loop header
LB: loop body
LE: loop exit
PB: predicated region body
PF: predicated region fallthrough
CT: control target
= control target key end

     0   :  { %11 = vsyncpa [#allocation3], 0  ;;  %s11223_s0 = inlined_call_operand.vmem [shape: f32[2,18,16,4], index: 0, kind: input, shape index: {}]   ;;  %s11224_s1 = inlined_call_operand.vmem [shape: bf16[36,4], index: 1, kind: input, shape index: {}]   ;;  %s11225_s2 = inlined_call_operand.vmem [shape: f32[1,4], index: 2, kind: input, shape index: {}]   ;;  %s11226_s3 = inlined_call_operand.vmem [shape: bf16[36,8], index: 3, kind: input, shape index: {}]   ;;  %s11227_s4 = inlined_call_operand.vmem [shape: f32[1,8], index: 4, kind: input, shape index: {}]   ;;  %s11228_s5 = inlined_call_operand.vmem [shape: bf16[4,8], index: 5, kind: input, shape index: {}]   ;;  %s11229_s6 = inlined_call_operand.hbm [shape: f32[2,8,8,8], index: 6, kind: output, shape index: {}]  }
   0x1   :  { %13 = vsyncpa [#allocation3 + $0x1], 0  ;;  %s6949_s21 = smov 0   ;;  %s6951_s22 = smov 0  }
   0x2   :  { %s6953_s23 = smov 0   ;;  %s6955_s24 = smov 0  }
   0x3 LB: > { %s6970_s25 = sadd.s32 4294967295, %s6902_s24   ;;  %s5407_s26 = sadd.s32 4294967294, %s6902_s24   ;;  %s6902_s24 = sphi %s6955_s24, %s11814_s24   ;;  %s6898_s23 = sphi %s6953_s23, %s11813_s23   ;;  %s6894_s22 = sphi %s6951_s22, %s11812_s22   ;;  %s6890_s21 = sphi %s6949_s21, %s11811_s21  }
   0x4   : > { %s6974_s27 = sadd.s32 1, %s6902_s24   ;;  %s157_s28 = sadd.s32 1, %s6898_s23 }
   0x5   : > { %s154_s29 = ssub.s32 %s6902_s24, %s6974_s27  ;;  %p167_p0 = scmp.ne.s32.totalorder %s6898_s23, %s6894_s22 }
   0x6   : > { %p155_p1 = scmp.eq.s32.totalorder %s154_s29, 0  ;;  %p168_p2 = scmp.eq.s32.totalorder %s6970_s25, 1 }
   0x7   : > { %p173_p3 = scmp.ne.s32.totalorder %s6894_s22, %s6890_s21  ;;  %p174_p4 = scmp.eq.s32.totalorder %s5407_s26, 1 }
   0x8   : > { %s6985_s30 = scalar_select %p155_p1, %s6898_s23, %s157_s28  }
   0x9   : > { %p6987_p5 = por %p168_p2, %p167_p0  ;;  %p6991_p6 = por %p174_p4, %p173_p3 }
   0xa   : > { %p5410_p7 = scmp.ge.s32.totalorder %s6902_s24, 1  ;;  %p215_p8 = scmp.lt.s32.totalorder %s6902_s24, 3 }
   0xc   : > { %p216_p9 = pnand %p5410_p7, %p215_p8 }
   0xe   : > { %219 = sbr.rel (%p216_p9) target bundleno = 1464 (0x5b8), region = 44 }
  0x13   : > { %p245_p10 = scmp.lt.s32.totalorder %s6970_s25, 1  ;;  %v287_v0 = vlaneseq  ;;  %s6904_s14 = smov 4   ;;  %vm1747_vm4 = vcmask 1041408   ;;  %vm1395_vm5 = vcmask 31744   ;;  %vm1461_vm6 = vcmask 97280  }
  0x14   : > { %s6905_s15 = smov 8   ;;  %s6906_s16 = smov 12   ;;  %vm1428_vm7 = vcmask 64512   ;;  %vm1494_vm8 = vcmask 130048   ;;  %vm1560_vm9 = vcmask 195584   ;;  %vm1527_vm10 = vcmask 162816  }
  0x15   : > { %s246_s9 = scalar_select %p245_p10, %s6970_s25, 1  ;;  %v7030_v9 = vshrl.u32 %v287_v0, 7  ;;  %vm1593_vm11 = vcmask 228352   ;;  %vm11356_vm12 = vcmask 261120   ;;  %vm11355_vm13 = vcmask 293888  }
  0x16   : > { %s6907_s17 = smov 16   ;;  %s6908_s18 = smov 20  }
  0x17   : > { %s5484_s10 = smul.u32 288, %s246_s9  ;;  %11411 = vst [vmem:[#allocation5_spill] sm:$0xff] %v7030_v9  ;;  %vm331_vm0 = vcmp.lt.s32.totalorder %v7030_v9, 1  ;;  %v7177_v47 = vadd.s32 8, %v7030_v9  ;;  %vm444_vm1 = vcmp.lt.s32.totalorder %v7030_v9, 7  ;;  %vm290_vm3 = vcmp.eq.s32.totalorder %v7030_v9, 0 }
  0x18   : > { %s6909_s19 = smov 24   ;;  %s6910_s20 = smov 28  }
  0x19   : > { %s7002_s13 = scalar_lea.vmem %s11223_s0, %s5484_s10  ;;  %11414 = vst [vmem:[#allocation8_spill] sm:$0xff] %v7177_v47  ;;  %vm293_vm2 = vcmp.eq.s32.totalorder %v7177_v47, 15  ;;  %s6911_s26 = smov 32   ;;  %v1679_v47 = vld [vmem:[%s11224_s1 + $0x10] sm:$0x3] }
  0x1a   : > { %v7005_v1 = vld [vmem:[%s7002_s13 + $0x40] sm:$0xff]  ;;  %v7008_v2 = vld [vmem:[%s7002_s13 + $0x48] sm:$0xff]  ;;  %v7039_v13 = vld [vmem:[%s7002_s13 + $0x50] sm:$0xff]  ;;  %s5474_s9 = sshll.u32 %s6970_s25, 6 }
  0x1b   : > { %v7011_v3 = vld [vmem:[%s7002_s13 + $0x20] sm:$0xff]  ;;  %v7015_v4 = vpack.i.bf16 %v7008_v2, %v7005_v1  ;;  %v7018_v5 = vld [vmem:[%s7002_s13 + $0x28] sm:$0xff]  ;;  %v7046_v14 = vld [vmem:[%s7002_s13 + $0x58] sm:$0xff]  ;;  %v412_v63 = vrot.slane %v7005_v1, 1  ;;  %v430_v0 = vrot.slane %v7008_v2, 1  ;;  %s5341_s12 = scalar_lea.hbm %s11229_s6, %s5474_s9 }
  0x1c   : > { %v7021_v6 = vld [vmem:[%s7002_s13] sm:$0xff]  ;;  %v7024_v7 = vld [vmem:[%s7002_s13 + $0x8] sm:$0xff]  ;;  %v7028_v8 = vpack.i.bf16 %v7018_v5, %v7011_v3  ;;  %v7049_v15 = vld [vmem:[%s7002_s13 + $0x30] sm:$0xff]  ;;  %v7070_v20 = vpack.i.bf16 %v7046_v14, %v7039_v13  ;;  %s5344_s25 = sshll.u32 %s5341_s12, 4  ;;  %s5345_s25 = int_to_ptr.hbm [resolvable:$true] %s5344_s25 }
  0x1d   : > { %v11231_v10 = vrot.slane %v7024_v7, 7  ;;  %v5534_v11 = vpack.i.bf16 %v7024_v7, %v7021_v6  ;;  %5555 = vrot.lane.b32.xlu2 %v7015_v4, %s6904_s14  ;;  %v11230_v12 = vrot.slane %v7021_v6, 7  ;;  %v7060_v17 = vld [vmem:[%s7002_s13 + $0x38] sm:$0xff]  ;;  %v7063_v18 = vld [vmem:[%s7002_s13 + $0x10] sm:$0xff]  ;;  %v7083_v23 = vld [vmem:[%s7002_s13 + $0x80] sm:$0xff]  ;;  %v426_v50 = vrot.slane %v7024_v7, 1 }
  0x1e   : > { %5545 = vrot.lane.b32.xlu1 %v7028_v8, %s6904_s14  ;;  %v7066_v19 = vld [vmem:[%s7002_s13 + $0x18] sm:$0xff]  ;;  %v7074_v21 = vpack.i.bf16 %v7060_v17, %v7049_v15  ;;  %v7090_v24 = vld [vmem:[%s7002_s13 + $0x88] sm:$0xff]  ;;  %v7093_v25 = vld [vmem:[%s7002_s13 + $0x70] sm:$0xff]  ;;  %v409_v48 = vrot.slane %v7063_v18, 1  ;;  %v408_v51 = vrot.slane %v7021_v6, 1 }
  0x1f   : > { %5535 = vrot.lane.b32.xlu0 %v5534_v11, %s6904_s14  ;;  %v7057_v16 = vsel %vm331_vm0, %v11231_v10, %v11230_v12  ;;  %v7078_v22 = vpack.i.bf16 %v7066_v19, %v7063_v18  ;;  %v7096_v26 = vld [vmem:[%s7002_s13 + $0x78] sm:$0xff]  ;;  %v7099_v27 = vld [vmem:[%s7002_s13 + $0x60] sm:$0xff]  ;;  %v7102_v28 = vld [vmem:[%s7002_s13 + $0x68] sm:$0xff]  ;;  %v7106_v29 = vpack.i.bf16 %v7090_v24, %v7083_v23  ;;  %v427_v49 = vrot.slane %v7066_v19, 1 }
  0x20   : > { %11412 = vst [vmem:[#allocation6_spill] sm:$0xff] %v7057_v16  ;;  %v7110_v30 = vpack.i.bf16 %v7096_v26, %v7093_v25  ;;  %v7114_v31 = vpack.i.bf16 %v7102_v28, %v7099_v27  ;;  %v7119_v32 = vld [vmem:[%s7002_s13 + $0xb0] sm:$0xff]  ;;  %v7126_v33 = vld [vmem:[%s7002_s13 + $0xb8] sm:$0xff]  ;;  %v7129_v34 = vld [vmem:[%s7002_s13 + $0xa0] sm:$0xff]  ;;  %v463_v56 = vsel %vm444_vm1, %v426_v50, %v408_v51  ;;  %v445_v61 = vsel %vm444_vm1, %v408_v51, %v426_v50 }
  0x21   : > { %v7132_v35 = vld [vmem:[%s7002_s13 + $0xa8] sm:$0xff]  ;;  %v7135_v36 = vld [vmem:[%s7002_s13 + $0x90] sm:$0xff]  ;;  %v7138_v37 = vld [vmem:[%s7002_s13 + $0x98] sm:$0xff]  ;;  %v7142_v38 = vpack.i.bf16 %v7126_v33, %v7119_v32  ;;  %v464_v55 = vsel %vm444_vm1, %v427_v49, %v409_v48  ;;  %v446_v57 = vsel %vm444_vm1, %v409_v48, %v427_v49  ;;  %v486_v62 = vsel %vm293_vm2, 0.0, %v463_v56 }
  0x22   : > { %v7146_v39 = vpack.i.bf16 %v7132_v35, %v7129_v34  ;;  %v7150_v40 = vpack.i.bf16 %v7138_v37, %v7135_v36  ;;  %v7155_v41 = vld [vmem:[%s7002_s13 + $0xe0] sm:$0xff]  ;;  %v7162_v42 = vld [vmem:[%s7002_s13 + $0xe8] sm:$0xff]  ;;  %v7165_v43 = vld [vmem:[%s7002_s13 + $0xd0] sm:$0xff]  ;;  %v488_v58 = vsel %vm293_vm2, 0.0, %v464_v55  ;;  %v410_v11 = vrot.slane %v7011_v3, 1 }
  0x23   : > { %11413 = vst [vmem:[#allocation7_spill] sm:$0xff] %v7142_v38  ;;  %v7168_v44 = vld [vmem:[%s7002_s13 + $0xd8] sm:$0xff]  ;;  %v7171_v45 = vld [vmem:[%s7002_s13 + $0xc0] sm:$0xff]  ;;  %v7174_v46 = vld [vmem:[%s7002_s13 + $0xc8] sm:$0xff]  ;;  %v7186_v52 = vpack.i.bf16 %v7162_v42, %v7155_v41  ;;  %v428_v48 = vrot.slane %v7018_v5, 1  ;;  %v411_v49 = vrot.slane %v7049_v15, 1  ;;  %v7227_v12 = vpack.i.bf16 %v488_v58, %v446_v57 }
  0x24   : > { %v7190_v53 = vpack.i.bf16 %v7168_v44, %v7165_v43  ;;  %v7194_v54 = vpack.i.bf16 %v7174_v46, %v7171_v45  ;;  %v7212_v59 = vld [vmem:[%s7002_s13 + $0xf0] sm:$0xff]  ;;  %v7215_v60 = vld [vmem:[%s7002_s13 + $0xf8] sm:$0xff]  ;;  %v429_v55 = vrot.slane %v7060_v17, 1  ;;  %v5614_v51 = vpack.i.bf16 %v486_v62, %v445_v61 }
  0x25   : > { %5560 = vrot.lane.b32.xlu2 %v7070_v20, %s6904_s14  ;;  %11415 = vst [vmem:[#allocation9_spill] sm:$0xff] %v7186_v52  ;;  %v7231_v50 = vpack.i.bf16 %v7215_v60, %v7212_v59  ;;  %v467_v56 = vsel %vm444_vm1, %v430_v0, %v412_v63  ;;  %v465_v10 = vsel %vm444_vm1, %v428_v48, %v410_v11  ;;  %v415_v61 = vrot.slane %v7093_v25, 1 }
  0x26   : > { %5550 = vrot.lane.b32.xlu1 %v7074_v21, %s6904_s14  ;;  %11416 = vst [vmem:[#allocation10_spill] sm:$0xff] %v7190_v53  ;;  %v466_v16 = vsel %vm444_vm1, %v429_v55, %v411_v49  ;;  %v449_v57 = vsel %vm444_vm1, %v412_v63, %v430_v0  ;;  %v494_v58 = vsel %vm293_vm2, 0.0, %v467_v56  ;;  %v433_v62 = vrot.slane %v7096_v26, 1 }
  0x27   : > { %5540 = vrot.lane.b32.xlu0 %v7078_v22, %s6904_s14  ;;  %11417 = vst [vmem:[#allocation11_spill] sm:$0xff] %v7227_v12  ;;  %v413_v63 = vrot.slane %v7039_v13, 1  ;;  %v431_v0 = vrot.slane %v7046_v14, 1  ;;  %v414_v56 = vrot.slane %v7099_v27, 1 }
  0x28   : > { %11418 = vst [vmem:[#allocation12_spill] sm:$0xff] %v7231_v50 }
  0x2d   : > { %5575 = vrot.lane.b32.xlu2 %v7106_v29, %s6904_s14 }
  0x2e   : > { %5570 = vrot.lane.b32.xlu1 %v7110_v30, %s6904_s14 }
  0x2f   : > { %5565 = vrot.lane.b32.xlu0 %v7114_v31, %s6904_s14 }
  0x35   : > { %5590 = vrot.lane.b32.xlu2 %v7142_v38, %s6904_s14  ;;  %v7262_v38 = vpack.i.bf16 %v494_v58, %v449_v57  ;;  %v436_v57 = vrot.slane %v7132_v35, 1  ;;  %v416_v58 = vrot.slane %v7083_v23, 1 }
  0x36   : > { %5585 = vrot.lane.b32.xlu1 %v7146_v39, %s6904_s14 }
  0x37   : > { %5580 = vrot.lane.b32.xlu0 %v7150_v40, %s6904_s14  ;;  %11419 = vst [vmem:[#allocation13_spill] sm:$0xff] %v7262_v38 }
  0x3d   : > { %5605 = vrot.lane.b32.xlu2 %v7186_v52, %s6904_s14  ;;  %v447_v52 = vsel %vm444_vm1, %v410_v11, %v428_v48 }
  0x3e   : > { %5600 = vrot.lane.b32.xlu1 %v7190_v53, %s6904_s14  ;;  %v448_v53 = vsel %vm444_vm1, %v411_v49, %v429_v55  ;;  %v452_v55 = vsel %vm444_vm1, %v415_v61, %v433_v62 }
  0x3f   : > { %5595 = vrot.lane.b32.xlu0 %v7194_v54, %s6904_s14 }
  0x45   : > { %5620 = vrot.lane.b32.xlu2 %v7227_v12, %s6905_s15  ;;  %v490_v12 = vsel %vm293_vm2, 0.0, %v465_v10  ;;  %v470_v10 = vsel %vm444_vm1, %v433_v62, %v415_v61 }
  0x46   : > { %5615 = vrot.lane.b32.xlu1 %v5614_v51, %s6905_s15  ;;  %v492_v51 = vsel %vm293_vm2, 0.0, %v466_v16  ;;  %v7264_v11 = vpack.i.bf16 %v490_v12, %v447_v52  ;;  %v468_v16 = vsel %vm444_vm1, %v431_v0, %v413_v63  ;;  %v500_v12 = vsel %vm293_vm2, 0.0, %v470_v10 }
  0x47   : > { %5610 = vrot.lane.b32.xlu0 %v7231_v50, %s6904_s14  ;;  %v432_v50 = vrot.slane %v7102_v28, 1  ;;  %v7266_v48 = vpack.i.bf16 %v492_v51, %v448_v53  ;;  %v450_v52 = vsel %vm444_vm1, %v413_v63, %v431_v0  ;;  %v418_v53 = vrot.slane %v7129_v34, 1 }
  0x48   : > { %11420 = vst [vmem:[#allocation14_spill] sm:$0xff] %v7264_v11  ;;  %v496_v61 = vsel %vm293_vm2, 0.0, %v468_v16  ;;  %v434_v10 = vrot.slane %v7090_v24, 1  ;;  %v435_v63 = vrot.slane %v7138_v37, 1  ;;  %v7298_v0 = vpack.i.bf16 %v500_v12, %v452_v55 }
  0x49   : > { %11421 = vst [vmem:[#allocation15_spill] sm:$0xff] %v7266_v48  ;;  %v469_v49 = vsel %vm444_vm1, %v432_v50, %v414_v56  ;;  %v451_v62 = vsel %vm444_vm1, %v414_v56, %v432_v50  ;;  %v473_v16 = vsel %vm444_vm1, %v436_v57, %v418_v53 }
  0x4a   : > { %v498_v51 = vsel %vm293_vm2, 0.0, %v469_v49  ;;  %11422 = vst [vmem:[#allocation16_spill] sm:$0xff] %v7298_v0  ;;  %v471_v50 = vsel %vm444_vm1, %v434_v10, %v416_v58  ;;  %v455_v49 = vsel %vm444_vm1, %v418_v53, %v436_v57  ;;  %v506_v55 = vsel %vm293_vm2, 0.0, %v473_v16 }
  0x4b   : > { %v453_v12 = vsel %vm444_vm1, %v416_v58, %v434_v10  ;;  %v419_v53 = vrot.slane %v7119_v32, 1  ;;  %v437_v57 = vrot.slane %v7126_v33, 1  ;;  %v420_v16 = vrot.slane %v7171_v45, 1 }
  0x4c   : > { %v438_v58 = vrot.slane %v7174_v46, 1  ;;  %v7334_v10 = vpack.i.bf16 %v506_v55, %v455_v49 }
  0x4d   : > { %5635 = vrot.lane.b32.xlu2 %v7262_v38, %s6905_s15  ;;  %v417_v38 = vrot.slane %v7135_v36, 1 }
  0x4e   : > { %5630 = vrot.lane.b32.xlu1 %v7266_v48, %s6905_s15  ;;  %v7300_v48 = vpack.i.bf16 %v496_v61, %v450_v52  ;;  %v502_v52 = vsel %vm293_vm2, 0.0, %v471_v50  ;;  %11424 = vst [vmem:[#allocation18_spill] sm:$0xff] %v7334_v10 }
  0x4f   : > { %5625 = vrot.lane.b32.xlu0 %v7264_v11, %s6905_s15  ;;  %v7302_v11 = vpack.i.bf16 %v498_v51, %v451_v62  ;;  %v472_v56 = vsel %vm444_vm1, %v435_v63, %v417_v38  ;;  %v454_v61 = vsel %vm444_vm1, %v417_v38, %v435_v63  ;;  %v421_v51 = vrot.slane %v7165_v43, 1 }
  0x50   : > { %v504_v62 = vsel %vm293_vm2, 0.0, %v472_v56  ;;  %v7336_v50 = vpack.i.bf16 %v502_v52, %v453_v12  ;;  %v474_v56 = vsel %vm444_vm1, %v437_v57, %v419_v53  ;;  %v296_v12 = vrot.slane %v7063_v18, 7 }
  0x51   : > { %11423 = vst [vmem:[#allocation17_spill] sm:$0xff] %v7302_v11  ;;  %v7338_v38 = vpack.i.bf16 %v504_v62, %v454_v61  ;;  %v314_v52 = vrot.slane %v7066_v19, 7  ;;  %v456_v61 = vsel %vm444_vm1, %v419_v53, %v437_v57  ;;  %v508_v62 = vsel %vm293_vm2, 0.0, %v474_v56 }
  0x52   : > { %v423_v18 = vrot.slane %v7212_v59, 1  ;;  %v441_v19 = vrot.slane %v7215_v60, 1  ;;  %v7372_v53 = vpack.i.bf16 %v508_v62, %v456_v61  ;;  %v315_v61 = vrot.slane %v7018_v5, 7 }
  0x53   : > { %11425 = vst [vmem:[#allocation19_spill] sm:$0xff] %v7338_v38  ;;  %v7387_v56 = vsel %vm331_vm0, %v296_v12, %v314_v52 }
  0x54   : > { %11427 = vst [vmem:[#allocation21_spill] sm:$0xff] %v7387_v56  ;;  %v460_v62 = vsel %vm444_vm1, %v423_v18, %v441_v19 }
  0x55   : > { %5650 = vrot.lane.b32.xlu2 %v7298_v0, %s6905_s15  ;;  %v439_v0 = vrot.slane %v7168_v44, 1 }
  0x56   : > { %5645 = vrot.lane.b32.xlu1 %v7302_v11, %s6905_s15  ;;  %v475_v11 = vsel %vm444_vm1, %v438_v58, %v420_v16 }
  0x57   : > { %5640 = vrot.lane.b32.xlu0 %v7300_v48, %s6905_s15  ;;  %v476_v63 = vsel %vm444_vm1, %v439_v0, %v421_v51  ;;  %v458_v49 = vsel %vm444_vm1, %v421_v51, %v439_v0  ;;  %v422_v0 = vrot.slane %v7155_v41, 1  ;;  %v440_v51 = vrot.slane %v7162_v42, 1 }
  0x58   : > { %v512_v55 = vsel %vm293_vm2, 0.0, %v476_v63 }
  0x59   : > { %v7370_v63 = vpack.i.bf16 %v512_v55, %v458_v49  ;;  %v317_v49 = vrot.slane %v7008_v2, 7  ;;  %v297_v55 = vrot.slane %v7011_v3, 7  ;;  %v316_v2 = vrot.slane %v7060_v17, 7 }
  0x5b   : > { %11426 = vst [vmem:[#allocation20_spill] sm:$0xff] %v7370_v63 }
  0x5d   : > { %5665 = vrot.lane.b32.xlu2 %v7334_v10, %s6905_s15  ;;  %v457_v10 = vsel %vm444_vm1, %v420_v16, %v438_v58  ;;  %v351_v16 = vsel %vm331_vm0, %v314_v52, %v296_v12  ;;  %v478_v58 = vsel %vm444_vm1, %v441_v19, %v423_v18  ;;  %v459_v12 = vsel %vm444_vm1, %v422_v0, %v440_v51 }
  0x5e   : > { %5660 = vrot.lane.b32.xlu1 %v7338_v38, %s6905_s15  ;;  %v510_v38 = vsel %vm293_vm2, 0.0, %v475_v11  ;;  %v477_v11 = vsel %vm444_vm1, %v440_v51, %v422_v0  ;;  %v352_v51 = vsel %vm331_vm0, %v315_v61, %v297_v55  ;;  %v7434_v19 = vsel %vm331_vm0, %v297_v55, %v315_v61 }
  0x5f   : > { %5655 = vrot.lane.b32.xlu0 %v7336_v50, %s6905_s15  ;;  %v7374_v57 = vpack.i.bf16 %v510_v38, %v457_v10  ;;  %v7391_v10 = vsel %vm290_vm3, 0.0, %v351_v16  ;;  %v299_v38 = vrot.slane %v7005_v1, 7  ;;  %v514_v52 = vsel %vm293_vm2, 0.0, %v477_v11  ;;  %11429 = vst [vmem:[#allocation23_spill] sm:$0xff] %v7434_v19 }
  0x60   : > { %11428 = vst [vmem:[#allocation22_spill] sm:$0xff] %v7391_v10  ;;  %v516_v16 = vsel %vm293_vm2, 0.0, %v478_v58  ;;  %v298_v1 = vrot.slane %v7049_v15, 7  ;;  %v5694_v3 = vpack.i.bf16 %v7387_v56, %v7391_v10  ;;  %v7413_v5 = vpack.i.bf16 %v514_v52, %v459_v12 }
  0x61   : > { %v354_v0 = vsel %vm331_vm0, %v317_v49, %v299_v38  ;;  %v7426_v15 = vsel %vm331_vm0, %v299_v38, %v317_v49  ;;  %v7438_v11 = vsel %vm290_vm3, 0.0, %v352_v51  ;;  %v302_v58 = vrot.slane %v7093_v25, 7 }
  0x62   : > { %v353_v18 = vsel %vm331_vm0, %v316_v2, %v298_v1  ;;  %v7430_v17 = vsel %vm290_vm3, 0.0, %v354_v0  ;;  %11430 = vst [vmem:[#allocation24_spill] sm:$0xff] %v7438_v11  ;;  %v320_v38 = vrot.slane %v7096_v26, 7  ;;  %v300_v49 = vrot.slane %v7039_v13, 7 }
  0x63   : > { %v318_v12 = vrot.slane %v7046_v14, 7  ;;  %v7450_v55 = vsel %vm331_vm0, %v298_v1, %v316_v2  ;;  %v7454_v61 = vsel %vm290_vm3, 0.0, %v353_v18  ;;  %v301_v52 = vrot.slane %v7099_v27, 7 }
  0x64   : > { %11431 = vst [vmem:[#allocation25_spill] sm:$0xff] %v7450_v55  ;;  %v7460_v25 = vpack.i.bf16 %v7426_v15, %v7430_v17  ;;  %v7464_v13 = vpack.i.bf16 %v7434_v19, %v7438_v11  ;;  %v7468_v14 = vpack.i.bf16 %v7450_v55, %v7454_v61  ;;  %v357_v26 = vsel %vm331_vm0, %v320_v38, %v302_v58  ;;  %v11485_v19 = vld [vmem:[#allocation13_spill] sm:$0xff] }
  0x65   : > { %5680 = vrot.lane.b32.xlu2 %v7370_v63, %s6905_s15  ;;  %v7415_v63 = vpack.i.bf16 %v516_v16, %v460_v62  ;;  %11432 = vst [vmem:[#allocation26_spill] sm:$0xff] %v7454_v61  ;;  %v319_v62 = vrot.slane %v7102_v28, 7  ;;  %v355_v27 = vsel %vm331_vm0, %v318_v12, %v300_v49  ;;  %v11433_v16 = vrot.slane %v7024_v7, 7 }
  0x66   : > { %5675 = vrot.lane.b32.xlu1 %v7374_v57, %s6905_s15  ;;  %v11434_v1 = vrot.slane %v7021_v6, 7  ;;  %v7492_v0 = vsel %vm290_vm3, 0.0, %v357_v26  ;;  %v7496_v7 = vsel %vm331_vm0, %v300_v49, %v318_v12  ;;  %v7500_v6 = vsel %vm290_vm3, 0.0, %v355_v27 }
  0x67   : > { %5670 = vrot.lane.b32.xlu0 %v7372_v53, %s6905_s15  ;;  %v356_v28 = vsel %vm331_vm0, %v319_v62, %v301_v52  ;;  %11436 = vst [vmem:[#allocation28_spill] sm:$0xff] %v7492_v0  ;;  %v7508_v51 = vsel %vm331_vm0, %v301_v52, %v319_v62  ;;  %v303_v12 = vrot.slane %v7083_v23, 7  ;;  %v321_v26 = vrot.slane %v7090_v24, 7 }
  0x68   : > { %v7482_v2 = vsel %vm331_vm0, %v11434_v1, %v11433_v16  ;;  %11437 = vst [vmem:[#allocation29_spill] sm:$0xff] %v7496_v7  ;;  %v7512_v18 = vsel %vm290_vm3, 0.0, %v356_v28  ;;  %v304_v27 = vrot.slane %v7135_v36, 7  ;;  %v322_v16 = vrot.slane %v7138_v37, 7 }
  0x69   : > { %11438 = vst [vmem:[#allocation30_spill] sm:$0xff] %v7500_v6  ;;  %v7528_v62 = vpack.i.bf16 %v7496_v7, %v7500_v6  ;;  %v358_v24 = vsel %vm331_vm0, %v321_v26, %v303_v12  ;;  %v7556_v28 = vsel %vm331_vm0, %v303_v12, %v321_v26  ;;  %v326_v12 = vrot.slane %v7168_v44, 7  ;;  %v11499_v7 = vld [vmem:[#allocation20_spill] sm:$0xff] }
  0x6a   : > { %11439 = vst [vmem:[#allocation31_spill] sm:$0xff] %v7508_v51  ;;  %v7560_v1 = vsel %vm290_vm3, 0.0, %v358_v24  ;;  %v306_v26 = vrot.slane %v7119_v32, 7  ;;  %v324_v24 = vrot.slane %v7126_v33, 7 }
  0x6b   : > { %11440 = vst [vmem:[#allocation32_spill] sm:$0xff] %v7512_v18 }
  0x6c   : > { %11443 = vst [vmem:[#allocation35_spill] sm:$0xff] %v7556_v28  ;;  %v361_v33 = vsel %vm331_vm0, %v324_v24, %v306_v26 }
  0x6d   : > { %5695 = vrot.lane.b32.xlu2 %v5694_v3, %s6906_s16  ;;  %v7488_v3 = vsel %vm331_vm0, %v302_v58, %v320_v38  ;;  %v305_v58 = vrot.slane %v7129_v34, 7  ;;  %v323_v38 = vrot.slane %v7132_v35, 7  ;;  %v7532_v34 = vpack.i.bf16 %v7508_v51, %v7512_v18  ;;  %11444 = vst [vmem:[#allocation36_spill] sm:$0xff] %v7560_v1 }
  0x6e   : > { %5690 = vrot.lane.b32.xlu1 %v7415_v63, %s6905_s15  ;;  %11435 = vst [vmem:[#allocation27_spill] sm:$0xff] %v7488_v3  ;;  %v7524_v52 = vpack.i.bf16 %v7488_v3, %v7492_v0  ;;  %v359_v35 = vsel %vm331_vm0, %v322_v16, %v304_v27  ;;  %v308_v0 = vrot.slane %v7165_v43, 7  ;;  %v307_v3 = vrot.slane %v7171_v45, 7  ;;  %v7597_v45 = vld [vmem:[%s7002_s13 + $0x100] sm:$0xff] }
  0x6f   : > { %5685 = vrot.lane.b32.xlu0 %v7413_v5, %s6905_s15  ;;  %v360_v23 = vsel %vm331_vm0, %v323_v38, %v305_v58  ;;  %v7544_v36 = vsel %vm331_vm0, %v305_v58, %v323_v38  ;;  %v7564_v58 = vsel %vm331_vm0, %v304_v27, %v322_v16  ;;  %v7568_v38 = vsel %vm290_vm3, 0.0, %v359_v35 }
  0x70   : > { %11441 = vst [vmem:[#allocation33_spill] sm:$0xff] %v7544_v36  ;;  %v7548_v37 = vsel %vm290_vm3, 0.0, %v360_v23  ;;  %v325_v27 = vrot.slane %v7174_v46, 7  ;;  %v7584_v35 = vpack.i.bf16 %v7556_v28, %v7560_v1  ;;  %v7588_v43 = vpack.i.bf16 %v7564_v58, %v7568_v38  ;;  %v7600_v46 = vld [vmem:[%s7002_s13 + $0x108] sm:$0xff] }
  0x71   : > { %11442 = vst [vmem:[#allocation34_spill] sm:$0xff] %v7548_v37  ;;  %v7580_v16 = vpack.i.bf16 %v7544_v36, %v7548_v37  ;;  %v363_v32 = vsel %vm331_vm0, %v326_v12, %v308_v0  ;;  %v7610_v1 = vsel %vm331_vm0, %v308_v0, %v326_v12  ;;  %v7618_v51 = vsel %vm331_vm0, %v306_v26, %v324_v24 }
  0x72   : > { %11445 = vst [vmem:[#allocation37_spill] sm:$0xff] %v7564_v58  ;;  %v362_v44 = vsel %vm331_vm0, %v325_v27, %v307_v3  ;;  %v7614_v28 = vsel %vm290_vm3, 0.0, %v363_v32  ;;  %v7622_v18 = vsel %vm290_vm3, 0.0, %v361_v33  ;;  %v7628_v61 = vsel %vm331_vm0, %v307_v3, %v325_v27 }
  0x73   : > { %11446 = vst [vmem:[#allocation38_spill] sm:$0xff] %v7568_v38  ;;  %v7632_v0 = vsel %vm290_vm3, 0.0, %v362_v44  ;;  %v311_v12 = vrot.slane %v7597_v45, 7  ;;  %v329_v32 = vrot.slane %v7600_v46, 7  ;;  %v309_v26 = vrot.slane %v7155_v41, 7 }
  0x74   : > { %11447 = vst [vmem:[#allocation39_spill] sm:$0xff] %v7610_v1  ;;  %v327_v24 = vrot.slane %v7162_v42, 7  ;;  %v310_v33 = vrot.slane %v7212_v59, 7  ;;  %v328_v37 = vrot.slane %v7215_v60, 7  ;;  %v7642_v3 = vpack.i.bf16 %v7610_v1, %v7614_v28 }
  0x75   : > { %5710 = vrot.lane.b32.xlu2 %v7460_v25, %s6906_s16  ;;  %11448 = vst [vmem:[#allocation40_spill] sm:$0xff] %v7614_v28  ;;  %v7646_v27 = vpack.i.bf16 %v7618_v51, %v7622_v18  ;;  %v7650_v44 = vpack.i.bf16 %v7628_v61, %v7632_v0  ;;  %v366_v41 = vsel %vm331_vm0, %v329_v32, %v311_v12 }
  0x76   : > { %5705 = vrot.lane.b32.xlu1 %v7468_v14, %s6906_s16  ;;  %11449 = vst [vmem:[#allocation41_spill] sm:$0xff] %v7618_v51  ;;  %v364_v42 = vsel %vm331_vm0, %v327_v24, %v309_v26  ;;  %v365_v59 = vsel %vm331_vm0, %v328_v37, %v310_v33  ;;  %v348_v60 = vsel %vm331_vm0, %v311_v12, %v329_v32  ;;  %v404_v28 = vsel %vm290_vm3, 0.0, %v366_v41 }
  0x77   : > { %5700 = vrot.lane.b32.xlu0 %v7464_v13, %s6906_s16  ;;  %v7516_v49 = vpop.permute.xlu2 %5555  ;;  %11450 = vst [vmem:[#allocation42_spill] sm:$0xff] %v7622_v18  ;;  %v7680_v18 = vsel %vm331_vm0, %v310_v33, %v328_v37  ;;  %v7684_v12 = vsel %vm290_vm3, 0.0, %v365_v59  ;;  %v7690_v51 = vpack.i.bf16 %v348_v60, %v404_v28 }
  0x78   : > { %11452 = vst [vmem:[#allocation44_spill] sm:$0xff] %v7628_v61  ;;  %v7672_v61 = vsel %vm331_vm0, %v309_v26, %v327_v24  ;;  %v7698_v24 = vpack.i.bf16 %v7680_v18, %v7684_v12 }
  0x79   : > { %11453 = vst [vmem:[#allocation45_spill] sm:$0xff] %v7632_v0  ;;  %v7676_v0 = vsel %vm290_vm3, 0.0, %v364_v42 }
  0x7a   : > { %11455 = vst [vmem:[#allocation47_spill] sm:$0xff] %v7672_v61  ;;  %v7694_v26 = vpack.i.bf16 %v7672_v61, %v7676_v0  ;;  %v11471_v61 = vld [vmem:[#allocation7_spill] sm:$0xff] }
  0x7b   : > { %11456 = vst [vmem:[#allocation48_spill] sm:$0xff] %v7676_v0 }
  0x7c   : > { %11457 = vst [vmem:[#allocation49_spill] sm:$0xff] %v7680_v18 }
  0x7d   : > { %5725 = vrot.lane.b32.xlu2 %v7524_v52, %s6906_s16  ;;  %11458 = vst [vmem:[#allocation50_spill] sm:$0xff] %v7684_v12 }
  0x7e   : > { %5720 = vrot.lane.b32.xlu1 %v7532_v34, %s6906_s16 }
  0x7f   : > { %5715 = vrot.lane.b32.xlu0 %v7528_v62, %s6906_s16  ;;  %v7570_v23 = vpop.permute.xlu2 %5560 }
  0x85   : > { %5740 = vrot.lane.b32.xlu2 %v7580_v16, %s6906_s16 }
  0x86   : > { %5735 = vrot.lane.b32.xlu1 %v7588_v43, %s6906_s16 }
  0x87   : > { %5730 = vrot.lane.b32.xlu0 %v7584_v35, %s6906_s16  ;;  %v7624_v55 = vpop.permute.xlu2 %5575 }
  0x88   : > { %11451 = vst [vmem:[#allocation43_spill] sm:$0xff] %v7624_v55 }
  0x8d   : > { %5755 = vrot.lane.b32.xlu2 %v7642_v3, %s6906_s16 }
  0x8e   : > { %5750 = vrot.lane.b32.xlu1 %v7650_v44, %s6906_s16 }
  0x8f   : > { %5745 = vrot.lane.b32.xlu0 %v7646_v27, %s6906_s16  ;;  %v7668_v1 = vpop.permute.xlu2 %5590 }
  0x90   : > { %11454 = vst [vmem:[#allocation46_spill] sm:$0xff] %v7668_v1  ;;  %v7686_v32 = vpop.permute.xlu1 %5545 }
  0x91   : > { %11459 = vst [vmem:[#allocation51_spill] sm:$0xff] %v7686_v32  ;;  %v7688_v41 = vpop.permute.xlu0 %5535 }
  0x95   : > { %5770 = vrot.lane.b32.xlu2 %v7690_v51, %s6906_s16 }
  0x96   : > { %5765 = vrot.lane.b32.xlu1 %v7698_v24, %s6906_s16 }
  0x97   : > { %5760 = vrot.lane.b32.xlu0 %v7694_v26, %s6906_s16  ;;  %v7706_v37 = vpop.permute.xlu2 %5605 }
  0x98   : > { %11460 = vst [vmem:[#allocation52_spill] sm:$0xff] %v7706_v37  ;;  %v7708_v28 = vpop.permute.xlu1 %5550 }
  0x99   : > { %11461 = vst [vmem:[#allocation53_spill] sm:$0xff] %v7708_v28  ;;  %v7710_v33 = vpop.permute.xlu0 %5540  ;;  %v11481_v28 = vld [vmem:[#allocation11_spill] sm:$0xff] }
  0x9d   : > { %5785 = vrot.lane.b32.xlu2 %v7074_v21, %s6907_s17 }
  0x9e   : > { %5780 = vrot.lane.b32.xlu1 %v7028_v8, %s6907_s17 }
  0x9f   : > { %5775 = vrot.lane.b32.xlu0 %v7078_v22, %s6907_s17  ;;  %v7718_v42 = vpop.permute.xlu2 %5620 }
  0xa0   : > { %11462 = vst [vmem:[#allocation54_spill] sm:$0xff] %v7718_v42  ;;  %v7720_v59 = vpop.permute.xlu1 %5570 }
  0xa1   : > { %11463 = vst [vmem:[#allocation55_spill] sm:$0xff] %v7720_v59  ;;  %v7722_v60 = vpop.permute.xlu0 %5565 }
  0xa2   : > { %11464 = vst [vmem:[#allocation56_spill] sm:$0xff] %v7722_v60 }
  0xa5   : > { %5800 = vrot.lane.b32.xlu2 %v7114_v31, %s6907_s17 }
  0xa6   : > { %5795 = vrot.lane.b32.xlu1 %v7070_v20, %s6907_s17 }
  0xa7   : > { %5790 = vrot.lane.b32.xlu0 %v7015_v4, %s6907_s17  ;;  %v7730_v18 = vpop.permute.xlu2 %5635 }
  0xa8   : > { %11465 = vst [vmem:[#allocation57_spill] sm:$0xff] %v7730_v18  ;;  %v7732_v22 = vpop.permute.xlu1 %5585 }
  0xa9   : > { %11466 = vst [vmem:[#allocation58_spill] sm:$0xff] %v7732_v22  ;;  %v7734_v12 = vpop.permute.xlu0 %5580 }
  0xaa   : > { %11467 = vst [vmem:[#allocation59_spill] sm:$0xff] %v7734_v12 }
  0xad   : > { %5815 = vrot.lane.b32.xlu2 %v7150_v40, %s6907_s17 }
  0xae   : > { %5810 = vrot.lane.b32.xlu1 %v7106_v29, %s6907_s17 }
  0xaf   : > { %5805 = vrot.lane.b32.xlu0 %v7110_v30, %s6907_s17  ;;  %v7742_v59 = vpop.permute.xlu2 %5650 }
  0xb0   : > { %11468 = vst [vmem:[#allocation60_spill] sm:$0xff] %v7742_v59  ;;  %v7744_v0 = vpop.permute.xlu1 %5600  ;;  %v11474_v59 = vld [vmem:[#allocation12_spill] sm:$0xff] }
  0xb1   : > { %11469 = vst [vmem:[#allocation61_spill] sm:$0xff] %v7744_v0  ;;  %v7746_v60 = vpop.permute.xlu0 %5595  ;;  %v11475_v0 = vld [vmem:[#allocation10_spill] sm:$0xff] }
  0xb2   : > { %11470 = vst [vmem:[#allocation62_spill] sm:$0xff] %v7746_v60  ;;  %v11476_v60 = vld [vmem:[#allocation9_spill] sm:$0xff] }
  0xb5   : > { %5830 = vrot.lane.b32.xlu2 %v7194_v54, %s6907_s17 }
  0xb6   : > { %5825 = vrot.lane.b32.xlu1 %v11471_v61, %s6907_s17 }
  0xb7   : > { %5820 = vrot.lane.b32.xlu0 %v7146_v39, %s6907_s17  ;;  %v7754_v37 = vpop.permute.xlu2 %5665 }
  0xb8   : > { %11472 = vst [vmem:[#allocation7_spill] sm:$0xff] %v7754_v37  ;;  %v7758_v36 = vpop.permute.xlu1 %5615  ;;  %v11480_v37 = vld [vmem:[#allocation14_spill] sm:$0xff] }
  0xb9   : > { %v7756_v18 = vpop.permute.xlu0 %5610 }
  0xba   : > { %11473 = vst [vmem:[#allocation63_spill] sm:$0xff] %v7756_v18  ;;  %v7774_v18 = vpack.i.bf16 %v7600_v46, %v7597_v45 }
  0xbd   : > { %5845 = vrot.lane.b32.xlu2 %v11474_v59, %s6907_s17 }
  0xbe   : > { %5840 = vrot.lane.b32.xlu1 %v11476_v60, %s6907_s17 }
  0xbf   : > { %5835 = vrot.lane.b32.xlu0 %v11475_v0, %s6907_s17  ;;  %v7766_v38 = vpop.permute.xlu2 %5680 }
  0xc0   : > { %11477 = vst [vmem:[#allocation12_spill] sm:$0xff] %v7766_v38  ;;  %v7770_v22 = vpop.permute.xlu1 %5630 }
  0xc1   : > { %v7768_v58 = vpop.permute.xlu0 %5625  ;;  %11479 = vst [vmem:[#allocation9_spill] sm:$0xff] %v7770_v22  ;;  %v11484_v22 = vld [vmem:[#allocation15_spill] sm:$0xff] }
  0xc2   : > { %11478 = vst [vmem:[#allocation10_spill] sm:$0xff] %v7768_v58 }
  0xc5   : > { %5860 = vrot.lane.b32.xlu2 %v11480_v37, %s6908_s18 }
  0xc6   : > { %5855 = vrot.lane.b32.xlu1 %v11481_v28, %s6908_s18 }
  0xc7   : > { %5850 = vrot.lane.b32.xlu0 %v7774_v18, %s6907_s17  ;;  %v7782_v12 = vpop.permute.xlu2 %5695 }
  0xc8   : > { %v7786_v58 = vpop.permute.xlu1 %5645 }
  0xc9   : > { %v7784_v38 = vpop.permute.xlu0 %5640  ;;  %11483 = vst [vmem:[#allocation11_spill] sm:$0xff] %v7786_v58  ;;  %v11489_v58 = vld [vmem:[#allocation17_spill] sm:$0xff] }
  0xca   : > { %11482 = vst [vmem:[#allocation14_spill] sm:$0xff] %v7784_v38  ;;  %v11490_v38 = vld [vmem:[#allocation16_spill] sm:$0xff] }
  0xcd   : > { %5875 = vrot.lane.b32.xlu2 %v7300_v48, %s6908_s18 }
  0xce   : > { %5870 = vrot.lane.b32.xlu1 %v11485_v19, %s6908_s18 }
  0xcf   : > { %5865 = vrot.lane.b32.xlu0 %v11484_v22, %s6908_s18  ;;  %v7794_v11 = vpop.permute.xlu2 %5710 }
  0xd0   : > { %11486 = vst [vmem:[#allocation15_spill] sm:$0xff] %v7794_v11  ;;  %v7798_v28 = vpop.permute.xlu1 %5660  ;;  %v11495_v11 = vld [vmem:[#allocation18_spill] sm:$0xff] }
  0xd1   : > { %v7796_v1 = vpop.permute.xlu0 %5655  ;;  %11488 = vst [vmem:[#allocation64_spill] sm:$0xff] %v7798_v28 }
  0xd2   : > { %11487 = vst [vmem:[#allocation13_spill] sm:$0xff] %v7796_v1  ;;  %v11494_v1 = vld [vmem:[#allocation19_spill] sm:$0xff] }
  0xd5   : > { %5890 = vrot.lane.b32.xlu2 %v7336_v50, %s6908_s18 }
  0xd6   : > { %5885 = vrot.lane.b32.xlu1 %v11490_v38, %s6908_s18 }
  0xd7   : > { %5880 = vrot.lane.b32.xlu0 %v11489_v58, %s6908_s18  ;;  %v7806_v55 = vpop.permute.xlu2 %5725 }
  0xd8   : > { %11491 = vst [vmem:[#allocation17_spill] sm:$0xff] %v7806_v55  ;;  %v7810_v56 = vpop.permute.xlu1 %5675  ;;  %v424_v55 = vrot.slane %v7597_v45, 1 }
  0xd9   : > { %v7808_v10 = vpop.permute.xlu0 %5670  ;;  %11493 = vst [vmem:[#allocation65_spill] sm:$0xff] %v7810_v56 }
  0xda   : > { %11492 = vst [vmem:[#allocation16_spill] sm:$0xff] %v7808_v10  ;;  %v442_v10 = vrot.slane %v7600_v46, 1 }
  0xdc   : > { %v479_v56 = vsel %vm444_vm1, %v442_v10, %v424_v55 }
  0xdd   : > { %5905 = vrot.lane.b32.xlu2 %v7372_v53, %s6908_s18  ;;  %v518_v45 = vsel %vm293_vm2, 0.0, %v479_v56 }
  0xde   : > { %5900 = vrot.lane.b32.xlu1 %v11495_v11, %s6908_s18 }
  0xdf   : > { %5895 = vrot.lane.b32.xlu0 %v11494_v1, %s6908_s18  ;;  %v7818_v28 = vpop.permute.xlu2 %5740 }
  0xe0   : > { %11496 = vst [vmem:[#allocation19_spill] sm:$0xff] %v7818_v28  ;;  %v7822_v6 = vpop.permute.xlu1 %5690 }
  0xe1   : > { %v7820_v42 = vpop.permute.xlu0 %5685  ;;  %11498 = vst [vmem:[#allocation66_spill] sm:$0xff] %v7822_v6  ;;  %v461_v6 = vsel %vm444_vm1, %v424_v55, %v442_v10 }
  0xe2   : > { %11497 = vst [vmem:[#allocation18_spill] sm:$0xff] %v7820_v42  ;;  %v7844_v32 = vpack.i.bf16 %v518_v45, %v461_v6 }
  0xe5   : > { %5920 = vrot.lane.b32.xlu2 %v7413_v5, %s6908_s18 }
  0xe6   : > { %5915 = vrot.lane.b32.xlu1 %v11499_v7, %s6908_s18 }
  0xe7   : > { %5910 = vrot.lane.b32.xlu0 %v7374_v57, %s6908_s18  ;;  %v7834_v28 = vpop.permute.xlu2 %5755 }
  0xe8   : > { %v7842_v42 = vpop.permute.xlu1 %5705 }
  0xe9   : > { %v7840_v46 = vpop.permute.xlu0 %5700 }
  0xed   : > { %5935 = vrot.lane.b32.xlu2 %v7464_v13, %s6909_s19 }
  0xee   : > { %5930 = vrot.lane.b32.xlu1 %v7844_v32, %s6908_s18 }
  0xef   : > { %5925 = vrot.lane.b32.xlu0 %v7415_v63, %s6908_s18  ;;  %v7852_v10 = vpop.permute.xlu2 %5770 }
  0xf0   : > { %11500 = vst [vmem:[#allocation20_spill] sm:$0xff] %v7852_v10  ;;  %v7856_v55 = vpop.permute.xlu1 %5720  ;;  %v7883_v10 = vld [vmem:[%s7002_s13 + $0x110] sm:$0xff] }
  0xf1   : > { %v7854_v56 = vpop.permute.xlu0 %5715  ;;  %11501 = vst [vmem:[#allocation67_spill] sm:$0xff] %v7856_v55 }
  0xf5   : > { %5950 = vrot.lane.b32.xlu2 %v7528_v62, %s6909_s19 }
  0xf6   : > { %5945 = vrot.lane.b32.xlu1 %v7460_v25, %s6909_s19 }
  0xf7   : > { %5940 = vrot.lane.b32.xlu0 %v7468_v14, %s6909_s19  ;;  %v7864_v13 = vpop.permute.xlu2 %5785 }
  0xf8   : > { %v7868_v45 = vpop.permute.xlu1 %5735 }
  0xf9   : > { %v7866_v6 = vpop.permute.xlu0 %5730  ;;  %11503 = vst [vmem:[#allocation69_spill] sm:$0xff] %v7868_v45 }
  0xfa   : > { %11502 = vst [vmem:[#allocation68_spill] sm:$0xff] %v7866_v6  ;;  %v7886_v6 = vld [vmem:[%s7002_s13 + $0x118] sm:$0xff] }
  0xfd   : > { %5965 = vrot.lane.b32.xlu2 %v7584_v35, %s6909_s19  ;;  %v330_v35 = vrot.slane %v7886_v6, 7 }
  0xfe   : > { %5960 = vrot.lane.b32.xlu1 %v7524_v52, %s6909_s19 }
  0xff   : > { %5955 = vrot.lane.b32.xlu0 %v7532_v34, %s6909_s19  ;;  %v7876_v62 = vpop.permute.xlu2 %5800  ;;  %v312_v34 = vrot.slane %v7883_v10, 7 }
 0x100   : > { %11504 = vst [vmem:[#allocation70_spill] sm:$0xff] %v7876_v62  ;;  %v7880_v25 = vpop.permute.xlu1 %5750 }
 0x101   : > { %v7878_v14 = vpop.permute.xlu0 %5745  ;;  %v367_v55 = vsel %vm331_vm0, %v330_v35, %v312_v34 }
 0x105   : > { %5980 = vrot.lane.b32.xlu2 %v7646_v27, %s6909_s19 }
 0x106   : > { %5975 = vrot.lane.b32.xlu1 %v7580_v16, %s6909_s19  ;;  %v349_v16 = vsel %vm331_vm0, %v312_v34, %v330_v35 }
 0x107   : > { %5970 = vrot.lane.b32.xlu0 %v7588_v43, %s6909_s19  ;;  %v7894_v52 = vpop.permute.xlu2 %5815  ;;  %v406_v43 = vsel %vm290_vm3, 0.0, %v367_v55 }
 0x108   : > { %11505 = vst [vmem:[#allocation71_spill] sm:$0xff] %v7894_v52  ;;  %v7900_v62 = vpop.permute.xlu1 %5765 }
 0x109   : > { %v7898_v45 = vpop.permute.xlu0 %5760  ;;  %11507 = vst [vmem:[#allocation73_spill] sm:$0xff] %v7900_v62 }
 0x10a   : > { %11506 = vst [vmem:[#allocation72_spill] sm:$0xff] %v7898_v45  ;;  %v6009_v45 = vpack.i.bf16 %v349_v16, %v406_v43 }
 0x10d   : > { %5995 = vrot.lane.b32.xlu2 %v7694_v26, %s6909_s19 }
 0x10e   : > { %5990 = vrot.lane.b32.xlu1 %v7642_v3, %s6909_s19 }
 0x10f   : > { %5985 = vrot.lane.b32.xlu0 %v7650_v44, %s6909_s19  ;;  %v7914_v27 = vpop.permute.xlu2 %5830 }
 0x110   : > { %v7918_v62 = vpop.permute.xlu1 %5780 }
 0x111   : > { %v7916_v52 = vpop.permute.xlu0 %5775 }
 0x112   : > { %v5778_v9 = vunpack.i.h.bf16 %v7916_v52 }
 0x115   : > { %6010 = vrot.lane.b32.xlu2 %v6009_v45, %s6909_s19 }
 0x116   : > { %6005 = vrot.lane.b32.xlu1 %v7690_v51, %s6909_s19 }
 0x117   : > { %6000 = vrot.lane.b32.xlu0 %v7698_v24, %s6909_s19  ;;  %v7925_v3 = vpop.permute.xlu2 %5845 }
 0x118   : > { %11508 = vst [vmem:[#allocation74_spill] sm:$0xff] %v7925_v3  ;;  %v7929_v26 = vpop.permute.xlu1 %5795 }
 0x119   : > { %v7927_v44 = vpop.permute.xlu0 %5790 }
 0x11d   : > { %6025 = vrot.lane.b32.xlu2 %v7015_v4, %s6910_s20 }
 0x11e   : > { %6020 = vrot.lane.b32.xlu1 %v7074_v21, %s6910_s20 }
 0x11f   : > { %6015 = vrot.lane.b32.xlu0 %v7028_v8, %s6910_s20  ;;  %v7937_v24 = vpop.permute.xlu2 %5860 }
 0x120   : > { %v7941_v51 = vpop.permute.xlu1 %5810 }
 0x121   : > { %v7939_v55 = vpop.permute.xlu0 %5805  ;;  %11510 = vst [vmem:[#allocation76_spill] sm:$0xff] %v7941_v51 }
 0x122   : > { %11509 = vst [vmem:[#allocation75_spill] sm:$0xff] %v7939_v55  ;;  %v11531_v55 = vld [vmem:[#allocation6_spill] sm:$0xff] }
 0x125   : > { %6040 = vrot.lane.b32.xlu2 %v7110_v30, %s6910_s20 }
 0x126   : > { %6035 = vrot.lane.b32.xlu1 %v7114_v31, %s6910_s20 }
 0x127   : > { %6030 = vrot.lane.b32.xlu0 %v7070_v20, %s6910_s20  ;;  %v7949_v4 = vpop.permute.xlu2 %5875 }
 0x128   : > { %v7953_v21 = vpop.permute.xlu1 %5825 }
 0x129   : > { %v7951_v8 = vpop.permute.xlu0 %5820 }
 0x12d   : > { %6055 = vrot.lane.b32.xlu2 %v7146_v39, %s6910_s20 }
 0x12e   : > { %6050 = vrot.lane.b32.xlu1 %v7150_v40, %s6910_s20 }
 0x12f   : > { %6045 = vrot.lane.b32.xlu0 %v7106_v29, %s6910_s20  ;;  %v7961_v30 = vpop.permute.xlu2 %5890 }
 0x130   : > { %11511 = vst [vmem:[#allocation77_spill] sm:$0xff] %v7961_v30  ;;  %v7965_v31 = vpop.permute.xlu1 %5840  ;;  %v5471_v30 = vld [vmem:[%s11224_s1 + $0x8] sm:$0xff] }
 0x131   : > { %v7963_v20 = vpop.permute.xlu0 %5835  ;;  %11512 = vst [vmem:[#allocation78_spill] sm:$0xff] %v7965_v31 }
 0x135   : > { %6070 = vrot.lane.b32.xlu2 %v11475_v0, %s6910_s20 }
 0x136   : > { %6065 = vrot.lane.b32.xlu1 %v7194_v54, %s6910_s20  ;;  %v6089_v54 = vpack.i.bf16 %v7886_v6, %v7883_v10 }
 0x137   : > { %6060 = vrot.lane.b32.xlu0 %v11471_v61, %s6910_s20  ;;  %v7977_v40 = vpop.permute.xlu2 %5905 }
 0x138   : > { %v7975_v29 = vpop.permute.xlu1 %5855 }
 0x139   : > { %v7973_v39 = vpop.permute.xlu0 %5850 }
 0x13a   : > { %11513 = vst [vmem:[#allocation79_spill] sm:$0xff] %v7973_v39 }
 0x13d   : > { %6085 = vrot.lane.b32.xlu2 %v7774_v18, %s6910_s20 }
 0x13e   : > { %6080 = vrot.lane.b32.xlu1 %v11474_v59, %s6910_s20 }
 0x13f   : > { %6075 = vrot.lane.b32.xlu0 %v11476_v60, %s6910_s20  ;;  %v7991_v45 = vpop.permute.xlu2 %5920 }
 0x140   : > { %v7987_v61 = vpop.permute.xlu1 %5870  ;;  %11514 = vst [vmem:[#allocation80_spill] sm:$0xff] %v7991_v45  ;;  %v5698_v45 = vunpack.i.h.bf16 %v7782_v12 }
 0x141   : > { %v7985_v0 = vpop.permute.xlu0 %5865 }
 0x145   : > { %6100 = vrot.lane.b32.xlu2 %v11484_v22, %s6911_s26 }
 0x146   : > { %6095 = vrot.lane.b32.xlu1 %v11480_v37, %s6911_s26 }
 0x147   : > { %6090 = vrot.lane.b32.xlu0 %v6089_v54, %s6910_s20  ;;  %v8002_v60 = vpop.permute.xlu2 %5935 }
 0x148   : > { %v8000_v59 = vpop.permute.xlu1 %5885 }
 0x149   : > { %v7998_v18 = vpop.permute.xlu0 %5880  ;;  %11516 = vst [vmem:[#allocation82_spill] sm:$0xff] %v8000_v59  ;;  %v5538_v59 = vunpack.i.h.bf16 %v7688_v41 }
 0x14a   : > { %11515 = vst [vmem:[#allocation81_spill] sm:$0xff] %v7998_v18 }
 0x14d   : > { %6115 = vrot.lane.b32.xlu2 %v11489_v58, %s6911_s26 }
 0x14e   : > { %6110 = vrot.lane.b32.xlu1 %v7300_v48, %s6911_s26 }
 0x14f   : > { %6105 = vrot.lane.b32.xlu0 %v11485_v19, %s6911_s26  ;;  %v8020_v58 = vpop.permute.xlu2 %5950 }
 0x150   : > { %v8012_v34 = vpop.permute.xlu1 %5900 }
 0x151   : > { %v8010_v22 = vpop.permute.xlu0 %5895 }
 0x152   : > { %11517 = vst [vmem:[#allocation83_spill] sm:$0xff] %v8010_v22  ;;  %v1692_v22 = vunpack.c.l.b16 %v1679_v47  ;;  %v5470_v47 = vld [vmem:[%s11224_s1] sm:$0xff] }
 0x155   : > { %6130 = vrot.lane.b32.xlu2 %v11494_v1, %s6911_s26 }
 0x156   : > { %6125 = vrot.lane.b32.xlu1 %v7336_v50, %s6911_s26  ;;  %v425_v50 = vrot.slane %v7883_v10, 1 }
 0x157   : > { %6120 = vrot.lane.b32.xlu0 %v11490_v38, %s6911_s26  ;;  %v443_v38 = vrot.slane %v7886_v6, 1  ;;  %v8038_v35 = vpop.permute.xlu2 %5965 }
 0x158   : > { %v8024_v19 = vpop.permute.xlu1 %5915  ;;  %11520 = vst [vmem:[#allocation86_spill] sm:$0xff] %v8038_v35 }
 0x159   : > { %v8022_v37 = vpop.permute.xlu0 %5910  ;;  %v480_v16 = vsel %vm444_vm1, %v443_v38, %v425_v50 }
 0x15d   : > { %6145 = vrot.lane.b32.xlu2 %v7374_v57, %s6911_s26  ;;  %v520_v57 = vsel %vm293_vm2, 0.0, %v480_v16 }
 0x15e   : > { %6140 = vrot.lane.b32.xlu1 %v7372_v53, %s6911_s26  ;;  %v462_v53 = vsel %vm444_vm1, %v425_v50, %v443_v38 }
 0x15f   : > { %6135 = vrot.lane.b32.xlu0 %v11495_v11, %s6911_s26  ;;  %v6169_v6 = vpack.i.bf16 %v520_v57, %v462_v53  ;;  %v8056_v43 = vpop.permute.xlu2 %5980 }
 0x160   : > { %v8034_v1 = vpop.permute.xlu1 %5930 }
 0x161   : > { %v8032_v48 = vpop.permute.xlu0 %5925  ;;  %11519 = vst [vmem:[#allocation85_spill] sm:$0xff] %v8034_v1 }
 0x162   : > { %11518 = vst [vmem:[#allocation84_spill] sm:$0xff] %v8032_v48 }
 0x165   : > { %6160 = vrot.lane.b32.xlu2 %v7415_v63, %s6911_s26 }
 0x166   : > { %6155 = vrot.lane.b32.xlu1 %v7413_v5, %s6911_s26 }
 0x167   : > { %6150 = vrot.lane.b32.xlu0 %v11499_v7, %s6911_s26  ;;  %v8065_v7 = vpop.permute.xlu2 %5995 }
 0x168   : > { %v8054_v10 = vpop.permute.xlu1 %5945 }
 0x169   : > { %v8052_v11 = vpop.permute.xlu0 %5940 }
 0x16e   : > { %6170 = vrot.lane.b32.xlu1 %v6169_v6, %s6911_s26 }
 0x16f   : > { %6165 = vrot.lane.b32.xlu0 %v7844_v32, %s6911_s26  ;;  %v8071_v38 = vpop.permute.xlu2 %6010 }
 0x170   : > { %v8063_v5 = vpop.permute.xlu1 %5960  ;;  %11524 = vst [vmem:[#allocation90_spill] sm:$0xff] %v8071_v38  ;;  %v1695_v38 = vpack.c.b16 %v1692_v22, %v1692_v22 }
 0x171   : > { %v8061_v63 = vpop.permute.xlu0 %5955  ;;  %11521 = vst [vmem:[#allocation87_spill] sm:$0xff] %v8063_v5 }
 0x172   : > { %v1749_v39 = vsel %vm1747_vm4, %v1695_v38, 0 }
 0x173   : > { %1756 = vmatpush.bf16.msra.mxu0 %v1749_v39  ;;  %5475 = vmatpush.bf16.msra.mxu3 %v1749_v39 }
 0x177   : > { %v8081_v6 = vpop.permute.xlu2 %6025  ;;  %1757 = vmatpush.bf16.msra.mxu0 %v5471_v30  ;;  %5476 = vmatpush.bf16.msra.mxu3 %v5471_v30  ;;  %v5537_v30 = vunpack.i.l.bf16 %v7688_v41  ;;  %v5777_v41 = vunpack.i.l.bf16 %v7916_v52 }
 0x178   : > { %v8069_v50 = vpop.permute.xlu1 %5975 }
 0x179   : > { %v8067_v54 = vpop.permute.xlu0 %5970  ;;  %11523 = vst [vmem:[#allocation89_spill] sm:$0xff] %v8069_v50 }
 0x17a   : > { %11522 = vst [vmem:[#allocation88_spill] sm:$0xff] %v8067_v54 }
 0x17b   : > { %1758 = vmatpush.bf16.msra.mxu0 %v5470_v47  ;;  %5477 = vmatpush.bf16.msra.mxu3 %v5470_v47  ;;  %v372_v47 = vsel %vm290_vm3, 0.0, %v11531_v55  ;;  %v1397_v55 = vsel %vm1395_vm5, %v7482_v2, %v5538_v59  ;;  %v5938_v2 = vunpack.i.h.bf16 %v8002_v60 }
 0x17c   : > { %v1396_v31 = vsel %vm1395_vm5, %v372_v47, %v5537_v30  ;;  %v5858_v30 = vunpack.i.h.bf16 %v7975_v29  ;;  %v5937_v47 = vunpack.i.l.bf16 %v8002_v60 }
 0x17f   : > { %v8091_v54 = vpop.permute.xlu2 %6040 }
 0x180   : > { %v8075_v53 = vpop.permute.xlu1 %5990  ;;  %11527 = vst [vmem:[#allocation93_spill] sm:$0xff] %v8091_v54 }
 0x181   : > { %v8073_v16 = vpop.permute.xlu0 %5985 }
 0x187   : > { %v8103_v38 = vpop.permute.xlu2 %6055 }
 0x188   : > { %v8079_v32 = vpop.permute.xlu1 %6005  ;;  %11528 = vst [vmem:[#allocation94_spill] sm:$0xff] %v8103_v38  ;;  %v5617_v38 = vunpack.i.l.bf16 %v7758_v36 }
 0x189   : > { %v8077_v57 = vpop.permute.xlu0 %6000  ;;  %11526 = vst [vmem:[#allocation92_spill] sm:$0xff] %v8079_v32 }
 0x18a   : > { %11525 = vst [vmem:[#allocation91_spill] sm:$0xff] %v8077_v57 }
 0x18f   : > { %v8109_v3 = vpop.permute.xlu2 %6070 }
 0x190   : > { %v8088_v50 = vpop.permute.xlu1 %6020 }
 0x191   : > { %v8086_v1 = vpop.permute.xlu0 %6015 }
 0x192   : > { %v6018_v52 = vunpack.i.h.bf16 %v8086_v1  ;;  %v6017_v59 = vunpack.i.l.bf16 %v8086_v1 }
 0x197   : > { %v8128_v54 = vpop.permute.xlu2 %6085 }
 0x198   : > { %v8096_v51 = vpop.permute.xlu1 %6035  ;;  %11533 = vst [vmem:[#allocation97_spill] sm:$0xff] %v8128_v54 }
 0x199   : > { %v8101_v22 = vpop.permute.xlu0 %6030 }
 0x1a0   : > { %v8105_v32 = vpop.permute.xlu1 %6050 }
 0x1a1   : > { %11529 = vst [vmem:[#allocation95_spill] sm:$0xff] %v8105_v32  ;;  %v8107_v48 = vpop.permute.xlu0 %6045  ;;  %v5618_v32 = vunpack.i.h.bf16 %v7758_v36  ;;  %v1429_v36 = vsel %vm1428_vm7, %v1396_v31, %v5617_v38  ;;  %v5557_v38 = vunpack.i.l.bf16 %v7516_v49 }
 0x1a2   : > { %11530 = vst [vmem:[#allocation96_spill] sm:$0xff] %v8107_v48  ;;  %v5697_v48 = vunpack.i.l.bf16 %v7782_v12 }
 0x1a3   : > { %v1430_v5 = vsel %vm1428_vm7, %v1397_v55, %v5618_v32 }
 0x1a4   : > { %v1462_v12 = vsel %vm1461_vm6, %v1429_v36, %v5697_v48  ;;  %v1463_v18 = vsel %vm1461_vm6, %v1430_v5, %v5698_v45 }
 0x1a5   : > { %v1495_v31 = vsel %vm1494_vm8, %v1462_v12, %v5777_v41  ;;  %v1496_v32 = vsel %vm1494_vm8, %v1463_v18, %v5778_v9  ;;  %v5563_v9 = vunpack.i.h.bf16 %v7570_v23 }
 0x1a6   : > { %v1529_v45 = vsel %vm1527_vm10, %v1496_v32, %v5858_v30 }
 0x1a7   : > { %v1562_v55 = vsel %vm1560_vm9, %v1529_v45, %v5938_v2  ;;  %v5542_v2 = vunpack.i.l.bf16 %v7710_v33 }
 0x1a8   : > { %v8111_v39 = vpop.permute.xlu1 %6065 }
 0x1a9   : > { %v8114_v35 = vpop.permute.xlu0 %6060 }
 0x1b0   : > { %v8123_v57 = vpop.permute.xlu1 %6080 }
 0x1b1   : > { %11532 = vst [vmem:[#allocation6_spill] sm:$0xff] %v8123_v57  ;;  %v5857_v57 = vunpack.i.l.bf16 %v7975_v29  ;;  %v5558_v29 = vunpack.i.h.bf16 %v7516_v49  ;;  %v8150_v60 = vpop.permute.xlu0 %6075  ;;  %v5562_v49 = vunpack.i.l.bf16 %v7570_v23  ;;  %v11535_v23 = vld [vmem:[#allocation51_spill] sm:$0xff] }
 0x1b2   : > { %11534 = vst [vmem:[#allocation98_spill] sm:$0xff] %v8150_v60  ;;  %v5547_v45 = vunpack.i.l.bf16 %v11535_v23 }
 0x1b3   : > { %v1528_v48 = vsel %vm1527_vm10, %v1495_v31, %v5857_v57  ;;  %v1595_v57 = vsel %vm1593_vm11, %v1562_v55, %v6018_v52  ;;  %v6101_v31 = vpop.permute.xlu2 %6100  ;;  %v8167_v52 = vsel %vm1395_vm5, %v7426_v15, %v5558_v29  ;;  %v11541_v15 = vld [vmem:[#allocation21_spill] sm:$0xff] }
 0x1b4   : > { %v1561_v5 = vsel %vm1560_vm9, %v1528_v48, %v5937_v47  ;;  %v5543_v47 = vunpack.i.h.bf16 %v7710_v33  ;;  %v8163_v48 = vsel %vm1395_vm5, %v7430_v17, %v5557_v38  ;;  %v11538_v33 = vld [vmem:[#allocation30_spill] sm:$0xff] }
 0x1b5   : > { %v1594_v18 = vsel %vm1593_vm11, %v1561_v5, %v6017_v59  ;;  %v5548_v59 = vunpack.i.h.bf16 %v11535_v23  ;;  %v11536_v5 = vld [vmem:[#allocation29_spill] sm:$0xff]  ;;  %v8178_v55 = vsel %vm1395_vm5, %v11538_v33, %v5562_v49  ;;  %v11540_v17 = vld [vmem:[#allocation54_spill] sm:$0xff]  ;;  %v5782_v33 = vunpack.i.l.bf16 %v7918_v62 }
 0x1b6   : > { %11539 = vst [vmem:[#allocation29_spill] sm:$0xff] %v8178_v55  ;;  %v5623_v38 = vunpack.i.h.bf16 %v11540_v17  ;;  %v1399_v29 = vsel %vm1395_vm5, %v11541_v15, %v5543_v47  ;;  %v11544_v49 = vld [vmem:[#allocation46_spill] sm:$0xff]  ;;  %v11546_v15 = vld [vmem:[#allocation23_spill] sm:$0xff] }
 0x1b8   : > { %v6096_v41 = vpop.permute.xlu1 %6095  ;;  %v1432_v23 = vsel %vm1428_vm7, %v1399_v29, %v5623_v38 }
 0x1b9   : > { %v6098_v36 = vunpack.i.h.bf16 %v6096_v41  ;;  %v6097_v1 = vunpack.i.l.bf16 %v6096_v41  ;;  %v8174_v41 = vsel %vm1395_vm5, %v11536_v5, %v5563_v9  ;;  %v5783_v5 = vunpack.i.h.bf16 %v7918_v62  ;;  %v8200_v54 = vpop.permute.xlu0 %6090 }
 0x1ba   : > { %11537 = vst [vmem:[#allocation51_spill] sm:$0xff] %v8174_v41  ;;  %v5942_v62 = vunpack.i.l.bf16 %v8052_v11  ;;  %v11550_v41 = vld [vmem:[#allocation10_spill] sm:$0xff] }
 0x1bb   : > { %v1627_v12 = vsel %vm11356_vm12, %v1594_v18, %v6097_v1  ;;  %v1628_v30 = vsel %vm11356_vm12, %v1595_v57, %v6098_v36  ;;  %v5622_v36 = vunpack.i.l.bf16 %v11540_v17  ;;  %v11542_v1 = vld [vmem:[#allocation22_spill] sm:$0xff]  ;;  %v5703_v57 = vunpack.i.h.bf16 %v7840_v46  ;;  %v11545_v17 = vld [vmem:[#allocation24_spill] sm:$0xff]  ;;  %11547 = vst [vmem:[#allocation30_spill] sm:$0xff] %v8200_v54 }
 0x1bc   : > { %v1659_v32 = vpack.c.bf16 %v1628_v30, %v1627_v12  ;;  %v1398_v18 = vsel %vm1395_vm5, %v11542_v1, %v5542_v2  ;;  %v5702_v12 = vunpack.i.l.bf16 %v7840_v46  ;;  %v1400_v47 = vsel %vm1395_vm5, %v11545_v17, %v5547_v45 }
 0x1bd   : > { %v1401_v2 = vsel %vm1395_vm5, %v11546_v15, %v5548_v59  ;;  %v5863_v1 = vunpack.i.h.bf16 %v7937_v24  ;;  %v5862_v46 = vunpack.i.l.bf16 %v7937_v24  ;;  %v5943_v30 = vunpack.i.h.bf16 %v8052_v11 }
 0x1be   : > { %5421 = vmatmul.msk.bf16.vlgmr.msra.gmra.mxu0 %vm11355_vm13, %v1659_v32  ;;  %v1431_v32 = vsel %vm1428_vm7, %v1398_v18, %v5622_v36  ;;  %v1465_v45 = vsel %vm1461_vm6, %v1432_v23, %v5703_v57  ;;  %v6023_v59 = vunpack.i.h.bf16 %v8088_v50  ;;  %v6022_v17 = vunpack.i.l.bf16 %v8088_v50  ;;  %v11548_v18 = vld [vmem:[#allocation59_spill] sm:$0xff]  ;;  %v11549_v57 = vld [vmem:[#allocation53_spill] sm:$0xff] }
 0x1bf   : > { %v1464_v55 = vsel %vm1461_vm6, %v1431_v32, %v5702_v12  ;;  %v1498_v24 = vsel %vm1494_vm8, %v1465_v45, %v5783_v5  ;;  %v6103_v54 = vunpack.i.h.bf16 %v6101_v31  ;;  %v6102_v36 = vunpack.i.l.bf16 %v6101_v31  ;;  %v8216_v32 = vpop.permute.xlu2 %6115  ;;  %v11556_v31 = vld [vmem:[#allocation19_spill] sm:$0xff] }
 0x1c0   : > { %v8188_v9 = vpop.permute.xlu1 %6110  ;;  %v1497_v15 = vsel %vm1494_vm8, %v1464_v55, %v5782_v33  ;;  %v5583_v38 = vunpack.i.h.bf16 %v11548_v18  ;;  %v5582_v29 = vunpack.i.l.bf16 %v11548_v18  ;;  %v1531_v12 = vsel %vm1527_vm10, %v1498_v24, %v5863_v1  ;;  %v11551_v33 = vld [vmem:[#allocation58_spill] sm:$0xff]  ;;  %v11553_v24 = vld [vmem:[#allocation64_spill] sm:$0xff] }
 0x1c1   : > { %v1530_v11 = vsel %vm1527_vm10, %v1497_v15, %v5862_v46  ;;  %v5628_v50 = vunpack.i.h.bf16 %v11550_v41  ;;  %v1564_v55 = vsel %vm1560_vm9, %v1531_v12, %v5943_v30  ;;  %v5627_v45 = vunpack.i.l.bf16 %v11550_v41  ;;  %v11555_v12 = vld [vmem:[#allocation38_spill] sm:$0xff] }
 0x1c2   : > { %v1563_v5 = vsel %vm1560_vm9, %v1530_v11, %v5942_v62  ;;  %v1597_v1 = vsel %vm1593_vm11, %v1564_v55, %v6023_v59  ;;  %v5663_v15 = vunpack.i.h.bf16 %v11553_v24  ;;  %v5662_v18 = vunpack.i.l.bf16 %v11553_v24  ;;  %v11554_v11 = vld [vmem:[#allocation37_spill] sm:$0xff] }
 0x1c3   : > { %v1596_v46 = vsel %vm1593_vm11, %v1563_v5, %v6022_v17  ;;  %v1630_v62 = vsel %vm11356_vm12, %v1597_v1, %v6103_v54  ;;  %v1415_v30 = vsel %vm1395_vm5, %v11554_v11, %v5583_v38  ;;  %v1414_v41 = vsel %vm1395_vm5, %v11555_v12, %v5582_v29  ;;  %v6106_v1 = vpop.permute.xlu0 %6105 }
 0x1c4   : > { %v1629_v23 = vsel %vm11356_vm12, %v1596_v46, %v6102_v36  ;;  %v5742_v17 = vunpack.i.l.bf16 %v11556_v31  ;;  %v1434_v59 = vsel %vm1428_vm7, %v1401_v2, %v5628_v50  ;;  %v5708_v5 = vunpack.i.h.bf16 %v7842_v42 }
 0x1c5   : > { %v5823_v55 = vunpack.i.h.bf16 %v7951_v8  ;;  %v5822_v36 = vunpack.i.l.bf16 %v7951_v8  ;;  %v1433_v54 = vsel %vm1428_vm7, %v1400_v47, %v5627_v45  ;;  %v5903_v46 = vunpack.i.h.bf16 %v8012_v34 }
 0x1c6   : > { %v5902_v38 = vunpack.i.l.bf16 %v8012_v34  ;;  %v1660_v29 = vpack.c.bf16 %v1630_v62, %v1629_v23  ;;  %v1448_v24 = vsel %vm1428_vm7, %v1415_v30, %v5663_v15  ;;  %v5983_v2 = vunpack.i.h.bf16 %v8056_v43 }
 0x1c7   : > { %v5982_v50 = vunpack.i.l.bf16 %v8056_v43  ;;  %v6063_v47 = vunpack.i.h.bf16 %v8114_v35  ;;  %v6062_v45 = vunpack.i.l.bf16 %v8114_v35  ;;  %v1467_v34 = vsel %vm1461_vm6, %v1434_v59, %v5708_v5  ;;  %v8262_v12 = vpop.permute.xlu2 %6130 }
 0x1c8   : > { %v8224_v60 = vpop.permute.xlu1 %6125  ;;  %v5707_v23 = vunpack.i.l.bf16 %v7842_v42  ;;  %v5788_v43 = vunpack.i.h.bf16 %v7864_v13  ;;  %v5787_v62 = vunpack.i.l.bf16 %v7864_v13  ;;  %v5868_v5 = vunpack.i.h.bf16 %v7985_v0 }
 0x1c9   : > { %11552 = vst [vmem:[#allocation54_spill] sm:$0xff] %v8224_v60  ;;  %v5743_v60 = vunpack.i.h.bf16 %v11556_v31  ;;  %v1447_v31 = vsel %vm1428_vm7, %v1414_v41, %v5662_v18 }
 0x1ca   : > { %v1480_v11 = vsel %vm1461_vm6, %v1447_v31, %v5742_v17  ;;  %v1466_v31 = vsel %vm1461_vm6, %v1433_v54, %v5707_v23  ;;  %v5748_v23 = vunpack.i.h.bf16 %v7878_v14 }
 0x1cb   : > { %v1481_v8 = vsel %vm1461_vm6, %v1448_v24, %v5743_v60  ;;  %v1513_v15 = vsel %vm1494_vm8, %v1480_v11, %v5822_v36  ;;  %v8283_v54 = vpop.permute.xlu0 %6120 }
 0x1cc   : > { %v1514_v18 = vsel %vm1494_vm8, %v1481_v8, %v5823_v55  ;;  %v1546_v60 = vsel %vm1527_vm10, %v1513_v15, %v5902_v38  ;;  %v5867_v55 = vunpack.i.l.bf16 %v7985_v0  ;;  %v5948_v38 = vunpack.i.h.bf16 %v8054_v10 }
 0x1cd   : > { %v1547_v30 = vsel %vm1527_vm10, %v1514_v18, %v5903_v46  ;;  %v1579_v41 = vsel %vm1560_vm9, %v1546_v60, %v5982_v50  ;;  %v5947_v46 = vunpack.i.l.bf16 %v8054_v10  ;;  %v6027_v50 = vunpack.i.l.bf16 %v8081_v6  ;;  %v11557_v10 = vld [vmem:[#allocation7_spill] sm:$0xff] }
 0x1ce   : > { %5422 = vmatmul.msk.bf16.gmra.mxu0 %vm11355_vm13, %v1660_v29  ;;  %v1580_v17 = vsel %vm1560_vm9, %v1547_v30, %v5983_v2  ;;  %v1612_v36 = vsel %vm1593_vm11, %v1579_v41, %v6062_v45  ;;  %v6028_v2 = vunpack.i.h.bf16 %v8081_v6  ;;  %v1499_v0 = vsel %vm1494_vm8, %v1466_v31, %v5787_v62  ;;  %v11559_v62 = vld [vmem:[#allocation33_spill] sm:$0xff] }
 0x1cf   : > { %v1613_v13 = vsel %vm1593_vm11, %v1580_v17, %v6063_v47  ;;  %v1500_v8 = vsel %vm1494_vm8, %v1467_v34, %v5788_v43  ;;  %v6108_v47 = vunpack.i.h.bf16 %v6106_v1  ;;  %v6107_v45 = vunpack.i.l.bf16 %v6106_v1 }
 0x1d0   : > { %v6141_v35 = vpop.permute.xlu1 %6140  ;;  %v5587_v15 = vunpack.i.l.bf16 %v11551_v33  ;;  %v5668_v18 = vunpack.i.h.bf16 %v11557_v10  ;;  %v1532_v60 = vsel %vm1527_vm10, %v1499_v0, %v5867_v55  ;;  %v1533_v30 = vsel %vm1527_vm10, %v1500_v8, %v5868_v5 }
 0x1d1   : > { %v6143_v42 = vunpack.i.h.bf16 %v6141_v35  ;;  %v6142_v59 = vunpack.i.l.bf16 %v6141_v35  ;;  %v5667_v6 = vunpack.i.l.bf16 %v11557_v10  ;;  %v1565_v34 = vsel %vm1560_vm9, %v1532_v60, %v5947_v46 }
 0x1d2   : > { %v1566_v1 = vsel %vm1560_vm9, %v1533_v30, %v5948_v38  ;;  %v11558_v43 = vunpack.i.h.bf16 %v11551_v33  ;;  %v5747_v41 = vunpack.i.l.bf16 %v7878_v14  ;;  %v1598_v17 = vsel %vm1593_vm11, %v1565_v34, %v6027_v50 }
 0x1d3   : > { %v1645_v29 = vsel %vm11356_vm12, %v1612_v36, %v6142_v59  ;;  %v1646_v24 = vsel %vm11356_vm12, %v1613_v13, %v6143_v42  ;;  %v1599_v42 = vsel %vm1593_vm11, %v1566_v1, %v6028_v2  ;;  %v5828_v59 = vunpack.i.h.bf16 %v7953_v21  ;;  %v11560_v13 = vld [vmem:[#allocation34_spill] sm:$0xff] }
 0x1d4   : > { %v1668_v11 = vpack.c.bf16 %v1646_v24, %v1645_v29  ;;  %v1417_v35 = vsel %vm1395_vm5, %v11559_v62, %v11558_v43  ;;  %v5827_v5 = vunpack.i.l.bf16 %v7953_v21  ;;  %v1631_v55 = vsel %vm11356_vm12, %v1598_v17, %v6107_v45  ;;  %v6146_v29 = vpop.permute.xlu2 %6145  ;;  %v11564_v62 = vld [vmem:[#allocation26_spill] sm:$0xff]  ;;  %v8329_v17 = vpop.permute.xlu0 %6135 }
 0x1d5   : > { %v1632_v36 = vsel %vm11356_vm12, %v1599_v42, %v6108_v47  ;;  %v1416_v33 = vsel %vm1395_vm5, %v11560_v13, %v5587_v15  ;;  %v1450_v38 = vsel %vm1428_vm7, %v1417_v35, %v5668_v18  ;;  %v5908_v46 = vunpack.i.h.bf16 %v7977_v40  ;;  %v11561_v18 = vld [vmem:[#allocation9_spill] sm:$0xff] }
 0x1d6   : > { %5430 = vmatmul.msk.bf16.vlgmr.msra.gmra.mxu3 %vm11355_vm13, %v1668_v11  ;;  %v5907_v14 = vunpack.i.l.bf16 %v7977_v40  ;;  %v1449_v24 = vsel %vm1428_vm7, %v1416_v33, %v5667_v6  ;;  %v1483_v31 = vsel %vm1461_vm6, %v1450_v38, %v5748_v23  ;;  %v5988_v21 = vunpack.i.h.bf16 %v8073_v16 }
 0x1d7   : > { %v5987_v2 = vunpack.i.l.bf16 %v8073_v16  ;;  %v1482_v50 = vsel %vm1461_vm6, %v1449_v24, %v5747_v41  ;;  %v6068_v11 = vunpack.i.h.bf16 %v8111_v39  ;;  %v6067_v0 = vunpack.i.l.bf16 %v8111_v39  ;;  %v11562_v39 = vld [vmem:[#allocation15_spill] sm:$0xff] }
 0x1d8   : > { %v1661_v8 = vpack.c.bf16 %v1632_v36, %v1631_v55  ;;  %v1516_v47 = vsel %vm1494_vm8, %v1483_v31, %v5828_v59  ;;  %v1515_v40 = vsel %vm1494_vm8, %v1482_v50, %v5827_v5  ;;  %v6148_v45 = vunpack.i.h.bf16 %v6146_v29 }
 0x1d9   : > { %v6147_v15 = vunpack.i.l.bf16 %v6146_v29  ;;  %v5553_v10 = vunpack.i.h.bf16 %v11549_v57  ;;  %v5632_v60 = vunpack.i.l.bf16 %v11561_v18  ;;  %v1548_v30 = vsel %vm1527_vm10, %v1515_v40, %v5907_v14 }
 0x1da   : > { %v1549_v16 = vsel %vm1527_vm10, %v1516_v47, %v5908_v46  ;;  %v5633_v6 = vunpack.i.h.bf16 %v11561_v18  ;;  %v5712_v23 = vunpack.i.l.bf16 %v11562_v39  ;;  %v1581_v34 = vsel %vm1560_vm9, %v1548_v30, %v5987_v2 }
 0x1db   : > { %v1582_v1 = vsel %vm1560_vm9, %v1549_v16, %v5988_v21  ;;  %v11563_v43 = vunpack.i.l.bf16 %v11549_v57  ;;  %v5713_v41 = vunpack.i.h.bf16 %v11562_v39  ;;  %v1614_v42 = vsel %vm1593_vm11, %v1581_v34, %v6067_v0  ;;  %v11565_v57 = vld [vmem:[#allocation25_spill] sm:$0xff] }
 0x1dc   : > { %v1615_v59 = vsel %vm1593_vm11, %v1582_v1, %v6068_v11  ;;  %v5793_v5 = vunpack.i.h.bf16 %v7927_v44  ;;  %v5792_v55 = vunpack.i.l.bf16 %v7927_v44  ;;  %v1647_v36 = vsel %vm11356_vm12, %v1614_v42, %v6147_v15  ;;  %v11568_v16 = vld [vmem:[#allocation41_spill] sm:$0xff] }
 0x1dd   : > { %v1402_v35 = vsel %vm1395_vm5, %v11564_v62, %v11563_v43  ;;  %v1648_v13 = vsel %vm11356_vm12, %v1615_v59, %v6148_v45  ;;  %v1403_v33 = vsel %vm1395_vm5, %v11565_v57, %v5553_v10  ;;  %v5873_v46 = vunpack.i.h.bf16 %v7987_v61  ;;  %v11566_v45 = vld [vmem:[#allocation16_spill] sm:$0xff] }
 0x1de   : > { %5423 = vmatmul.msk.bf16.gmra.mxu0 %vm11355_vm13, %v1661_v8  ;;  %v1435_v38 = vsel %vm1428_vm7, %v1402_v35, %v5632_v60  ;;  %v5872_v14 = vunpack.i.l.bf16 %v7987_v61  ;;  %v1436_v29 = vsel %vm1428_vm7, %v1403_v33, %v5633_v6  ;;  %v5953_v31 = vunpack.i.h.bf16 %v8020_v58 }
 0x1df   : > { %v1468_v24 = vsel %vm1461_vm6, %v1435_v38, %v5712_v23  ;;  %v5952_v44 = vunpack.i.l.bf16 %v8020_v58  ;;  %v1469_v21 = vsel %vm1461_vm6, %v1436_v29, %v5713_v41  ;;  %v6033_v2 = vunpack.i.h.bf16 %v8101_v22  ;;  %v11569_v41 = vld [vmem:[#allocation42_spill] sm:$0xff] }
 0x1e0   : > { %v6032_v50 = vunpack.i.l.bf16 %v8101_v22  ;;  %v1669_v11 = vpack.c.bf16 %v1648_v13, %v1647_v36  ;;  %v1501_v0 = vsel %vm1494_vm8, %v1468_v24, %v5792_v55  ;;  %v1502_v8 = vsel %vm1494_vm8, %v1469_v21, %v5793_v5  ;;  %v6151_v5 = vpop.permute.xlu0 %6150 }
 0x1e1   : > { %v6113_v61 = vunpack.i.h.bf16 %v8188_v9  ;;  %v6112_v47 = vunpack.i.l.bf16 %v8188_v9  ;;  %v5592_v40 = vunpack.i.l.bf16 %v11544_v49  ;;  %v5673_v15 = vunpack.i.h.bf16 %v11566_v45 }
 0x1e2   : > { %v1534_v58 = vsel %vm1527_vm10, %v1501_v0, %v5872_v14  ;;  %v1535_v10 = vsel %vm1527_vm10, %v1502_v8, %v5873_v46  ;;  %v5672_v22 = vunpack.i.l.bf16 %v11566_v45  ;;  %v5753_v18 = vunpack.i.h.bf16 %v7880_v25 }
 0x1e3   : > { %v1567_v60 = vsel %vm1560_vm9, %v1534_v58, %v5952_v44  ;;  %v1568_v30 = vsel %vm1560_vm9, %v1535_v10, %v5953_v31  ;;  %v11567_v9 = vunpack.i.h.bf16 %v11544_v49  ;;  %v5752_v39 = vunpack.i.l.bf16 %v7880_v25  ;;  %v11570_v31 = vld [vmem:[#allocation57_spill] sm:$0xff] }
 0x1e4   : > { %v1600_v23 = vsel %vm1593_vm11, %v1567_v60, %v6032_v50  ;;  %v1601_v34 = vsel %vm1593_vm11, %v1568_v30, %v6033_v2  ;;  %v5833_v1 = vunpack.i.h.bf16 %v7914_v27  ;;  %v5832_v43 = vunpack.i.l.bf16 %v7914_v27  ;;  %v11571_v50 = vld [vmem:[#allocation52_spill] sm:$0xff] }
 0x1e5   : > { %v1419_v6 = vsel %vm1395_vm5, %v11568_v16, %v11567_v9  ;;  %v1633_v62 = vsel %vm11356_vm12, %v1600_v23, %v6112_v47  ;;  %v1634_v35 = vsel %vm11356_vm12, %v1601_v34, %v6113_v61  ;;  %v1418_v49 = vsel %vm1395_vm5, %v11569_v41, %v5592_v40  ;;  %v11572_v9 = vld [vmem:[#allocation62_spill] sm:$0xff]  ;;  %v11573_v41 = vld [vmem:[#allocation65_spill] sm:$0xff] }
 0x1e6   : > { %5431 = vmatmul.msk.bf16.gmra.mxu3 %vm11355_vm13, %v1669_v11  ;;  %v1452_v42 = vsel %vm1428_vm7, %v1419_v6, %v5673_v15  ;;  %v5913_v59 = vunpack.i.h.bf16 %v8022_v37  ;;  %v5912_v25 = vunpack.i.l.bf16 %v8022_v37  ;;  %v1451_v55 = vsel %vm1428_vm7, %v1418_v49, %v5672_v22 }
 0x1e7   : > { %v1485_v36 = vsel %vm1461_vm6, %v1452_v42, %v5753_v18  ;;  %v5993_v27 = vunpack.i.h.bf16 %v8075_v53  ;;  %v5992_v13 = vunpack.i.l.bf16 %v8075_v53  ;;  %v1484_v57 = vsel %vm1461_vm6, %v1451_v55, %v5752_v39  ;;  %v11574_v55 = vld [vmem:[#allocation45_spill] sm:$0xff] }
 0x1e8   : > { %v6073_v33 = vunpack.i.h.bf16 %v8109_v3  ;;  %v6072_v38 = vunpack.i.l.bf16 %v8109_v3  ;;  %v1662_v46 = vpack.c.bf16 %v1634_v35, %v1633_v62  ;;  %v1517_v14 = vsel %vm1494_vm8, %v1484_v57, %v5832_v43 }
 0x1e9   : > { %v1518_v37 = vsel %vm1494_vm8, %v1485_v36, %v5833_v1  ;;  %v6153_v29 = vunpack.i.h.bf16 %v6151_v5  ;;  %v6152_v24 = vunpack.i.l.bf16 %v6151_v5  ;;  %v5638_v44 = vunpack.i.h.bf16 %v11570_v31 }
 0x1ea   : > { %v5637_v21 = vunpack.i.l.bf16 %v11570_v31  ;;  %v1550_v2 = vsel %vm1527_vm10, %v1517_v14, %v5912_v25  ;;  %v1551_v53 = vsel %vm1527_vm10, %v1518_v37, %v5913_v59  ;;  %v5608_v11 = vunpack.i.h.bf16 %v11571_v50  ;;  %v11575_v14 = vld [vmem:[#allocation44_spill] sm:$0xff]  ;;  %v6156_v31 = vpop.permute.xlu1 %6155 }
 0x1eb   : > { %v5718_v3 = vunpack.i.h.bf16 %v7854_v56  ;;  %v1583_v0 = vsel %vm1560_vm9, %v1550_v2, %v5992_v13  ;;  %v1584_v8 = vsel %vm1560_vm9, %v1551_v53, %v5993_v27  ;;  %v5607_v61 = vunpack.i.l.bf16 %v11571_v50  ;;  %v11608_v50 = vld [vmem:[#allocation55_spill] sm:$0xff] }
 0x1ec   : > { %v5717_v47 = vunpack.i.l.bf16 %v7854_v56  ;;  %v1616_v40 = vsel %vm1593_vm11, %v1583_v0, %v6072_v38  ;;  %v1617_v45 = vsel %vm1593_vm11, %v1584_v8, %v6073_v33  ;;  %v5798_v15 = vunpack.i.h.bf16 %v7929_v26 }
 0x1ed   : > { %v5797_v58 = vunpack.i.l.bf16 %v7929_v26  ;;  %v1649_v10 = vsel %vm11356_vm12, %v1616_v40, %v6152_v24  ;;  %v1650_v22 = vsel %vm11356_vm12, %v1617_v45, %v6153_v29  ;;  %v1438_v18 = vsel %vm1428_vm7, %v8167_v52, %v5638_v44 }
 0x1ee   : > { %5424 = vmatmul.msk.bf16.gmra.mxu0 %vm11355_vm13, %v1662_v46  ;;  %v1437_v60 = vsel %vm1428_vm7, %v8163_v48, %v5637_v21  ;;  %v5878_v56 = vunpack.i.h.bf16 %v7949_v4  ;;  %v5877_v30 = vunpack.i.l.bf16 %v7949_v4  ;;  %v5597_v16 = vunpack.i.l.bf16 %v11572_v9 }
 0x1ef   : > { %v1471_v6 = vsel %vm1461_vm6, %v1438_v18, %v5718_v3  ;;  %v5958_v26 = vunpack.i.h.bf16 %v8061_v63  ;;  %v5957_v39 = vunpack.i.l.bf16 %v8061_v63  ;;  %v1470_v23 = vsel %vm1461_vm6, %v1437_v60, %v5717_v47  ;;  %v11576_v3 = vld [vmem:[#allocation98_spill] sm:$0xff] }
 0x1f0   : > { %v6038_v34 = vunpack.i.h.bf16 %v8096_v51  ;;  %v6037_v52 = vunpack.i.l.bf16 %v8096_v51  ;;  %v1670_v1 = vpack.c.bf16 %v1650_v22, %v1649_v10  ;;  %v1504_v48 = vsel %vm1494_vm8, %v1471_v6, %v5798_v15 }
 0x1f1   : > { %v1503_v43 = vsel %vm1494_vm8, %v1470_v23, %v5797_v58  ;;  %v6118_v4 = vunpack.i.h.bf16 %v8216_v32  ;;  %v6117_v62 = vunpack.i.l.bf16 %v8216_v32  ;;  %v5598_v35 = vunpack.i.h.bf16 %v11572_v9  ;;  %v11577_v58 = vld [vmem:[#allocation47_spill] sm:$0xff] }
 0x1f2   : > { %v5677_v49 = vunpack.i.l.bf16 %v11573_v41  ;;  %v1536_v63 = vsel %vm1527_vm10, %v1503_v43, %v5877_v30  ;;  %v1537_v42 = vsel %vm1527_vm10, %v1504_v48, %v5878_v56  ;;  %v5678_v51 = vunpack.i.h.bf16 %v11573_v41  ;;  %v11579_v30 = vld [vmem:[#allocation67_spill] sm:$0xff] }
 0x1f3   : > { %v5757_v59 = vunpack.i.l.bf16 %v7834_v28  ;;  %v1569_v25 = vsel %vm1560_vm9, %v1536_v63, %v5957_v39  ;;  %v1570_v5 = vsel %vm1560_vm9, %v1537_v42, %v5958_v26  ;;  %v1420_v32 = vsel %vm1395_vm5, %v11574_v55, %v5597_v16  ;;  %v11580_v26 = vld [vmem:[#allocation56_spill] sm:$0xff]  ;;  %v11583_v41 = vld [vmem:[#allocation51_spill] sm:$0xff]  ;;  %v11584_v63 = vld [vmem:[#allocation81_spill] sm:$0xff] }
 0x1f4   : > { %v5758_v36 = vunpack.i.h.bf16 %v7834_v28  ;;  %v1602_v27 = vsel %vm1593_vm11, %v1569_v25, %v6037_v52  ;;  %v1603_v13 = vsel %vm1593_vm11, %v1570_v5, %v6038_v34  ;;  %v5838_v57 = vunpack.i.h.bf16 %v7963_v20  ;;  %v11581_v52 = vld [vmem:[#allocation70_spill] sm:$0xff]  ;;  %v11586_v55 = vld [vmem:[#allocation87_spill] sm:$0xff] }
 0x1f5   : > { %v5837_v33 = vunpack.i.l.bf16 %v7963_v20  ;;  %v1635_v38 = vsel %vm11356_vm12, %v1602_v27, %v6117_v62  ;;  %v1636_v46 = vsel %vm11356_vm12, %v1603_v13, %v6118_v4  ;;  %v1421_v37 = vsel %vm1395_vm5, %v11575_v14, %v5598_v35  ;;  %v11582_v62 = vld [vmem:[#allocation61_spill] sm:$0xff] }
 0x1f6   : > { %5432 = vmatmul.msk.bf16.gmra.mxu3 %vm11355_vm13, %v1670_v1  ;;  %v1453_v29 = vsel %vm1428_vm7, %v1420_v32, %v5677_v49  ;;  %v5918_v24 = vunpack.i.h.bf16 %v8024_v19  ;;  %v5917_v28 = vunpack.i.l.bf16 %v8024_v19  ;;  %v1454_v44 = vsel %vm1428_vm7, %v1421_v37, %v5678_v51  ;;  %v11587_v13 = vld [vmem:[#allocation93_spill] sm:$0xff] }
 0x1f7   : > { %v1486_v21 = vsel %vm1461_vm6, %v1453_v29, %v5757_v59  ;;  %v5998_v20 = vunpack.i.h.bf16 %v8065_v7  ;;  %v5997_v2 = vunpack.i.l.bf16 %v8065_v7  ;;  %v1487_v53 = vsel %vm1461_vm6, %v1454_v44, %v5758_v36  ;;  %v11578_v7 = vld [vmem:[#allocation14_spill] sm:$0xff]  ;;  %v11585_v59 = vld [vmem:[#allocation29_spill] sm:$0xff] }
 0x1f8   : > { %v6078_v0 = vunpack.i.h.bf16 %v11576_v3  ;;  %v6077_v8 = vunpack.i.l.bf16 %v11576_v3  ;;  %v1663_v47 = vpack.c.bf16 %v1636_v46, %v1635_v38  ;;  %v1519_v40 = vsel %vm1494_vm8, %v1486_v21, %v5837_v33 }
 0x1f9   : > { %v1520_v19 = vsel %vm1494_vm8, %v1487_v53, %v5838_v57  ;;  %v6158_v45 = vunpack.i.h.bf16 %v6156_v31  ;;  %v6157_v15 = vunpack.i.l.bf16 %v6156_v31  ;;  %v8457_v10 = vsel %vm1395_vm5, %v11577_v58, %v5608_v11 }
 0x1fa   : > { %v5643_v22 = vunpack.i.h.bf16 %v11578_v7  ;;  %v1552_v18 = vsel %vm1527_vm10, %v1519_v40, %v5917_v28  ;;  %v1553_v60 = vsel %vm1527_vm10, %v1520_v19, %v5918_v24  ;;  %v5642_v56 = vunpack.i.l.bf16 %v11578_v7  ;;  %v11588_v28 = vld [vmem:[#allocation12_spill] sm:$0xff] }
 0x1fb   : > { %v5723_v9 = vunpack.i.h.bf16 %v11579_v30  ;;  %v1585_v16 = vsel %vm1560_vm9, %v1552_v18, %v5997_v2  ;;  %v1586_v6 = vsel %vm1560_vm9, %v1553_v60, %v5998_v20  ;;  %v5567_v39 = vunpack.i.l.bf16 %v11580_v26  ;;  %v11589_v2 = vld [vmem:[#allocation72_spill] sm:$0xff] }
 0x1fc   : > { %v5722_v11 = vunpack.i.l.bf16 %v11579_v30  ;;  %v1618_v23 = vsel %vm1593_vm11, %v1585_v16, %v6077_v8  ;;  %v1619_v34 = vsel %vm1593_vm11, %v1586_v6, %v6078_v0  ;;  %v5803_v1 = vunpack.i.h.bf16 %v11581_v52  ;;  %v11590_v8 = vld [vmem:[#allocation39_spill] sm:$0xff]  ;;  %v11592_v18 = vld [vmem:[#allocation40_spill] sm:$0xff]  ;;  %v6161_v6 = vpop.permute.xlu2 %6160 }
 0x1fd   : > { %v5802_v48 = vunpack.i.l.bf16 %v11581_v52  ;;  %v1651_v43 = vsel %vm11356_vm12, %v1618_v23, %v6157_v15  ;;  %v1652_v4 = vsel %vm11356_vm12, %v1619_v34, %v6158_v45  ;;  %v5603_v35 = vunpack.i.h.bf16 %v11582_v62  ;;  %v11591_v45 = vld [vmem:[#allocation78_spill] sm:$0xff]  ;;  %v11593_v30 = vld [vmem:[#allocation80_spill] sm:$0xff]  ;;  %v11594_v34 = vld [vmem:[#allocation91_spill] sm:$0xff] }
 0x1fe   : > { %5425 = vmatmul.msk.bf16.gmra.mxu0 %vm11355_vm13, %v1663_v47  ;;  %v1440_v49 = vsel %vm1428_vm7, %v11583_v41, %v5643_v22  ;;  %v5883_v42 = vunpack.i.h.bf16 %v11584_v63  ;;  %v5882_v51 = vunpack.i.l.bf16 %v11584_v63  ;;  %v1439_v25 = vsel %vm1428_vm7, %v11585_v59, %v5642_v56  ;;  %v11596_v59 = vld [vmem:[#allocation11_spill] sm:$0xff] }
 0x1ff   : > { %v1473_v5 = vsel %vm1461_vm6, %v1440_v49, %v5723_v9  ;;  %v5963_v32 = vunpack.i.h.bf16 %v11586_v55  ;;  %v5962_v36 = vunpack.i.l.bf16 %v11586_v55  ;;  %v1472_v27 = vsel %vm1461_vm6, %v1439_v25, %v5722_v11 }
 0x200   : > { %v6043_v57 = vunpack.i.h.bf16 %v11587_v13  ;;  %v6042_v33 = vunpack.i.l.bf16 %v11587_v13  ;;  %v1671_v38 = vpack.c.bf16 %v1652_v4, %v1651_v43  ;;  %v1505_v46 = vsel %vm1494_vm8, %v1472_v27, %v5802_v48  ;;  %v11595_v43 = vld [vmem:[#allocation6_spill] sm:$0xff] }
 0x201   : > { %v1506_v14 = vsel %vm1494_vm8, %v1473_v5, %v5803_v1  ;;  %v6123_v37 = vunpack.i.h.bf16 %v8283_v54  ;;  %v6122_v29 = vunpack.i.l.bf16 %v8283_v54  ;;  %v5602_v24 = vunpack.i.l.bf16 %v11582_v62 }
 0x202   : > { %v5683_v31 = vunpack.i.h.bf16 %v11588_v28  ;;  %v1538_v44 = vsel %vm1527_vm10, %v1505_v46, %v5882_v51  ;;  %v1539_v21 = vsel %vm1527_vm10, %v1506_v14, %v5883_v42  ;;  %v5682_v20 = vunpack.i.l.bf16 %v11588_v28 }
 0x203   : > { %v5763_v53 = vunpack.i.h.bf16 %v11589_v2  ;;  %v1571_v3 = vsel %vm1560_vm9, %v1538_v44, %v5962_v36  ;;  %v1572_v0 = vsel %vm1560_vm9, %v1539_v21, %v5963_v32  ;;  %v1423_v54 = vsel %vm1395_vm5, %v11590_v8, %v5603_v35  ;;  %v11597_v36 = vld [vmem:[#allocation17_spill] sm:$0xff]  ;;  %v11600_v21 = vld [vmem:[#allocation31_spill] sm:$0xff]  ;;  %v11602_v8 = vld [vmem:[#allocation86_spill] sm:$0xff] }
 0x204   : > { %v5762_v47 = vunpack.i.l.bf16 %v11589_v2  ;;  %v1604_v40 = vsel %vm1593_vm11, %v1571_v3, %v6042_v33  ;;  %v1605_v19 = vsel %vm1593_vm11, %v1572_v0, %v6043_v57  ;;  %v5843_v15 = vunpack.i.h.bf16 %v11591_v45  ;;  %v11598_v33 = vld [vmem:[#allocation32_spill] sm:$0xff] }
 0x205   : > { %v5842_v58 = vunpack.i.l.bf16 %v11591_v45  ;;  %v1637_v7 = vsel %vm11356_vm12, %v1604_v40, %v6122_v29  ;;  %v1638_v22 = vsel %vm11356_vm12, %v1605_v19, %v6123_v37  ;;  %v1422_v60 = vsel %vm1395_vm5, %v11592_v18, %v5602_v24  ;;  %v11599_v29 = vld [vmem:[#allocation75_spill] sm:$0xff]  ;;  %v11603_v19 = vld [vmem:[#allocation96_spill] sm:$0xff]  ;;  %v11604_v18 = vld [vmem:[#allocation54_spill] sm:$0xff] }
 0x206   : > { %5433 = vmatmul.msk.bf16.gmra.mxu3 %vm11355_vm13, %v1671_v38  ;;  %v1456_v56 = vsel %vm1428_vm7, %v1423_v54, %v5683_v31  ;;  %v5923_v9 = vunpack.i.h.bf16 %v11593_v30  ;;  %v5922_v16 = vunpack.i.l.bf16 %v11593_v30  ;;  %v1455_v11 = vsel %vm1428_vm7, %v1422_v60, %v5682_v20  ;;  %v11605_v30 = vld [vmem:[#allocation48_spill] sm:$0xff] }
 0x207   : > { %v1489_v23 = vsel %vm1461_vm6, %v1456_v56, %v5763_v53  ;;  %v6003_v52 = vunpack.i.h.bf16 %v11594_v34  ;;  %v6002_v1 = vunpack.i.l.bf16 %v11594_v34  ;;  %v1488_v48 = vsel %vm1461_vm6, %v1455_v11, %v5762_v47 }
 0x208   : > { %v6083_v4 = vunpack.i.h.bf16 %v11595_v43  ;;  %v6082_v62 = vunpack.i.l.bf16 %v11595_v43  ;;  %v1664_v35 = vpack.c.bf16 %v1638_v22, %v1637_v7  ;;  %v1522_v41 = vsel %vm1494_vm8, %v1489_v23, %v5843_v15 }
 0x209   : > { %v1521_v49 = vsel %vm1494_vm8, %v1488_v48, %v5842_v58  ;;  %v6163_v63 = vunpack.i.h.bf16 %v6161_v6  ;;  %v6162_v42 = vunpack.i.l.bf16 %v6161_v6  ;;  %v5568_v51 = vunpack.i.h.bf16 %v11580_v26 }
 0x20a   : > { %v5647_v25 = vunpack.i.l.bf16 %v11596_v59  ;;  %v1554_v5 = vsel %vm1527_vm10, %v1521_v49, %v5922_v16  ;;  %v1555_v55 = vsel %vm1527_vm10, %v1522_v41, %v5923_v9  ;;  %v5648_v32 = vunpack.i.h.bf16 %v11596_v59  ;;  %v11606_v16 = vld [vmem:[#allocation18_spill] sm:$0xff] }
 0x20b   : > { %v5727_v27 = vunpack.i.l.bf16 %v11597_v36  ;;  %v1587_v13 = vsel %vm1560_vm9, %v1554_v5, %v6002_v1  ;;  %v1588_v57 = vsel %vm1560_vm9, %v1555_v55, %v6003_v52  ;;  %v1408_v38 = vsel %vm1395_vm5, %v11598_v33, %v5567_v39  ;;  %v11601_v39 = vld [vmem:[#allocation82_spill] sm:$0xff]  ;;  %v11607_v52 = vld [vmem:[#allocation73_spill] sm:$0xff]  ;;  %v11610_v5 = vld [vmem:[#allocation84_spill] sm:$0xff] }
 0x20c   : > { %v5728_v46 = vunpack.i.h.bf16 %v11597_v36  ;;  %v1620_v14 = vsel %vm1593_vm11, %v1587_v13, %v6082_v62  ;;  %v1621_v37 = vsel %vm1593_vm11, %v1588_v57, %v6083_v4  ;;  %v5808_v24 = vunpack.i.h.bf16 %v11599_v29  ;;  %v11609_v41 = vld [vmem:[#allocation74_spill] sm:$0xff]  ;;  %v6166_v36 = vpop.permute.xlu0 %6165  ;;  %v11611_v57 = vld [vmem:[#allocation92_spill] sm:$0xff] }
 0x20d   : > { %v5807_v28 = vunpack.i.l.bf16 %v11599_v29  ;;  %v1653_v31 = vsel %vm11356_vm12, %v1620_v14, %v6162_v42  ;;  %v1654_v44 = vsel %vm11356_vm12, %v1621_v37, %v6163_v63  ;;  %v1409_v26 = vsel %vm1395_vm5, %v11600_v21, %v5568_v51  ;;  %v11612_v14 = vld [vmem:[#allocation97_spill] sm:$0xff]  ;;  %v11613_v21 = vld [vmem:[#allocation60_spill] sm:$0xff] }
 0x20e   : > { %5426 = vmatmul.msk.bf16.gmra.mxu0 %vm11355_vm13, %v1664_v35  ;;  %v1441_v20 = vsel %vm1428_vm7, %v1408_v38, %v5647_v25  ;;  %v5888_v2 = vunpack.i.h.bf16 %v11601_v39  ;;  %v5887_v53 = vunpack.i.l.bf16 %v11601_v39  ;;  %v1442_v3 = vsel %vm1428_vm7, %v1409_v26, %v5648_v32 }
 0x20f   : > { %v1474_v0 = vsel %vm1461_vm6, %v1441_v20, %v5727_v27  ;;  %v5968_v54 = vunpack.i.h.bf16 %v11602_v8  ;;  %v5967_v47 = vunpack.i.l.bf16 %v11602_v8  ;;  %v1475_v40 = vsel %vm1461_vm6, %v1442_v3, %v5728_v46 }
 0x210   : > { %v6048_v45 = vunpack.i.h.bf16 %v11603_v19  ;;  %v6047_v15 = vunpack.i.l.bf16 %v11603_v19  ;;  %v1672_v58 = vpack.c.bf16 %v1654_v44, %v1653_v31  ;;  %v1507_v7 = vsel %vm1494_vm8, %v1474_v0, %v5807_v28  ;;  %v11615_v0 = vld [vmem:[#allocation68_spill] sm:$0xff] }
 0x211   : > { %v1508_v22 = vsel %vm1494_vm8, %v1475_v40, %v5808_v24  ;;  %v6128_v60 = vunpack.i.h.bf16 %v11604_v18  ;;  %v6127_v56 = vunpack.i.l.bf16 %v11604_v18  ;;  %v1424_v9 = vsel %vm1395_vm5, %v11605_v30, %v5607_v61  ;;  %v11616_v40 = vld [vmem:[#allocation28_spill] sm:$0xff] }
 0x212   : > { %v5688_v6 = vunpack.i.h.bf16 %v11606_v16  ;;  %v1540_v11 = vsel %vm1527_vm10, %v1507_v7, %v5887_v53  ;;  %v1541_v23 = vsel %vm1527_vm10, %v1508_v22, %v5888_v2  ;;  %v5687_v34 = vunpack.i.l.bf16 %v11606_v16  ;;  %v11614_v53 = vld [vmem:[#allocation27_spill] sm:$0xff]  ;;  %v11617_v7 = vld [vmem:[#allocation76_spill] sm:$0xff]  ;;  %v11618_v16 = vld [vmem:[#allocation77_spill] sm:$0xff] }
 0x213   : > { %v5768_v1 = vunpack.i.h.bf16 %v11607_v52  ;;  %v1573_v48 = vsel %vm1560_vm9, %v1540_v11, %v5967_v47  ;;  %v1574_v43 = vsel %vm1560_vm9, %v1541_v23, %v5968_v54  ;;  %v5573_v4 = vunpack.i.h.bf16 %v11608_v50  ;;  %v11619_v23 = vld [vmem:[#allocation63_spill] sm:$0xff] }
 0x214   : > { %v5767_v61 = vunpack.i.l.bf16 %v11607_v52  ;;  %v1606_v62 = vsel %vm1593_vm11, %v1573_v48, %v6047_v15  ;;  %v1607_v35 = vsel %vm1593_vm11, %v1574_v43, %v6048_v45  ;;  %v5848_v49 = vunpack.i.h.bf16 %v11609_v41 }
 0x215   : > { %v5847_v63 = vunpack.i.l.bf16 %v11609_v41  ;;  %v1639_v42 = vsel %vm11356_vm12, %v1606_v62, %v6127_v56  ;;  %v1640_v51 = vsel %vm11356_vm12, %v1607_v35, %v6128_v60  ;;  %v5572_v59 = vunpack.i.l.bf16 %v11608_v50 }
 0x216   : > { %5434 = vmatmul.msk.bf16.gmra.mxu3 %vm11355_vm13, %v1672_v58  ;;  %v1458_v25 = vsel %vm1428_vm7, %v8457_v10, %v5688_v6  ;;  %v5928_v55 = vunpack.i.h.bf16 %v11610_v5  ;;  %v5927_v32 = vunpack.i.l.bf16 %v11610_v5  ;;  %v1457_v27 = vsel %vm1428_vm7, %v1424_v9, %v5687_v34 }
 0x217   : > { %v1491_v13 = vsel %vm1461_vm6, %v1458_v25, %v5768_v1  ;;  %v6008_v33 = vunpack.i.h.bf16 %v11611_v57  ;;  %v6007_v38 = vunpack.i.l.bf16 %v11611_v57  ;;  %v1490_v46 = vsel %vm1461_vm6, %v1457_v27, %v5767_v61  ;;  %v11620_v1 = vld [vmem:[#allocation88_spill] sm:$0xff] }
 0x218   : > { %v6088_v37 = vunpack.i.h.bf16 %v11612_v14  ;;  %v6087_v29 = vunpack.i.l.bf16 %v11612_v14  ;;  %v1665_v10 = vpack.c.bf16 %v1640_v51, %v1639_v42  ;;  %v1523_v24 = vsel %vm1494_vm8, %v1490_v46, %v5847_v63 }
 0x219   : > { %v1524_v28 = vsel %vm1494_vm8, %v1491_v13, %v5848_v49  ;;  %v6168_v31 = vunpack.i.h.bf16 %v6166_v36  ;;  %v6167_v44 = vunpack.i.l.bf16 %v6166_v36  ;;  %v5653_v26 = vunpack.i.h.bf16 %v11613_v21  ;;  %v11623_v36 = vld [vmem:[#allocation20_spill] sm:$0xff] }
 0x21a   : > { %v5652_v20 = vunpack.i.l.bf16 %v11613_v21  ;;  %v1556_v39 = vsel %vm1527_vm10, %v1523_v24, %v5927_v32  ;;  %v1557_v2 = vsel %vm1527_vm10, %v1524_v28, %v5928_v55  ;;  %v1411_v3 = vsel %vm1395_vm5, %v11614_v53, %v5573_v4  ;;  %v11621_v4 = vld [vmem:[#allocation95_spill] sm:$0xff] }
 0x21b   : > { %v5733_v8 = vunpack.i.h.bf16 %v11615_v0  ;;  %v1589_v54 = vsel %vm1560_vm9, %v1556_v39, %v6007_v38  ;;  %v1590_v47 = vsel %vm1560_vm9, %v1557_v2, %v6008_v33  ;;  %v1410_v19 = vsel %vm1395_vm5, %v11616_v40, %v5572_v59  ;;  %v11622_v59 = vld [vmem:[#allocation66_spill] sm:$0xff]  ;;  %v6171_v2 = vpop.permute.xlu1 %6170 }
 0x21c   : > { %v5732_v45 = vunpack.i.l.bf16 %v11615_v0  ;;  %v1622_v15 = vsel %vm1593_vm11, %v1589_v54, %v6087_v29  ;;  %v1623_v58 = vsel %vm1593_vm11, %v1590_v47, %v6088_v37  ;;  %v5813_v22 = vunpack.i.h.bf16 %v11617_v7  ;;  %v11624_v33 = vld [vmem:[#allocation50_spill] sm:$0xff]  ;;  %v11625_v37 = vld [vmem:[#allocation79_spill] sm:$0xff] }
 0x21d   : > { %v5812_v18 = vunpack.i.l.bf16 %v11617_v7  ;;  %v1655_v60 = vsel %vm11356_vm12, %v1622_v15, %v6167_v44  ;;  %v1656_v56 = vsel %vm11356_vm12, %v1623_v58, %v6168_v31  ;;  %v1444_v30 = vsel %vm1428_vm7, %v1411_v3, %v5653_v26  ;;  %v11626_v31 = vld [vmem:[#allocation49_spill] sm:$0xff]  ;;  %v11628_v0 = vld [vmem:[#allocation90_spill] sm:$0xff] }
 0x21e   : > { %5427 = vmatmul.msk.bf16.gmra.mxu0 %vm11355_vm13, %v1665_v10  ;;  %v1443_v9 = vsel %vm1428_vm7, %v1410_v19, %v5652_v20  ;;  %v5893_v6 = vunpack.i.h.bf16 %v11618_v16  ;;  %v5892_v11 = vunpack.i.l.bf16 %v11618_v16  ;;  %v5612_v34 = vunpack.i.l.bf16 %v11619_v23  ;;  %v11627_v26 = vld [vmem:[#allocation85_spill] sm:$0xff]  ;;  %v11629_v40 = vld [vmem:[#allocation30_spill] sm:$0xff] }
 0x21f   : > { %v1477_v52 = vsel %vm1461_vm6, %v1444_v30, %v5733_v8  ;;  %v5973_v48 = vunpack.i.h.bf16 %v11620_v1  ;;  %v5972_v43 = vunpack.i.l.bf16 %v11620_v1  ;;  %v1476_v50 = vsel %vm1461_vm6, %v1443_v9, %v5732_v45  ;;  %v11631_v30 = vld [vmem:[#allocation13_spill] sm:$0xff] }
 0x220   : > { %v6053_v61 = vunpack.i.h.bf16 %v11621_v4  ;;  %v6052_v62 = vunpack.i.l.bf16 %v11621_v4  ;;  %v1673_v35 = vpack.c.bf16 %v1656_v56, %v1655_v60  ;;  %v1510_v41 = vsel %vm1494_vm8, %v1477_v52, %v5813_v22  ;;  %v11630_v60 = vld [vmem:[#allocation43_spill] sm:$0xff] }
 0x221   : > { %v1509_v49 = vsel %vm1494_vm8, %v1476_v50, %v5812_v18  ;;  %v6133_v63 = vunpack.i.h.bf16 %v8262_v12  ;;  %v6132_v42 = vunpack.i.l.bf16 %v8262_v12  ;;  %v5613_v51 = vunpack.i.h.bf16 %v11619_v23  ;;  %v11632_v23 = vld [vmem:[#allocation69_spill] sm:$0xff] }
 0x222   : > { %v5692_v25 = vunpack.i.l.bf16 %v11622_v59  ;;  %v1542_v5 = vsel %vm1527_vm10, %v1509_v49, %v5892_v11  ;;  %v1543_v55 = vsel %vm1527_vm10, %v1510_v41, %v5893_v6  ;;  %v5693_v32 = vunpack.i.h.bf16 %v11622_v59 }
 0x223   : > { %v5772_v27 = vunpack.i.l.bf16 %v11623_v36  ;;  %v1575_v13 = vsel %vm1560_vm9, %v1542_v5, %v5972_v43  ;;  %v1576_v57 = vsel %vm1560_vm9, %v1543_v55, %v5973_v48  ;;  %v1426_v12 = vsel %vm1395_vm5, %v11624_v33, %v5612_v34  ;;  %v11634_v43 = vld [vmem:[#allocation35_spill] sm:$0xff] }
 0x224   : > { %v5773_v38 = vunpack.i.h.bf16 %v11623_v36  ;;  %v1608_v46 = vsel %vm1593_vm11, %v1575_v13, %v6052_v62  ;;  %v1609_v14 = vsel %vm1593_vm11, %v1576_v57, %v6053_v61  ;;  %v5853_v29 = vunpack.i.h.bf16 %v11625_v37  ;;  %v11637_v5 = vld [vmem:[#allocation83_spill] sm:$0xff]  ;;  %v11638_v13 = vld [vmem:[#allocation89_spill] sm:$0xff] }
 0x225   : > { %v5852_v10 = vunpack.i.l.bf16 %v11625_v37  ;;  %v1641_v24 = vsel %vm11356_vm12, %v1608_v46, %v6132_v42  ;;  %v1642_v28 = vsel %vm11356_vm12, %v1609_v14, %v6133_v63  ;;  %v1427_v44 = vsel %vm1395_vm5, %v11626_v31, %v5613_v51  ;;  %v11636_v51 = vld [vmem:[#allocation36_spill] sm:$0xff] }
 0x226   : > { %5435 = vmatmul.msk.bf16.gmra.mxu3 %vm11355_vm13, %v1673_v35  ;;  %v1459_v21 = vsel %vm1428_vm7, %v1426_v12, %v5692_v25  ;;  %v5933_v20 = vunpack.i.h.bf16 %v11627_v26  ;;  %v5932_v39 = vunpack.i.l.bf16 %v11627_v26  ;;  %v1460_v53 = vsel %vm1428_vm7, %v1427_v44, %v5693_v32  ;;  %v11635_v35 = vld [vmem:[#allocation71_spill] sm:$0xff] }
 0x227   : > { %v1492_v3 = vsel %vm1461_vm6, %v1459_v21, %v5772_v27  ;;  %v6013_v8 = vunpack.i.h.bf16 %v11628_v0  ;;  %v6012_v54 = vunpack.i.l.bf16 %v11628_v0  ;;  %v1493_v47 = vsel %vm1461_vm6, %v1460_v53, %v5773_v38  ;;  %v11639_v38 = vld [vmem:[#allocation94_spill] sm:$0xff] }
 0x228   : > { %v6093_v19 = vunpack.i.h.bf16 %v11629_v40  ;;  %v6092_v45 = vunpack.i.l.bf16 %v11629_v40  ;;  %v1666_v15 = vpack.c.bf16 %v1642_v28, %v1641_v24  ;;  %v1525_v58 = vsel %vm1494_vm8, %v1492_v3, %v5852_v10 }
 0x229   : > { %v1526_v7 = vsel %vm1494_vm8, %v1493_v47, %v5853_v29  ;;  %v6173_v22 = vunpack.i.h.bf16 %v6171_v2  ;;  %v6172_v18 = vunpack.i.l.bf16 %v6171_v2  ;;  %v5577_v56 = vunpack.i.l.bf16 %v11630_v60 }
 0x22a   : > { %v5658_v9 = vunpack.i.h.bf16 %v11631_v30  ;;  %v1558_v16 = vsel %vm1527_vm10, %v1525_v58, %v5932_v39  ;;  %v1559_v6 = vsel %vm1527_vm10, %v1526_v7, %v5933_v20  ;;  %v5657_v11 = vunpack.i.l.bf16 %v11631_v30  ;;  %v8704_v20 = vld [vmem:[%s11225_s2] ss:$0 sm:$0xff] }
 0x22b   : > { %v5738_v34 = vunpack.i.h.bf16 %v11632_v23  ;;  %v1591_v52 = vsel %vm1560_vm9, %v1558_v16, %v6012_v54  ;;  %v1592_v1 = vsel %vm1560_vm9, %v1559_v6, %v6013_v8  ;;  %v11633_v48 = vunpack.i.h.bf16 %v11630_v60 }
 0x22c   : > { %v5737_v4 = vunpack.i.l.bf16 %v11632_v23  ;;  %v1624_v61 = vsel %vm1593_vm11, %v1591_v52, %v6092_v45  ;;  %v1625_v62 = vsel %vm1593_vm11, %v1592_v1, %v6093_v19  ;;  %v5818_v41 = vunpack.i.h.bf16 %v11635_v35 }
 0x22d   : > { %v1413_v50 = vsel %vm1395_vm5, %v11634_v43, %v11633_v48  ;;  %v5817_v49 = vunpack.i.l.bf16 %v11635_v35  ;;  %v1657_v63 = vsel %vm11356_vm12, %v1624_v61, %v6172_v18  ;;  %v1658_v42 = vsel %vm11356_vm12, %v1625_v62, %v6173_v22 }
 0x22e   : > { %5428 = vmatmul.msk.bf16.gmra.mxu0 %vm11355_vm13, %v1666_v15  ;;  %v1412_v59 = vsel %vm1395_vm5, %v11636_v51, %v5577_v56  ;;  %v1446_v25 = vsel %vm1428_vm7, %v1413_v50, %v5658_v9  ;;  %v5898_v55 = vunpack.i.h.bf16 %v11637_v5  ;;  %v5897_v32 = vunpack.i.l.bf16 %v11637_v5 }
 0x22f   : > { %v1445_v36 = vsel %vm1428_vm7, %v1412_v59, %v5657_v11  ;;  %v1479_v27 = vsel %vm1461_vm6, %v1446_v25, %v5738_v34  ;;  %v5978_v57 = vunpack.i.h.bf16 %v11638_v13  ;;  %v5977_v33 = vunpack.i.l.bf16 %v11638_v13 }
 0x230   : > { %v1478_v12 = vsel %vm1461_vm6, %v1445_v36, %v5737_v4  ;;  %v6058_v46 = vunpack.i.h.bf16 %v11639_v38  ;;  %v6057_v14 = vunpack.i.l.bf16 %v11639_v38  ;;  %v1674_v37 = vpack.c.bf16 %v1658_v42, %v1657_v63 }
 0x231   : > { %v1511_v29 = vsel %vm1494_vm8, %v1478_v12, %v5817_v49  ;;  %v1512_v10 = vsel %vm1494_vm8, %v1479_v27, %v5818_v41  ;;  %v6138_v24 = vunpack.i.h.bf16 %v8329_v17  ;;  %v6137_v28 = vunpack.i.l.bf16 %v8329_v17 }
 0x232   : > { %v1544_v31 = vsel %vm1527_vm10, %v1511_v29, %v5897_v32  ;;  %v1545_v44 = vsel %vm1527_vm10, %v1512_v10, %v5898_v55  ;;  %v11357_v40 = vmov 0.0  }
 0x233   : > { %v1577_v21 = vsel %vm1560_vm9, %v1544_v31, %v5977_v33  ;;  %v1578_v26 = vsel %vm1560_vm9, %v1545_v44, %v5978_v57 }
 0x234   : > { %v1610_v39 = vsel %vm1593_vm11, %v1577_v21, %v6057_v14  ;;  %v1611_v2 = vsel %vm1593_vm11, %v1578_v26, %v6058_v46 }
 0x235   : > { %v1643_v17 = vsel %vm11356_vm12, %v1610_v39, %v6137_v28  ;;  %v1644_v53 = vsel %vm11356_vm12, %v1611_v2, %v6138_v24 }
 0x236   : > { %5436 = vmatmul.msk.bf16.gmra.mxu3 %vm11355_vm13, %v1674_v37  ;;  %v1667_v8 = vpack.c.bf16 %v1644_v53, %v1643_v17 }
 0x23b   : > { %v1760_v3 = vpop.f32.mrf.mxu0 }
 0x23c   : > { %v1761_v0 = vadd.f32 %v8704_v20, %v1760_v3 }
 0x23e   : > { %vm1840_vm14 = vcmp.ge.f32.partialorder %v1761_v0, 0.0  ;;  %v1872_v54 = vmul.f32 0.2, %v1761_v0  ;;  %5429 = vmatmul.msk.bf16.gmra.mxu0 %vm11355_vm13, %v1667_v8 }
 0x240   : > { %v8712_v47 = vsel %vm1840_vm14, %v1761_v0, %v1872_v54 }
 0x241   : > { %v6174_v19 = vpack.i.bf16 %v8712_v47, %v11357_v40  ;;  %v1937_v7 = vrot.slane %v8712_v47, 7  ;;  %v2035_v18 = vrot.slane %v8712_v47, 1 }
 0x243   : > { %v1762_v45 = vpop.f32.mrf.mxu0  ;;  %6175 = vrot.lane.b32.xlu2 %v6174_v19, %s6904_s14 }
 0x244   : > { %v1763_v15 = vadd.f32 %v8704_v20, %v1762_v45 }
 0x246   : > { %vm1841_vm15 = vcmp.ge.f32.partialorder %v1763_v15, 0.0  ;;  %v1873_v58 = vmul.f32 0.2, %v1763_v15 }
 0x248   : > { %v8719_v22 = vsel %vm1841_vm15, %v1763_v15, %v1873_v58 }
 0x249   : > { %v1953_v60 = vrot.slane %v8719_v22, 7  ;;  %v2051_v56 = vrot.slane %v8719_v22, 1 }
 0x24b   : > { %v1765_v9 = vpop.f32.mrf.mxu0  ;;  %v8728_v6 = vsel %vm331_vm0, %v1953_v60, %v1937_v7  ;;  %v2067_v11 = vsel %vm444_vm1, %v2035_v18, %v2051_v56  ;;  %v2083_v23 = vsel %vm444_vm1, %v2051_v56, %v2035_v18  ;;  %v8736_v34 = vsel %vm331_vm0, %v1937_v7, %v1953_v60 }
 0x24c   : > { %v1766_v52 = vadd.f32 %v8704_v20, %v1765_v9  ;;  %v2102_v48 = vsel %vm293_vm2, 0.0, %v2083_v23  ;;  %v9106_v1 = vsel %vm290_vm3, 0.0, %v8728_v6 }
 0x24d   : > { %v8741_v43 = vpack.i.bf16 %v2102_v48, %v2067_v11 }
 0x24e   : > { %vm1842_vm14 = vcmp.ge.f32.partialorder %v1766_v52, 0.0  ;;  %v1874_v50 = vmul.f32 0.2, %v1766_v52 }
 0x24f   : > { %11642 = vst [vmem:[#allocation21_spill] sm:$0xff] %v8741_v43 }
 0x250   : > { %v1906_v4 = vsel %vm1842_vm14, %v1766_v52, %v1874_v50 }
 0x251   : > { %v6179_v61 = vpack.i.bf16 %v1906_v4, %v8719_v22  ;;  %v1938_v49 = vrot.slane %v1906_v4, 7  ;;  %v2036_v42 = vrot.slane %v1906_v4, 1 }
 0x253   : > { %v1767_v62 = vpop.f32.mrf.mxu0  ;;  %6180 = vrot.lane.b32.xlu0 %v6179_v61, %s6904_s14 }
 0x254   : > { %v1768_v35 = vadd.f32 %v8704_v20, %v1767_v62 }
 0x256   : > { %vm1843_vm15 = vcmp.ge.f32.partialorder %v1768_v35, 0.0  ;;  %v1875_v41 = vmul.f32 0.2, %v1768_v35 }
 0x258   : > { %v1907_v63 = vsel %vm1843_vm15, %v1768_v35, %v1875_v41 }
 0x259   : > { %v1954_v51 = vrot.slane %v1907_v63, 7  ;;  %v1805_v59 = vpop.f32.mrf.mxu3  ;;  %v2052_v25 = vrot.slane %v1907_v63, 1  ;;  %v8746_v5 = vpack.i.bf16 %v1907_v63, %v1906_v4 }
 0x25a   : > { %v1806_v46 = vadd.f32 %v8704_v20, %v1805_v59 }
 0x25b   : > { %v1770_v55 = vpop.f32.mrf.mxu0  ;;  %v2068_v32 = vsel %vm444_vm1, %v2036_v42, %v2052_v25  ;;  %v2084_v36 = vsel %vm444_vm1, %v2052_v25, %v2036_v42  ;;  %v8754_v27 = vsel %vm331_vm0, %v1954_v51, %v1938_v49  ;;  %v8758_v13 = vsel %vm331_vm0, %v1938_v49, %v1954_v51 }
 0x25c   : > { %v1771_v57 = vadd.f32 %v8704_v20, %v1770_v55  ;;  %v2104_v33 = vsel %vm293_vm2, 0.0, %v2084_v36  ;;  %v1890_v24 = vmul.f32 0.2, %v1806_v46  ;;  %vm1858_vm15 = vcmp.ge.f32.partialorder %v1806_v46, 0.0 }
 0x25d   : > { %v8763_v12 = vpack.i.bf16 %v2104_v33, %v2068_v32  ;;  %v9125_v6 = vsel %vm290_vm3, 0.0, %v8754_v27 }
 0x25e   : > { %vm1844_vm14 = vcmp.ge.f32.partialorder %v1771_v57, 0.0  ;;  %v1876_v38 = vmul.f32 0.2, %v1771_v57  ;;  %v8771_v39 = vsel %vm1858_vm15, %v1806_v46, %v1890_v24 }
 0x25f   : > { %11643 = vst [vmem:[#allocation22_spill] sm:$0xff] %v8763_v12  ;;  %v2044_v19 = vrot.slane %v8771_v39, 1 }
 0x260   : > { %v1908_v14 = vsel %vm1844_vm14, %v1771_v57, %v1876_v38  ;;  %11645 = vst [vmem:[#allocation24_spill] sm:$0xff] %v8771_v39 }
 0x261   : > { %v1807_v37 = vpop.f32.mrf.mxu3  ;;  %v6184_v29 = vpack.i.bf16 %v1908_v14, %v1907_v63  ;;  %v1939_v53 = vrot.slane %v1908_v14, 7  ;;  %v2037_v3 = vrot.slane %v1908_v14, 1 }
 0x262   : > { %v1808_v10 = vadd.f32 %v8704_v20, %v1807_v37 }
 0x263   : > { %v1772_v28 = vpop.f32.mrf.mxu0  ;;  %6185 = vrot.lane.b32.xlu1 %v6184_v29, %s6904_s14 }
 0x264   : > { %vm1859_vm13 = vcmp.ge.f32.partialorder %v1808_v10, 0.0  ;;  %v1891_v31 = vmul.f32 0.2, %v1808_v10  ;;  %v1773_v44 = vadd.f32 %v8704_v20, %v1772_v28 }
 0x266   : > { %v8769_v21 = vsel %vm1859_vm13, %v1808_v10, %v1891_v31  ;;  %vm1845_vm12 = vcmp.ge.f32.partialorder %v1773_v44, 0.0  ;;  %v1877_v26 = vmul.f32 0.2, %v1773_v44 }
 0x267   : > { %11644 = vst [vmem:[#allocation46_spill] sm:$0xff] %v8769_v21  ;;  %v2060_v2 = vrot.slane %v8769_v21, 1 }
 0x268   : > { %v1909_v17 = vsel %vm1845_vm12, %v1773_v44, %v1877_v26 }
 0x269   : > { %v1955_v0 = vrot.slane %v1909_v17, 7  ;;  %v2053_v8 = vrot.slane %v1909_v17, 1  ;;  %v1810_v54 = vpop.f32.mrf.mxu3  ;;  %v2092_v11 = vsel %vm444_vm1, %v2060_v2, %v2044_v19  ;;  %v2076_v50 = vsel %vm444_vm1, %v2044_v19, %v2060_v2 }
 0x26a   : > { %v1811_v45 = vadd.f32 %v8704_v20, %v1810_v54  ;;  %v2120_v4 = vsel %vm293_vm2, 0.0, %v2092_v11  ;;  %v8799_v62 = vpack.i.bf16 %v1909_v17, %v1908_v14 }
 0x26b   : > { %v1775_v15 = vpop.f32.mrf.mxu0  ;;  %v2069_v58 = vsel %vm444_vm1, %v2037_v3, %v2053_v8  ;;  %v2085_v7 = vsel %vm444_vm1, %v2053_v8, %v2037_v3  ;;  %v8782_v18 = vsel %vm331_vm0, %v1939_v53, %v1955_v0  ;;  %v8786_v60 = vsel %vm331_vm0, %v1955_v0, %v1939_v53 }
 0x26c   : > { %v1776_v56 = vadd.f32 %v8704_v20, %v1775_v15  ;;  %v2106_v9 = vsel %vm293_vm2, 0.0, %v2085_v7  ;;  %v1892_v48 = vmul.f32 0.2, %v1811_v45  ;;  %vm1860_vm13 = vcmp.ge.f32.partialorder %v1811_v45, 0.0 }
 0x26d   : > { %v8793_v23 = vpack.i.bf16 %v2106_v9, %v2069_v58  ;;  %v8802_v63 = vpack.i.bf16 %v2120_v4, %v2076_v50 }
 0x26e   : > { %vm1846_vm12 = vcmp.ge.f32.partialorder %v1776_v56, 0.0  ;;  %v1878_v52 = vmul.f32 0.2, %v1776_v56  ;;  %v8804_v42 = vsel %vm1860_vm13, %v1811_v45, %v1892_v48 }
 0x26f   : > { %11646 = vst [vmem:[#allocation23_spill] sm:$0xff] %v8793_v23  ;;  %v2045_v55 = vrot.slane %v8804_v42, 1  ;;  %v1947_v46 = vrot.slane %v8804_v42, 7 }
 0x270   : > { %v1910_v61 = vsel %vm1846_vm12, %v1776_v56, %v1878_v52  ;;  %11647 = vst [vmem:[#allocation59_spill] sm:$0xff] %v8802_v63 }
 0x271   : > { %v1812_v35 = vpop.f32.mrf.mxu3  ;;  %v6189_v41 = vpack.i.bf16 %v1910_v61, %v1909_v17  ;;  %v1940_v14 = vrot.slane %v1910_v61, 7  ;;  %v2038_v29 = vrot.slane %v1910_v61, 1 }
 0x272   : > { %v1813_v49 = vadd.f32 %v8704_v20, %v1812_v35 }
 0x273   : > { %v1777_v51 = vpop.f32.mrf.mxu0  ;;  %6190 = vrot.lane.b32.xlu2 %v6189_v41, %s6904_s14 }
 0x274   : > { %vm1861_vm14 = vcmp.ge.f32.partialorder %v1813_v49, 0.0  ;;  %v1893_v59 = vmul.f32 0.2, %v1813_v49  ;;  %v1778_v25 = vadd.f32 %v8704_v20, %v1777_v51 }
 0x276   : > { %v8809_v32 = vsel %vm1861_vm14, %v1813_v49, %v1893_v59  ;;  %vm1847_vm15 = vcmp.ge.f32.partialorder %v1778_v25, 0.0  ;;  %v1879_v36 = vmul.f32 0.2, %v1778_v25 }
 0x277   : > { %v1963_v57 = vrot.slane %v8809_v32, 7  ;;  %v2061_v33 = vrot.slane %v8809_v32, 1  ;;  %v8815_v38 = vpack.i.bf16 %v8809_v32, %v8804_v42 }
 0x278   : > { %v1911_v37 = vsel %vm1847_vm15, %v1778_v25, %v1879_v36 }
 0x279   : > { %11648 = vst [vmem:[#allocation53_spill] sm:$0xff] %v8815_v38  ;;  %v1956_v10 = vrot.slane %v1911_v37, 7  ;;  %v1815_v24 = vpop.f32.mrf.mxu3  ;;  %v2054_v28 = vrot.slane %v1911_v37, 1  ;;  %v2077_v31 = vsel %vm444_vm1, %v2045_v55, %v2061_v33  ;;  %v2093_v44 = vsel %vm444_vm1, %v2061_v33, %v2045_v55 }
 0x27a   : > { %v2122_v26 = vsel %vm293_vm2, 0.0, %v2093_v44  ;;  %v8826_v2 = vsel %vm331_vm0, %v1963_v57, %v1947_v46  ;;  %v8830_v17 = vsel %vm331_vm0, %v1947_v46, %v1963_v57  ;;  %v1816_v19 = vadd.f32 %v8704_v20, %v1815_v24 }
 0x27b   : > { %v1780_v53 = vpop.f32.mrf.mxu0  ;;  %v2086_v3 = vsel %vm444_vm1, %v2054_v28, %v2038_v29  ;;  %v8836_v0 = vsel %vm331_vm0, %v1956_v10, %v1940_v14  ;;  %v8838_v8 = vpack.i.bf16 %v2122_v26, %v2077_v31  ;;  %v2070_v45 = vsel %vm444_vm1, %v2038_v29, %v2054_v28 }
 0x27c   : > { %v1781_v54 = vadd.f32 %v8704_v20, %v1780_v53  ;;  %v2108_v15 = vsel %vm293_vm2, 0.0, %v2086_v3  ;;  %v8848_v58 = vsel %vm331_vm0, %v1940_v14, %v1956_v10  ;;  %v8850_v9 = vpack.i.bf16 %v1911_v37, %v1910_v61 }
 0x27d   : > { %11649 = vst [vmem:[#allocation10_spill] sm:$0xff] %v8838_v8  ;;  %v8852_v11 = vpack.i.bf16 %v2108_v15, %v2070_v45  ;;  %v1894_v52 = vmul.f32 0.2, %v1816_v19  ;;  %vm1862_vm13 = vcmp.ge.f32.partialorder %v1816_v19, 0.0  ;;  %v6204_v46 = vpack.i.bf16 %v8804_v42, %v8769_v21 }
 0x27e   : > { %vm1848_vm12 = vcmp.ge.f32.partialorder %v1781_v54, 0.0  ;;  %v1880_v7 = vmul.f32 0.2, %v1781_v54  ;;  %11650 = vst [vmem:[#allocation58_spill] sm:$0xff] %v8850_v9 }
 0x27f   : > { %11651 = vst [vmem:[#allocation64_spill] sm:$0xff] %v8852_v11  ;;  %v8857_v51 = vsel %vm1862_vm13, %v1816_v19, %v1894_v52 }
 0x280   : > { %v1912_v56 = vsel %vm1848_vm12, %v1781_v54, %v1880_v7  ;;  %v1948_v36 = vrot.slane %v8857_v51, 7  ;;  %v2046_v28 = vrot.slane %v8857_v51, 1 }
 0x281   : > { %v1817_v48 = vpop.f32.mrf.mxu3  ;;  %v6194_v50 = vpack.i.bf16 %v1912_v56, %v1911_v37  ;;  %v1941_v14 = vrot.slane %v1912_v56, 7  ;;  %v2039_v10 = vrot.slane %v1912_v56, 1 }
 0x282   : > { %v1818_v4 = vadd.f32 %v8704_v20, %v1817_v48 }
 0x283   : > { %v1782_v35 = vpop.f32.mrf.mxu0  ;;  %6195 = vrot.lane.b32.xlu0 %v6194_v50, %s6904_s14 }
 0x284   : > { %vm1863_vm14 = vcmp.ge.f32.partialorder %v1818_v4, 0.0  ;;  %v1895_v41 = vmul.f32 0.2, %v1818_v4  ;;  %v1783_v49 = vadd.f32 %v8704_v20, %v1782_v35 }
 0x286   : > { %v1927_v59 = vsel %vm1863_vm14, %v1818_v4, %v1895_v41  ;;  %vm1849_vm15 = vcmp.ge.f32.partialorder %v1783_v49, 0.0  ;;  %v1881_v61 = vmul.f32 0.2, %v1783_v49 }
 0x287   : > { %v1964_v25 = vrot.slane %v1927_v59, 7  ;;  %v8860_v55 = vpack.i.bf16 %v1927_v59, %v8857_v51  ;;  %v2062_v57 = vrot.slane %v1927_v59, 1 }
 0x288   : > { %v1913_v33 = vsel %vm1849_vm15, %v1783_v49, %v1881_v61 }
 0x289   : > { %11652 = vst [vmem:[#allocation37_spill] sm:$0xff] %v8860_v55  ;;  %v1957_v37 = vrot.slane %v1913_v33, 7  ;;  %v1820_v29 = vpop.f32.mrf.mxu3  ;;  %v2055_v24 = vrot.slane %v1913_v33, 1  ;;  %v8869_v44 = vsel %vm331_vm0, %v1948_v36, %v1964_v25  ;;  %v8873_v26 = vsel %vm331_vm0, %v1964_v25, %v1948_v36 }
 0x28a   : > { %v1821_v31 = vadd.f32 %v8704_v20, %v1820_v29  ;;  %v2094_v45 = vsel %vm444_vm1, %v2062_v57, %v2046_v28  ;;  %v2078_v35 = vsel %vm444_vm1, %v2046_v28, %v2062_v57  ;;  %v8897_v61 = vpack.i.bf16 %v1913_v33, %v1912_v56 }
 0x28b   : > { %v1785_v53 = vpop.f32.mrf.mxu0  ;;  %6205 = vrot.lane.b32.xlu0 %v6204_v46, %s6904_s14  ;;  %v2087_v42 = vsel %vm444_vm1, %v2055_v24, %v2039_v10  ;;  %v8880_v3 = vsel %vm331_vm0, %v1957_v37, %v1941_v14  ;;  %v2071_v15 = vsel %vm444_vm1, %v2039_v10, %v2055_v24  ;;  %v8891_v52 = vsel %vm331_vm0, %v1941_v14, %v1957_v37 }
 0x28c   : > { %vm1864_vm12 = vcmp.ge.f32.partialorder %v1821_v31, 0.0  ;;  %v1896_v54 = vmul.f32 0.2, %v1821_v31  ;;  %v1786_v19 = vadd.f32 %v8704_v20, %v1785_v53  ;;  %v2110_v7 = vsel %vm293_vm2, 0.0, %v2087_v42  ;;  %11653 = vst [vmem:[#allocation38_spill] sm:$0xff] %v8897_v61 }
 0x28d   : > { %v2124_v41 = vsel %vm293_vm2, 0.0, %v2094_v45  ;;  %v8899_v25 = vpack.i.bf16 %v2110_v7, %v2071_v15  ;;  %v6209_v45 = vpack.i.bf16 %v8857_v51, %v8809_v32 }
 0x28e   : > { %v1928_v48 = vsel %vm1864_vm12, %v1821_v31, %v1896_v54  ;;  %vm1850_vm13 = vcmp.ge.f32.partialorder %v1786_v19, 0.0  ;;  %v1882_v50 = vmul.f32 0.2, %v1786_v19  ;;  %v8903_v37 = vpack.i.bf16 %v2124_v41, %v2078_v35 }
 0x28f   : > { %v6214_v4 = vpack.i.bf16 %v1928_v48, %v1927_v59  ;;  %v1949_v31 = vrot.slane %v1928_v48, 7 }
 0x290   : > { %v1914_v49 = vsel %vm1850_vm13, %v1786_v19, %v1882_v50  ;;  %11654 = vst [vmem:[#allocation19_spill] sm:$0xff] %v8903_v37 }
 0x291   : > { %v1822_v36 = vpop.f32.mrf.mxu3  ;;  %6215 = vrot.lane.b32.xlu2 %v6214_v4, %s6904_s14  ;;  %v6199_v46 = vpack.i.bf16 %v1914_v49, %v1913_v33  ;;  %v2040_v15 = vrot.slane %v1914_v49, 1  ;;  %v2047_v4 = vrot.slane %v1928_v48, 1  ;;  %v1942_v35 = vrot.slane %v1914_v49, 7 }
 0x292   : > { %v1823_v14 = vadd.f32 %v8704_v20, %v1822_v36 }
 0x293   : > { %v1787_v59 = vpop.f32.mrf.mxu0  ;;  %6200 = vrot.lane.b32.xlu1 %v6199_v46, %s6904_s14 }
 0x294   : > { %vm1865_vm14 = vcmp.ge.f32.partialorder %v1823_v14, 0.0  ;;  %v1897_v57 = vmul.f32 0.2, %v1823_v14  ;;  %v1788_v29 = vadd.f32 %v8704_v20, %v1787_v59 }
 0x296   : > { %v1929_v10 = vsel %vm1865_vm14, %v1823_v14, %v1897_v57  ;;  %vm1851_vm15 = vcmp.ge.f32.partialorder %v1788_v29, 0.0  ;;  %v1883_v56 = vmul.f32 0.2, %v1788_v29 }
 0x297   : > { %v1965_v24 = vrot.slane %v1929_v10, 7  ;;  %v8907_v28 = vpack.i.bf16 %v1929_v10, %v1928_v48  ;;  %v2063_v33 = vrot.slane %v1929_v10, 1 }
 0x298   : > { %v1915_v53 = vsel %vm1851_vm15, %v1788_v29, %v1883_v56 }
 0x299   : > { %11655 = vst [vmem:[#allocation7_spill] sm:$0xff] %v8907_v28  ;;  %v1958_v42 = vrot.slane %v1915_v53, 7  ;;  %v2056_v54 = vrot.slane %v1915_v53, 1  ;;  %v1825_v19 = vpop.f32.mrf.mxu3  ;;  %v8914_v50 = vsel %vm331_vm0, %v1965_v24, %v1949_v31  ;;  %v2095_v32 = vsel %vm444_vm1, %v2063_v33, %v2047_v4 }
 0x29a   : > { %v1826_v7 = vadd.f32 %v8704_v20, %v1825_v19  ;;  %v8932_v59 = vsel %vm331_vm0, %v1949_v31, %v1965_v24  ;;  %v2079_v30 = vsel %vm444_vm1, %v2047_v4, %v2063_v33 }
 0x29b   : > { %v1790_v41 = vpop.f32.mrf.mxu0  ;;  %6210 = vrot.lane.b32.xlu1 %v6209_v45, %s6904_s14  ;;  %v2088_v14 = vsel %vm444_vm1, %v2056_v54, %v2040_v15  ;;  %v8924_v51 = vsel %vm331_vm0, %v1942_v35, %v1958_v42  ;;  %v8928_v48 = vsel %vm331_vm0, %v1958_v42, %v1942_v35  ;;  %v2072_v19 = vsel %vm444_vm1, %v2040_v15, %v2056_v54 }
 0x29c   : > { %vm1866_vm12 = vcmp.ge.f32.partialorder %v1826_v7, 0.0  ;;  %v1898_v36 = vmul.f32 0.2, %v1826_v7  ;;  %v1791_v46 = vadd.f32 %v8704_v20, %v1790_v41  ;;  %v2112_v45 = vsel %vm293_vm2, 0.0, %v2088_v14 }
 0x29d   : > { %v2126_v42 = vsel %vm293_vm2, 0.0, %v2095_v32 }
 0x29e   : > { %v1930_v57 = vsel %vm1866_vm12, %v1826_v7, %v1898_v36  ;;  %vm1852_vm13 = vcmp.ge.f32.partialorder %v1791_v46, 0.0  ;;  %v1884_v29 = vmul.f32 0.2, %v1791_v46  ;;  %v8946_v7 = vpack.i.bf16 %v2112_v45, %v2072_v19 }
 0x29f   : > { %v6219_v56 = vpack.i.bf16 %v1930_v57, %v1929_v10  ;;  %v8944_v10 = vpack.i.bf16 %v1915_v53, %v1914_v49  ;;  %v8949_v15 = vpack.i.bf16 %v2126_v42, %v2079_v30  ;;  %v1950_v49 = vrot.slane %v1930_v57, 7 }
 0x2a0   : > { %v1916_v41 = vsel %vm1852_vm13, %v1791_v46, %v1884_v29 }
 0x2a1   : > { %v1827_v35 = vpop.f32.mrf.mxu3  ;;  %6220 = vrot.lane.b32.xlu0 %v6219_v56, %s6904_s14  ;;  %v6229_v24 = vpack.i.bf16 %v1916_v41, %v1915_v53  ;;  %11656 = vst [vmem:[#allocation33_spill] sm:$0xff] %v8944_v10  ;;  %v2048_v53 = vrot.slane %v1930_v57, 1  ;;  %v1943_v19 = vrot.slane %v1916_v41, 7  ;;  %v2041_v45 = vrot.slane %v1916_v41, 1 }
 0x2a2   : > { %v1828_v31 = vadd.f32 %v8704_v20, %v1827_v35  ;;  %11657 = vst [vmem:[#allocation34_spill] sm:$0xff] %v8949_v15 }
 0x2a3   : > { %v1792_v54 = vpop.f32.mrf.mxu0  ;;  %6230 = vrot.lane.b32.xlu2 %v6229_v24, %s6904_s14 }
 0x2a4   : > { %vm1867_vm14 = vcmp.ge.f32.partialorder %v1828_v31, 0.0  ;;  %v1899_v33 = vmul.f32 0.2, %v1828_v31  ;;  %v1793_v4 = vadd.f32 %v8704_v20, %v1792_v54 }
 0x2a6   : > { %v1931_v36 = vsel %vm1867_vm14, %v1828_v31, %v1899_v33  ;;  %vm1853_vm15 = vcmp.ge.f32.partialorder %v1793_v4, 0.0  ;;  %v1885_v46 = vmul.f32 0.2, %v1793_v4 }
 0x2a7   : > { %v1966_v14 = vrot.slane %v1931_v36, 7  ;;  %v2064_v32 = vrot.slane %v1931_v36, 1  ;;  %v8952_v29 = vpack.i.bf16 %v1931_v36, %v1930_v57 }
 0x2a8   : > { %v1917_v56 = vsel %vm1853_vm15, %v1793_v4, %v1885_v46 }
 0x2a9   : > { %11658 = vst [vmem:[#allocation9_spill] sm:$0xff] %v8952_v29  ;;  %v1959_v35 = vrot.slane %v1917_v56, 7  ;;  %v2057_v24 = vrot.slane %v1917_v56, 1  ;;  %v1830_v30 = vpop.f32.mrf.mxu3  ;;  %v8957_v54 = vsel %vm331_vm0, %v1950_v49, %v1966_v14  ;;  %v8961_v31 = vsel %vm331_vm0, %v1966_v14, %v1950_v49 }
 0x2aa   : > { %v1831_v42 = vadd.f32 %v8704_v20, %v1830_v30  ;;  %v2096_v4 = vsel %vm444_vm1, %v2064_v32, %v2048_v53  ;;  %v2080_v28 = vsel %vm444_vm1, %v2048_v53, %v2064_v32  ;;  %v8982_v55 = vpack.i.bf16 %v1917_v56, %v1916_v41 }
 0x2ab   : > { %v1795_v33 = vpop.f32.mrf.mxu0  ;;  %v2089_v57 = vsel %vm444_vm1, %v2057_v24, %v2041_v45  ;;  %v8969_v46 = vsel %vm331_vm0, %v1943_v19, %v1959_v35  ;;  %v2073_v14 = vsel %vm444_vm1, %v2041_v45, %v2057_v24  ;;  %v8980_v29 = vsel %vm331_vm0, %v1959_v35, %v1943_v19 }
 0x2ac   : > { %vm1868_vm12 = vcmp.ge.f32.partialorder %v1831_v42, 0.0  ;;  %v1900_v30 = vmul.f32 0.2, %v1831_v42  ;;  %v1796_v40 = vadd.f32 %v8704_v20, %v1795_v33  ;;  %v2114_v49 = vsel %vm293_vm2, 0.0, %v2089_v57  ;;  %11659 = vst [vmem:[#allocation15_spill] sm:$0xff] %v8982_v55 }
 0x2ad   : > { %v2128_v33 = vsel %vm293_vm2, 0.0, %v2096_v4  ;;  %v8988_v53 = vpack.i.bf16 %v2114_v49, %v2073_v14 }
 0x2ae   : > { %v1932_v38 = vsel %vm1868_vm12, %v1831_v42, %v1900_v30  ;;  %vm1854_vm13 = vcmp.ge.f32.partialorder %v1796_v40, 0.0  ;;  %v1886_v10 = vmul.f32 0.2, %v1796_v40  ;;  %v8992_v19 = vpack.i.bf16 %v2128_v33, %v2080_v28 }
 0x2af   : > { %v6224_v9 = vpack.i.bf16 %v1932_v38, %v1931_v36  ;;  %v1951_v28 = vrot.slane %v1932_v38, 7 }
 0x2b0   : > { %v8986_v32 = vsel %vm1854_vm13, %v1796_v40, %v1886_v10  ;;  %11660 = vst [vmem:[#allocation26_spill] sm:$0xff] %v8992_v19 }
 0x2b1   : > { %v1832_v45 = vpop.f32.mrf.mxu3  ;;  %6225 = vrot.lane.b32.xlu1 %v6224_v9, %s6904_s14  ;;  %v6234_v24 = vpack.i.bf16 %v8986_v32, %v1917_v56  ;;  %v2049_v56 = vrot.slane %v1932_v38, 1  ;;  %v2042_v33 = vrot.slane %v8986_v32, 1 }
 0x2b2   : > { %v1833_v41 = vadd.f32 %v8704_v20, %v1832_v45 }
 0x2b3   : > { %v1797_v35 = vpop.f32.mrf.mxu0  ;;  %6235 = vrot.lane.b32.xlu0 %v6234_v24, %s6904_s14 }
 0x2b4   : > { %vm1869_vm14 = vcmp.ge.f32.partialorder %v1833_v41, 0.0  ;;  %v1901_v42 = vmul.f32 0.2, %v1833_v41  ;;  %v1798_v36 = vadd.f32 %v8704_v20, %v1797_v35  ;;  %v11662_v35 = vmov 0.0  }
 0x2b6   : > { %v1933_v40 = vsel %vm1869_vm14, %v1833_v41, %v1901_v42  ;;  %vm1855_vm15 = vcmp.ge.f32.partialorder %v1798_v36, 0.0  ;;  %v1887_v10 = vmul.f32 0.2, %v1798_v36 }
 0x2b7   : > { %v1967_v57 = vrot.slane %v1933_v40, 7  ;;  %v2065_v4 = vrot.slane %v1933_v40, 1  ;;  %2224 = vrot.lane.b32.xlu2 %v1933_v40, %s6904_s14  ;;  %v8998_v9 = vpack.i.bf16 %v1933_v40, %v1932_v38 }
 0x2b8   : > { %v9000_v30 = vsel %vm1855_vm15, %v1798_v36, %v1887_v10 }
 0x2b9   : > { %11661 = vst [vmem:[#allocation25_spill] sm:$0xff] %v8998_v9  ;;  %v2058_v14 = vrot.slane %v9000_v30, 1  ;;  %v1835_v49 = vpop.f32.mrf.mxu3  ;;  %6245 = vrot.lane.b32.xlu1 %v8741_v43, %s6905_s15  ;;  %v2097_v45 = vsel %vm444_vm1, %v2065_v4, %v2049_v56  ;;  %v9010_v24 = vsel %vm331_vm0, %v1951_v28, %v1967_v57  ;;  %v9014_v38 = vsel %vm331_vm0, %v1967_v57, %v1951_v28 }
 0x2ba   : > { %v1836_v40 = vadd.f32 %v8704_v20, %v1835_v49  ;;  %v2081_v10 = vsel %vm444_vm1, %v2049_v56, %v2065_v4  ;;  %v2130_v43 = vsel %vm293_vm2, 0.0, %v2097_v45  ;;  %v9028_v57 = vpack.i.bf16 %v9000_v30, %v8986_v32 }
 0x2bb   : > { %v1800_v41 = vpop.f32.mrf.mxu0  ;;  %6240 = vrot.lane.b32.xlu0 %v11662_v35, %s6905_s15  ;;  %v2090_v36 = vsel %vm444_vm1, %v2058_v14, %v2042_v33  ;;  %v2074_v28 = vsel %vm444_vm1, %v2042_v33, %v2058_v14  ;;  %v9036_v35 = vpack.i.bf16 %v2130_v43, %v2081_v10 }
 0x2bc   : > { %v1801_v42 = vadd.f32 %v8704_v20, %v1800_v41  ;;  %11663 = vst [vmem:[#allocation16_spill] sm:$0xff] %v9028_v57  ;;  %v2116_v41 = vsel %vm293_vm2, 0.0, %v2090_v36  ;;  %vm1870_vm12 = vcmp.ge.f32.partialorder %v1836_v40, 0.0  ;;  %v1902_v4 = vmul.f32 0.2, %v1836_v40 }
 0x2bd   : > { %11664 = vst [vmem:[#allocation41_spill] sm:$0xff] %v9036_v35  ;;  %v9041_v9 = vpack.i.bf16 %v2116_v41, %v2074_v28 }
 0x2be   : > { %v1888_v49 = vmul.f32 0.2, %v1801_v42  ;;  %vm1856_vm13 = vcmp.ge.f32.partialorder %v1801_v42, 0.0  ;;  %v1934_v36 = vsel %vm1870_vm12, %v1836_v40, %v1902_v4 }
 0x2bf   : > { %6250 = vrot.lane.b32.xlu2 %v8763_v12, %s6905_s15  ;;  %11665 = vst [vmem:[#allocation42_spill] sm:$0xff] %v9041_v9  ;;  %v1952_v41 = vrot.slane %v1934_v36, 7 }
 0x2c0   : > { %v9045_v14 = vsel %vm1856_vm13, %v1801_v42, %v1888_v49  ;;  %vm4360_vm13 = vcmask 25600  }
 0x2c1   : > { %v1837_v56 = vpop.f32.mrf.mxu3  ;;  %6260 = vrot.lane.b32.xlu1 %v8852_v11, %s6905_s15  ;;  %v6274_v28 = vpack.i.bf16 %v9045_v14, %v9000_v30 }
 0x2c2   : > { %v1838_v45 = vadd.f32 %v8704_v20, %v1837_v56  ;;  %v2050_v56 = vrot.slane %v1934_v36, 1 }
 0x2c3   : > { %v1802_v12 = vpop.f32.mrf.mxu0  ;;  %6255 = vrot.lane.b32.xlu0 %v8793_v23, %s6905_s15  ;;  %v2043_v23 = vrot.slane %v9045_v14, 1 }
 0x2c4   : > { %vm1871_vm14 = vcmp.ge.f32.partialorder %v1838_v45, 0.0  ;;  %v1903_v43 = vmul.f32 0.2, %v1838_v45  ;;  %v1803_v33 = vadd.f32 %v8704_v20, %v1802_v12 }
 0x2c6   : > { %v1935_v10 = vsel %vm1871_vm14, %v1838_v45, %v1903_v43  ;;  %vm1857_vm15 = vcmp.ge.f32.partialorder %v1803_v33, 0.0  ;;  %v1889_v55 = vmul.f32 0.2, %v1803_v33 }
 0x2c7   : > { %v1968_v57 = vrot.slane %v1935_v10, 7  ;;  %v2066_v11 = vrot.slane %v1935_v10, 1  ;;  %6265 = vrot.lane.b32.xlu2 %v8899_v25, %s6905_s15  ;;  %v9052_v49 = vpack.i.bf16 %v1935_v10, %v1934_v36 }
 0x2c8   : > { %v1921_v42 = vsel %vm1857_vm15, %v1803_v33, %v1889_v55 }
 0x2c9   : > { %v2059_v20 = vrot.slane %v1921_v42, 1  ;;  %6275 = vrot.lane.b32.xlu1 %v6274_v28, %s6904_s14  ;;  %v1984_v12 = vsel %vm331_vm0, %v1952_v41, %v1968_v57  ;;  %v2000_v40 = vsel %vm331_vm0, %v1968_v57, %v1952_v41  ;;  %v9061_v4 = vpack.i.bf16 %v1921_v42, %v9045_v14 }
 0x2ca   : > { %v2082_v45 = vsel %vm444_vm1, %v2050_v56, %v2066_v11  ;;  %v2033_v57 = vsel %vm290_vm3, 0.0, %v2000_v40  ;;  %v2098_v36 = vsel %vm444_vm1, %v2066_v11, %v2050_v56  ;;  %v6289_v11 = vpack.i.bf16 %v8771_v39, %v1921_v42 }
 0x2cb   : > { %11666 = vst [vmem:[#allocation57_spill] sm:$0xff] %v9061_v4  ;;  %6270 = vrot.lane.b32.xlu0 %v8946_v7, %s6905_s15  ;;  %v2091_v55 = vsel %vm444_vm1, %v2059_v20, %v2043_v23  ;;  %v2075_v43 = vsel %vm444_vm1, %v2043_v23, %v2059_v20  ;;  %v9077_v10 = vpack.i.bf16 %v1984_v12, %v2033_v57  ;;  %v2132_v28 = vsel %vm293_vm2, 0.0, %v2098_v36 }
 0x2cc   : > { %v2118_v33 = vsel %vm293_vm2, 0.0, %v2091_v55  ;;  %v9083_v41 = vpack.i.bf16 %v2132_v28, %v2082_v45  ;;  %v9111_v56 = vsel %vm290_vm3, 0.0, %v8786_v60  ;;  %v6329_v20 = vpack.i.bf16 %v8736_v34, %v9106_v1 }
 0x2cd   : > { %11667 = vst [vmem:[#allocation52_spill] sm:$0xff] %v9077_v10  ;;  %v9085_v23 = vpack.i.bf16 %v2118_v33, %v2075_v43  ;;  %v9120_v12 = vpack.i.bf16 %v8782_v18, %v9111_v56  ;;  %v9132_v60 = vsel %vm290_vm3, 0.0, %v8836_v0  ;;  %v9136_v40 = vpack.i.bf16 %v8758_v13, %v9125_v6  ;;  %v9149_v43 = vpop.permute.xlu2 %6175 }
 0x2ce   : > { %11668 = vst [vmem:[#allocation62_spill] sm:$0xff] %v9083_v41  ;;  %v9141_v45 = vsel %vm290_vm3, 0.0, %v8928_v48  ;;  %v1961_v55 = vrot.slane %v1921_v42, 7  ;;  %v9147_v27 = vpack.i.bf16 %v8848_v58, %v9132_v60  ;;  %v1945_v0 = vrot.slane %v9045_v14, 7 }
 0x2cf   : > { %6285 = vrot.lane.b32.xlu2 %v9041_v9, %s6905_s15  ;;  %11669 = vst [vmem:[#allocation65_spill] sm:$0xff] %v9085_v23  ;;  %v9156_v33 = vpack.i.bf16 %v8924_v51, %v9141_v45  ;;  %v9161_v48 = vsel %vm290_vm3, 0.0, %v8880_v3  ;;  %v1960_v42 = vrot.slane %v9000_v30, 7  ;;  %v9171_v57 = vsel %vm290_vm3, 0.0, %v8980_v29 }
 0x2d0   : > { %11670 = vst [vmem:[#allocation45_spill] sm:$0xff] %v9147_v27  ;;  %v1993_v14 = vsel %vm331_vm0, %v1961_v55, %v1945_v0  ;;  %v1962_v36 = vrot.slane %v8769_v21, 7  ;;  %v1944_v28 = vrot.slane %v8986_v32, 7  ;;  %v9177_v3 = vpack.i.bf16 %v8891_v52, %v9161_v48 }
 0x2d1   : > { %6280 = vrot.lane.b32.xlu1 %v8988_v53, %s6905_s15  ;;  %11671 = vst [vmem:[#allocation44_spill] sm:$0xff] %v9156_v33  ;;  %v9181_v30 = vsel %vm331_vm0, %v1945_v0, %v1961_v55  ;;  %v9192_v29 = vpack.i.bf16 %v8969_v46, %v9171_v57  ;;  %vm11735_vm2 = vcmask 293888  }
 0x2d2   : > { %11672 = vst [vmem:[#allocation98_spill] sm:$0xff] %v9177_v3  ;;  %v1992_v32 = vsel %vm331_vm0, %v1960_v42, %v1944_v28  ;;  %vm11746_vm14 = vmmov %vm11735_vm2 }
 0x2d3   : > { %6295 = vrot.lane.b32.xlu0 %v9085_v23, %s6905_s15  ;;  %11673 = vst [vmem:[#allocation47_spill] sm:$0xff] %v9192_v29  ;;  %v9212_v41 = vsel %vm290_vm3, 0.0, %v1992_v32  ;;  %v9252_v32 = vpop.permute.xlu0 %6180 }
 0x2d5   : > { %v9196_v23 = vpop.permute.xlu2 %6190 }
 0x2d7   : > { %6290 = vrot.lane.b32.xlu2 %v6289_v11, %s6904_s14  ;;  %v9185_v11 = vsel %vm290_vm3, 0.0, %v1993_v14  ;;  %v9208_v14 = vsel %vm331_vm0, %v1944_v28, %v1960_v42  ;;  %v9231_v42 = vsel %vm290_vm3, 0.0, %v8873_v26  ;;  %v9250_v26 = vsel %vm290_vm3, 0.0, %v8826_v2 }
 0x2d8   : > { %v9202_v55 = vpack.i.bf16 %v9181_v30, %v9185_v11 }
 0x2d9   : > { %6300 = vrot.lane.b32.xlu1 %v8802_v63, %s6905_s15 }
 0x2da   : > { %11674 = vst [vmem:[#allocation14_spill] sm:$0xff] %v9202_v55 }
 0x2db   : > { %6310 = vrot.lane.b32.xlu0 %v8903_v37, %s6905_s15 }
 0x2df   : > { %6305 = vrot.lane.b32.xlu2 %v8838_v8, %s6905_s15 }
 0x2e1   : > { %6315 = vrot.lane.b32.xlu1 %v8949_v15, %s6905_s15 }
 0x2e3   : > { %6325 = vrot.lane.b32.xlu0 %v9036_v35, %s6905_s15 }
 0x2e7   : > { %6320 = vrot.lane.b32.xlu2 %v8992_v19, %s6905_s15 }
 0x2e9   : > { %6330 = vrot.lane.b32.xlu1 %v6329_v20, %s6906_s16  ;;  %v1946_v20 = vrot.slane %v8771_v39, 7 }
 0x2eb   : > { %6340 = vrot.lane.b32.xlu0 %v9120_v12, %s6906_s16  ;;  %v1994_v0 = vsel %vm331_vm0, %v1962_v36, %v1946_v20  ;;  %v9218_v9 = vsel %vm331_vm0, %v1946_v20, %v1962_v36  ;;  %v9239_v28 = vpop.permute.xlu2 %6215  ;;  %v9245_v20 = vpack.i.bf16 %v8869_v44, %v9231_v42  ;;  %vm11732_vm0 = vcmask 261120  }
 0x2ec   : > { %v9222_v35 = vsel %vm290_vm3, 0.0, %v1994_v0  ;;  %v9259_v0 = vsel %vm290_vm3, 0.0, %v8914_v50  ;;  %vm11733_vm1 = vmmov %vm11732_vm0 }
 0x2ed   : > { %v9237_v36 = vpack.i.bf16 %v9218_v9, %v9222_v35  ;;  %11677 = vst [vmem:[#allocation70_spill] sm:$0xff] %v9245_v20  ;;  %v9274_v2 = vpack.i.bf16 %v8932_v59, %v9259_v0  ;;  %vm11744_vm12 = vmmov %vm11732_vm0 }
 0x2ee   : > { %vm11747_vm15 = vmmov %vm11732_vm0 }
 0x2ef   : > { %6335 = vrot.lane.b32.xlu2 %v9136_v40, %s6906_s16  ;;  %11676 = vst [vmem:[#allocation56_spill] sm:$0xff] %v9237_v36 }
 0x2f0   : > { %11679 = vst [vmem:[#allocation51_spill] sm:$0xff] %v9274_v2 }
 0x2f1   : > { %6345 = vrot.lane.b32.xlu1 %v9147_v27, %s6906_s16 }
 0x2f3   : > { %6355 = vrot.lane.b32.xlu0 %v9156_v33, %s6906_s16 }
 0x2f5   : > { %v9291_v33 = vpop.permute.xlu0 %6195 }
 0x2f7   : > { %6350 = vrot.lane.b32.xlu2 %v9177_v3, %s6906_s16 }
 0x2f9   : > { %6360 = vrot.lane.b32.xlu1 %v9192_v29, %s6906_s16  ;;  %v9226_v29 = vpack.i.bf16 %v9208_v14, %v9212_v41 }
 0x2fb   : > { %6370 = vrot.lane.b32.xlu0 %v9202_v55, %s6906_s16  ;;  %11675 = vst [vmem:[#allocation67_spill] sm:$0xff] %v9226_v29  ;;  %v9268_v55 = vsel %vm290_vm3, 0.0, %v9014_v38  ;;  %v9289_v38 = vsel %vm290_vm3, 0.0, %v8961_v31  ;;  %v6183_v31 = vunpack.i.h.bf16 %v9252_v32  ;;  %vm11737_vm3 = vmmov %vm11732_vm0 }
 0x2fc   : > { %v9284_v19 = vpack.i.bf16 %v9010_v24, %v9268_v55  ;;  %v9297_v15 = vpack.i.bf16 %v8957_v54, %v9289_v38 }
 0x2fd   : > { %v9278_v50 = vpop.permute.xlu2 %6230  ;;  %v9309_v16 = vpop.permute.xlu0 %6205  ;;  %v3000_v27 = vsel %vm1395_vm5, %v9125_v6, %v6183_v31  ;;  %v11685_v31 = vld [vmem:[#allocation58_spill] sm:$0xff] }
 0x2fe   : > { %11680 = vst [vmem:[#allocation81_spill] sm:$0xff] %v9284_v19 }
 0x2ff   : > { %6365 = vrot.lane.b32.xlu2 %v9226_v29, %s6906_s16  ;;  %v9276_v29 = vpop.permute.xlu1 %6185  ;;  %11681 = vst [vmem:[#allocation29_spill] sm:$0xff] %v9297_v15 }
 0x301   : > { %6375 = vrot.lane.b32.xlu1 %v9237_v36, %s6906_s16  ;;  %v9263_v36 = vpack.i.bf16 %v8830_v17, %v9250_v26 }
 0x303   : > { %6385 = vrot.lane.b32.xlu0 %v9245_v20, %s6906_s16  ;;  %11678 = vst [vmem:[#allocation61_spill] sm:$0xff] %v9263_v36 }
 0x307   : > { %6380 = vrot.lane.b32.xlu2 %v9263_v36, %s6906_s16 }
 0x309   : > { %6390 = vrot.lane.b32.xlu1 %v9274_v2, %s6906_s16  ;;  %v9301_v2 = vpop.permute.xlu1 %6200 }
 0x30a   : > { %v6202_v6 = vunpack.i.l.bf16 %v9301_v2 }
 0x30b   : > { %6400 = vrot.lane.b32.xlu0 %v9284_v19, %s6906_s16  ;;  %v6187_v19 = vunpack.i.l.bf16 %v9276_v29 }
 0x30d   : > { %v3001_v8 = vsel %vm1395_vm5, %v8758_v13, %v6187_v19  ;;  %v11686_v19 = vld [vmem:[#allocation33_spill] sm:$0xff] }
 0x30f   : > { %6395 = vrot.lane.b32.xlu2 %v9297_v15, %s6906_s16  ;;  %v11682_v15 = vpack.i.bf16 %v8719_v22, %v8712_v47 }
 0x311   : > { %v9303_v37 = vpop.permute.xlu2 %2224  ;;  %6405 = vrot.lane.b32.xlu1 %v9077_v10, %s6906_s16  ;;  %v9323_v36 = vpop.permute.xlu1 %6210  ;;  %s6860_s16 = scalar_lea.hbm %s11229_s6, 128 }
 0x313   : > { %6415 = vrot.lane.b32.xlu0 %v8746_v5, %s6907_s17 }
 0x317   : > { %6410 = vrot.lane.b32.xlu2 %v11682_v15, %s6907_s17  ;;  %v9333_v15 = vpop.permute.xlu0 %6220 }
 0x319   : > { %v6251_v3 = vpop.permute.xlu2 %6250  ;;  %6420 = vrot.lane.b32.xlu1 %v8799_v62, %s6907_s17 }
 0x31a   : > { %v6253_v20 = vunpack.i.h.bf16 %v6251_v3  ;;  %v6252_v10 = vunpack.i.l.bf16 %v6251_v3  ;;  %v6198_v3 = vunpack.i.h.bf16 %v9291_v33 }
 0x31b   : > { %6430 = vrot.lane.b32.xlu0 %v8897_v61, %s6907_s17 }
 0x31c   : > { %v9328_v47 = vsel %vm1428_vm7, %v3001_v8, %v6253_v20  ;;  %v9331_v22 = vsel %vm1428_vm7, %v3000_v27, %v6252_v10  ;;  %v3006_v8 = vsel %vm1395_vm5, %v9161_v48, %v6198_v3  ;;  %v3007_v10 = vsel %vm1395_vm5, %v8891_v52, %v6202_v6  ;;  %v11687_v20 = vld [vmem:[#allocation16_spill] sm:$0xff]  ;;  %v11690_v48 = vld [vmem:[#allocation15_spill] sm:$0xff] }
 0x31d   : > { %11683 = vst [vmem:[#allocation87_spill] sm:$0xff] %v9328_v47  ;;  %v6178_v52 = vunpack.i.h.bf16 %v9149_v43  ;;  %v6182_v3 = vunpack.i.l.bf16 %v9252_v32 }
 0x31e   : > { %11684 = vst [vmem:[#allocation93_spill] sm:$0xff] %v9331_v22 }
 0x31f   : > { %6425 = vrot.lane.b32.xlu2 %v11685_v31, %s6907_s17 }
 0x321   : > { %v6266_v13 = vpop.permute.xlu2 %6265  ;;  %6435 = vrot.lane.b32.xlu1 %v11686_v19, %s6907_s17 }
 0x322   : > { %v6268_v61 = vunpack.i.h.bf16 %v6266_v13  ;;  %v6267_v63 = vunpack.i.l.bf16 %v6266_v13 }
 0x323   : > { %v9345_v27 = vpop.permute.xlu1 %6225  ;;  %6445 = vrot.lane.b32.xlu0 %v11687_v20, %s6907_s17 }
 0x324   : > { %v9350_v47 = vsel %vm1428_vm7, %v3007_v10, %v6268_v61  ;;  %v9353_v31 = vsel %vm1428_vm7, %v3006_v8, %v6267_v63  ;;  %v6177_v63 = vunpack.i.l.bf16 %v9149_v43  ;;  %v11691_v10 = vld [vmem:[#allocation53_spill] sm:$0xff]  ;;  %v6454_v43 = vpack.i.bf16 %v8769_v21, %v8771_v39 }
 0x325   : > { %11688 = vst [vmem:[#allocation12_spill] sm:$0xff] %v9350_v47  ;;  %v9355_v19 = vpop.permute.xlu0 %6235 }
 0x326   : > { %11689 = vst [vmem:[#allocation72_spill] sm:$0xff] %v9353_v31  ;;  %v6238_v13 = vunpack.i.h.bf16 %v9355_v19  ;;  %v2998_v31 = vsel %vm1395_vm5, %v9106_v1, %v6178_v52  ;;  %v6193_v52 = vunpack.i.h.bf16 %v9196_v23 }
 0x327   : > { %6440 = vrot.lane.b32.xlu2 %v11690_v48, %s6907_s17 }
 0x328   : > { %v3012_v8 = vsel %vm1395_vm5, %v9212_v41, %v6238_v13 }
 0x329   : > { %v9362_v6 = vpop.permute.xlu2 %6285  ;;  %6450 = vrot.lane.b32.xlu1 %v9061_v4, %s6907_s17  ;;  %v2999_v4 = vsel %vm1395_vm5, %v8736_v34, %v6182_v3  ;;  %v6188_v3 = vunpack.i.h.bf16 %v9276_v29 }
 0x32a   : > { %v6287_v61 = vunpack.i.l.bf16 %v9362_v6 }
 0x32b   : > { %6460 = vrot.lane.b32.xlu0 %v11691_v10, %s6907_s17  ;;  %v6246_v20 = vpop.permute.xlu1 %6245 }
 0x32c   : > { %v9373_v48 = vsel %vm1428_vm7, %v3012_v8, %v6287_v61  ;;  %v6248_v32 = vunpack.i.h.bf16 %v6246_v20  ;;  %v6247_v47 = vunpack.i.l.bf16 %v6246_v20  ;;  %v2996_v20 = vsel %vm1395_vm5, 0.0, %v6177_v63  ;;  %v11693_v63 = vld [vmem:[#allocation9_spill] sm:$0xff] }
 0x32d   : > { %v6241_v22 = vpop.permute.xlu0 %6240 }
 0x32e   : > { %v9382_v41 = vsel %vm1428_vm7, %v2998_v31, %v6247_v47  ;;  %v9385_v13 = vsel %vm1428_vm7, %v2999_v4, %v6248_v32  ;;  %v6243_v61 = vunpack.i.h.bf16 %v6241_v22  ;;  %v6242_v8 = vunpack.i.l.bf16 %v6241_v22  ;;  %v11692_v4 = vld [vmem:[#allocation37_spill] sm:$0xff] }
 0x32f   : > { %6455 = vrot.lane.b32.xlu2 %v6454_v43, %s6907_s17  ;;  %v6197_v47 = vunpack.i.l.bf16 %v9291_v33  ;;  %v6192_v22 = vunpack.i.l.bf16 %v9196_v23 }
 0x330   : > { %v9390_v1 = vsel %vm1428_vm7, %v2996_v20, %v6242_v8  ;;  %v9393_v34 = vsel %vm1428_vm7, %v2996_v20, %v6243_v61  ;;  %v3004_v8 = vsel %vm1395_vm5, %v9132_v60, %v6193_v52  ;;  %v6208_v60 = vunpack.i.h.bf16 %v9309_v16 }
 0x331   : > { %v9397_v31 = vpop.permute.xlu2 %6290  ;;  %6465 = vrot.lane.b32.xlu1 %v11692_v4, %s6907_s17  ;;  %v3005_v33 = vsel %vm1395_vm5, %v8848_v58, %v6197_v47  ;;  %v6212_v52 = vunpack.i.l.bf16 %v9323_v36  ;;  %v11694_v58 = vld [vmem:[#allocation7_spill] sm:$0xff] }
 0x333   : > { %6475 = vrot.lane.b32.xlu0 %v11693_v63, %s6907_s17  ;;  %v6261_v32 = vpop.permute.xlu1 %6260  ;;  %v3003_v63 = vsel %vm1395_vm5, %v8782_v18, %v6192_v22  ;;  %v6232_v18 = vunpack.i.l.bf16 %v9278_v50 }
 0x334   : > { %v6263_v43 = vunpack.i.h.bf16 %v6261_v32  ;;  %v6262_v61 = vunpack.i.l.bf16 %v6261_v32  ;;  %v3002_v32 = vsel %vm1395_vm5, %v9111_v56, %v6188_v3  ;;  %v3018_v3 = vsel %vm1395_vm5, %v9250_v26, %v6208_v60 }
 0x335   : > { %v6256_v20 = vpop.permute.xlu0 %6255  ;;  %v3009_v26 = vsel %vm1395_vm5, %v8924_v51, %v6232_v18  ;;  %v11697_v18 = vld [vmem:[#allocation22_spill] sm:$0xff] }
 0x336   : > { %v9410_v21 = vsel %vm1428_vm7, %v3005_v33, %v6263_v43  ;;  %v9413_v23 = vsel %vm1428_vm7, %v3004_v8, %v6262_v61  ;;  %v6258_v29 = vunpack.i.h.bf16 %v6256_v20  ;;  %v6257_v39 = vunpack.i.l.bf16 %v6256_v20  ;;  %v11695_v8 = vld [vmem:[#allocation25_spill] sm:$0xff] }
 0x337   : > { %6470 = vrot.lane.b32.xlu2 %v11694_v58, %s6907_s17  ;;  %v6203_v33 = vunpack.i.h.bf16 %v9301_v2  ;;  %v11696_v20 = vld [vmem:[#allocation21_spill] sm:$0xff] }
 0x338   : > { %v9424_v47 = vsel %vm1428_vm7, %v3002_v32, %v6257_v39  ;;  %v9427_v43 = vsel %vm1428_vm7, %v3003_v63, %v6258_v29  ;;  %v3019_v39 = vsel %vm1395_vm5, %v8830_v17, %v6212_v52 }
 0x339   : > { %v6306_v61 = vpop.permute.xlu2 %6305  ;;  %6480 = vrot.lane.b32.xlu1 %v11695_v8, %s6907_s17  ;;  %v3008_v52 = vsel %vm1395_vm5, %v9141_v45, %v6203_v33  ;;  %v6237_v45 = vunpack.i.l.bf16 %v9355_v19 }
 0x33a   : > { %v6308_v56 = vunpack.i.h.bf16 %v6306_v61  ;;  %v6307_v22 = vunpack.i.l.bf16 %v6306_v61  ;;  %v6288_v61 = vunpack.i.h.bf16 %v9362_v6 }
 0x33b   : > { %6490 = vrot.lane.b32.xlu0 %v11696_v20, %s6908_s18  ;;  %v6276_v63 = vpop.permute.xlu1 %6275 }
 0x33c   : > { %v9440_v29 = vsel %vm1428_vm7, %v3019_v39, %v6308_v56  ;;  %v9443_v32 = vsel %vm1428_vm7, %v3018_v3, %v6307_v22  ;;  %v6277_v8 = vunpack.i.l.bf16 %v6276_v63  ;;  %v6223_v56 = vunpack.i.h.bf16 %v9333_v15 }
 0x33d   : > { %v6271_v58 = vpop.permute.xlu0 %6270  ;;  %v6227_v22 = vunpack.i.l.bf16 %v9345_v27 }
 0x33e   : > { %v3013_v17 = vsel %vm1395_vm5, %v9208_v14, %v6277_v8  ;;  %v6273_v2 = vunpack.i.h.bf16 %v6271_v58  ;;  %v6272_v60 = vunpack.i.l.bf16 %v6271_v58  ;;  %v6233_v58 = vunpack.i.h.bf16 %v9278_v50 }
 0x33f   : > { %6485 = vrot.lane.b32.xlu2 %v9052_v49, %s6907_s17  ;;  %v9457_v6 = vsel %vm1428_vm7, %v3013_v17, %v6288_v61  ;;  %v3024_v39 = vsel %vm1395_vm5, %v9289_v38, %v6223_v56  ;;  %v3025_v20 = vsel %vm1395_vm5, %v8957_v54, %v6227_v22  ;;  %v6292_v61 = vunpack.i.l.bf16 %v9397_v31  ;;  %v11698_v17 = vld [vmem:[#allocation64_spill] sm:$0xff] }
 0x340   : > { %v9460_v51 = vsel %vm1428_vm7, %v3008_v52, %v6272_v60  ;;  %v9463_v14 = vsel %vm1428_vm7, %v3009_v26, %v6273_v2  ;;  %v6278_v26 = vunpack.i.h.bf16 %v6276_v63  ;;  %v3010_v38 = vsel %vm1395_vm5, %v9171_v57, %v6233_v58  ;;  %v11699_v57 = vld [vmem:[#allocation23_spill] sm:$0xff] }
 0x341   : > { %v6321_v8 = vpop.permute.xlu2 %6320  ;;  %6495 = vrot.lane.b32.xlu1 %v11697_v18, %s6908_s18  ;;  %v3011_v54 = vsel %vm1395_vm5, %v8969_v46, %v6237_v45  ;;  %v6207_v45 = vunpack.i.l.bf16 %v9309_v16 }
 0x342   : > { %v6323_v3 = vunpack.i.h.bf16 %v6321_v8  ;;  %v6322_v33 = vunpack.i.l.bf16 %v6321_v8 }
 0x343   : > { %6505 = vrot.lane.b32.xlu0 %v11698_v17, %s6908_s18  ;;  %v6281_v50 = vpop.permute.xlu1 %6280 }
 0x344   : > { %v9477_v19 = vsel %vm1428_vm7, %v3025_v20, %v6323_v3  ;;  %v9480_v2 = vsel %vm1428_vm7, %v3024_v39, %v6322_v33  ;;  %v6283_v60 = vunpack.i.h.bf16 %v6281_v50  ;;  %v6282_v52 = vunpack.i.l.bf16 %v6281_v50 }
 0x345   : > { %v6296_v56 = vpop.permute.xlu0 %6295  ;;  %v3015_v33 = vsel %vm1395_vm5, %v9181_v30, %v6292_v61  ;;  %v3014_v39 = vsel %vm1395_vm5, %v9185_v11, %v6278_v26  ;;  %v6293_v20 = vunpack.i.h.bf16 %v9397_v31  ;;  %v6217_v11 = vunpack.i.l.bf16 %v9239_v28 }
 0x346   : > { %v9487_v63 = vsel %vm1428_vm7, %v3011_v54, %v6283_v60  ;;  %v9490_v22 = vsel %vm1428_vm7, %v3010_v38, %v6282_v52  ;;  %v6298_v8 = vunpack.i.h.bf16 %v6296_v56  ;;  %v6297_v3 = vunpack.i.l.bf16 %v6296_v56 }
 0x347   : > { %6500 = vrot.lane.b32.xlu2 %v11699_v57, %s6908_s18  ;;  %v6213_v26 = vunpack.i.h.bf16 %v9323_v36  ;;  %v3017_v54 = vsel %vm1395_vm5, %v9218_v9, %v6207_v45  ;;  %v3016_v36 = vsel %vm1395_vm5, %v9222_v35, %v6293_v20  ;;  %v6218_v45 = vunpack.i.h.bf16 %v9239_v28 }
 0x348   : > { %v9499_v46 = vsel %vm1428_vm7, %v3014_v39, %v6297_v3  ;;  %v9502_v58 = vsel %vm1428_vm7, %v3015_v33, %v6298_v8  ;;  %v3021_v39 = vsel %vm1395_vm5, %v8869_v44, %v6217_v11  ;;  %v6222_v20 = vunpack.i.l.bf16 %v9333_v15 }
 0x349   : > { %v6336_v50 = vpop.permute.xlu2 %6335  ;;  %6510 = vrot.lane.b32.xlu1 %v8899_v25, %s6908_s18 }
 0x34a   : > { %v6338_v30 = vunpack.i.h.bf16 %v6336_v50  ;;  %v6337_v61 = vunpack.i.l.bf16 %v6336_v50 }
 0x34b   : > { %6520 = vrot.lane.b32.xlu0 %v8988_v53, %s6908_s18  ;;  %v6301_v60 = vpop.permute.xlu1 %6300 }
 0x34c   : > { %v9514_v52 = vsel %vm1461_vm6, %v9382_v41, %v6337_v61  ;;  %v9518_v16 = vsel %vm1461_vm6, %v9385_v13, %v6338_v30  ;;  %v6303_v31 = vunpack.i.h.bf16 %v6301_v60  ;;  %v6302_v38 = vunpack.i.l.bf16 %v6301_v60 }
 0x34d   : > { %v6311_v56 = vpop.permute.xlu0 %6310  ;;  %v3020_v13 = vsel %vm1395_vm5, %v9231_v42, %v6213_v26  ;;  %v6228_v42 = vunpack.i.h.bf16 %v9345_v27  ;;  %v3023_v27 = vsel %vm1395_vm5, %v8932_v59, %v6222_v20  ;;  %v11701_v20 = vld [vmem:[#allocation87_spill] sm:$0xff] }
 0x34e   : > { %v3049_v8 = vsel %vm1428_vm7, %v3017_v54, %v6303_v31  ;;  %v3048_v3 = vsel %vm1428_vm7, %v3016_v36, %v6302_v38  ;;  %v6313_v33 = vunpack.i.h.bf16 %v6311_v56  ;;  %v6312_v41 = vunpack.i.l.bf16 %v6311_v56 }
 0x34f   : > { %6515 = vrot.lane.b32.xlu2 %v8946_v7, %s6908_s18  ;;  %v3026_v54 = vsel %vm1395_vm5, %v9268_v55, %v6228_v42 }
 0x350   : > { %v9533_v9 = vsel %vm1428_vm7, %v3020_v13, %v6312_v41  ;;  %v9536_v35 = vsel %vm1428_vm7, %v3021_v39, %v6313_v33 }
 0x351   : > { %v6351_v50 = vpop.permute.xlu2 %6350  ;;  %6525 = vrot.lane.b32.xlu1 %v9136_v40, %s6909_s19  ;;  %v3022_v40 = vsel %vm1395_vm5, %v9259_v0, %v6218_v45 }
 0x352   : > { %v6353_v44 = vunpack.i.h.bf16 %v6351_v50  ;;  %v6352_v30 = vunpack.i.l.bf16 %v6351_v50 }
 0x353   : > { %6535 = vrot.lane.b32.xlu0 %v11697_v18, %s6911_s26  ;;  %v6316_v61 = vpop.permute.xlu1 %6315 }
 0x354   : > { %v9547_v11 = vsel %vm1461_vm6, %v9413_v23, %v6352_v30  ;;  %v9551_v28 = vsel %vm1461_vm6, %v9410_v21, %v6353_v44  ;;  %v6318_v15 = vunpack.i.h.bf16 %v6316_v61  ;;  %v6317_v26 = vunpack.i.l.bf16 %v6316_v61 }
 0x355   : > { %v6326_v60 = vpop.permute.xlu0 %6325  ;;  %v3027_v21 = vsel %vm1395_vm5, %v9010_v24, %v9303_v37 }
 0x356   : > { %v3055_v18 = vsel %vm1428_vm7, %v3023_v27, %v6318_v15  ;;  %v3054_v31 = vsel %vm1428_vm7, %v3022_v40, %v6317_v26  ;;  %v6328_v38 = vunpack.i.h.bf16 %v6326_v60  ;;  %v6327_v23 = vunpack.i.l.bf16 %v6326_v60 }
 0x357   : > { %6530 = vrot.lane.b32.xlu2 %v8746_v5, %s6910_s20 }
 0x358   : > { %v9567_v0 = vsel %vm1428_vm7, %v3026_v54, %v6327_v23  ;;  %v9570_v59 = vsel %vm1428_vm7, %v3027_v21, %v6328_v38  ;;  %v11704_v21 = vld [vmem:[#allocation72_spill] sm:$0xff] }
 0x359   : > { %v6366_v36 = vpop.permute.xlu2 %6365  ;;  %6540 = vrot.lane.b32.xlu1 %v9120_v12, %s6909_s19 }
 0x35a   : > { %v6368_v56 = vunpack.i.h.bf16 %v6366_v36  ;;  %v6367_v33 = vunpack.i.l.bf16 %v6366_v36 }
 0x35b   : > { %6550 = vrot.lane.b32.xlu0 %v11699_v57, %s6911_s26  ;;  %v6331_v37 = vpop.permute.xlu1 %6330 }
 0x35c   : > { %v9578_v24 = vsel %vm1461_vm6, %v9490_v22, %v6367_v33  ;;  %v9582_v5 = vsel %vm1461_vm6, %v9487_v63, %v6368_v56  ;;  %v6333_v55 = vunpack.i.h.bf16 %v6331_v37  ;;  %v6332_v41 = vunpack.i.l.bf16 %v6331_v37  ;;  %v11700_v22 = vld [vmem:[#allocation93_spill] sm:$0xff]  ;;  %v11706_v56 = vld [vmem:[#allocation10_spill] sm:$0xff] }
 0x35d   : > { %v6341_v39 = vpop.permute.xlu0 %6340 }
 0x35e   : > { %v9586_v12 = vsel %vm1461_vm6, %v9393_v34, %v6333_v55  ;;  %v9590_v13 = vsel %vm1461_vm6, %v9390_v1, %v6332_v41  ;;  %v6343_v57 = vunpack.i.h.bf16 %v6341_v39  ;;  %v6342_v45 = vunpack.i.l.bf16 %v6341_v39  ;;  %v11702_v34 = vld [vmem:[#allocation59_spill] sm:$0xff] }
 0x35f   : > { %6545 = vrot.lane.b32.xlu2 %v8799_v62, %s6910_s20 }
 0x360   : > { %v9596_v63 = vsel %vm1461_vm6, %v11700_v22, %v6342_v45  ;;  %v9600_v50 = vsel %vm1461_vm6, %v11701_v20, %v6343_v57 }
 0x361   : > { %v6381_v44 = vpop.permute.xlu2 %6380  ;;  %6555 = vrot.lane.b32.xlu1 %v11702_v34, %s6908_s18 }
 0x362   : > { %v6383_v30 = vunpack.i.h.bf16 %v6381_v44  ;;  %v6382_v1 = vunpack.i.l.bf16 %v6381_v44 }
 0x363   : > { %6565 = vrot.lane.b32.xlu0 %v11691_v10, %s6910_s20  ;;  %v6346_v42 = vpop.permute.xlu1 %6345  ;;  %v11703_v10 = vld [vmem:[#allocation61_spill] sm:$0xff] }
 0x364   : > { %v9607_v62 = vsel %vm1461_vm6, %v3048_v3, %v6382_v1  ;;  %v9610_v61 = vsel %vm1461_vm6, %v3049_v8, %v6383_v30  ;;  %v6348_v15 = vunpack.i.h.bf16 %v6346_v42  ;;  %v6347_v26 = vunpack.i.l.bf16 %v6346_v42  ;;  %v11705_v8 = vld [vmem:[#allocation12_spill] sm:$0xff]  ;;  %v11708_v1 = vld [vmem:[#allocation45_spill] sm:$0xff] }
 0x365   : > { %v6356_v40 = vpop.permute.xlu0 %6355 }
 0x366   : > { %v3067_v27 = vsel %vm1461_vm6, %v9427_v43, %v6348_v15  ;;  %v3066_v60 = vsel %vm1461_vm6, %v9424_v47, %v6347_v26  ;;  %v6358_v38 = vunpack.i.h.bf16 %v6356_v40  ;;  %v6357_v23 = vunpack.i.l.bf16 %v6356_v40  ;;  %v11707_v47 = vld [vmem:[#allocation58_spill] sm:$0xff] }
 0x367   : > { %6560 = vrot.lane.b32.xlu2 %v11703_v10, %s6909_s19 }
 0x368   : > { %v9620_v3 = vsel %vm1461_vm6, %v11704_v21, %v6357_v23  ;;  %v9624_v54 = vsel %vm1461_vm6, %v11705_v8, %v6358_v38  ;;  %v11710_v8 = vld [vmem:[#allocation98_spill] sm:$0xff] }
 0x369   : > { %v6396_v36 = vpop.permute.xlu2 %6395  ;;  %6570 = vrot.lane.b32.xlu1 %v11706_v56, %s6911_s26 }
 0x36a   : > { %v6398_v43 = vunpack.i.h.bf16 %v6396_v36  ;;  %v6397_v33 = vunpack.i.l.bf16 %v6396_v36 }
 0x36b   : > { %6580 = vrot.lane.b32.xlu0 %v11707_v47, %s6910_s20  ;;  %v6361_v37 = vpop.permute.xlu1 %6360 }
 0x36c   : > { %v9631_v55 = vsel %vm1461_vm6, %v3054_v31, %v6397_v33  ;;  %v9634_v41 = vsel %vm1461_vm6, %v3055_v18, %v6398_v43  ;;  %v6363_v39 = vunpack.i.h.bf16 %v6361_v37  ;;  %v6362_v57 = vunpack.i.l.bf16 %v6361_v37 }
 0x36d   : > { %v6371_v45 = vpop.permute.xlu0 %6370 }
 0x36e   : > { %v3073_v22 = vsel %vm1461_vm6, %v9463_v14, %v6363_v39  ;;  %v3072_v20 = vsel %vm1461_vm6, %v9460_v51, %v6362_v57  ;;  %v6373_v44 = vunpack.i.h.bf16 %v6371_v45  ;;  %v6372_v30 = vunpack.i.l.bf16 %v6371_v45  ;;  %v11709_v51 = vld [vmem:[#allocation70_spill] sm:$0xff]  ;;  %v11711_v57 = vld [vmem:[#allocation19_spill] sm:$0xff] }
 0x36f   : > { %6575 = vrot.lane.b32.xlu2 %v11708_v1, %s6909_s19 }
 0x370   : > { %v9644_v31 = vsel %vm1461_vm6, %v9373_v48, %v6372_v30  ;;  %v9648_v18 = vsel %vm1461_vm6, %v9457_v6, %v6373_v44  ;;  %v11712_v44 = vld [vmem:[#allocation38_spill] sm:$0xff] }
 0x371   : > { %v9650_v42 = vpop.permute.xlu2 %6410  ;;  %6585 = vrot.lane.b32.xlu1 %v11698_v17, %s6911_s26 }
 0x373   : > { %6595 = vrot.lane.b32.xlu0 %v11709_v51, %s6909_s19  ;;  %v6376_v14 = vpop.permute.xlu1 %6375 }
 0x374   : > { %v6378_v15 = vunpack.i.h.bf16 %v6376_v14  ;;  %v6377_v26 = vunpack.i.l.bf16 %v6376_v14 }
 0x375   : > { %v6386_v40 = vpop.permute.xlu0 %6385 }
 0x376   : > { %v9658_v48 = vsel %vm1461_vm6, %v9502_v58, %v6378_v15  ;;  %v9662_v6 = vsel %vm1461_vm6, %v9499_v46, %v6377_v26  ;;  %v6388_v38 = vunpack.i.h.bf16 %v6386_v40  ;;  %v6387_v23 = vunpack.i.l.bf16 %v6386_v40 }
 0x377   : > { %6590 = vrot.lane.b32.xlu2 %v11706_v56, %s6908_s18 }
 0x378   : > { %v9668_v17 = vsel %vm1461_vm6, %v9443_v32, %v6387_v23  ;;  %v9672_v10 = vsel %vm1461_vm6, %v9440_v29, %v6388_v38 }
 0x379   : > { %v6426_v21 = vpop.permute.xlu2 %6425  ;;  %6600 = vrot.lane.b32.xlu1 %v11692_v4, %s6910_s20 }
 0x37a   : > { %v6428_v58 = vunpack.i.h.bf16 %v6426_v21  ;;  %v6427_v46 = vunpack.i.l.bf16 %v6426_v21 }
 0x37b   : > { %6610 = vrot.lane.b32.xlu0 %v11710_v8, %s6909_s19  ;;  %v6391_v36 = vpop.permute.xlu1 %6390 }
 0x37c   : > { %v9679_v56 = vsel %vm1494_vm8, %v3066_v60, %v6427_v46  ;;  %v9682_v32 = vsel %vm1494_vm8, %v3067_v27, %v6428_v58  ;;  %v6393_v43 = vunpack.i.h.bf16 %v6391_v36  ;;  %v6392_v33 = vunpack.i.l.bf16 %v6391_v36 }
 0x37d   : > { %v6401_v29 = vpop.permute.xlu0 %6400 }
 0x37e   : > { %v3085_v47 = vsel %vm1461_vm6, %v9536_v35, %v6393_v43  ;;  %v3084_v4 = vsel %vm1461_vm6, %v9533_v9, %v6392_v33  ;;  %v6403_v37 = vunpack.i.h.bf16 %v6401_v29  ;;  %v6402_v39 = vunpack.i.l.bf16 %v6401_v29  ;;  %v11715_v43 = vld [vmem:[#allocation7_spill] sm:$0xff] }
 0x37f   : > { %6605 = vrot.lane.b32.xlu2 %v11711_v57, %s6911_s26 }
 0x380   : > { %v9692_v60 = vsel %vm1461_vm6, %v9480_v2, %v6402_v39  ;;  %v9696_v27 = vsel %vm1461_vm6, %v9477_v19, %v6403_v37 }
 0x381   : > { %v6441_v45 = vpop.permute.xlu2 %6440  ;;  %6615 = vrot.lane.b32.xlu1 %v11712_v44, %s6910_s20 }
 0x382   : > { %v6443_v35 = vunpack.i.h.bf16 %v6441_v45  ;;  %v6442_v30 = vunpack.i.l.bf16 %v6441_v45 }
 0x383   : > { %6625 = vrot.lane.b32.xlu0 %v11711_v57, %s6908_s18  ;;  %v6406_v9 = vpop.permute.xlu1 %6405 }
 0x384   : > { %v9703_v1 = vsel %vm1494_vm8, %v3072_v20, %v6442_v30  ;;  %v9706_v2 = vsel %vm1494_vm8, %v3073_v22, %v6443_v35  ;;  %v6408_v51 = vunpack.i.h.bf16 %v6406_v9  ;;  %v6407_v14 = vunpack.i.l.bf16 %v6406_v9 }
 0x385   : > { %v6416_v19 = vpop.permute.xlu0 %6415 }
 0x386   : > { %v3091_v15 = vsel %vm1461_vm6, %v9570_v59, %v6408_v51  ;;  %v3090_v26 = vsel %vm1461_vm6, %v9567_v0, %v6407_v14  ;;  %v6418_v40 = vunpack.i.h.bf16 %v6416_v19  ;;  %v6417_v38 = vunpack.i.l.bf16 %v6416_v19  ;;  %v11713_v59 = vld [vmem:[#allocation51_spill] sm:$0xff]  ;;  %v11714_v0 = vld [vmem:[#allocation34_spill] sm:$0xff]  ;;  %vm11738_vm6 = vmmov %vm11732_vm0 }
 0x387   : > { %6620 = vrot.lane.b32.xlu2 %v8899_v25, %s6911_s26 }
 0x388   : > { %v9716_v20 = vsel %vm1494_vm8, %v9514_v52, %v6417_v38  ;;  %v9720_v22 = vsel %vm1494_vm8, %v9518_v16, %v6418_v40 }
 0x389   : > { %v9722_v23 = vpop.permute.xlu2 %6455  ;;  %6630 = vrot.lane.b32.xlu1 %v11713_v59, %s6909_s19 }
 0x38b   : > { %6640 = vrot.lane.b32.xlu0 %v11714_v0, %s6911_s26  ;;  %v6421_v21 = vpop.permute.xlu1 %6420 }
 0x38c   : > { %v6423_v58 = vunpack.i.h.bf16 %v6421_v21  ;;  %v6422_v46 = vunpack.i.l.bf16 %v6421_v21 }
 0x38d   : > { %v6431_v25 = vpop.permute.xlu0 %6430 }
 0x38e   : > { %v9730_v52 = vsel %vm1494_vm8, %v9600_v50, %v6423_v58  ;;  %v9734_v16 = vsel %vm1494_vm8, %v9596_v63, %v6422_v46  ;;  %v6433_v8 = vunpack.i.h.bf16 %v6431_v25  ;;  %v6432_v36 = vunpack.i.l.bf16 %v6431_v25  ;;  %v11716_v50 = vld [vmem:[#allocation44_spill] sm:$0xff] }
 0x38f   : > { %6635 = vrot.lane.b32.xlu2 %v11715_v43, %s6910_s20 }
 0x390   : > { %v9740_v33 = vsel %vm1494_vm8, %v9547_v11, %v6432_v36  ;;  %v9744_v29 = vsel %vm1494_vm8, %v9551_v28, %v6433_v8  ;;  %v11720_v36 = vld [vmem:[#allocation29_spill] sm:$0xff] }
 0x391   : > { %v6471_v37 = vpop.permute.xlu2 %6470  ;;  %6645 = vrot.lane.b32.xlu1 %v11716_v50, %s6909_s19  ;;  %v11722_v50 = vld [vmem:[#allocation15_spill] sm:$0xff] }
 0x392   : > { %v6473_v39 = vunpack.i.h.bf16 %v6471_v37  ;;  %v6472_v63 = vunpack.i.l.bf16 %v6471_v37 }
 0x393   : > { %6655 = vrot.lane.b32.xlu0 %v8946_v7, %s6911_s26  ;;  %v6436_v57 = vpop.permute.xlu1 %6435  ;;  %v11717_v7 = vld [vmem:[#allocation33_spill] sm:$0xff] }
 0x394   : > { %v9751_v45 = vsel %vm1494_vm8, %v3084_v4, %v6472_v63  ;;  %v9754_v11 = vsel %vm1494_vm8, %v3085_v47, %v6473_v39  ;;  %v6438_v44 = vunpack.i.h.bf16 %v6436_v57  ;;  %v6437_v35 = vunpack.i.l.bf16 %v6436_v57 }
 0x395   : > { %v6446_v28 = vpop.permute.xlu0 %6445 }
 0x396   : > { %v3103_v30 = vsel %vm1494_vm8, %v9624_v54, %v6438_v44  ;;  %v3102_v9 = vsel %vm1494_vm8, %v9620_v3, %v6437_v35  ;;  %v6448_v51 = vunpack.i.h.bf16 %v6446_v28  ;;  %v6447_v14 = vunpack.i.l.bf16 %v6446_v28  ;;  %v11718_v3 = vld [vmem:[#allocation9_spill] sm:$0xff] }
 0x397   : > { %6650 = vrot.lane.b32.xlu2 %v11717_v7, %s6910_s20  ;;  %v5473_v7 = vld [vmem:[%s11226_s3 + $0x8] sm:$0xff] }
 0x398   : > { %v9764_v4 = vsel %vm1494_vm8, %v9578_v24, %v6447_v14  ;;  %v9768_v47 = vsel %vm1494_vm8, %v9582_v5, %v6448_v51 }
 0x399   : > { %v6486_v19 = vpop.permute.xlu2 %6485  ;;  %6660 = vrot.lane.b32.xlu1 %v11714_v0, %s6908_s18 }
 0x39a   : > { %v6488_v54 = vunpack.i.h.bf16 %v6486_v19  ;;  %v6487_v40 = vunpack.i.l.bf16 %v6486_v19  ;;  %v11723_v19 = vld [vmem:[#allocation47_spill] sm:$0xff] }
 0x39b   : > { %6670 = vrot.lane.b32.xlu0 %v11718_v3, %s6910_s20  ;;  %v6451_v38 = vpop.permute.xlu1 %6450 }
 0x39c   : > { %v9775_v59 = vsel %vm1494_vm8, %v3090_v26, %v6487_v40  ;;  %v9778_v24 = vsel %vm1494_vm8, %v3091_v15, %v6488_v54  ;;  %v6453_v21 = vunpack.i.h.bf16 %v6451_v38  ;;  %v6452_v58 = vunpack.i.l.bf16 %v6451_v38  ;;  %v5472_v38 = vld [vmem:[%s11226_s3] sm:$0xff] }
 0x39d   : > { %v6461_v5 = vpop.permute.xlu0 %6460 }
 0x39e   : > { %v9782_v46 = vsel %vm1494_vm8, %v9648_v18, %v6453_v21  ;;  %v9786_v0 = vsel %vm1494_vm8, %v9644_v31, %v6452_v58  ;;  %v6463_v25 = vunpack.i.h.bf16 %v6461_v5  ;;  %v6462_v8 = vunpack.i.l.bf16 %v6461_v5  ;;  %v3272_v18 = vld [vmem:[%s11226_s3 + $0x10] sm:$0x3]  ;;  %v11721_v31 = vld [vmem:[#allocation26_spill] sm:$0xff]  ;;  %v11724_v21 = vld [vmem:[#allocation81_spill] sm:$0xff] }
 0x39f   : > { %11719 = vst [vmem:[#allocation39_spill] sm:$0xff] %v9782_v46  ;;  %6665 = vrot.lane.b32.xlu2 %v11720_v36, %s6909_s19  ;;  %v3285_v37 = vunpack.c.l.b16 %v3272_v18  ;;  %v11726_v18 = vld [vmem:[#allocation67_spill] sm:$0xff] }
 0x3a0   : > { %v9792_v15 = vsel %vm1494_vm8, %v9607_v62, %v6462_v8  ;;  %v9796_v26 = vsel %vm1494_vm8, %v9610_v61, %v6463_v25  ;;  %v6834_v46 = vld [vmem:[%s7002_s13 + $0xf0] sm:$0xff] }
 0x3a1   : > { %v9801_v43 = vpop.permute.xlu2 %6500  ;;  %6675 = vrot.lane.b32.xlu1 %v11721_v31, %s6911_s26  ;;  %v3288_v62 = vpack.c.b16 %v3285_v37, %v3285_v37 }
 0x3a3   : > { %6685 = vrot.lane.b32.xlu0 %v11722_v50, %s6910_s20  ;;  %v6466_v39 = vpop.permute.xlu1 %6465  ;;  %v3340_v61 = vsel %vm1747_vm4, %v3288_v62, 0  ;;  %v11727_v50 = vld [vmem:[#allocation41_spill] sm:$0xff] }
 0x3a4   : > { %v6468_v63 = vunpack.i.h.bf16 %v6466_v39  ;;  %v6467_v57 = vunpack.i.l.bf16 %v6466_v39  ;;  %3347 = vmatpush.bf16.msra.mxu1 %v3340_v61  ;;  %5479 = vmatpush.bf16.msrb.mxu3 %v3340_v61  ;;  %v11728_v39 = vld [vmem:[#allocation16_spill] sm:$0xff] }
 0x3a5   : > { %v6476_v44 = vpop.permute.xlu0 %6475  ;;  %5478 = vmatpush.bf16.msra.mxu2 %v3340_v61 }
 0x3a6   : > { %v9810_v35 = vsel %vm1494_vm8, %v9672_v10, %v6468_v63  ;;  %v9814_v28 = vsel %vm1494_vm8, %v9668_v17, %v6467_v57  ;;  %v6478_v51 = vunpack.i.h.bf16 %v6476_v44  ;;  %v6477_v14 = vunpack.i.l.bf16 %v6476_v44 }
 0x3a7   : > { %6680 = vrot.lane.b32.xlu2 %v11723_v19, %s6909_s19  ;;  %v6413_v19 = vunpack.i.h.bf16 %v9650_v42 }
 0x3a8   : > { %v9823_v10 = vsel %vm1494_vm8, %v9631_v55, %v6477_v14  ;;  %v9827_v17 = vsel %vm1494_vm8, %v9634_v41, %v6478_v51  ;;  %3348 = vmatpush.bf16.msra.mxu1 %v5473_v7  ;;  %5481 = vmatpush.bf16.msrb.mxu3 %v5473_v7 }
 0x3a9   : > { %v6516_v54 = vpop.permute.xlu2 %6515  ;;  %6690 = vrot.lane.b32.xlu1 %v8988_v53, %s6911_s26  ;;  %5480 = vmatpush.bf16.msra.mxu2 %v5473_v7  ;;  %v11729_v7 = vld [vmem:[#allocation42_spill] sm:$0xff] }
 0x3aa   : > { %v6518_v40 = vunpack.i.h.bf16 %v6516_v54  ;;  %v6517_v3 = vunpack.i.l.bf16 %v6516_v54  ;;  %v6412_v54 = vunpack.i.l.bf16 %v9650_v42 }
 0x3ab   : > { %6700 = vrot.lane.b32.xlu0 %v11724_v21, %s6909_s19  ;;  %v6481_v55 = vpop.permute.xlu1 %6480  ;;  %v11730_v21 = vld [vmem:[#allocation52_spill] sm:$0xff] }
 0x3ac   : > { %v9837_v41 = vsel %vm1527_vm10, %v3102_v9, %v6517_v3  ;;  %v9840_v58 = vsel %vm1527_vm10, %v3103_v30, %v6518_v40  ;;  %v6483_v53 = vunpack.i.h.bf16 %v6481_v55  ;;  %v6482_v5 = vunpack.i.l.bf16 %v6481_v55  ;;  %3349 = vmatpush.bf16.msra.mxu1 %v5472_v38  ;;  %5483 = vmatpush.bf16.msrb.mxu3 %v5472_v38  ;;  %v11725_v30 = vld [vmem:[#allocation25_spill] sm:$0xff]  ;;  %v11731_v55 = vld [vmem:[#allocation62_spill] sm:$0xff] }
 0x3ad   : > { %v6491_v25 = vpop.permute.xlu0 %6490  ;;  %5482 = vmatpush.bf16.msra.mxu2 %v5472_v38  ;;  %v3092_v42 = vsel %vm1494_vm8, %v9590_v13, %v6412_v54 }
 0x3ae   : > { %v9844_v8 = vsel %vm1494_vm8, %v9696_v27, %v6483_v53  ;;  %v9848_v36 = vsel %vm1494_vm8, %v9692_v60, %v6482_v5  ;;  %v6493_v3 = vunpack.i.h.bf16 %v6491_v25 }
 0x3af   : > { %6695 = vrot.lane.b32.xlu2 %v11721_v31, %s6908_s18 }
 0x3b1   : > { %v6531_v9 = vpop.permute.xlu2 %6530  ;;  %6705 = vrot.lane.b32.xlu1 %v11725_v30, %s6910_s20 }
 0x3b3   : > { %6715 = vrot.lane.b32.xlu0 %v11726_v18, %s6909_s19  ;;  %v6496_v37 = vpop.permute.xlu1 %6495  ;;  %v6533_v18 = vunpack.i.h.bf16 %v6531_v9 }
 0x3b5   : > { %v9856_v27 = vpop.permute.xlu0 %6505 }
 0x3b7   : > { %6710 = vrot.lane.b32.xlu2 %v11727_v50, %s6911_s26 }
 0x3b9   : > { %v9860_v60 = vpop.permute.xlu2 %6545  ;;  %6720 = vrot.lane.b32.xlu1 %v11728_v39, %s6910_s20 }
 0x3bb   : > { %6730 = vrot.lane.b32.xlu0 %v11727_v50, %s6908_s18  ;;  %v6511_v31 = vpop.permute.xlu1 %6510  ;;  %v6532_v50 = vunpack.i.l.bf16 %v6531_v9  ;;  %v6497_v9 = vunpack.i.l.bf16 %v6496_v37 }
 0x3bc   : > { %v6513_v62 = vunpack.i.h.bf16 %v6511_v31  ;;  %v6512_v63 = vunpack.i.l.bf16 %v6511_v31 }
 0x3bd   : > { %v6521_v57 = vpop.permute.xlu0 %6520 }
 0x3be   : > { %v9868_v44 = vsel %vm1527_vm10, %v9744_v29, %v6513_v62  ;;  %v9872_v61 = vsel %vm1527_vm10, %v9740_v33, %v6512_v63  ;;  %v6523_v51 = vunpack.i.h.bf16 %v6521_v57  ;;  %v6522_v14 = vunpack.i.l.bf16 %v6521_v57 }
 0x3bf   : > { %6725 = vrot.lane.b32.xlu2 %v11729_v7, %s6911_s26  ;;  %v6492_v33 = vunpack.i.l.bf16 %v6491_v25 }
 0x3c0   : > { %v9880_v40 = vsel %vm1527_vm10, %v9703_v1, %v6522_v14  ;;  %v9884_v29 = vsel %vm1527_vm10, %v9706_v2, %v6523_v51  ;;  %v3093_v1 = vsel %vm1494_vm8, %v9586_v12, %v6413_v19  ;;  %v6498_v19 = vunpack.i.h.bf16 %v6496_v37 }
 0x3c1   : > { %v9886_v38 = vpop.permute.xlu2 %6560  ;;  %6735 = vrot.lane.b32.xlu1 %v11730_v21, %s6909_s19  ;;  %v3124_v30 = vsel %vm1527_vm10, %v3092_v42, %v6492_v33  ;;  %v3125_v25 = vsel %vm1527_vm10, %v3093_v1, %v6493_v3  ;;  %v11734_v33 = vld [vmem:[#allocation57_spill] sm:$0xff]  ;;  %v3126_v42 = vsel %vm1527_vm10, %v9716_v20, %v6497_v9  ;;  %v6548_v1 = vunpack.i.h.bf16 %v9860_v60 }
 0x3c2   : > { %v3127_v37 = vsel %vm1527_vm10, %v9720_v22, %v6498_v19 }
 0x3c3   : > { %6745 = vrot.lane.b32.xlu0 %v11731_v55, %s6911_s26  ;;  %v6526_v53 = vpop.permute.xlu1 %6525 }
 0x3c4   : > { %v6528_v5 = vunpack.i.h.bf16 %v6526_v53  ;;  %v6527_v2 = vunpack.i.l.bf16 %v6526_v53 }
 0x3c5   : > { %v6536_v39 = vpop.permute.xlu0 %6535 }
 0x3c6   : > { %v3156_v31 = vsel %vm1560_vm9, %v3124_v30, %v6527_v2  ;;  %v3157_v62 = vsel %vm1560_vm9, %v3125_v25, %v6528_v5  ;;  %v6538_v63 = vunpack.i.h.bf16 %v6536_v39  ;;  %v6537_v57 = vunpack.i.l.bf16 %v6536_v39 }
 0x3c7   : > { %6740 = vrot.lane.b32.xlu2 %v9052_v49, %s6910_s20  ;;  %v3188_v12 = vsel %vm1593_vm11, %v3156_v31, %v6532_v50  ;;  %v3189_v13 = vsel %vm1593_vm11, %v3157_v62, %v6533_v18  ;;  %v6547_v5 = vunpack.i.l.bf16 %v9860_v60  ;;  %v11736_v50 = vld [vmem:[#allocation14_spill] sm:$0xff]  ;;  %v4937_v60 = vld [vmem:[%s11228_s5] sm:$0x3] }
 0x3c8   : > { %v3220_v51 = vsel %vm11732_vm0, %v3188_v12, %v6537_v57  ;;  %v3221_v14 = vsel %vm11733_vm1, %v3189_v13, %v6538_v63  ;;  %v11739_v63 = vld [vmem:[#allocation65_spill] sm:$0xff]  ;;  %v5146_v12 = vsel %vm1747_vm4, %v4937_v60, 0  ;;  %v6458_v13 = vunpack.i.h.bf16 %v9722_v23  ;;  %vm11742_vm4 = vmmov %vm11735_vm2 }
 0x3c9   : > { %v9906_v54 = vpop.permute.xlu2 %6575  ;;  %6750 = vrot.lane.b32.xlu1 %v11729_v7, %s6908_s18  ;;  %v3252_v3 = vpack.c.bf16 %v3221_v14, %v3220_v51  ;;  %v6457_v51 = vunpack.i.l.bf16 %v9722_v23  ;;  %5155 = vmatpush.bf16.msrb.mxu2 %v5146_v12  ;;  %v11740_v14 = vmov 0.0   ;;  %v11741_v23 = vld [vmem:[#allocation24_spill] sm:$0xff]  ;;  %v6502_v60 = vunpack.i.l.bf16 %v9801_v43  ;;  %vm11749_vm1 = vmmov %vm11735_vm2 }
 0x3ca   : > { %v6577_v12 = vunpack.i.l.bf16 %v9906_v54 }
 0x3cb   : > { %6760 = vrot.lane.b32.xlu0 %v11734_v33, %s6910_s20  ;;  %v6541_v49 = vpop.permute.xlu1 %6540  ;;  %5445 = vmatmul.msk.bf16.vlgmr.msra.gmra.mxu1 %vm11735_vm2, %v3252_v3  ;;  %vm11750_vm2 = vmmov %vm11732_vm0 }
 0x3cc   : > { %v6543_v21 = vunpack.i.h.bf16 %v6541_v49  ;;  %v6542_v53 = vunpack.i.l.bf16 %v6541_v49  ;;  %v3110_v49 = vsel %vm1494_vm8, %v9662_v6, %v6457_v51 }
 0x3cd   : > { %v6551_v7 = vpop.permute.xlu0 %6550 }
 0x3ce   : > { %v3158_v2 = vsel %vm1560_vm9, %v3126_v42, %v6542_v53  ;;  %v3159_v30 = vsel %vm1560_vm9, %v3127_v37, %v6543_v21  ;;  %v6553_v25 = vunpack.i.h.bf16 %v6551_v7  ;;  %v6552_v18 = vunpack.i.l.bf16 %v6551_v7 }
 0x3cf   : > { %6755 = vrot.lane.b32.xlu2 %v11736_v50, %s6909_s19  ;;  %v3190_v39 = vsel %vm1593_vm11, %v3158_v2, %v6547_v5  ;;  %v3191_v20 = vsel %vm1593_vm11, %v3159_v30, %v6548_v1  ;;  %v3111_v21 = vsel %vm1494_vm8, %v9658_v48, %v6458_v13  ;;  %v6779_v37 = vpack.i.bf16 %v11741_v23, %v11740_v14  ;;  %vm11743_vm8 = vmmov %vm11732_vm0  ;;  %v6806_v13 = vld [vmem:[%s7002_s13 + $0x48] sm:$0xff] }
 0x3d0   : > { %v3222_v22 = vsel %vm11737_vm3, %v3190_v39, %v6552_v18  ;;  %v3223_v31 = vsel %vm11738_vm6, %v3191_v20, %v6553_v25  ;;  %v6563_v1 = vunpack.i.h.bf16 %v9886_v38  ;;  %v6562_v5 = vunpack.i.l.bf16 %v9886_v38  ;;  %vm11751_vm3 = vmmov %vm11732_vm0 }
 0x3d1   : > { %v9930_v62 = vpop.permute.xlu2 %6590  ;;  %6765 = vrot.lane.b32.xlu1 %v11739_v63, %s6911_s26  ;;  %v3253_v57 = vpack.c.bf16 %v3223_v31, %v3222_v22  ;;  %v6503_v31 = vunpack.i.h.bf16 %v9801_v43  ;;  %v4210_v51 = vsel %vm1395_vm5, %v6806_v13, 0.0  ;;  %v11745_v43 = vld [vmem:[#allocation56_spill] sm:$0xff]  ;;  %vm11752_vm6 = vmmov %vm11749_vm1 }
 0x3d3   : > { %6775 = vrot.lane.b32.xlu0 %v11740_v14, %s6909_s19  ;;  %v6556_v19 = vpop.permute.xlu1 %6555 }
 0x3d4   : > { %v6558_v9 = vunpack.i.h.bf16 %v6556_v19  ;;  %v6557_v3 = vunpack.i.l.bf16 %v6556_v19 }
 0x3d5   : > { %v6566_v33 = vpop.permute.xlu0 %6565 }
 0x3d6   : > { %v3142_v53 = vsel %vm1527_vm10, %v3110_v49, %v6557_v3  ;;  %v3143_v42 = vsel %vm1527_vm10, %v3111_v21, %v6558_v9  ;;  %v6568_v7 = vunpack.i.h.bf16 %v6566_v33  ;;  %v6567_v2 = vunpack.i.l.bf16 %v6566_v33  ;;  %v6808_v49 = vld [vmem:[%s7002_s13 + $0x30] sm:$0xff]  ;;  %v6809_v21 = vld [vmem:[%s7002_s13 + $0x20] sm:$0xff] }
 0x3d7   : > { %6770 = vrot.lane.b32.xlu2 %v11731_v55, %s6908_s18  ;;  %v3174_v48 = vsel %vm1560_vm9, %v3142_v53, %v6562_v5  ;;  %v3175_v30 = vsel %vm1560_vm9, %v3143_v42, %v6563_v1  ;;  %v4201_v53 = vsel %vm1395_vm5, %v6809_v21, 0.0  ;;  %v6810_v42 = vld [vmem:[%s7002_s13 + $0x18] sm:$0xff]  ;;  %v6812_v5 = vld [vmem:[%s7002_s13 + $0x10] sm:$0xff] }
 0x3d8   : > { %v3206_v38 = vsel %vm1593_vm11, %v3174_v48, %v6567_v2  ;;  %v3207_v50 = vsel %vm1593_vm11, %v3175_v30, %v6568_v7  ;;  %v4203_v23 = vsel %vm1395_vm5, %v6810_v42, 0.0  ;;  %v4200_v7 = vsel %vm1395_vm5, %v6812_v5, 0.0  ;;  %v6816_v42 = vld [vmem:[%s7002_s13 + $0x88] sm:$0xff] }
 0x3d9   : > { %v9951_v6 = vpop.permute.xlu2 %6605  ;;  %6780 = vrot.lane.b32.xlu1 %v6779_v37, %s6910_s20  ;;  %v6811_v37 = vld [vmem:[%s7002_s13 + $0x28] sm:$0xff]  ;;  %v3128_v2 = vsel %vm1527_vm10, %v9734_v16, %v6502_v60  ;;  %v3129_v48 = vsel %vm1527_vm10, %v9730_v52, %v6503_v31  ;;  %v4202_v13 = vadd.f32 %v4201_v53, %v4200_v7  ;;  %v4222_v53 = vsel %vm1395_vm5, %v6816_v42, 0.0  ;;  %v6833_v7 = vld [vmem:[%s7002_s13 + $0xc0] sm:$0xff] }
 0x3da   : > { %v4204_v1 = vsel %vm1395_vm5, %v6811_v37, 0.0 }
 0x3db   : > { %6790 = vrot.lane.b32.xlu0 %v11739_v63, %s6908_s18  ;;  %v6571_v55 = vpop.permute.xlu1 %6570  ;;  %5446 = vmatmul.msk.bf16.gmra.mxu1 %vm11742_vm4, %v3253_v57  ;;  %v6578_v57 = vunpack.i.h.bf16 %v9906_v54  ;;  %v4206_v54 = vsel %vm1395_vm5, %v6808_v49, 0.0  ;;  %v6593_v49 = vunpack.i.h.bf16 %v9930_v62  ;;  %vm11753_vm4 = vmmov %vm11732_vm0  ;;  %s6854_s18 = sshra.s32 %s5345_s25, 4  ;;  %s6855_s18 = int_to_ptr.hbm [resolvable:$true] %s6854_s18 }
 0x3dc   : > { %v6573_v25 = vunpack.i.h.bf16 %v6571_v55  ;;  %v6572_v18 = vunpack.i.l.bf16 %v6571_v55  ;;  %v3160_v55 = vsel %vm1560_vm9, %v3128_v2, %v6577_v12  ;;  %v6817_v2 = vld [vmem:[%s7002_s13 + $0x80] sm:$0xff]  ;;  %p6861_p0 = scmp.lt.s32.totalorder %s6855_s18, %s11229_s6 }
 0x3dd   : > { %v6581_v39 = vpop.permute.xlu0 %6580 }
 0x3de   : > { %v3238_v20 = vsel %vm11743_vm8, %v3206_v38, %v6572_v18  ;;  %v3239_v22 = vsel %vm11744_vm12, %v3207_v50, %v6573_v25  ;;  %v6583_v19 = vunpack.i.h.bf16 %v6581_v39  ;;  %v6582_v9 = vunpack.i.l.bf16 %v6581_v39  ;;  %v6813_v50 = vld [vmem:[%s7002_s13 + $0x38] sm:$0xff]  ;;  %vm11754_vm8 = vmmov %vm11732_vm0 }
 0x3df   : > { %6785 = vrot.lane.b32.xlu2 %v11740_v14, %s6911_s26  ;;  %v3261_v63 = vpack.c.bf16 %v3239_v22, %v3238_v20  ;;  %v6807_v14 = vld [vmem:[%s7002_s13 + $0x40] sm:$0xff]  ;;  %v3161_v25 = vsel %vm1560_vm9, %v3129_v48, %v6578_v57  ;;  %v4209_v39 = vsel %vm1395_vm5, %v6813_v50, 0.0  ;;  %v4264_v48 = vrot.slane %v4202_v13, 2  ;;  %vm11755_vm12 = vmmov %vm11749_vm1 }
 0x3e0   : > { %v4207_v33 = vsel %vm1395_vm5, %v6807_v14, 0.0  ;;  %v3192_v16 = vsel %vm1593_vm11, %v3160_v55, %v6582_v9  ;;  %v3193_v52 = vsel %vm1593_vm11, %v3161_v25, %v6583_v19  ;;  %v11748_v9 = vld [vmem:[#allocation46_spill] sm:$0xff]  ;;  %v4266_v55 = vrot.slane %v4202_v13, 6 }
 0x3e1   : > { %v9971_v3 = vpop.permute.xlu2 %6620  ;;  %6795 = vrot.lane.b32.xlu1 %v11745_v43, %s6909_s19  ;;  %5454 = vmatmul.msk.bf16.vlgmr.msra.gmra.mxu2 %vm11746_vm14, %v3261_v63  ;;  %v9998_v20 = vadd.f32 %v4207_v33, %v4206_v54  ;;  %v6814_v63 = vld [vmem:[%s7002_s13 + $0x58] sm:$0xff]  ;;  %v6815_v43 = vld [vmem:[%s7002_s13 + $0x50] sm:$0xff]  ;;  %v10020_v33 = vadd.f32 %v4210_v51, %v4209_v39  ;;  %v6592_v54 = vunpack.i.l.bf16 %v9930_v62  ;;  %v4219_v62 = vsel %vm1395_vm5, %v6817_v2, 0.0  ;;  %vm11756_vm14 = vmmov %vm11732_vm0  ;;  %s6856_s19 = scalar_lea.hbm %s6855_s18, 64 }
 0x3e2   : > { %v10008_v57 = vsel %vm1395_vm5, %v6814_v63, 0.0  ;;  %v10018_v14 = vsel %vm1395_vm5, %v6815_v43, 0.0  ;;  %v4361_v25 = vsel %vm4360_vm13, %v4202_v13, 0.0  ;;  %v3145_v50 = vsel %vm1527_vm10, %v9796_v26, %v6593_v49  ;;  %p6857_p11 = scmp.ne.s32.totalorder %s6855_s18, %s6856_s19  ;;  %p6862_p1 = scmp.lt.s32.totalorder %s6860_s16, %s6856_s19 }
 0x3e3   : > { %6800 = vrot.lane.b32.xlu0 %v11702_v34, %s6911_s26  ;;  %v6586_v30 = vpop.permute.xlu1 %6585  ;;  %v10002_v34 = vadd.f32 %v4204_v1, %v4203_v23  ;;  %v10012_v12 = vsel %vm4360_vm13, %v9998_v20, 0.0  ;;  %v4368_v26 = vsel %vm4360_vm13, %v4264_v48, 0.0  ;;  %v10056_v42 = vsel %vm4360_vm13, %v4266_v55, 0.0  ;;  %s242_s26 = sand.u32 1, %s6894_s22  }
 0x3e4   : > { %v6588_v18 = vunpack.i.h.bf16 %v6586_v30  ;;  %v6587_v38 = vunpack.i.l.bf16 %v6586_v30  ;;  %v4265_v30 = vrot.slane %v4202_v13, 4  ;;  %v4362_v13 = vrot.slane %v4361_v25, 4  ;;  %s5411_s29 = sshll.u32 %s242_s26, 6  ;;  %p6858_p12 = pnand %p6857_p11, %p6987_p5 }
 0x3e5   : > { %v6596_v22 = vpop.permute.xlu0 %6595  ;;  %v10033_v51 = vsel %vm4360_vm13, %v10002_v34, 0.0  ;;  %s10971_s14 = scalar_lea.vmem [#allocation2], %s5411_s29  ;;  %p6863_p2 = por %p6862_p1, %p6861_p0 }
 0x3e6   : > { %v3224_v31 = vsel %vm11747_vm15, %v3192_v16, %v6587_v38  ;;  %v3225_v60 = vsel %vm11732_vm0, %v3193_v52, %v6588_v18  ;;  %v6598_v23 = vunpack.i.h.bf16 %v6596_v22  ;;  %v6597_v37 = vunpack.i.l.bf16 %v6596_v22  ;;  %vm11757_vm15 = vmmov %vm11732_vm0  ;;  %s5342_s28 = sshll.u32 %s10971_s14, 4  ;;  %p6859_p13 = pneg %p6858_p12  ;;  %s5343_s28 = int_to_ptr.vmem [resolvable:$true] %s5342_s28 }
 0x3e7   : > { %2841 = vrot.lane.b32.xlu2 %v11748_v9, %s6910_s20  ;;  %v3254_v19 = vpack.c.bf16 %v3225_v60, %v3224_v31  ;;  %v3144_v38 = vsel %vm1527_vm10, %v9792_v15, %v6592_v54  ;;  %v6608_v52 = vunpack.i.h.bf16 %v9951_v6  ;;  %v6607_v22 = vunpack.i.l.bf16 %v9951_v6  ;;  %v6818_v9 = vld [vmem:[%s7002_s13 + $0x78] sm:$0xff]  ;;  %vm11758_vm0 = vmmov %vm11749_vm1 }
 0x3e8   : > { %v3176_v31 = vsel %vm1560_vm9, %v3144_v38, %v6597_v37  ;;  %v3177_v60 = vsel %vm1560_vm9, %v3145_v50, %v6598_v23  ;;  %v4375_v49 = vsel %vm4360_vm13, %v4265_v30, 0.0  ;;  %v6508_v23 = vunpack.i.h.bf16 %v9856_v27  ;;  %p6864_p3 = pnand %p6863_p2, %p6859_p13 }
 0x3e9   : > { %v10027_v1 = vpop.permute.xlu2 %6635  ;;  %v6507_v37 = vunpack.i.l.bf16 %v9856_v27  ;;  %v10071_v27 = vadd.f32 %v4362_v13, %v4361_v25  ;;  %v6622_v25 = vunpack.i.l.bf16 %v9971_v3 }
 0x3eb   : > { %v6601_v18 = vpop.permute.xlu1 %6600  ;;  %5447 = vmatmul.msk.bf16.gmra.mxu1 %vm11749_vm1, %v3254_v19  ;;  %v4221_v19 = vsel %vm1395_vm5, %v6818_v9, 0.0  ;;  %vm11759_vm1 = vmmov %vm11750_vm2 }
 0x3ec   : > { %v6603_v39 = vunpack.i.h.bf16 %v6601_v18  ;;  %v6602_v16 = vunpack.i.l.bf16 %v6601_v18 }
 0x3ed   : > { %v6611_v63 = vpop.permute.xlu0 %6610 }
 0x3ee   : > { %v3209_v15 = vsel %vm1593_vm11, %v3177_v60, %v6603_v39  ;;  %v3208_v43 = vsel %vm1593_vm11, %v3176_v31, %v6602_v16  ;;  %v6613_v38 = vunpack.i.h.bf16 %v6611_v63  ;;  %v6612_v30 = vunpack.i.l.bf16 %v6611_v63 }
 0x3ef   : > { %v3240_v6 = vsel %vm11750_vm2, %v3208_v43, %v6607_v22  ;;  %v3241_v54 = vsel %vm11751_vm3, %v3209_v15, %v6608_v52  ;;  %v4369_v39 = vrot.slane %v4368_v26, 4  ;;  %v10064_v16 = vadd.f32 %v4222_v53, %v4221_v19  ;;  %v6819_v52 = vld [vmem:[%s7002_s13 + $0x70] sm:$0xff]  ;;  %v6820_v22 = vld [vmem:[%s7002_s13 + $0x68] sm:$0xff]  ;;  %v6821_v15 = vld [vmem:[%s7002_s13 + $0x60] sm:$0xff] }
 0x3f0   : > { %v3262_v2 = vpack.c.bf16 %v3241_v54, %v3240_v6  ;;  %v4218_v55 = vsel %vm1395_vm5, %v6819_v52, 0.0  ;;  %v4216_v31 = vsel %vm1395_vm5, %v6820_v22, 0.0  ;;  %v4376_v60 = vrot.slane %v4375_v49, 4  ;;  %vm11760_vm2 = vmmov %vm11759_vm1 }
 0x3f1   : > { %v10062_v50 = vpop.permute.xlu2 %6650  ;;  %v4213_v63 = vsel %vm1395_vm5, %v6821_v15, 0.0  ;;  %v3130_v53 = vsel %vm1527_vm10, %v9679_v56, %v6507_v37  ;;  %v3131_v19 = vsel %vm1527_vm10, %v9682_v32, %v6508_v23  ;;  %v10084_v15 = vadd.f32 %v4219_v62, %v4218_v55  ;;  %v6823_v55 = vld [vmem:[%s7002_s13 + $0x90] sm:$0xff]  ;;  %vm11763_vm3 = vmmov %vm11758_vm0 }
 0x3f2   : > { %5455 = vmatmul.msk.bf16.gmra.mxu2 %vm11752_vm6, %v3262_v2  ;;  %v6623_v2 = vunpack.i.h.bf16 %v9971_v3  ;;  %v3162_v13 = vsel %vm1560_vm9, %v3130_v53, %v6612_v30  ;;  %v3163_v52 = vsel %vm1560_vm9, %v3131_v19, %v6613_v38  ;;  %v10087_v56 = vadd.f32 %v4216_v31, %v10008_v57  ;;  %v6822_v57 = vld [vmem:[%s7002_s13 + $0xa0] sm:$0xff]  ;;  %v6824_v31 = vld [vmem:[%s7002_s13 + $0xb8] sm:$0xff]  ;;  %v6825_v19 = vld [vmem:[%s7002_s13 + $0xb0] sm:$0xff] }
 0x3f3   : > { %v6616_v43 = vpop.permute.xlu1 %6615  ;;  %v10091_v37 = vadd.f32 %v4369_v39, %v4368_v26  ;;  %v10098_v62 = vadd.f32 %v4213_v63, %v10018_v14  ;;  %v4225_v30 = vsel %vm1395_vm5, %v6822_v57, 0.0  ;;  %v4224_v26 = vsel %vm1395_vm5, %v6823_v55, 0.0  ;;  %v6831_v55 = vld [vmem:[%s7002_s13 + $0xd0] sm:$0xff]  ;;  %vm11767_vm6 = vmmov %vm11759_vm1 }
 0x3f4   : > { %v6618_v6 = vunpack.i.h.bf16 %v6616_v43  ;;  %v6617_v54 = vunpack.i.l.bf16 %v6616_v43  ;;  %v10093_v43 = vadd.f32 %v4376_v60, %v4375_v49  ;;  %v4364_v49 = vrot.slane %v10071_v27, 2 }
 0x3f5   : > { %v6626_v22 = vpop.permute.xlu0 %6625  ;;  %v4233_v60 = vsel %vm1395_vm5, %v6824_v31, 0.0  ;;  %v4236_v31 = vsel %vm1395_vm5, %v6831_v55, 0.0 }
 0x3f6   : > { %v3194_v32 = vsel %vm1593_vm11, %v3162_v13, %v6617_v54  ;;  %v3195_v23 = vsel %vm1593_vm11, %v3163_v52, %v6618_v6  ;;  %v6628_v53 = vunpack.i.h.bf16 %v6626_v22  ;;  %v6627_v14 = vunpack.i.l.bf16 %v6626_v22  ;;  %v6826_v54 = vld [vmem:[%s7002_s13 + $0xa8] sm:$0xff] }
 0x3f7   : > { %v3226_v3 = vsel %vm11753_vm4, %v3194_v32, %v6622_v25  ;;  %v3227_v38 = vsel %vm11754_vm8, %v3195_v23, %v6623_v2  ;;  %v4230_v6 = vsel %vm1395_vm5, %v6825_v19, 0.0  ;;  %v4228_v2 = vsel %vm1395_vm5, %v6826_v54, 0.0  ;;  %v6827_v25 = vld [vmem:[%s7002_s13 + $0x98] sm:$0xff]  ;;  %v6828_v52 = vld [vmem:[%s7002_s13 + $0xe8] sm:$0xff]  ;;  %vm11768_vm4 = vmmov %vm11759_vm1 }
 0x3f8   : > { %v3255_v39 = vpack.c.bf16 %v3227_v38, %v3226_v3  ;;  %v4227_v13 = vsel %vm1395_vm5, %v6827_v25, 0.0  ;;  %v4240_v32 = vsel %vm1395_vm5, %v6828_v52, 0.0  ;;  %v10117_v23 = vadd.f32 %v4225_v30, %v4224_v26  ;;  %v6829_v3 = vld [vmem:[%s7002_s13 + $0xe0] sm:$0xff]  ;;  %v6830_v38 = vld [vmem:[%s7002_s13 + $0xd8] sm:$0xff]  ;;  %v6832_v54 = vld [vmem:[%s7002_s13 + $0xc8] sm:$0xff] }
 0x3f9   : > { %v10107_v63 = vpop.permute.xlu2 %6665  ;;  %v4237_v22 = vsel %vm1395_vm5, %v6829_v3, 0.0  ;;  %v4239_v57 = vsel %vm1395_vm5, %v6830_v38, 0.0  ;;  %v4234_v25 = vsel %vm1395_vm5, %v6832_v54, 0.0  ;;  %v4231_v52 = vsel %vm1395_vm5, %v6833_v7, 0.0  ;;  %vm11769_vm8 = vmmov %vm11758_vm0 }
 0x3fa   : > { %v6638_v3 = vunpack.i.h.bf16 %v10027_v1  ;;  %v6637_v38 = vunpack.i.l.bf16 %v10027_v1  ;;  %v3146_v55 = vsel %vm1527_vm10, %v9814_v28, %v6627_v14  ;;  %v10138_v5 = vadd.f32 %v4237_v22, %v4236_v31 }
 0x3fb   : > { %v6631_v19 = vpop.permute.xlu1 %6630  ;;  %5448 = vmatmul.msk.bf16.gmra.mxu1 %vm11755_vm12, %v3255_v39  ;;  %v3147_v39 = vsel %vm1527_vm10, %v9810_v35, %v6628_v53  ;;  %v4242_v28 = vsel %vm1395_vm5, %v6834_v46, 0.0  ;;  %v6835_v35 = vld [vmem:[%s7002_s13 + $0x100] sm:$0xff]  ;;  %v10156_v46 = vadd.f32 %v4228_v2, %v4227_v13  ;;  %vm11771_vm12 = vmmov %vm11759_vm1 }
 0x3fc   : > { %v6633_v30 = vunpack.i.h.bf16 %v6631_v19  ;;  %v6632_v26 = vunpack.i.l.bf16 %v6631_v19  ;;  %v10140_v19 = vadd.f32 %v4231_v52, %v4230_v6  ;;  %v4243_v53 = vsel %vm1395_vm5, %v6835_v35, 0.0 }
 0x3fd   : > { %v6641_v18 = vpop.permute.xlu0 %6640  ;;  %v10154_v52 = vadd.f32 %v4364_v49, %v10071_v27  ;;  %v6837_v49 = vld [vmem:[%s7002_s13 + $0x108] sm:$0xff] }
 0x3fe   : > { %v3178_v54 = vsel %vm1560_vm9, %v3146_v55, %v6632_v26  ;;  %v3179_v48 = vsel %vm1560_vm9, %v3147_v39, %v6633_v30  ;;  %v6643_v7 = vunpack.i.h.bf16 %v6641_v18  ;;  %v6642_v9 = vunpack.i.l.bf16 %v6641_v18 }
 0x3ff   : > { %v3210_v21 = vsel %vm1593_vm11, %v3178_v54, %v6637_v38  ;;  %v3211_v1 = vsel %vm1593_vm11, %v3179_v48, %v6638_v3  ;;  %v4371_v18 = vrot.slane %v10091_v37, 2  ;;  %v10159_v3 = vadd.f32 %v4240_v32, %v4239_v57  ;;  %v6836_v38 = vld [vmem:[%s7002_s13 + $0xf8] sm:$0xff]  ;;  %s5330_s13 = scalar_lea.sflag [#allocation3], %s242_s26 }
 0x400   : > { %v3242_v14 = vsel %vm11756_vm14, %v3210_v21, %v6642_v9  ;;  %v3243_v30 = vsel %vm11757_vm15, %v3211_v1, %v6643_v7  ;;  %v10162_v9 = vadd.f32 %v4234_v25, %v4233_v60  ;;  %v4245_v55 = vsel %vm1395_vm5, %v6836_v38, 0.0  ;;  %vm11772_vm14 = vmmov %vm11759_vm1 }
 0x401   : > { %v6681_v31 = vpop.permute.xlu2 %6680  ;;  %v3263_v48 = vpack.c.bf16 %v3243_v30, %v3242_v14  ;;  %v10166_v39 = vadd.f32 %v4243_v53, %v4242_v28  ;;  %v4246_v2 = vsel %vm1395_vm5, %v6837_v49, 0.0  ;;  %v6653_v57 = vunpack.i.h.bf16 %v10062_v50  ;;  %vm11773_vm15 = vmmov %vm11758_vm0 }
 0x402   : > { %v6652_v60 = vunpack.i.l.bf16 %v10062_v50  ;;  %v6683_v25 = vunpack.i.h.bf16 %v6681_v31  ;;  %v6682_v7 = vunpack.i.l.bf16 %v6681_v31  ;;  %v10178_v30 = vadd.f32 %v4246_v2, %v4245_v55 }
 0x403   : > { %v6646_v54 = vpop.permute.xlu1 %6645  ;;  %5456 = vmatmul.msk.bf16.gmra.mxu2 %vm11758_vm0, %v3263_v48  ;;  %v6668_v50 = vunpack.i.h.bf16 %v10107_v63  ;;  %v6667_v31 = vunpack.i.l.bf16 %v10107_v63  ;;  %v11764_v48 = vrot.slane %v10056_v42, 4  ;;  %vm11777_vm0 = vmmov %vm11759_vm1 }
 0x404   : > { %v6648_v13 = vunpack.i.h.bf16 %v6646_v54  ;;  %v6647_v32 = vunpack.i.l.bf16 %v6646_v54  ;;  %v10199_v63 = vsel %vm1560_vm9, %v9840_v58, %v6683_v25 }
 0x405   : > { %v6656_v1 = vpop.permute.xlu0 %6655  ;;  %v4384_v21 = vadd.f32 %v11764_v48, %v10056_v42 }
 0x406   : > { %v3164_v28 = vsel %vm1560_vm9, %v9872_v61, %v6647_v32  ;;  %v3165_v35 = vsel %vm1560_vm9, %v9868_v44, %v6648_v13  ;;  %v6658_v53 = vunpack.i.h.bf16 %v6656_v1  ;;  %v6657_v14 = vunpack.i.l.bf16 %v6656_v1 }
 0x407   : > { %v3196_v38 = vsel %vm1593_vm11, %v3164_v28, %v6652_v60  ;;  %v3197_v54 = vsel %vm1593_vm11, %v3165_v35, %v6653_v57  ;;  %v10189_v44 = vsel %vm1560_vm9, %v9837_v41, %v6682_v7  ;;  %v4272_v13 = vrot.slane %v9998_v20, 6 }
 0x408   : > { %v3228_v49 = vsel %vm11759_vm1, %v3196_v38, %v6657_v14  ;;  %v3229_v61 = vsel %vm11760_vm2, %v3197_v54, %v6658_v53  ;;  %v11761_v32 = vrot.slane %v9998_v20, 2  ;;  %v11762_v28 = vrot.slane %v9998_v20, 4  ;;  %vm11779_vm1 = vmmov %vm11777_vm0 }
 0x409   : > { %v6696_v55 = vpop.permute.xlu2 %6695  ;;  %v3256_v2 = vpack.c.bf16 %v3229_v61, %v3228_v49  ;;  %v10211_v38 = vsel %vm4360_vm13, %v4272_v13, 0.0  ;;  %v4268_v61 = vrot.slane %v10002_v34, 4  ;;  %vm11781_vm2 = vmmov %vm11763_vm3 }
 0x40a   : > { %v10195_v57 = vsel %vm4360_vm13, %v11761_v32, 0.0  ;;  %v6698_v60 = vunpack.i.h.bf16 %v6696_v55  ;;  %v6697_v1 = vunpack.i.l.bf16 %v6696_v55  ;;  %v10204_v41 = vsel %vm4360_vm13, %v11762_v28, 0.0 }
 0x40b   : > { %v6661_v7 = vpop.permute.xlu1 %6660  ;;  %5449 = vmatmul.msk.bf16.gmra.mxu1 %vm11763_vm3, %v3256_v2  ;;  %v4425_v53 = vrot.slane %v10195_v57, 4  ;;  %v4432_v14 = vrot.slane %v10204_v41, 4  ;;  %v4269_v55 = vrot.slane %v10002_v34, 6  ;;  %v4403_v48 = vsel %vm4360_vm13, %v4268_v61, 0.0  ;;  %vm11782_vm3 = vmmov %vm11777_vm0 }
 0x40c   : > { %v10215_v58 = vsel %vm1527_vm10, %v9823_v10, %v6697_v1  ;;  %v10219_v20 = vsel %vm1527_vm10, %v9827_v17, %v6698_v60  ;;  %v6663_v25 = vunpack.i.h.bf16 %v6661_v7  ;;  %v6662_v54 = vunpack.i.l.bf16 %v6661_v7 }
 0x40d   : > { %v6671_v49 = vpop.permute.xlu0 %6670  ;;  %v4378_v7 = vrot.slane %v10093_v43, 2 }
 0x40e   : > { %v3148_v32 = vsel %vm1527_vm10, %v9751_v45, %v6662_v54  ;;  %v3149_v10 = vsel %vm1527_vm10, %v9754_v11, %v6663_v25  ;;  %v6673_v1 = vunpack.i.h.bf16 %v6671_v49  ;;  %v6672_v17 = vunpack.i.l.bf16 %v6671_v49 }
 0x40f   : > { %v3180_v60 = vsel %vm1560_vm9, %v3148_v32, %v6667_v31  ;;  %v3181_v28 = vsel %vm1560_vm9, %v3149_v10, %v6668_v50  ;;  %v4372_v45 = vadd.f32 %v4371_v18, %v10091_v37  ;;  %v11765_v11 = vrot.slane %v10033_v51, 4 }
 0x410   : > { %v3212_v27 = vsel %vm1593_vm11, %v3180_v60, %v6672_v17  ;;  %v3213_v26 = vsel %vm1593_vm11, %v3181_v28, %v6673_v1  ;;  %v4379_v50 = vadd.f32 %v4378_v7, %v10093_v43  ;;  %v4385_v54 = vrot.slane %v4384_v21, 2 }
 0x411   : > { %v4391_v31 = vadd.f32 %v11765_v11, %v10033_v51  ;;  %v10243_v25 = vpop.permute.xlu2 %6710  ;;  %v11766_v49 = vrot.slane %v10002_v34, 2  ;;  %v4366_v37 = vrot.slane %v10154_v52, 1  ;;  %v4373_v18 = vrot.slane %v4372_v45, 1 }
 0x412   : > { %v4380_v51 = vrot.slane %v4379_v50, 1  ;;  %v4386_v17 = vadd.f32 %v4385_v54, %v4384_v21 }
 0x413   : > { %v4396_v42 = vsel %vm4360_vm13, %v11766_v49, 0.0  ;;  %v6676_v1 = vpop.permute.xlu1 %6675  ;;  %v4392_v60 = vrot.slane %v4391_v31, 2  ;;  %v10254_v34 = vadd.f32 %v4366_v37, %v10154_v52  ;;  %v10256_v11 = vadd.f32 %v4373_v18, %v4372_v45 }
 0x414   : > { %v4397_v28 = vrot.slane %v4396_v42, 4  ;;  %v6678_v43 = vunpack.i.h.bf16 %v6676_v1  ;;  %v6677_v7 = vunpack.i.l.bf16 %v6676_v1  ;;  %v10258_v49 = vadd.f32 %v4380_v51, %v4379_v50 }
 0x415   : > { %v6686_v61 = vpop.permute.xlu0 %6685  ;;  %v4387_v6 = vrot.slane %v4386_v17, 1  ;;  %v4393_v22 = vadd.f32 %v4392_v60, %v4391_v31  ;;  %v4404_v37 = vrot.slane %v4403_v48, 4  ;;  %v4410_v31 = vsel %vm4360_vm13, %v4269_v55, 0.0 }
 0x416   : > { %v4398_v13 = vadd.f32 %v4397_v28, %v4396_v42  ;;  %v6688_v32 = vunpack.i.h.bf16 %v6686_v61  ;;  %v6687_v10 = vunpack.i.l.bf16 %v6686_v61  ;;  %v3244_v2 = vsel %vm11767_vm6, %v3212_v27, %v6677_v7  ;;  %vm11783_vm6 = vmmov %vm11777_vm0 }
 0x417   : > { %v3245_v21 = vsel %vm11768_vm4, %v3213_v26, %v6678_v43  ;;  %v10262_v35 = vadd.f32 %v4387_v6, %v4386_v17  ;;  %v4394_v1 = vrot.slane %v4393_v22, 1  ;;  %v4411_v6 = vrot.slane %v4410_v31, 4  ;;  %vm11784_vm4 = vmmov %vm11781_vm2 }
 0x418   : > { %v3264_v54 = vpack.c.bf16 %v3245_v21, %v3244_v2  ;;  %v4399_v52 = vrot.slane %v4398_v13, 2  ;;  %v3198_v45 = vsel %vm1593_vm11, %v10189_v44, %v6687_v10  ;;  %v3199_v50 = vsel %vm1593_vm11, %v10199_v63, %v6688_v32 }
 0x419   : > { %v10269_v42 = vpop.permute.xlu2 %6725  ;;  %v10272_v27 = vadd.f32 %v4394_v1, %v4393_v22  ;;  %v11770_v2 = vrot.slane %v10012_v12, 4  ;;  %v4405_v63 = vadd.f32 %v4404_v37, %v4403_v48  ;;  %v4426_v55 = vadd.f32 %v4425_v53, %v10195_v57 }
 0x41a   : > { %5457 = vmatmul.msk.bf16.gmra.mxu2 %vm11769_vm8, %v3264_v54  ;;  %v4400_v26 = vadd.f32 %v4399_v52, %v4398_v13  ;;  %v6728_v44 = vunpack.i.h.bf16 %v10269_v42  ;;  %v6727_v10 = vunpack.i.l.bf16 %v10269_v42  ;;  %v4412_v17 = vadd.f32 %v4411_v6, %v4410_v31  ;;  %vm11785_vm8 = vmmov %vm11777_vm0 }
 0x41b   : > { %v4419_v18 = vadd.f32 %v11770_v2, %v10012_v12  ;;  %v6691_v32 = vpop.permute.xlu1 %6690  ;;  %v4433_v13 = vadd.f32 %v4432_v14, %v10204_v41  ;;  %v4406_v12 = vrot.slane %v4405_v63, 2  ;;  %v4427_v43 = vrot.slane %v4426_v55, 2 }
 0x41c   : > { %v4401_v51 = vrot.slane %v4400_v26, 1  ;;  %v6693_v60 = vunpack.i.h.bf16 %v6691_v32  ;;  %v6692_v28 = vunpack.i.l.bf16 %v6691_v32  ;;  %v4413_v48 = vrot.slane %v4412_v17, 2 }
 0x41d   : > { %v4420_v22 = vrot.slane %v4419_v18, 2  ;;  %v6701_v7 = vpop.permute.xlu0 %6700  ;;  %v4434_v54 = vrot.slane %v4433_v13, 2  ;;  %v4407_v31 = vadd.f32 %v4406_v12, %v4405_v63  ;;  %v4428_v2 = vadd.f32 %v4427_v43, %v4426_v55 }
 0x41e   : > { %v10285_v61 = vadd.f32 %v4401_v51, %v4400_v26  ;;  %v6703_v1 = vunpack.i.h.bf16 %v6701_v7  ;;  %v6702_v57 = vunpack.i.l.bf16 %v6701_v7  ;;  %v3230_v53 = vsel %vm11771_vm12, %v3198_v45, %v6692_v28  ;;  %vm11786_vm12 = vmmov %vm11777_vm0 }
 0x41f   : > { %v4421_v21 = vadd.f32 %v4420_v22, %v4419_v18  ;;  %v3231_v52 = vsel %vm11772_vm14, %v3199_v50, %v6693_v60  ;;  %v4414_v6 = vadd.f32 %v4413_v48, %v4412_v17  ;;  %v4435_v32 = vadd.f32 %v4434_v54, %v4433_v13  ;;  %vm11787_vm14 = vmmov %vm11781_vm2 }
 0x420   : > { %v3257_v37 = vpack.c.bf16 %v3231_v52, %v3230_v53  ;;  %v3182_v14 = vsel %vm1560_vm9, %v10215_v58, %v6702_v57  ;;  %v3183_v26 = vsel %vm1560_vm9, %v10219_v20, %v6703_v1  ;;  %v4408_v51 = vrot.slane %v4407_v31, 1 }
 0x421   : > { %v4422_v41 = vrot.slane %v4421_v21, 1  ;;  %v10293_v18 = vpop.permute.xlu2 %6740  ;;  %v4415_v45 = vrot.slane %v4414_v6, 1  ;;  %v4439_v50 = vrot.slane %v10211_v38, 4  ;;  %v4429_v58 = vrot.slane %v4428_v2, 1 }
 0x422   : > { %5450 = vmatmul.msk.bf16.gmra.mxu1 %vm11773_vm15, %v3257_v37  ;;  %v6743_v63 = vunpack.i.h.bf16 %v10293_v18  ;;  %v6742_v17 = vunpack.i.l.bf16 %v10293_v18  ;;  %v4436_v60 = vrot.slane %v4435_v32, 1  ;;  %v10301_v20 = vadd.f32 %v4408_v51, %v4407_v31 }
 0x423   : > { %v10296_v22 = vadd.f32 %v4422_v41, %v4421_v21  ;;  %v6706_v28 = vpop.permute.xlu1 %6705  ;;  %v10303_v55 = vadd.f32 %v4415_v45, %v4414_v6  ;;  %v4440_v13 = vadd.f32 %v4439_v50, %v10211_v38  ;;  %v4445_v12 = vsel %vm4360_vm13, %v10020_v33, 0.0 }
 0x424   : > { %v6708_v43 = vunpack.i.h.bf16 %v6706_v28  ;;  %v6707_v7 = vunpack.i.l.bf16 %v6706_v28  ;;  %v10308_v48 = vadd.f32 %v4429_v58, %v4428_v2  ;;  %v10310_v21 = vadd.f32 %v4436_v60, %v4435_v32 }
 0x425   : > { %v6716_v54 = vpop.permute.xlu0 %6715  ;;  %v4441_v1 = vrot.slane %v4440_v13, 2  ;;  %v4446_v57 = vrot.slane %v4445_v12, 4  ;;  %v11774_v53 = vrot.slane %v10020_v33, 2  ;;  %v11775_v37 = vrot.slane %v10020_v33, 4 }
 0x426   : > { %v3215_v31 = vsel %vm1593_vm11, %v3183_v26, %v6708_v43  ;;  %v3214_v6 = vsel %vm1593_vm11, %v3182_v14, %v6707_v7  ;;  %v6718_v41 = vunpack.i.h.bf16 %v6716_v54  ;;  %v6717_v2 = vunpack.i.l.bf16 %v6716_v54 }
 0x427   : > { %v4452_v52 = vsel %vm4360_vm13, %v11774_v53, 0.0  ;;  %v4459_v38 = vsel %vm4360_vm13, %v11775_v37, 0.0  ;;  %v11776_v32 = vunpack.i.l.bf16 %v10243_v25  ;;  %v11778_v45 = vunpack.i.h.bf16 %v10243_v25 }
 0x428   : > { %v4442_v58 = vadd.f32 %v4441_v1, %v4440_v13  ;;  %v4447_v60 = vadd.f32 %v4446_v57, %v4445_v12  ;;  %v3168_v28 = vsel %vm1560_vm9, %v9880_v40, %v6717_v2  ;;  %v3169_v26 = vsel %vm1560_vm9, %v9884_v29, %v6718_v41 }
 0x429   : > { %v3246_v51 = vsel %vm11777_vm0, %v3214_v6, %v11776_v32  ;;  %v3247_v50 = vsel %vm11779_vm1, %v3215_v31, %v11778_v45  ;;  %v4453_v14 = vrot.slane %v4452_v52, 4  ;;  %v10330_v7 = vpop.permute.xlu2 %6755  ;;  %v4460_v37 = vrot.slane %v4459_v38, 4 }
 0x42a   : > { %v3265_v43 = vpack.c.bf16 %v3247_v50, %v3246_v51  ;;  %v4443_v54 = vrot.slane %v4442_v58, 1  ;;  %v4448_v53 = vrot.slane %v4447_v60, 2  ;;  %v11780_v6 = vrot.slane %v10020_v33, 6 }
 0x42b   : > { %v4454_v40 = vadd.f32 %v4453_v14, %v4452_v52  ;;  %v6721_v29 = vpop.permute.xlu1 %6720  ;;  %v4461_v41 = vadd.f32 %v4460_v37, %v4459_v38  ;;  %v10339_v2 = vmul.f32 0.25, %v10254_v34  ;;  %v10342_v12 = vmul.f32 0.25, %v10256_v11 }
 0x42c   : > { %v4466_v25 = vsel %vm4360_vm13, %v11780_v6, 0.0  ;;  %5458 = vmatmul.msk.bf16.gmra.mxu2 %vm11781_vm2, %v3265_v43  ;;  %v4444_v57 = vadd.f32 %v4443_v54, %v4442_v58  ;;  %v4449_v31 = vadd.f32 %v4448_v53, %v4447_v60  ;;  %v6723_v32 = vunpack.i.h.bf16 %v6721_v29 }
 0x42d   : > { %v4467_v1 = vrot.slane %v4466_v25, 4  ;;  %v6722_v51 = vunpack.i.l.bf16 %v6721_v29  ;;  %v4455_v33 = vrot.slane %v4454_v40, 2  ;;  %v6731_v50 = vpop.permute.xlu0 %6730  ;;  %v4462_v13 = vrot.slane %v4461_v41, 2 }
 0x42e   : > { %v4450_v6 = vrot.slane %v4449_v31, 1  ;;  %v10345_v52 = vmul.f32 0.25, %v10258_v49  ;;  %v3201_v38 = vsel %vm1593_vm11, %v3169_v26, %v6723_v32  ;;  %v6733_v60 = vunpack.i.h.bf16 %v6731_v50 }
 0x42f   : > { %v4468_v45 = vadd.f32 %v4467_v1, %v4466_v25  ;;  %v3200_v58 = vsel %vm1593_vm11, %v3168_v28, %v6722_v51  ;;  %v6732_v34 = vunpack.i.l.bf16 %v6731_v50  ;;  %v3233_v14 = vsel %vm11783_vm6, %v3201_v38, %v6728_v44 }
 0x430   : > { %v3232_v43 = vsel %vm11782_vm3, %v3200_v58, %v6727_v10  ;;  %v4451_v54 = vadd.f32 %v4450_v6, %v4449_v31  ;;  %v4456_v11 = vadd.f32 %v4455_v33, %v4454_v40  ;;  %v3153_v28 = vsel %vm1527_vm10, %v9844_v8, %v6733_v60 }
 0x431   : > { %v3152_v49 = vsel %vm1527_vm10, %v9848_v36, %v6732_v34  ;;  %v3258_v53 = vpack.c.bf16 %v3233_v14, %v3232_v43  ;;  %v4463_v26 = vadd.f32 %v4462_v13, %v4461_v41  ;;  %v6771_v37 = vpop.permute.xlu2 %6770  ;;  %v4469_v1 = vrot.slane %v4468_v45, 2 }
 0x432   : > { %v4457_v25 = vrot.slane %v4456_v11, 1  ;;  %v4812_v29 = vmul.f32 0.25, %v10262_v35  ;;  %v4813_v10 = vmul.f32 0.25, %v10272_v27  ;;  %v6773_v42 = vunpack.i.h.bf16 %v6771_v37 }
 0x433   : > { %v6772_v32 = vunpack.i.l.bf16 %v6771_v37  ;;  %5451 = vmatmul.msk.bf16.gmra.mxu1 %vm11784_vm4, %v3258_v53  ;;  %v4464_v44 = vrot.slane %v4463_v26, 1  ;;  %v4814_v40 = vmul.f32 0.25, %v10285_v61  ;;  %v6736_v36 = vpop.permute.xlu1 %6735  ;;  %v4470_v51 = vadd.f32 %v4469_v1, %v4468_v45 }
 0x434   : > { %v4458_v31 = vadd.f32 %v4457_v25, %v4456_v11  ;;  %v4815_v8 = vmul.f32 0.25, %v10301_v20  ;;  %v4816_v13 = vmul.f32 0.25, %v10303_v55  ;;  %v10371_v35 = vsel %vm1527_vm10, %v9778_v24, %v6773_v42 }
 0x435   : > { %v10367_v41 = vsel %vm1527_vm10, %v9775_v59, %v6772_v32  ;;  %v6738_v27 = vunpack.i.h.bf16 %v6736_v36  ;;  %v6737_v33 = vunpack.i.l.bf16 %v6736_v36  ;;  %v6746_v50 = vpop.permute.xlu0 %6745  ;;  %v4465_v6 = vadd.f32 %v4464_v44, %v4463_v26 }
 0x436   : > { %v4471_v61 = vrot.slane %v4470_v51, 1  ;;  %v4817_v58 = vmul.f32 0.25, %v10296_v22  ;;  %v4818_v45 = vmul.f32 0.25, %v10308_v48  ;;  %v6748_v38 = vunpack.i.h.bf16 %v6746_v50 }
 0x437   : > { %v3184_v20 = vsel %vm1560_vm9, %v3152_v49, %v6737_v33  ;;  %v3185_v55 = vsel %vm1560_vm9, %v3153_v28, %v6738_v27  ;;  %v6747_v59 = vunpack.i.l.bf16 %v6746_v50  ;;  %v4819_v43 = vmul.f32 0.25, %v10310_v21 }
 0x438   : > { %v3216_v24 = vsel %vm1593_vm11, %v3184_v20, %v6742_v17  ;;  %v3217_v60 = vsel %vm1593_vm11, %v3185_v55, %v6743_v63  ;;  %v4472_v34 = vadd.f32 %v4471_v61, %v4470_v51  ;;  %v4820_v14 = vmul.f32 0.25, %v4444_v57 }
 0x439   : > { %v3248_v22 = vsel %vm11785_vm8, %v3216_v24, %v6747_v59  ;;  %v3249_v48 = vsel %vm11786_vm12, %v3217_v60, %v6748_v38  ;;  %v4821_v11 = vmul.f32 0.25, %v4451_v54  ;;  %v10386_v28 = vpop.permute.xlu2 %6785  ;;  %v4822_v53 = vmul.f32 0.25, %v4458_v31  ;;  %vm11790_vm12 = vmmov %vm11785_vm8 }
 0x43a   : > { %v3266_v49 = vpack.c.bf16 %v3249_v48, %v3248_v22  ;;  %v4823_v26 = vmul.f32 0.25, %v4465_v6  ;;  %v4824_v37 = vmul.f32 0.25, %v4472_v34  ;;  %v6788_v17 = vunpack.i.h.bf16 %v10386_v28 }
 0x43b   : > { %v6787_v18 = vunpack.i.l.bf16 %v10386_v28  ;;  %v4873_v63 = vpack.c.bf16 %v10339_v2, %v10339_v2  ;;  %v4874_v21 = vpack.c.bf16 %v10342_v12, %v10342_v12  ;;  %v4875_v57 = vpack.c.bf16 %v10345_v52, %v10345_v52  ;;  %v6751_v2 = vpop.permute.xlu1 %6750 }
 0x43c   : > { %v4876_v54 = vpack.c.bf16 %v4812_v29, %v4812_v29  ;;  %v4877_v25 = vpack.c.bf16 %v4813_v10, %v4813_v10  ;;  %v4878_v1 = vpack.c.bf16 %v4814_v40, %v4814_v40  ;;  %5459 = vmatmul.msk.bf16.vlgmr.msrb.gmra.mxu3 %vm11787_vm14, %v3266_v49  ;;  %v4879_v42 = vpack.c.bf16 %v4815_v8, %v4815_v8 }
 0x43d   : > { %v4880_v32 = vpack.c.bf16 %v4816_v13, %v4816_v13  ;;  %v4881_v44 = vpack.c.bf16 %v4817_v58, %v4817_v58  ;;  %v4882_v36 = vpack.c.bf16 %v4818_v45, %v4818_v45  ;;  %v4883_v31 = vpack.c.bf16 %v4819_v43, %v4819_v43  ;;  %v6761_v50 = vpop.permute.xlu0 %6760 }
 0x43e   : > { %v4884_v51 = vpack.c.bf16 %v4820_v14, %v4820_v14  ;;  %v4885_v27 = vpack.c.bf16 %v4821_v11, %v4821_v11  ;;  %v4886_v33 = vpack.c.bf16 %v4822_v53, %v4822_v53  ;;  %v4887_v6 = vpack.c.bf16 %v4823_v26, %v4823_v26 }
 0x43f   : > { %v4888_v12 = vpack.c.bf16 %v4824_v37, %v4824_v37  ;;  %v5002_v61 = vunpack.c.l.b16 %v4873_v63  ;;  %v5003_v20 = vunpack.c.l.b16 %v4874_v21  ;;  %v5004_v52 = vunpack.c.l.b16 %v4875_v57 }
 0x440   : > { %v5005_v29 = vunpack.c.l.b16 %v4876_v54  ;;  %v5006_v10 = vunpack.c.l.b16 %v4877_v25  ;;  %v5007_v40 = vunpack.c.l.b16 %v4878_v1  ;;  %v5008_v55 = vunpack.c.l.b16 %v4879_v42 }
 0x441   : > { %v5009_v38 = vunpack.c.l.b16 %v4880_v32  ;;  %v5010_v8 = vunpack.c.l.b16 %v4881_v44  ;;  %v5011_v13 = vunpack.c.l.b16 %v4882_v36  ;;  %v5012_v58 = vunpack.c.l.b16 %v4883_v31  ;;  %v10413_v44 = vld [vmem:[%s11227_s4] ss:$0 sm:$0xff] }
 0x442   : > { %v5013_v45 = vunpack.c.l.b16 %v4884_v51  ;;  %v5014_v59 = vunpack.c.l.b16 %v4885_v27  ;;  %v5015_v24 = vunpack.c.l.b16 %v4886_v33  ;;  %v5016_v60 = vunpack.c.l.b16 %v4887_v6 }
 0x443   : > { %v5017_v34 = vunpack.c.l.b16 %v4888_v12  ;;  %vm5066_vm15 = vcmask 1041409   ;;  %vm5068_vm0 = vcmask 1042434   ;;  %vm5070_vm1 = vcmask 1043459   ;;  %v6766_v42 = vpop.permute.xlu1 %6765 }
 0x444   : > { %v5067_v43 = vsel %vm5066_vm15, %v5003_v20, %v5002_v61  ;;  %vm5072_vm2 = vcmask 1044484   ;;  %vm5074_vm3 = vcmask 1045509   ;;  %vm5076_vm6 = vcmask 1046534  }
 0x445   : > { %v5069_v22 = vsel %vm5068_vm0, %v5004_v52, %v5067_v43  ;;  %vm5078_vm4 = vcmask 1047559   ;;  %v5080_v48 = vsel %vm5066_vm15, %v5011_v13, %v5010_v8  ;;  %v6753_v49 = vunpack.i.h.bf16 %v6751_v2  ;;  %v6776_v32 = vpop.permute.xlu0 %6775 }
 0x446   : > { %v5071_v14 = vsel %vm5070_vm1, %v5005_v29, %v5069_v22  ;;  %v5081_v11 = vsel %vm5068_vm0, %v5012_v58, %v5080_v48  ;;  %v6752_v53 = vunpack.i.l.bf16 %v6751_v2  ;;  %v6763_v63 = vunpack.i.h.bf16 %v6761_v50 }
 0x447   : > { %v5073_v26 = vsel %vm5072_vm2, %v5006_v10, %v5071_v14  ;;  %v5082_v37 = vsel %vm5070_vm1, %v5013_v45, %v5081_v11  ;;  %v6762_v21 = vunpack.i.l.bf16 %v6761_v50  ;;  %v3139_v25 = vsel %vm1527_vm10, %v9768_v47, %v6753_v49 }
 0x448   : > { %v5075_v57 = vsel %vm5074_vm3, %v5007_v40, %v5073_v26  ;;  %v5083_v54 = vsel %vm5072_vm2, %v5014_v59, %v5082_v37  ;;  %v3138_v1 = vsel %vm1527_vm10, %v9764_v4, %v6752_v53  ;;  %v11788_v51 = vunpack.i.l.bf16 %v10330_v7  ;;  %v3351_v4 = vpop.f32.mrf.mxu1 }
 0x449   : > { %v5077_v36 = vsel %vm5076_vm6, %v5008_v55, %v5075_v57  ;;  %v5084_v31 = vsel %vm5074_vm3, %v5015_v24, %v5083_v54  ;;  %v11789_v47 = vunpack.i.h.bf16 %v10330_v7  ;;  %v6768_v20 = vunpack.i.h.bf16 %v6766_v42 }
 0x44a   : > { %v3170_v27 = vsel %vm1560_vm9, %v3138_v1, %v11788_v51  ;;  %v5079_v2 = vsel %vm5078_vm4, %v5009_v38, %v5077_v36  ;;  %v5085_v50 = vsel %vm5076_vm6, %v5016_v60, %v5084_v31  ;;  %v6767_v52 = vunpack.i.l.bf16 %v6766_v42 }
 0x44b   : > { %v3171_v33 = vsel %vm1560_vm9, %v3139_v25, %v11789_v47  ;;  %v3202_v6 = vsel %vm1593_vm11, %v3170_v27, %v6762_v21  ;;  %v5086_v61 = vsel %vm5078_vm4, %v5017_v34, %v5085_v50  ;;  %v6778_v29 = vunpack.i.h.bf16 %v6776_v32 }
 0x44c   : > { %v3203_v12 = vsel %vm1593_vm11, %v3171_v33, %v6763_v63  ;;  %v5129_v10 = vpack.c.b16 %v5086_v61, %v5079_v2  ;;  %v6777_v40 = vunpack.i.l.bf16 %v6776_v32  ;;  %v3352_v7 = vadd.f32 %v10413_v44, %v3351_v4 }
 0x44d   : > { %v4277_v55 = vrot.slane %v10098_v62, 4  ;;  %v10432_v38 = vsel %vm1560_vm9, %v10371_v35, %v6778_v29  ;;  %v3234_v8 = vsel %vm11785_vm8, %v3202_v6, %v6767_v52  ;;  %v3235_v13 = vsel %vm11790_vm12, %v3203_v12, %v6768_v20 }
 0x44e   : > { %v4278_v58 = vrot.slane %v10098_v62, 6  ;;  %5461 = vmatmul.msk.bf16.vlgmr.msrb.gmra.mxu2 %vm1395_vm5, %v5129_v10  ;;  %v10440_v45 = vsel %vm1560_vm9, %v10367_v41, %v6777_v40  ;;  %vm3431_vm14 = vcmp.ge.f32.partialorder %v3352_v7, 0.0  ;;  %v3463_v59 = vmul.f32 0.2, %v3352_v7 }
 0x44f   : > { %v3259_v24 = vpack.c.bf16 %v3235_v13, %v3234_v8  ;;  %v4279_v60 = vrot.slane %v10087_v56, 2  ;;  %v4280_v35 = vrot.slane %v10087_v56, 4  ;;  %v4281_v34 = vrot.slane %v10087_v56, 6 }
 0x450   : > { %v4283_v43 = vrot.slane %v10084_v15, 4  ;;  %v3495_v22 = vsel %vm3431_vm14, %v3352_v7, %v3463_v59  ;;  %vm11791_vm8 = vcmask 293888   ;;  %v4284_v48 = vrot.slane %v10084_v15, 6  ;;  %vm11795_vm14 = vmmov %vm11790_vm12 }
 0x451   : > { %5452 = vmatmul.msk.bf16.gmra.mxu1 %vm11791_vm8, %v3259_v24  ;;  %v4285_v14 = vrot.slane %v10064_v16, 2  ;;  %v4286_v41 = vrot.slane %v10064_v16, 4  ;;  %v10451_v11 = vsel %vm1428_vm7, %v3495_v22, 0.0  ;;  %v4287_v49 = vrot.slane %v10064_v16, 6 }
 0x452   : > { %v4473_v53 = vsel %vm4360_vm13, %v10098_v62, 0.0  ;;  %v11792_v26 = vrot.slane %v10098_v62, 2  ;;  %v4487_v57 = vsel %vm4360_vm13, %v4277_v55, 0.0  ;;  %v4494_v54 = vsel %vm4360_vm13, %v4278_v58, 0.0 }
 0x453   : > { %v4474_v63 = vrot.slane %v4473_v53, 4  ;;  %v4488_v25 = vrot.slane %v4487_v57, 4  ;;  %v4495_v1 = vrot.slane %v4494_v54, 4  ;;  %v4501_v42 = vsel %vm4360_vm13, %v10087_v56, 0.0 }
 0x454   : > { %v4480_v37 = vsel %vm4360_vm13, %v11792_v26, 0.0  ;;  %v4508_v32 = vsel %vm4360_vm13, %v4279_v60, 0.0  ;;  %v4502_v51 = vrot.slane %v4501_v42, 4  ;;  %v4515_v33 = vsel %vm4360_vm13, %v4280_v35, 0.0 }
 0x455   : > { %v4481_v21 = vrot.slane %v4480_v37, 4  ;;  %v4475_v36 = vadd.f32 %v4474_v63, %v4473_v53  ;;  %v4509_v27 = vrot.slane %v4508_v32, 4  ;;  %v4489_v62 = vadd.f32 %v4488_v25, %v4487_v57 }
 0x456   : > { %v4496_v47 = vadd.f32 %v4495_v1, %v4494_v54  ;;  %v4522_v4 = vsel %vm4360_vm13, %v4281_v34, 0.0  ;;  %v4503_v6 = vadd.f32 %v4502_v51, %v4501_v42  ;;  %v4516_v52 = vrot.slane %v4515_v33, 4 }
 0x457   : > { %v4482_v31 = vadd.f32 %v4481_v21, %v4480_v37  ;;  %v4476_v2 = vrot.slane %v4475_v36, 2  ;;  %v4510_v12 = vadd.f32 %v4509_v27, %v4508_v32  ;;  %v4490_v61 = vrot.slane %v4489_v62, 2 }
 0x458   : > { %v4497_v20 = vrot.slane %v4496_v47, 2  ;;  %v4523_v56 = vrot.slane %v4522_v4, 4  ;;  %v4504_v40 = vrot.slane %v4503_v6, 2  ;;  %v4517_v13 = vadd.f32 %v4516_v52, %v4515_v33 }
 0x459   : > { %v4483_v50 = vrot.slane %v4482_v31, 2  ;;  %v4477_v29 = vadd.f32 %v4476_v2, %v4475_v36  ;;  %v4511_v7 = vrot.slane %v4510_v12, 2  ;;  %v4491_v55 = vadd.f32 %v4490_v61, %v4489_v62 }
 0x45a   : > { %v4498_v8 = vadd.f32 %v4497_v20, %v4496_v47  ;;  %v4524_v58 = vadd.f32 %v4523_v56, %v4522_v4  ;;  %v4505_v60 = vadd.f32 %v4504_v40, %v4503_v6  ;;  %v4518_v53 = vrot.slane %v4517_v13, 2 }
 0x45b   : > { %v4484_v10 = vadd.f32 %v4483_v50, %v4482_v31  ;;  %v4478_v59 = vrot.slane %v4477_v29, 1  ;;  %v4512_v35 = vadd.f32 %v4511_v7, %v4510_v12  ;;  %v4492_v34 = vrot.slane %v4491_v55, 1 }
 0x45c   : > { %v4499_v22 = vrot.slane %v4498_v8, 1  ;;  %v4525_v26 = vrot.slane %v4524_v58, 2  ;;  %v4506_v21 = vrot.slane %v4505_v60, 1  ;;  %v4519_v1 = vadd.f32 %v4518_v53, %v4517_v13 }
 0x45d   : > { %v4485_v24 = vrot.slane %v4484_v10, 1  ;;  %v4479_v37 = vadd.f32 %v4478_v59, %v4477_v29  ;;  %v4513_v57 = vrot.slane %v4512_v35, 1  ;;  %v10466_v54 = vadd.f32 %v4492_v34, %v4491_v55 }
 0x45e   : > { %v10468_v25 = vadd.f32 %v4499_v22, %v4498_v8  ;;  %v4526_v42 = vadd.f32 %v4525_v26, %v4524_v58  ;;  %v10470_v32 = vadd.f32 %v4506_v21, %v4505_v60  ;;  %v4529_v31 = vsel %vm4360_vm13, %v10084_v15, 0.0 }
 0x45f   : > { %v4486_v63 = vadd.f32 %v4485_v24, %v4484_v10  ;;  %v10472_v36 = vadd.f32 %v4513_v57, %v4512_v35  ;;  %v11793_v51 = vrot.slane %v10084_v15, 2  ;;  %v4520_v62 = vrot.slane %v4519_v1, 1 }
 0x460   : > { %v4527_v47 = vrot.slane %v4526_v42, 1  ;;  %v4530_v33 = vrot.slane %v4529_v31, 4  ;;  %v4543_v2 = vsel %vm4360_vm13, %v4283_v43, 0.0  ;;  %v4550_v50 = vsel %vm4360_vm13, %v4284_v48, 0.0 }
 0x461   : > { %v4536_v27 = vsel %vm4360_vm13, %v11793_v51, 0.0  ;;  %v4557_v6 = vsel %vm4360_vm13, %v10064_v16, 0.0  ;;  %v4564_v12 = vsel %vm4360_vm13, %v4285_v14, 0.0  ;;  %v4521_v61 = vadd.f32 %v4520_v62, %v4519_v1 }
 0x462   : > { %v4537_v4 = vrot.slane %v4536_v27, 4  ;;  %v4528_v20 = vadd.f32 %v4527_v47, %v4526_v42  ;;  %v4531_v52 = vadd.f32 %v4530_v33, %v4529_v31  ;;  %v4544_v29 = vrot.slane %v4543_v2, 4 }
 0x463   : > { %v4551_v10 = vrot.slane %v4550_v50, 4  ;;  %v4558_v40 = vrot.slane %v4557_v6, 4  ;;  %v4565_v7 = vrot.slane %v4564_v12, 4  ;;  %v4571_v15 = vsel %vm4360_vm13, %v4286_v41, 0.0 }
 0x464   : > { %v4538_v56 = vadd.f32 %v4537_v4, %v4536_v27  ;;  %v4532_v43 = vrot.slane %v4531_v52, 2  ;;  %v4578_v48 = vsel %vm4360_vm13, %v4287_v49, 0.0  ;;  %v4545_v8 = vadd.f32 %v4544_v29, %v4543_v2 }
 0x465   : > { %v4552_v14 = vadd.f32 %v4551_v10, %v4550_v50  ;;  %v4559_v13 = vadd.f32 %v4558_v40, %v4557_v6  ;;  %v4566_v58 = vadd.f32 %v4565_v7, %v4564_v12  ;;  %v4572_v60 = vrot.slane %v4571_v15, 4 }
 0x466   : > { %v4539_v55 = vrot.slane %v4538_v56, 2  ;;  %v4533_v59 = vadd.f32 %v4532_v43, %v4531_v52  ;;  %v4579_v35 = vrot.slane %v4578_v48, 4  ;;  %v4546_v34 = vrot.slane %v4545_v8, 2 }
 0x467   : > { %v4553_v22 = vrot.slane %v4552_v14, 2  ;;  %v4560_v53 = vrot.slane %v4559_v13, 2  ;;  %v4567_v26 = vrot.slane %v4566_v58, 2  ;;  %v4573_v1 = vadd.f32 %v4572_v60, %v4571_v15 }
 0x468   : > { %v4540_v24 = vadd.f32 %v4539_v55, %v4538_v56  ;;  %v4534_v21 = vrot.slane %v4533_v59, 1  ;;  %v4580_v41 = vadd.f32 %v4579_v35, %v4578_v48  ;;  %v4547_v42 = vadd.f32 %v4546_v34, %v4545_v8 }
 0x469   : > { %v4554_v16 = vadd.f32 %v4553_v22, %v4552_v14  ;;  %v4561_v31 = vadd.f32 %v4560_v53, %v4559_v13  ;;  %v4568_v49 = vadd.f32 %v4567_v26, %v4566_v58  ;;  %v4574_v62 = vrot.slane %v4573_v1, 2 }
 0x46a   : > { %v4541_v57 = vrot.slane %v4540_v24, 1  ;;  %v4535_v51 = vadd.f32 %v4534_v21, %v4533_v59  ;;  %v4581_v47 = vrot.slane %v4580_v41, 2  ;;  %v4548_v33 = vrot.slane %v4547_v42, 1 }
 0x46b   : > { %v4555_v4 = vrot.slane %v4554_v16, 1  ;;  %v4562_v2 = vrot.slane %v4561_v31, 1  ;;  %v4569_v50 = vrot.slane %v4568_v49, 1  ;;  %v4575_v6 = vadd.f32 %v4574_v62, %v4573_v1 }
 0x46c   : > { %v4542_v27 = vadd.f32 %v4541_v57, %v4540_v24  ;;  %v4582_v12 = vadd.f32 %v4581_v47, %v4580_v41  ;;  %v4825_v52 = vmul.f32 0.25, %v4479_v37  ;;  %v4826_v56 = vmul.f32 0.25, %v4486_v63  ;;  %v10500_v41 = vpop.permute.xlu1 %6780 }
 0x46d   : > { %v4549_v29 = vadd.f32 %v4548_v33, %v4547_v42  ;;  %v4556_v10 = vadd.f32 %v4555_v4, %v4554_v16  ;;  %v4563_v40 = vadd.f32 %v4562_v2, %v4561_v31  ;;  %v4570_v7 = vadd.f32 %v4569_v50, %v4568_v49  ;;  %v3353_v2 = vpop.f32.mrf.mxu1 }
 0x46e   : > { %v4576_v43 = vrot.slane %v4575_v6, 1  ;;  %v4583_v55 = vrot.slane %v4582_v12, 1  ;;  %v4827_v15 = vmul.f32 0.25, %v10466_v54  ;;  %v4828_v48 = vmul.f32 0.25, %v10468_v25 }
 0x46f   : > { %v4829_v8 = vmul.f32 0.25, %v10470_v32  ;;  %v4830_v14 = vmul.f32 0.25, %v10472_v36  ;;  %v4831_v13 = vmul.f32 0.25, %v4521_v61  ;;  %v4832_v58 = vmul.f32 0.25, %v4528_v20 }
 0x470   : > { %v4577_v59 = vadd.f32 %v4576_v43, %v4575_v6  ;;  %v4584_v24 = vadd.f32 %v4583_v55, %v4582_v12  ;;  %v4833_v37 = vmul.f32 0.25, %v4535_v51  ;;  %v4834_v63 = vmul.f32 0.25, %v4542_v27  ;;  %v6791_v27 = vpop.permute.xlu0 %6790 }
 0x471   : > { %v4835_v60 = vmul.f32 0.25, %v4549_v29  ;;  %v4836_v35 = vmul.f32 0.25, %v4556_v10  ;;  %v4837_v34 = vmul.f32 0.25, %v4563_v40  ;;  %v4838_v22 = vmul.f32 0.25, %v4570_v7 }
 0x472   : > { %v4839_v53 = vmul.f32 0.25, %v4577_v59  ;;  %v4840_v26 = vmul.f32 0.25, %v4584_v24  ;;  %v4889_v21 = vpack.c.bf16 %v4825_v52, %v4825_v52  ;;  %v4890_v54 = vpack.c.bf16 %v4826_v56, %v4826_v56 }
 0x473   : > { %v4891_v57 = vpack.c.bf16 %v4827_v15, %v4827_v15  ;;  %v4892_v25 = vpack.c.bf16 %v4828_v48, %v4828_v48  ;;  %v4893_v1 = vpack.c.bf16 %v4829_v8, %v4829_v8  ;;  %v4894_v32 = vpack.c.bf16 %v4830_v14, %v4830_v14 }
 0x474   : > { %v4895_v36 = vpack.c.bf16 %v4831_v13, %v4831_v13  ;;  %v4896_v61 = vpack.c.bf16 %v4832_v58, %v4832_v58  ;;  %v4897_v20 = vpack.c.bf16 %v4833_v37, %v4833_v37  ;;  %v4898_v42 = vpack.c.bf16 %v4834_v63, %v4834_v63 }
 0x475   : > { %v4899_v16 = vpack.c.bf16 %v4835_v60, %v4835_v60  ;;  %v4900_v31 = vpack.c.bf16 %v4836_v35, %v4836_v35  ;;  %v4901_v49 = vpack.c.bf16 %v4837_v34, %v4837_v34  ;;  %v4902_v51 = vpack.c.bf16 %v4838_v22, %v4838_v22 }
 0x476   : > { %v4903_v62 = vpack.c.bf16 %v4839_v53, %v4839_v53  ;;  %v4904_v47 = vpack.c.bf16 %v4840_v26, %v4840_v26  ;;  %v5018_v33 = vunpack.c.l.b16 %v4889_v21  ;;  %v5019_v4 = vunpack.c.l.b16 %v4890_v54  ;;  %v6796_v54 = vpop.permute.xlu1 %6795 }
 0x477   : > { %v5020_v50 = vunpack.c.l.b16 %v4891_v57  ;;  %v5021_v6 = vunpack.c.l.b16 %v4892_v25  ;;  %v5022_v12 = vunpack.c.l.b16 %v4893_v1  ;;  %v5023_v52 = vunpack.c.l.b16 %v4894_v32  ;;  %v11794_v32 = vld [vmem:[#allocation39_spill] sm:$0xff] }
 0x478   : > { %v5024_v56 = vunpack.c.l.b16 %v4895_v36  ;;  %v5025_v29 = vunpack.c.l.b16 %v4896_v61  ;;  %v5026_v10 = vunpack.c.l.b16 %v4897_v20  ;;  %v5027_v40 = vunpack.c.l.b16 %v4898_v42  ;;  %v10528_v42 = vpop.permute.xlu0 %6800 }
 0x479   : > { %v5028_v7 = vunpack.c.l.b16 %v4899_v16  ;;  %v5029_v43 = vunpack.c.l.b16 %v4900_v31  ;;  %v5030_v55 = vunpack.c.l.b16 %v4901_v49  ;;  %v5031_v15 = vunpack.c.l.b16 %v4902_v51  ;;  %v3356_v51 = vpop.f32.mrf.mxu1 }
 0x47a   : > { %v5032_v48 = vunpack.c.l.b16 %v4903_v62  ;;  %v5033_v8 = vunpack.c.l.b16 %v4904_v47  ;;  %v5087_v14 = vsel %vm5066_vm15, %v5019_v4, %v5018_v33  ;;  %v5094_v13 = vsel %vm5066_vm15, %v5027_v40, %v5026_v10 }
 0x47b   : > { %v5088_v58 = vsel %vm5068_vm0, %v5020_v50, %v5087_v14  ;;  %v5095_v59 = vsel %vm5068_vm0, %v5028_v7, %v5094_v13  ;;  %v6783_v24 = vunpack.i.h.bf16 %v10500_v41  ;;  %v6782_v37 = vunpack.i.l.bf16 %v10500_v41 }
 0x47c   : > { %v5089_v63 = vsel %vm5070_vm1, %v5021_v6, %v5088_v58  ;;  %v5096_v60 = vsel %vm5070_vm1, %v5029_v43, %v5095_v59  ;;  %v6793_v35 = vunpack.i.h.bf16 %v6791_v27  ;;  %v6792_v34 = vunpack.i.l.bf16 %v6791_v27 }
 0x47d   : > { %v5090_v22 = vsel %vm5072_vm2, %v5022_v12, %v5089_v63  ;;  %v5097_v53 = vsel %vm5072_vm2, %v5030_v55, %v5096_v60  ;;  %v3218_v26 = vsel %vm1593_vm11, %v10440_v45, %v6782_v37  ;;  %v3219_v21 = vsel %vm1593_vm11, %v10432_v38, %v6782_v37 }
 0x47e   : > { %v5091_v57 = vsel %vm5074_vm3, %v5023_v52, %v5090_v22  ;;  %v5098_v25 = vsel %vm5074_vm3, %v5031_v15, %v5097_v53  ;;  %v3140_v1 = vsel %vm1527_vm10, %v9786_v0, %v6792_v34  ;;  %v3141_v36 = vsel %vm1527_vm10, %v11794_v32, %v6793_v35 }
 0x47f   : > { %v5092_v61 = vsel %vm5076_vm6, %v5024_v56, %v5091_v57  ;;  %v5099_v20 = vsel %vm5076_vm6, %v5032_v48, %v5098_v25  ;;  %v3354_v45 = vadd.f32 %v10413_v44, %v3353_v2  ;;  %v3250_v38 = vsel %vm11790_vm12, %v3218_v26, %v6787_v18 }
 0x480   : > { %v5093_v16 = vsel %vm5078_vm4, %v5025_v29, %v5092_v61  ;;  %v5100_v31 = vsel %vm5078_vm4, %v5033_v8, %v5099_v20  ;;  %v3251_v0 = vsel %vm11795_vm14, %v3219_v21, %v6788_v17  ;;  %v6798_v49 = vunpack.i.h.bf16 %v6796_v54 }
 0x481   : > { %v5130_v27 = vpack.c.b16 %v5100_v31, %v5093_v16  ;;  %vm3432_vm10 = vcmp.ge.f32.partialorder %v3354_v45, 0.0  ;;  %v3464_v62 = vmul.f32 0.2, %v3354_v45  ;;  %v3267_v47 = vpack.c.bf16 %v3251_v0, %v3250_v38 }
 0x482   : > { %v6797_v33 = vunpack.i.l.bf16 %v6796_v54  ;;  %v10536_v4 = vsel %vm1560_vm9, %v3141_v36, %v6798_v49  ;;  %v6803_v18 = vunpack.i.h.bf16 %v10528_v42  ;;  %v6802_v2 = vunpack.i.l.bf16 %v10528_v42 }
 0x483   : > { %5462 = vmatmul.msk.bf16.gmra.mxu2 %vm1395_vm5, %v5130_v27  ;;  %v3496_v50 = vsel %vm3432_vm10, %v3354_v45, %v3464_v62  ;;  %5460 = vmatmul.msk.bf16.gmra.mxu3 %vm11791_vm8, %v3267_v47  ;;  %v3357_v28 = vadd.f32 %v10413_v44, %v3356_v51  ;;  %vm3687_vm12 = vcmask 58368   ;;  %v4289_v17 = vrot.slane %v10117_v23, 4 }
 0x484   : > { %v10545_v6 = vsel %vm1428_vm7, %v3496_v50, 0.0  ;;  %v10548_v12 = vsel %vm1560_vm9, %v3140_v1, %v6797_v33  ;;  %v4290_v52 = vrot.slane %v10117_v23, 6  ;;  %v4291_v56 = vrot.slane %v10156_v46, 2 }
 0x485   : > { %vm3433_vm14 = vcmp.ge.f32.partialorder %v3357_v28, 0.0  ;;  %v3465_v29 = vmul.f32 0.2, %v3357_v28  ;;  %v4292_v10 = vrot.slane %v10156_v46, 4  ;;  %v4293_v40 = vrot.slane %v10156_v46, 6 }
 0x486   : > { %v4295_v7 = vrot.slane %v10140_v19, 4  ;;  %v4296_v43 = vrot.slane %v10140_v19, 6  ;;  %v4297_v55 = vrot.slane %v10162_v9, 2  ;;  %v4298_v15 = vrot.slane %v10162_v9, 4 }
 0x487   : > { %v3497_v48 = vsel %vm3433_vm14, %v3357_v28, %v3465_v29  ;;  %v4299_v8 = vrot.slane %v10162_v9, 6  ;;  %v4585_v14 = vsel %vm4360_vm13, %v10117_v23, 0.0  ;;  %v11796_v13 = vrot.slane %v10117_v23, 2 }
 0x488   : > { %v3528_v59 = vsel %vm1428_vm7, %v3497_v48, 0.0  ;;  %v4586_v37 = vrot.slane %v4585_v14, 4  ;;  %v4599_v60 = vsel %vm4360_vm13, %v4289_v17, 0.0  ;;  %v4606_v22 = vsel %vm4360_vm13, %v4290_v52, 0.0 }
 0x489   : > { %v4592_v58 = vsel %vm4360_vm13, %v11796_v13, 0.0  ;;  %v3529_v35 = vadd.f32 %v3528_v59, %v10451_v11  ;;  %v4600_v34 = vrot.slane %v4599_v60, 4  ;;  %v4613_v53 = vsel %vm4360_vm13, %v10156_v46, 0.0 }
 0x48a   : > { %v4593_v63 = vrot.slane %v4592_v58, 4  ;;  %v4587_v26 = vadd.f32 %v4586_v37, %v4585_v14  ;;  %v4607_v54 = vrot.slane %v4606_v22, 4  ;;  %v4614_v23 = vrot.slane %v4613_v53, 4 }
 0x48b   : > { %v3591_v57 = vrot.slane %v3529_v35, 2  ;;  %v3592_v25 = vrot.slane %v3529_v35, 4  ;;  %v3593_v1 = vrot.slane %v3529_v35, 6  ;;  %v3688_v32 = vsel %vm3687_vm12, %v3529_v35, 0.0 }
 0x48c   : > { %v4594_v21 = vadd.f32 %v4593_v63, %v4592_v58  ;;  %v3689_v36 = vrot.slane %v3688_v32, 4  ;;  %v4588_v61 = vrot.slane %v4587_v26, 2  ;;  %v4601_v45 = vadd.f32 %v4600_v34, %v4599_v60 }
 0x48d   : > { %v3695_v11 = vsel %vm3687_vm12, %v3591_v57, 0.0  ;;  %v3702_v38 = vsel %vm3687_vm12, %v3592_v25, 0.0  ;;  %v3709_v16 = vsel %vm3687_vm12, %v3593_v1, 0.0  ;;  %v4608_v31 = vadd.f32 %v4607_v54, %v4606_v22 }
 0x48e   : > { %v4595_v20 = vrot.slane %v4594_v21, 2  ;;  %v3690_v0 = vadd.f32 %v3689_v36, %v3688_v32  ;;  %v3696_v49 = vrot.slane %v3695_v11, 4  ;;  %v3703_v51 = vrot.slane %v3702_v38, 4 }
 0x48f   : > { %v3710_v27 = vrot.slane %v3709_v16, 4  ;;  %v4589_v62 = vadd.f32 %v4588_v61, %v4587_v26  ;;  %v4602_v33 = vrot.slane %v4601_v45, 2  ;;  %v4609_v50 = vrot.slane %v4608_v31, 2 }
 0x490   : > { %v4596_v47 = vadd.f32 %v4595_v20, %v4594_v21  ;;  %v3691_v28 = vrot.slane %v3690_v0, 2  ;;  %v3697_v17 = vadd.f32 %v3696_v49, %v3695_v11  ;;  %v10574_v52 = vadd.f32 %v3703_v51, %v3702_v38 }
 0x491   : > { %v10576_v29 = vadd.f32 %v3710_v27, %v3709_v16  ;;  %v4590_v48 = vrot.slane %v4589_v62, 1  ;;  %v4603_v13 = vadd.f32 %v4602_v33, %v4601_v45  ;;  %v4610_v58 = vadd.f32 %v4609_v50, %v4608_v31 }
 0x492   : > { %v4597_v14 = vrot.slane %v4596_v47, 1  ;;  %v10578_v59 = vadd.f32 %v3691_v28, %v3690_v0  ;;  %v3698_v37 = vrot.slane %v3697_v17, 2  ;;  %v3705_v63 = vrot.slane %v10574_v52, 2 }
 0x493   : > { %v4615_v60 = vadd.f32 %v4614_v23, %v4613_v53  ;;  %v10581_v35 = vadd.f32 %v4590_v48, %v4589_v62  ;;  %v4604_v22 = vrot.slane %v4603_v13, 1  ;;  %v4611_v26 = vrot.slane %v4610_v58, 1 }
 0x494   : > { %v10583_v34 = vadd.f32 %v4597_v14, %v4596_v47  ;;  %v3693_v21 = vrot.slane %v10578_v59, 1  ;;  %v10586_v54 = vadd.f32 %v3698_v37, %v3697_v17  ;;  %v4620_v25 = vsel %vm4360_vm13, %v4291_v56, 0.0 }
 0x495   : > { %v4616_v57 = vrot.slane %v4615_v60, 2  ;;  %v10591_v1 = vadd.f32 %v4604_v22, %v4603_v13  ;;  %v10593_v32 = vadd.f32 %v4611_v26, %v4610_v58  ;;  %v4621_v53 = vrot.slane %v4620_v25, 4 }
 0x496   : > { %v4627_v23 = vsel %vm4360_vm13, %v4292_v10, 0.0  ;;  %v4634_v20 = vsel %vm4360_vm13, %v4293_v40, 0.0  ;;  %v4641_v45 = vsel %vm4360_vm13, %v10140_v19, 0.0  ;;  %v11797_v16 = vrot.slane %v10140_v19, 2 }
 0x497   : > { %v4617_v36 = vadd.f32 %v4616_v57, %v4615_v60  ;;  %v4628_v61 = vrot.slane %v4627_v23, 4  ;;  %v4622_v11 = vadd.f32 %v4621_v53, %v4620_v25  ;;  %v4635_v56 = vrot.slane %v4634_v20, 4 }
 0x498   : > { %v4642_v38 = vrot.slane %v4641_v45, 4  ;;  %v4648_v31 = vsel %vm4360_vm13, %v11797_v16, 0.0  ;;  %v4655_v10 = vsel %vm4360_vm13, %v4295_v7, 0.0  ;;  %v4662_v28 = vsel %vm4360_vm13, %v4296_v43, 0.0 }
 0x499   : > { %v4618_v0 = vrot.slane %v4617_v36, 1  ;;  %v4629_v49 = vadd.f32 %v4628_v61, %v4627_v23  ;;  %v4649_v51 = vrot.slane %v4648_v31, 4  ;;  %v4623_v46 = vrot.slane %v4622_v11, 2 }
 0x49a   : > { %v4636_v27 = vadd.f32 %v4635_v56, %v4634_v20  ;;  %v4643_v40 = vadd.f32 %v4642_v38, %v4641_v45  ;;  %v4656_v62 = vrot.slane %v4655_v10, 4  ;;  %v4663_v60 = vrot.slane %v4662_v28, 4 }
 0x49b   : > { %v4619_v47 = vadd.f32 %v4618_v0, %v4617_v36  ;;  %v4630_v33 = vrot.slane %v4629_v49, 2  ;;  %v4650_v50 = vadd.f32 %v4649_v51, %v4648_v31  ;;  %v4624_v17 = vadd.f32 %v4623_v46, %v4622_v11 }
 0x49c   : > { %v4637_v48 = vrot.slane %v4636_v27, 2  ;;  %v4644_v14 = vrot.slane %v4643_v40, 2  ;;  %v4657_v13 = vadd.f32 %v4656_v62, %v4655_v10  ;;  %v4669_v7 = vsel %vm4360_vm13, %v10162_v9, 0.0 }
 0x49d   : > { %v4631_v58 = vadd.f32 %v4630_v33, %v4629_v49  ;;  %v4651_v37 = vrot.slane %v4650_v50, 2  ;;  %v4625_v22 = vrot.slane %v4624_v17, 1  ;;  %v4664_v36 = vadd.f32 %v4663_v60, %v4662_v28 }
 0x49e   : > { %v4638_v26 = vadd.f32 %v4637_v48, %v4636_v27  ;;  %v4645_v57 = vadd.f32 %v4644_v14, %v4643_v40  ;;  %v4658_v25 = vrot.slane %v4657_v13, 2  ;;  %v4670_v19 = vrot.slane %v4669_v7, 4 }
 0x49f   : > { %v4632_v53 = vrot.slane %v4631_v58, 1  ;;  %v4652_v23 = vadd.f32 %v4651_v37, %v4650_v50  ;;  %v4626_v61 = vadd.f32 %v4625_v22, %v4624_v17  ;;  %v4665_v38 = vrot.slane %v4664_v36, 2 }
 0x4a0   : > { %v4639_v43 = vrot.slane %v4638_v26, 1  ;;  %v4646_v20 = vrot.slane %v4645_v57, 1  ;;  %v4659_v45 = vadd.f32 %v4658_v25, %v4657_v13  ;;  %v4671_v16 = vadd.f32 %v4670_v19, %v4669_v7 }
 0x4a1   : > { %v4633_v11 = vadd.f32 %v4632_v53, %v4631_v58  ;;  %v4653_v56 = vrot.slane %v4652_v23, 1  ;;  %v4676_v51 = vsel %vm4360_vm13, %v4297_v55, 0.0  ;;  %v4666_v46 = vadd.f32 %v4665_v38, %v4664_v36 }
 0x4a2   : > { %v4640_v31 = vadd.f32 %v4639_v43, %v4638_v26  ;;  %v4647_v0 = vadd.f32 %v4646_v20, %v4645_v57  ;;  %v4660_v49 = vrot.slane %v4659_v45, 1  ;;  %v4672_v27 = vrot.slane %v4671_v16, 2 }
 0x4a3   : > { %v4654_v10 = vadd.f32 %v4653_v56, %v4652_v23  ;;  %v4677_v40 = vrot.slane %v4676_v51, 4  ;;  %v4683_v33 = vsel %vm4360_vm13, %v4298_v15, 0.0  ;;  %v4690_v50 = vsel %vm4360_vm13, %v4299_v8, 0.0 }
 0x4a4   : > { %v4661_v62 = vadd.f32 %v4660_v49, %v4659_v45  ;;  %v4841_v28 = vmul.f32 0.25, %v10581_v35  ;;  %v4667_v17 = vrot.slane %v4666_v46, 1  ;;  %v4673_v48 = vadd.f32 %v4672_v27, %v4671_v16 }
 0x4a5   : > { %v4678_v14 = vadd.f32 %v4677_v40, %v4676_v51  ;;  %v4684_v13 = vrot.slane %v4683_v33, 4  ;;  %v4691_v55 = vrot.slane %v4690_v50, 4  ;;  %v4842_v58 = vmul.f32 0.25, %v10583_v34 }
 0x4a6   : > { %v4843_v37 = vmul.f32 0.25, %v10591_v1  ;;  %v4844_v60 = vmul.f32 0.25, %v10593_v32  ;;  %v4668_v7 = vadd.f32 %v4667_v17, %v4666_v46  ;;  %v4674_v22 = vrot.slane %v4673_v48, 1  ;;  %v3358_v17 = vpop.f32.mrf.mxu1 }
 0x4a7   : > { %v4679_v15 = vrot.slane %v4678_v14, 2  ;;  %v4685_v26 = vadd.f32 %v4684_v13, %v4683_v33  ;;  %v4692_v9 = vadd.f32 %v4691_v55, %v4690_v50  ;;  %v4845_v57 = vmul.f32 0.25, %v4619_v47 }
 0x4a8   : > { %v4846_v8 = vmul.f32 0.25, %v4626_v61  ;;  %v4847_v25 = vmul.f32 0.25, %v4633_v11  ;;  %v4675_v35 = vadd.f32 %v4674_v22, %v4673_v48  ;;  %v4848_v36 = vmul.f32 0.25, %v4640_v31 }
 0x4a9   : > { %v4680_v53 = vadd.f32 %v4679_v15, %v4678_v14  ;;  %v4686_v23 = vrot.slane %v4685_v26, 2  ;;  %v4693_v19 = vrot.slane %v4692_v9, 2  ;;  %v4849_v43 = vmul.f32 0.25, %v4647_v0 }
 0x4aa   : > { %v4850_v20 = vmul.f32 0.25, %v4654_v10  ;;  %v4851_v34 = vmul.f32 0.25, %v4661_v62  ;;  %v4852_v56 = vmul.f32 0.25, %v4668_v7  ;;  %v4853_v32 = vmul.f32 0.25, %v4675_v35 }
 0x4ab   : > { %v4681_v45 = vrot.slane %v4680_v53, 1  ;;  %v4687_v1 = vadd.f32 %v4686_v23, %v4685_v26  ;;  %v4694_v38 = vadd.f32 %v4693_v19, %v4692_v9  ;;  %v4905_v16 = vpack.c.bf16 %v4841_v28, %v4841_v28 }
 0x4ac   : > { %v4906_v49 = vpack.c.bf16 %v4842_v58, %v4842_v58  ;;  %v4907_v51 = vpack.c.bf16 %v4843_v37, %v4843_v37  ;;  %v4908_v61 = vpack.c.bf16 %v4844_v60, %v4844_v60  ;;  %v4909_v11 = vpack.c.bf16 %v4845_v57, %v4845_v57 }
 0x4ad   : > { %v4682_v46 = vadd.f32 %v4681_v45, %v4680_v53  ;;  %v4688_v47 = vrot.slane %v4687_v1, 1  ;;  %v4695_v27 = vrot.slane %v4694_v38, 1  ;;  %v4910_v40 = vpack.c.bf16 %v4846_v8, %v4846_v8  ;;  %v2842_v45 = vpop.permute.xlu2 %2841 }
 0x4ae   : > { %v4911_v33 = vpack.c.bf16 %v4847_v25, %v4847_v25  ;;  %v4912_v31 = vpack.c.bf16 %v4848_v36, %v4848_v36  ;;  %v4913_v10 = vpack.c.bf16 %v4849_v43, %v4849_v43  ;;  %v4914_v62 = vpack.c.bf16 %v4850_v20, %v4850_v20 }
 0x4af   : > { %v4689_v50 = vadd.f32 %v4688_v47, %v4687_v1  ;;  %v4854_v0 = vmul.f32 0.25, %v4682_v46  ;;  %v4696_v48 = vadd.f32 %v4695_v27, %v4694_v38  ;;  %v4915_v14 = vpack.c.bf16 %v4851_v34, %v4851_v34 }
 0x4b0   : > { %v4916_v13 = vpack.c.bf16 %v4852_v56, %v4852_v56  ;;  %v4917_v55 = vpack.c.bf16 %v4853_v32, %v4853_v32  ;;  %v5034_v37 = vunpack.c.l.b16 %v4905_v16  ;;  %v5035_v7 = vunpack.c.l.b16 %v4906_v49  ;;  %v3396_v16 = vpop.f32.mrf.mxu2 }
 0x4b1   : > { %v4855_v28 = vmul.f32 0.25, %v4689_v50  ;;  %v4918_v58 = vpack.c.bf16 %v4854_v0, %v4854_v0  ;;  %v4856_v22 = vmul.f32 0.25, %v4696_v48  ;;  %v5036_v60 = vunpack.c.l.b16 %v4907_v51 }
 0x4b2   : > { %v5037_v15 = vunpack.c.l.b16 %v4908_v61  ;;  %v5038_v26 = vunpack.c.l.b16 %v4909_v11  ;;  %v5039_v57 = vunpack.c.l.b16 %v4910_v40  ;;  %v5040_v8 = vunpack.c.l.b16 %v4911_v33  ;;  %v3361_v33 = vpop.f32.mrf.mxu1 }
 0x4b3   : > { %v4919_v9 = vpack.c.bf16 %v4855_v28, %v4855_v28  ;;  %v5041_v25 = vunpack.c.l.b16 %v4912_v31  ;;  %v4920_v35 = vpack.c.bf16 %v4856_v22, %v4856_v22  ;;  %v5042_v53 = vunpack.c.l.b16 %v4913_v10 }
 0x4b4   : > { %v5043_v23 = vunpack.c.l.b16 %v4914_v62  ;;  %v5044_v36 = vunpack.c.l.b16 %v4915_v14  ;;  %v5045_v19 = vunpack.c.l.b16 %v4916_v13  ;;  %v5046_v43 = vunpack.c.l.b16 %v4917_v55 }
 0x4b5   : > { %v5047_v20 = vunpack.c.l.b16 %v4918_v58  ;;  %v5048_v34 = vunpack.c.l.b16 %v4919_v9  ;;  %v5049_v1 = vunpack.c.l.b16 %v4920_v35  ;;  %v5101_v56 = vsel %vm5066_vm15, %v5035_v7, %v5034_v37 }
 0x4b6   : > { %v5108_v32 = vsel %vm5066_vm15, %v5043_v23, %v5042_v53  ;;  %v3204_v38 = vsel %vm1593_vm11, %v10548_v12, %v6783_v24  ;;  %v5102_v49 = vsel %vm5068_vm0, %v5036_v60, %v5101_v56  ;;  %v3205_v46 = vsel %vm1593_vm11, %v10536_v4, %v2842_v45 }
 0x4b7   : > { %v5109_v51 = vsel %vm5068_vm0, %v5044_v36, %v5108_v32  ;;  %vm11798_vm9 = vcmask 261120   ;;  %v5103_v61 = vsel %vm5070_vm1, %v5037_v15, %v5102_v49  ;;  %v3359_v24 = vadd.f32 %v10413_v44, %v3358_v17 }
 0x4b8   : > { %v3236_v47 = vsel %vm11798_vm9, %v3204_v38, %v6802_v2  ;;  %v5110_v11 = vsel %vm5070_vm1, %v5045_v19, %v5109_v51  ;;  %vm11799_vm10 = vmmov %vm11798_vm9  ;;  %v5104_v12 = vsel %vm5072_vm2, %v5038_v26, %v5103_v61  ;;  %v3397_v4 = vadd.f32 %v10413_v44, %v3396_v16 }
 0x4b9   : > { %v3237_v41 = vsel %vm11799_vm10, %v3205_v46, %v6803_v18  ;;  %v5111_v27 = vsel %vm5072_vm2, %v5046_v43, %v5110_v11  ;;  %v5105_v2 = vsel %vm5074_vm3, %v5039_v57, %v5104_v12  ;;  %vm3434_vm11 = vcmp.ge.f32.partialorder %v3359_v24, 0.0 }
 0x4ba   : > { %v3260_v40 = vpack.c.bf16 %v3237_v41, %v3236_v47  ;;  %v5112_v31 = vsel %vm5074_vm3, %v5047_v20, %v5111_v27  ;;  %v3466_v50 = vmul.f32 0.2, %v3359_v24  ;;  %v5106_v42 = vsel %vm5076_vm6, %v5040_v8, %v5105_v2 }
 0x4bb   : > { %v5113_v18 = vsel %vm5076_vm6, %v5048_v34, %v5112_v31  ;;  %vm3449_vm14 = vcmp.ge.f32.partialorder %v3397_v4, 0.0  ;;  %v3481_v0 = vmul.f32 0.2, %v3397_v4  ;;  %v5107_v10 = vsel %vm5078_vm4, %v5041_v25, %v5106_v42 }
 0x4bc   : > { %5453 = vmatmul.msk.bf16.gmra.mxu1 %vm11791_vm8, %v3260_v40  ;;  %v5114_v62 = vsel %vm5078_vm4, %v5049_v1, %v5113_v18  ;;  %v3498_v17 = vsel %vm3434_vm11, %v3359_v24, %v3466_v50  ;;  %v3362_v48 = vadd.f32 %v10413_v44, %v3361_v33  ;;  %v4301_v28 = vrot.slane %v10138_v5, 4 }
 0x4bd   : > { %v5131_v14 = vpack.c.b16 %v5114_v62, %v5107_v10  ;;  %v3531_v13 = vsel %vm1428_vm7, %v3498_v17, 0.0  ;;  %v3513_v55 = vsel %vm3449_vm14, %v3397_v4, %v3481_v0  ;;  %v4302_v22 = vrot.slane %v10138_v5, 6 }
 0x4be   : > { %v10660_v58 = vadd.f32 %v3531_v13, %v10545_v6  ;;  %v10663_v37 = vsel %vm1428_vm7, %v3513_v55, 0.0  ;;  %vm3435_vm9 = vcmp.ge.f32.partialorder %v3362_v48, 0.0  ;;  %v3467_v7 = vmul.f32 0.2, %v3362_v48 }
 0x4bf   : > { %5463 = vmatmul.msk.bf16.gmra.mxu2 %vm1395_vm5, %v5131_v14  ;;  %v4303_v44 = vrot.slane %v10159_v3, 2  ;;  %v4304_v60 = vrot.slane %v10159_v3, 4  ;;  %v4305_v15 = vrot.slane %v10159_v3, 6  ;;  %v4307_v35 = vrot.slane %v10166_v39, 4 }
 0x4c0   : > { %v3594_v26 = vrot.slane %v10660_v58, 2  ;;  %v3595_v6 = vrot.slane %v10660_v58, 4  ;;  %v3716_v9 = vsel %vm3687_vm12, %v10660_v58, 0.0  ;;  %v3499_v57 = vsel %vm3435_vm9, %v3362_v48, %v3467_v7 }
 0x4c1   : > { %v3717_v8 = vrot.slane %v3716_v9, 4  ;;  %v10675_v25 = vsel %vm1428_vm7, %v3499_v57, 0.0  ;;  %v4308_v53 = vrot.slane %v10166_v39, 6  ;;  %v4309_v23 = vrot.slane %v10178_v30, 2 }
 0x4c2   : > { %v4310_v36 = vrot.slane %v10178_v30, 4  ;;  %v4311_v19 = vrot.slane %v10178_v30, 6  ;;  %v4697_v43 = vsel %vm4360_vm13, %v10138_v5, 0.0  ;;  %v11800_v45 = vrot.slane %v10138_v5, 2 }
 0x4c3   : > { %v10684_v20 = vadd.f32 %v3717_v8, %v3716_v9  ;;  %v4698_v34 = vrot.slane %v4697_v43, 4  ;;  %v4711_v56 = vsel %vm4360_vm13, %v4301_v28, 0.0  ;;  %v4718_v16 = vsel %vm4360_vm13, %v4302_v22, 0.0 }
 0x4c4   : > { %v4704_v1 = vsel %vm4360_vm13, %v11800_v45, 0.0  ;;  %v4712_v38 = vrot.slane %v4711_v56, 4  ;;  %v4725_v49 = vsel %vm4360_vm13, %v10159_v3, 0.0  ;;  %v4719_v46 = vrot.slane %v4718_v16, 4 }
 0x4c5   : > { %v4705_v32 = vrot.slane %v4704_v1, 4  ;;  %v4699_v51 = vadd.f32 %v4698_v34, %v4697_v43  ;;  %v4726_v47 = vrot.slane %v4725_v49, 4  ;;  %v4732_v61 = vsel %vm4360_vm13, %v4303_v44, 0.0 }
 0x4c6   : > { %v4713_v41 = vadd.f32 %v4712_v38, %v4711_v56  ;;  %v4733_v24 = vrot.slane %v4732_v61, 4  ;;  %v4739_v5 = vsel %vm4360_vm13, %v4304_v60, 0.0  ;;  %v4720_v27 = vadd.f32 %v4719_v46, %v4718_v16 }
 0x4c7   : > { %v4706_v11 = vadd.f32 %v4705_v32, %v4704_v1  ;;  %v4700_v12 = vrot.slane %v4699_v51, 2  ;;  %v4727_v40 = vadd.f32 %v4726_v47, %v4725_v49  ;;  %v4740_v4 = vrot.slane %v4739_v5, 4 }
 0x4c8   : > { %v4714_v2 = vrot.slane %v4713_v41, 2  ;;  %v4734_v31 = vadd.f32 %v4733_v24, %v4732_v61  ;;  %v4746_v50 = vsel %vm4360_vm13, %v4305_v15, 0.0  ;;  %v4721_v42 = vrot.slane %v4720_v27, 2 }
 0x4c9   : > { %v4707_v33 = vrot.slane %v4706_v11, 2  ;;  %v4701_v3 = vadd.f32 %v4700_v12, %v4699_v51  ;;  %v4728_v18 = vrot.slane %v4727_v40, 2  ;;  %v4741_v0 = vadd.f32 %v4740_v4, %v4739_v5 }
 0x4ca   : > { %v4715_v62 = vadd.f32 %v4714_v2, %v4713_v41  ;;  %v4735_v17 = vrot.slane %v4734_v31, 2  ;;  %v4747_v48 = vrot.slane %v4746_v50, 4  ;;  %v4722_v13 = vadd.f32 %v4721_v42, %v4720_v27  ;;  %v10729_v42 = vpop.f32.mrf.mxu2 }
 0x4cb   : > { %v4708_v10 = vadd.f32 %v4707_v33, %v4706_v11  ;;  %v4702_v14 = vrot.slane %v4701_v3, 1  ;;  %v4729_v55 = vadd.f32 %v4728_v18, %v4727_v40  ;;  %v4742_v28 = vrot.slane %v4741_v0, 2  ;;  %v10731_v18 = vpop.f32.mrf.mxu1 }
 0x4cc   : > { %v4716_v22 = vrot.slane %v4715_v62, 1  ;;  %v4736_v44 = vadd.f32 %v4735_v17, %v4734_v31  ;;  %v4748_v60 = vadd.f32 %v4747_v48, %v4746_v50  ;;  %v4723_v57 = vrot.slane %v4722_v13, 1 }
 0x4cd   : > { %v4709_v7 = vrot.slane %v4708_v10, 1  ;;  %v10696_v9 = vadd.f32 %v4702_v14, %v4701_v3  ;;  %v4730_v15 = vrot.slane %v4729_v55, 1  ;;  %v4743_v8 = vadd.f32 %v4742_v28, %v4741_v0 }
 0x4ce   : > { %v10700_v34 = vadd.f32 %v4716_v22, %v4715_v62  ;;  %v4737_v45 = vrot.slane %v4736_v44, 1  ;;  %v4749_v1 = vrot.slane %v4748_v60, 2  ;;  %v10702_v56 = vadd.f32 %v4723_v57, %v4722_v13 }
 0x4cf   : > { %v10698_v43 = vadd.f32 %v4709_v7, %v4708_v10  ;;  %v10704_v32 = vadd.f32 %v4730_v15, %v4729_v55  ;;  %v4744_v38 = vrot.slane %v4743_v8, 1  ;;  %v4753_v16 = vsel %vm4360_vm13, %v10166_v39, 0.0 }
 0x4d0   : > { %v10708_v49 = vadd.f32 %v4737_v45, %v4736_v44  ;;  %v4750_v51 = vadd.f32 %v4749_v1, %v4748_v60  ;;  %v4754_v46 = vrot.slane %v4753_v16, 4  ;;  %v11801_v47 = vrot.slane %v10166_v39, 2 }
 0x4d1   : > { %v10713_v11 = vadd.f32 %v4744_v38, %v4743_v8  ;;  %v4767_v24 = vsel %vm4360_vm13, %v4307_v35, 0.0  ;;  %v4774_v5 = vsel %vm4360_vm13, %v4308_v53, 0.0  ;;  %v4781_v2 = vsel %vm4360_vm13, %v10178_v30, 0.0 }
 0x4d2   : > { %v4760_v61 = vsel %vm4360_vm13, %v11801_v47, 0.0  ;;  %v4751_v12 = vrot.slane %v4750_v51, 1  ;;  %v4755_v27 = vadd.f32 %v4754_v46, %v4753_v16  ;;  %v4768_v40 = vrot.slane %v4767_v24, 4 }
 0x4d3   : > { %v4761_v41 = vrot.slane %v4760_v61, 4  ;;  %v4775_v4 = vrot.slane %v4774_v5, 4  ;;  %v4788_v31 = vsel %vm4360_vm13, %v4309_v23, 0.0  ;;  %v4795_v35 = vsel %vm4360_vm13, %v4310_v36, 0.0 }
 0x4d4   : > { %v4752_v50 = vadd.f32 %v4751_v12, %v4750_v51  ;;  %v4756_v39 = vrot.slane %v4755_v27, 2  ;;  %v4769_v3 = vadd.f32 %v4768_v40, %v4767_v24  ;;  %v4782_v10 = vrot.slane %v4781_v2, 4  ;;  %v10739_v40 = vpop.f32.mrf.mxu1 }
 0x4d5   : > { %v4762_v33 = vadd.f32 %v4761_v41, %v4760_v61  ;;  %v4776_v53 = vadd.f32 %v4775_v4, %v4774_v5  ;;  %v4789_v62 = vrot.slane %v4788_v31, 4  ;;  %v4796_v17 = vrot.slane %v4795_v35, 4 }
 0x4d6   : > { %v4757_v48 = vadd.f32 %v4756_v39, %v4755_v27  ;;  %v4770_v14 = vrot.slane %v4769_v3, 2  ;;  %v4802_v23 = vsel %vm4360_vm13, %v4311_v19, 0.0  ;;  %v4783_v55 = vadd.f32 %v4782_v10, %v4781_v2  ;;  %v10737_v27 = vpop.f32.mrf.mxu2 }
 0x4d7   : > { %v4763_v0 = vrot.slane %v4762_v33, 2  ;;  %v4777_v13 = vrot.slane %v4776_v53, 2  ;;  %v4790_v28 = vadd.f32 %v4789_v62, %v4788_v31  ;;  %v4797_v7 = vadd.f32 %v4796_v17, %v4795_v35 }
 0x4d8   : > { %v4758_v22 = vrot.slane %v4757_v48, 1  ;;  %v4771_v44 = vadd.f32 %v4770_v14, %v4769_v3  ;;  %v4803_v57 = vrot.slane %v4802_v23, 4  ;;  %v4784_v8 = vrot.slane %v4783_v55, 2 }
 0x4d9   : > { %v4764_v36 = vadd.f32 %v4763_v0, %v4762_v33  ;;  %v4778_v60 = vadd.f32 %v4777_v13, %v4776_v53  ;;  %v4791_v45 = vrot.slane %v4790_v28, 2  ;;  %v4798_v1 = vrot.slane %v4797_v7, 2 }
 0x4da   : > { %v4759_v38 = vadd.f32 %v4758_v22, %v4757_v48  ;;  %v4772_v16 = vrot.slane %v4771_v44, 1  ;;  %v4804_v46 = vadd.f32 %v4803_v57, %v4802_v23  ;;  %v4785_v30 = vadd.f32 %v4784_v8, %v4783_v55 }
 0x4db   : > { %v4765_v15 = vrot.slane %v4764_v36, 1  ;;  %v4779_v51 = vrot.slane %v4778_v60, 1  ;;  %v4792_v61 = vadd.f32 %v4791_v45, %v4790_v28  ;;  %v4799_v19 = vadd.f32 %v4798_v1, %v4797_v7 }
 0x4dc   : > { %v4773_v41 = vadd.f32 %v4772_v16, %v4771_v44  ;;  %v4805_v5 = vrot.slane %v4804_v46, 2  ;;  %v4857_v12 = vmul.f32 0.25, %v10696_v9  ;;  %v4786_v4 = vrot.slane %v4785_v30, 1 }
 0x4dd   : > { %v4766_v47 = vadd.f32 %v4765_v15, %v4764_v36  ;;  %v4780_v24 = vadd.f32 %v4779_v51, %v4778_v60  ;;  %v4793_v33 = vrot.slane %v4792_v61, 1  ;;  %v4800_v2 = vrot.slane %v4799_v19, 1 }
 0x4de   : > { %v4858_v31 = vmul.f32 0.25, %v10698_v43  ;;  %v4806_v35 = vadd.f32 %v4805_v5, %v4804_v46  ;;  %v4859_v39 = vmul.f32 0.25, %v10700_v34  ;;  %v4860_v3 = vmul.f32 0.25, %v10702_v56  ;;  %v3403_v45 = vpop.f32.mrf.mxu2 }
 0x4df   : > { %v4861_v53 = vmul.f32 0.25, %v10704_v32  ;;  %v4787_v0 = vadd.f32 %v4786_v4, %v4785_v30  ;;  %v4794_v10 = vadd.f32 %v4793_v33, %v4792_v61  ;;  %v4801_v62 = vadd.f32 %v4800_v2, %v4799_v19 }
 0x4e0   : > { %v4862_v9 = vmul.f32 0.25, %v10708_v49  ;;  %v4807_v17 = vrot.slane %v4806_v35, 1  ;;  %v4863_v48 = vmul.f32 0.25, %v10713_v11  ;;  %v4864_v14 = vmul.f32 0.25, %v4752_v50  ;;  %v3368_v11 = vpop.f32.mrf.mxu1 }
 0x4e1   : > { %v4865_v13 = vmul.f32 0.25, %v4759_v38  ;;  %v4866_v23 = vmul.f32 0.25, %v4766_v47  ;;  %v4867_v36 = vmul.f32 0.25, %v4773_v41  ;;  %v4868_v43 = vmul.f32 0.25, %v4780_v24 }
 0x4e2   : > { %v4869_v55 = vmul.f32 0.25, %v4787_v0  ;;  %v4808_v28 = vadd.f32 %v4807_v17, %v4806_v35  ;;  %v4870_v34 = vmul.f32 0.25, %v4794_v10  ;;  %v4871_v7 = vmul.f32 0.25, %v4801_v62  ;;  %v10752_v17 = vld [vmem:[%s11227_s4] ss:$0 sm:$0xff] }
 0x4e3   : > { %v4921_v56 = vpack.c.bf16 %v4857_v12, %v4857_v12  ;;  %v4922_v22 = vpack.c.bf16 %v4858_v31, %v4858_v31  ;;  %v4923_v32 = vpack.c.bf16 %v4859_v39, %v4859_v39  ;;  %v4924_v44 = vpack.c.bf16 %v4860_v3, %v4860_v3 }
 0x4e4   : > { %v4925_v60 = vpack.c.bf16 %v4861_v53, %v4861_v53  ;;  %v4872_v57 = vmul.f32 0.25, %v4808_v28  ;;  %v4926_v15 = vpack.c.bf16 %v4862_v9, %v4862_v9  ;;  %v4927_v49 = vpack.c.bf16 %v4863_v48, %v4863_v48 }
 0x4e5   : > { %v4928_v8 = vpack.c.bf16 %v4864_v14, %v4864_v14  ;;  %v4929_v50 = vpack.c.bf16 %v4865_v13, %v4865_v13  ;;  %v4930_v1 = vpack.c.bf16 %v4866_v23, %v4866_v23  ;;  %v4931_v38 = vpack.c.bf16 %v4867_v36, %v4867_v36 }
 0x4e6   : > { %v4932_v16 = vpack.c.bf16 %v4868_v43, %v4868_v43  ;;  %v4933_v51 = vpack.c.bf16 %v4869_v55, %v4869_v55  ;;  %v4934_v46 = vpack.c.bf16 %v4870_v34, %v4870_v34  ;;  %v4935_v47 = vpack.c.bf16 %v4871_v7, %v4871_v7  ;;  %v3406_v55 = vpop.f32.mrf.mxu2 }
 0x4e7   : > { %v4936_v30 = vpack.c.bf16 %v4872_v57, %v4872_v57  ;;  %v5050_v61 = vunpack.c.l.b16 %v4921_v56  ;;  %v5051_v19 = vunpack.c.l.b16 %v4922_v22  ;;  %v5052_v41 = vunpack.c.l.b16 %v4923_v32 }
 0x4e8   : > { %v5053_v24 = vunpack.c.l.b16 %v4924_v44  ;;  %v5054_v5 = vunpack.c.l.b16 %v4925_v60  ;;  %v5055_v12 = vunpack.c.l.b16 %v4926_v15  ;;  %v5056_v4 = vunpack.c.l.b16 %v4927_v49  ;;  %v3371_v28 = vpop.f32.mrf.mxu1 }
 0x4e9   : > { %v5057_v33 = vunpack.c.l.b16 %v4928_v8  ;;  %v5058_v2 = vunpack.c.l.b16 %v4929_v50  ;;  %v5059_v31 = vunpack.c.l.b16 %v4930_v1  ;;  %v5060_v35 = vunpack.c.l.b16 %v4931_v38 }
 0x4ea   : > { %v5061_v39 = vunpack.c.l.b16 %v4932_v16  ;;  %v5062_v3 = vunpack.c.l.b16 %v4933_v51  ;;  %v5063_v53 = vunpack.c.l.b16 %v4934_v46  ;;  %v5064_v0 = vunpack.c.l.b16 %v4935_v47 }
 0x4eb   : > { %v5065_v10 = vunpack.c.l.b16 %v4936_v30  ;;  %v5115_v62 = vsel %vm5066_vm15, %v5051_v19, %v5050_v61  ;;  %v5122_v9 = vsel %vm5066_vm15, %v5059_v31, %v5058_v2  ;;  %v3399_v48 = vadd.f32 %v10752_v17, %v10729_v42 }
 0x4ec   : > { %v3364_v14 = vadd.f32 %v10752_v17, %v10731_v18  ;;  %v5116_v13 = vsel %vm5068_vm0, %v5052_v41, %v5115_v62  ;;  %v5123_v23 = vsel %vm5068_vm0, %v5060_v35, %v5122_v9  ;;  %v3402_v36 = vadd.f32 %v10752_v17, %v10737_v27 }
 0x4ed   : > { %v3367_v43 = vadd.f32 %v10752_v17, %v10739_v40  ;;  %v5117_v34 = vsel %vm5070_vm1, %v5053_v24, %v5116_v13  ;;  %v5124_v7 = vsel %vm5070_vm1, %v5061_v39, %v5123_v23  ;;  %vm3450_vm13 = vcmp.ge.f32.partialorder %v3399_v48, 0.0 }
 0x4ee   : > { %v3482_v42 = vmul.f32 0.2, %v3399_v48  ;;  %v5118_v18 = vsel %vm5072_vm2, %v5054_v5, %v5117_v34  ;;  %v5125_v56 = vsel %vm5072_vm2, %v5062_v3, %v5124_v7  ;;  %vm3436_vm10 = vcmp.ge.f32.partialorder %v3364_v14, 0.0  ;;  %v3408_v5 = vpop.f32.mrf.mxu2 }
 0x4ef   : > { %v3468_v22 = vmul.f32 0.2, %v3364_v14  ;;  %v5119_v32 = vsel %vm5074_vm3, %v5055_v12, %v5118_v18  ;;  %v5126_v27 = vsel %vm5074_vm3, %v5063_v53, %v5125_v56  ;;  %vm3451_vm11 = vcmp.ge.f32.partialorder %v3402_v36, 0.0 }
 0x4f0   : > { %v3514_v44 = vsel %vm3450_vm13, %v3399_v48, %v3482_v42  ;;  %v5120_v40 = vsel %vm5076_vm6, %v5056_v4, %v5119_v32  ;;  %v5127_v60 = vsel %vm5076_vm6, %v5064_v0, %v5126_v27  ;;  %v3483_v1 = vmul.f32 0.2, %v3402_v36  ;;  %v10784_v12 = vpop.f32.mrf.mxu1 }
 0x4f1   : > { %v10773_v57 = vsel %vm1428_vm7, %v3514_v44, 0.0  ;;  %v3500_v15 = vsel %vm3436_vm10, %v3364_v14, %v3468_v22  ;;  %v5121_v49 = vsel %vm5078_vm4, %v5057_v33, %v5120_v40  ;;  %v5128_v8 = vsel %vm5078_vm4, %v5065_v10, %v5127_v60 }
 0x4f2   : > { %v3536_v50 = vsel %vm1428_vm7, %v3500_v15, 0.0  ;;  %v5132_v38 = vpack.c.b16 %v5128_v8, %v5121_v49  ;;  %vm3437_vm8 = vcmp.ge.f32.partialorder %v3367_v43, 0.0  ;;  %v3469_v16 = vmul.f32 0.2, %v3367_v43 }
 0x4f3   : > { %v3404_v51 = vadd.f32 %v10752_v17, %v3403_v45  ;;  %v3515_v46 = vsel %vm3451_vm11, %v3402_v36, %v3483_v1  ;;  %v3369_v47 = vadd.f32 %v10752_v17, %v3368_v11  ;;  %v3407_v30 = vadd.f32 %v10752_v17, %v3406_v55 }
 0x4f4   : > { %v3372_v61 = vadd.f32 %v10752_v17, %v3371_v28  ;;  %5464 = vmatmul.msk.bf16.gmra.mxu2 %vm1395_vm5, %v5132_v38  ;;  %v3557_v19 = vsel %vm1428_vm7, %v3515_v46, 0.0  ;;  %v3501_v41 = vsel %vm3437_vm8, %v3367_v43, %v3469_v16  ;;  %v3409_v3 = vadd.f32 %v10752_v17, %v3408_v5 }
 0x4f5   : > { %vm3452_vm14 = vcmp.ge.f32.partialorder %v3404_v51, 0.0  ;;  %v3484_v24 = vmul.f32 0.2, %v3404_v51  ;;  %v3534_v4 = vsel %vm1428_vm7, %v3501_v41, 0.0  ;;  %vm3438_vm9 = vcmp.ge.f32.partialorder %v3369_v47, 0.0 }
 0x4f6   : > { %v3470_v45 = vmul.f32 0.2, %v3369_v47  ;;  %vm3453_vm13 = vcmp.ge.f32.partialorder %v3407_v30, 0.0  ;;  %v3535_v11 = vadd.f32 %v3534_v4, %v10675_v25  ;;  %v3485_v2 = vmul.f32 0.2, %v3407_v30  ;;  %v3411_v32 = vpop.f32.mrf.mxu2 }
 0x4f7   : > { %v3516_v33 = vsel %vm3452_vm14, %v3404_v51, %v3484_v24  ;;  %vm3439_vm10 = vcmp.ge.f32.partialorder %v3372_v61, 0.0  ;;  %v3471_v39 = vmul.f32 0.2, %v3372_v61  ;;  %vm3454_vm5 = vcmp.ge.f32.partialorder %v3409_v3, 0.0 }
 0x4f8   : > { %v3560_v31 = vsel %vm1428_vm7, %v3516_v33, 0.0  ;;  %v3502_v35 = vsel %vm3438_vm9, %v3369_v47, %v3470_v45  ;;  %v3597_v53 = vrot.slane %v3535_v11, 2  ;;  %v3598_v0 = vrot.slane %v3535_v11, 4  ;;  %v3376_v27 = vpop.f32.mrf.mxu1 }
 0x4f9   : > { %v3599_v10 = vrot.slane %v3535_v11, 6  ;;  %v3744_v62 = vsel %vm3687_vm12, %v3535_v11, 0.0  ;;  %v3537_v48 = vsel %vm1428_vm7, %v3502_v35, 0.0  ;;  %v3517_v14 = vsel %vm3453_vm13, %v3407_v30, %v3485_v2 }
 0x4fa   : > { %v3745_v9 = vrot.slane %v3744_v62, 4  ;;  %v3503_v13 = vsel %vm3439_vm10, %v3372_v61, %v3471_v39  ;;  %v3751_v25 = vsel %vm3687_vm12, %v3597_v53, 0.0  ;;  %v3758_v23 = vsel %vm3687_vm12, %v3598_v0, 0.0 }
 0x4fb   : > { %v3765_v36 = vsel %vm3687_vm12, %v3599_v10, 0.0  ;;  %v10795_v43 = vadd.f32 %v3537_v48, %v3536_v50  ;;  %v3752_v28 = vrot.slane %v3751_v25, 4  ;;  %v3759_v34 = vrot.slane %v3758_v23, 4 }
 0x4fc   : > { %v3746_v55 = vadd.f32 %v3745_v9, %v3744_v62  ;;  %v3766_v7 = vrot.slane %v3765_v36, 4  ;;  %v3558_v22 = vsel %vm1428_vm7, %v3517_v14, 0.0  ;;  %v3539_v50 = vsel %vm1428_vm7, %v3503_v13, 0.0 }
 0x4fd   : > { %v3600_v42 = vrot.slane %v10795_v43, 2  ;;  %v3601_v18 = vrot.slane %v10795_v43, 4  ;;  %v3772_v56 = vsel %vm3687_vm12, %v10795_v43, 0.0  ;;  %v3753_v40 = vadd.f32 %v3752_v28, %v3751_v25 }
 0x4fe   : > { %v3747_v44 = vrot.slane %v3746_v55, 2  ;;  %v10802_v60 = vadd.f32 %v3759_v34, %v3758_v23  ;;  %v10804_v15 = vadd.f32 %v3766_v7, %v3765_v36  ;;  %v3773_v49 = vrot.slane %v3772_v56, 4  ;;  %v3413_v9 = vpop.f32.mrf.mxu2 }
 0x4ff   : > { %v3559_v8 = vadd.f32 %v3558_v22, %v3557_v19  ;;  %v3754_v38 = vrot.slane %v3753_v40, 2  ;;  %v3486_v51 = vmul.f32 0.2, %v3409_v3  ;;  %v3374_v62 = vadd.f32 %v10752_v17, %v10784_v12 }
 0x500   : > { %v10807_v1 = vadd.f32 %v3747_v44, %v3746_v55  ;;  %v3761_v16 = vrot.slane %v10802_v60, 2  ;;  %v10810_v46 = vadd.f32 %v3773_v49, %v3772_v56  ;;  %v3378_v48 = vpop.f32.mrf.mxu1  ;;  %v3377_v23 = vadd.f32 %v10752_v17, %v3376_v27 }
 0x501   : > { %v3621_v47 = vrot.slane %v3559_v8, 2  ;;  %v3622_v30 = vrot.slane %v3559_v8, 4  ;;  %v3623_v61 = vrot.slane %v3559_v8, 6  ;;  %v10813_v24 = vadd.f32 %v3754_v38, %v3753_v40 }
 0x502   : > { %v3749_v41 = vrot.slane %v10807_v1, 1  ;;  %v3968_v19 = vsel %vm3687_vm12, %v3559_v8, 0.0  ;;  %v3518_v5 = vsel %vm3454_vm5, %v3409_v3, %v3486_v51  ;;  %v3412_v3 = vadd.f32 %v10752_v17, %v3411_v32 }
 0x503   : > { %v3969_v4 = vrot.slane %v3968_v19, 4  ;;  %v3975_v45 = vsel %vm3687_vm12, %v3621_v47, 0.0  ;;  %v3982_v11 = vsel %vm3687_vm12, %v3622_v30, 0.0  ;;  %v3989_v33 = vsel %vm3687_vm12, %v3623_v61, 0.0 }
 0x504   : > { %v3976_v2 = vrot.slane %v3975_v45, 4  ;;  %v3983_v35 = vrot.slane %v3982_v11, 4  ;;  %v3990_v39 = vrot.slane %v3989_v33, 4  ;;  %v3561_v53 = vsel %vm1428_vm7, %v3518_v5, 0.0 }
 0x505   : > { %v3970_v0 = vadd.f32 %v3969_v4, %v3968_v19  ;;  %v10820_v10 = vadd.f32 %v3561_v53, %v3560_v31  ;;  %vm3440_vm11 = vcmp.ge.f32.partialorder %v3374_v62, 0.0  ;;  %v3472_v22 = vmul.f32 0.2, %v3374_v62 }
 0x506   : > { %v3977_v14 = vadd.f32 %v3976_v2, %v3975_v45  ;;  %v10825_v13 = vadd.f32 %v3983_v35, %v3982_v11  ;;  %v10827_v25 = vadd.f32 %v3990_v39, %v3989_v33  ;;  %vm3455_vm8 = vcmp.ge.f32.partialorder %v3412_v3, 0.0  ;;  %v3416_v45 = vpop.f32.mrf.mxu2 }
 0x507   : > { %v3971_v36 = vrot.slane %v3970_v0, 2  ;;  %v3996_v28 = vsel %vm3687_vm12, %v10820_v10, 0.0  ;;  %v3487_v32 = vmul.f32 0.2, %v3412_v3  ;;  %vm3441_vm14 = vcmp.ge.f32.partialorder %v3377_v23, 0.0 }
 0x508   : > { %v3978_v12 = vrot.slane %v3977_v14, 2  ;;  %v3997_v7 = vrot.slane %v3996_v28, 4  ;;  %v3473_v40 = vmul.f32 0.2, %v3377_v23  ;;  %v3504_v8 = vsel %vm3440_vm11, %v3374_v62, %v3472_v22  ;;  %v3381_v11 = vpop.f32.mrf.mxu1 }
 0x509   : > { %v10835_v56 = vadd.f32 %v3971_v36, %v3970_v0  ;;  %v3519_v38 = vsel %vm3455_vm8, %v3412_v3, %v3487_v32  ;;  %v3414_v51 = vadd.f32 %v10752_v17, %v3413_v9  ;;  %v3542_v47 = vsel %vm1428_vm7, %v3504_v8, 0.0 }
 0x50a   : > { %v10837_v44 = vadd.f32 %v3978_v12, %v3977_v14  ;;  %v10839_v27 = vadd.f32 %v3997_v7, %v3996_v28  ;;  %v3563_v30 = vsel %vm1428_vm7, %v3519_v38, 0.0  ;;  %v3505_v61 = vsel %vm3441_vm14, %v3377_v23, %v3473_v40 }
 0x50b   : > { %v3379_v19 = vadd.f32 %v10752_v17, %v3378_v48  ;;  %v3540_v5 = vsel %vm1428_vm7, %v3505_v61, 0.0  ;;  %vm3456_vm9 = vcmp.ge.f32.partialorder %v3414_v51, 0.0  ;;  %v3488_v4 = vmul.f32 0.2, %v3414_v51 }
 0x50c   : > { %v3596_v33 = vrot.slane %v10660_v58, 6  ;;  %v3541_v2 = vadd.f32 %v3540_v5, %v3539_v50  ;;  %v3417_v39 = vadd.f32 %v10752_v17, %v3416_v45  ;;  %v3382_v0 = vadd.f32 %v10752_v17, %v3381_v11 }
 0x50d   : > { %vm3442_vm13 = vcmp.ge.f32.partialorder %v3379_v19, 0.0  ;;  %v3474_v35 = vmul.f32 0.2, %v3379_v19  ;;  %v3520_v53 = vsel %vm3456_vm9, %v3414_v51, %v3488_v4  ;;  %v10853_v62 = vadd.f32 %v3693_v21, %v10578_v59 }
 0x50e   : > { %v3700_v3 = vrot.slane %v10586_v54, 1  ;;  %v3603_v9 = vrot.slane %v3541_v2, 2  ;;  %v3604_v48 = vrot.slane %v3541_v2, 4  ;;  %v3605_v14 = vrot.slane %v3541_v2, 6  ;;  %v3418_v11 = vpop.f32.mrf.mxu2 }
 0x50f   : > { %v3800_v23 = vsel %vm3687_vm12, %v3541_v2, 0.0  ;;  %v3566_v36 = vsel %vm1428_vm7, %v3520_v53, 0.0  ;;  %v3506_v28 = vsel %vm3442_vm13, %v3379_v19, %v3474_v35  ;;  %vm3457_vm10 = vcmp.ge.f32.partialorder %v3417_v39, 0.0 }
 0x510   : > { %v3801_v50 = vrot.slane %v3800_v23, 4  ;;  %v3807_v12 = vsel %vm3687_vm12, %v3603_v9, 0.0  ;;  %v3814_v7 = vsel %vm3687_vm12, %v3604_v48, 0.0  ;;  %v3821_v22 = vsel %vm3687_vm12, %v3605_v14, 0.0  ;;  %v3383_v2 = vpop.f32.mrf.mxu1 }
 0x511   : > { %v3543_v59 = vsel %vm1428_vm7, %v3506_v28, 0.0  ;;  %v3808_v32 = vrot.slane %v3807_v12, 4  ;;  %v3815_v40 = vrot.slane %v3814_v7, 4  ;;  %v3822_v8 = vrot.slane %v3821_v22, 4 }
 0x512   : > { %v3802_v21 = vadd.f32 %v3801_v50, %v3800_v23  ;;  %v10862_v38 = vadd.f32 %v3543_v59, %v3542_v47  ;;  %v3489_v51 = vmul.f32 0.2, %v3417_v39  ;;  %vm3443_vm5 = vcmp.ge.f32.partialorder %v3382_v0, 0.0 }
 0x513   : > { %v3475_v61 = vmul.f32 0.2, %v3382_v0  ;;  %v3809_v19 = vadd.f32 %v3808_v32, %v3807_v12  ;;  %v10864_v4 = vadd.f32 %v3815_v40, %v3814_v7  ;;  %v10866_v45 = vadd.f32 %v3822_v8, %v3821_v22 }
 0x514   : > { %v3803_v5 = vrot.slane %v3802_v21, 2  ;;  %v3606_v35 = vrot.slane %v10862_v38, 2  ;;  %v3828_v9 = vsel %vm3687_vm12, %v10862_v38, 0.0  ;;  %v3521_v47 = vsel %vm3457_vm10, %v3417_v39, %v3489_v51 }
 0x515   : > { %v3810_v14 = vrot.slane %v3809_v19, 2  ;;  %v3817_v23 = vrot.slane %v10864_v4, 2  ;;  %v3829_v50 = vrot.slane %v3828_v9, 4  ;;  %v3564_v28 = vsel %vm1428_vm7, %v3521_v47, 0.0 }
 0x516   : > { %v10873_v48 = vadd.f32 %v3803_v5, %v3802_v21  ;;  %v3507_v12 = vsel %vm3443_vm5, %v3382_v0, %v3475_v61  ;;  %v3419_v7 = vadd.f32 %v10752_v17, %v3418_v11  ;;  %v3384_v22 = vadd.f32 %v10752_v17, %v3383_v2 }
 0x517   : > { %v10881_v32 = vadd.f32 %v3810_v14, %v3809_v19  ;;  %v10883_v40 = vadd.f32 %v3829_v50, %v3828_v9  ;;  %v3565_v39 = vadd.f32 %v3564_v28, %v3563_v30  ;;  %v10886_v21 = vsel %vm1428_vm7, %v3507_v12, 0.0 }
 0x518   : > { %v3805_v59 = vrot.slane %v10873_v48, 1  ;;  %vm3458_vm11 = vcmp.ge.f32.partialorder %v3419_v7, 0.0  ;;  %v3490_v8 = vmul.f32 0.2, %v3419_v7  ;;  %vm3444_vm8 = vcmp.ge.f32.partialorder %v3384_v22, 0.0 }
 0x519   : > { %v3627_v51 = vrot.slane %v3565_v39, 2  ;;  %v3628_v5 = vrot.slane %v3565_v39, 4  ;;  %v3629_v0 = vrot.slane %v3565_v39, 6  ;;  %v4024_v61 = vsel %vm3687_vm12, %v3565_v39, 0.0 }
 0x51a   : > { %v4025_v11 = vrot.slane %v4024_v61, 4  ;;  %v3522_v2 = vsel %vm3458_vm11, %v3419_v7, %v3490_v8  ;;  %v3476_v47 = vmul.f32 0.2, %v3384_v22  ;;  %v3701_v19 = vadd.f32 %v3700_v3, %v10586_v54 }
 0x51b   : > { %v4031_v9 = vsel %vm3687_vm12, %v3627_v51, 0.0  ;;  %v4038_v30 = vsel %vm3687_vm12, %v3628_v5, 0.0  ;;  %v4045_v14 = vsel %vm3687_vm12, %v3629_v0, 0.0  ;;  %v3567_v50 = vsel %vm1428_vm7, %v3522_v2, 0.0 }
 0x51c   : > { %v4026_v28 = vadd.f32 %v4025_v11, %v4024_v61  ;;  %v4032_v12 = vrot.slane %v4031_v9, 4  ;;  %v4039_v31 = vrot.slane %v4038_v30, 4  ;;  %v4046_v55 = vrot.slane %v4045_v14, 4 }
 0x51d   : > { %v10894_v34 = vadd.f32 %v3567_v50, %v3566_v36  ;;  %v3508_v39 = vsel %vm3444_vm8, %v3384_v22, %v3476_v47  ;;  %v3706_v54 = vadd.f32 %v3705_v63, %v10574_v52  ;;  %v3712_v3 = vrot.slane %v10576_v29, 2 }
 0x51e   : > { %v4027_v7 = vrot.slane %v4026_v28, 2  ;;  %v4033_v8 = vadd.f32 %v4032_v12, %v4031_v9  ;;  %v10901_v51 = vadd.f32 %v4039_v31, %v4038_v30  ;;  %v10903_v5 = vadd.f32 %v4046_v55, %v4045_v14 }
 0x51f   : > { %v4052_v36 = vsel %vm3687_vm12, %v10894_v34, 0.0  ;;  %v10910_v22 = vsel %vm1428_vm7, %v3508_v39, 0.0  ;;  %v3707_v31 = vrot.slane %v3706_v54, 1  ;;  %v3713_v55 = vadd.f32 %v3712_v3, %v10576_v29  ;;  %v3421_v3 = vpop.f32.mrf.mxu3 }
 0x520   : > { %v10912_v11 = vadd.f32 %v4027_v7, %v4026_v28  ;;  %v4034_v52 = vrot.slane %v4033_v8, 2  ;;  %v4053_v2 = vrot.slane %v4052_v36, 4  ;;  %v3719_v47 = vrot.slane %v10684_v20, 2 }
 0x521   : > { %v3723_v9 = vsel %vm3687_vm12, %v3594_v26, 0.0  ;;  %v3708_v12 = vadd.f32 %v3707_v31, %v3706_v54  ;;  %v3714_v39 = vrot.slane %v3713_v55, 1  ;;  %v3730_v29 = vsel %vm3687_vm12, %v3595_v6, 0.0 }
 0x522   : > { %v10921_v14 = vadd.f32 %v4034_v52, %v4033_v8  ;;  %v10923_v50 = vadd.f32 %v4053_v2, %v4052_v36  ;;  %v3724_v28 = vrot.slane %v3723_v9, 4  ;;  %v3720_v7 = vadd.f32 %v3719_v47, %v10684_v20 }
 0x523   : > { %v3731_v0 = vrot.slane %v3730_v29, 4  ;;  %v3737_v26 = vsel %vm3687_vm12, %v3596_v33, 0.0  ;;  %v4136_v8 = vmul.f32 0.25, %v10853_v62  ;;  %v3715_v36 = vadd.f32 %v3714_v39, %v3713_v55 }
 0x524   : > { %v3725_v61 = vadd.f32 %v3724_v28, %v3723_v9  ;;  %v3721_v52 = vrot.slane %v3720_v7, 1  ;;  %v3738_v2 = vrot.slane %v3737_v26, 4  ;;  %v4137_v54 = vmul.f32 0.25, %v3701_v19 }
 0x525   : > { %v3732_v63 = vadd.f32 %v3731_v0, %v3730_v29  ;;  %v4138_v20 = vmul.f32 0.25, %v3708_v12  ;;  %v3422_v47 = vadd.f32 %v10752_v17, %v3421_v3  ;;  %v4139_v49 = vmul.f32 0.25, %v3715_v36 }
 0x526   : > { %v3726_v31 = vrot.slane %v3725_v61, 2  ;;  %v3722_v30 = vadd.f32 %v3721_v52, %v3720_v7  ;;  %v3739_v6 = vadd.f32 %v3738_v2, %v3737_v26  ;;  %v5241_v9 = vsel %vm5066_vm15, %v4137_v54, %v4136_v8 }
 0x527   : > { %v3733_v58 = vrot.slane %v3732_v63, 2  ;;  %v5242_v33 = vsel %vm5068_vm0, %v4138_v20, %v5241_v9  ;;  %vm3459_vm14 = vcmp.ge.f32.partialorder %v3422_v47, 0.0  ;;  %v3491_v19 = vmul.f32 0.2, %v3422_v47 }
 0x528   : > { %v3727_v28 = vadd.f32 %v3726_v31, %v3725_v61  ;;  %v3740_v62 = vrot.slane %v3739_v6, 2  ;;  %v4140_v55 = vmul.f32 0.25, %v3722_v30  ;;  %v5243_v39 = vsel %vm5070_vm1, %v4139_v49, %v5242_v33  ;;  %v5157_v33 = vpop.f32.mrf.mxu2 }
 0x529   : > { %v3734_v0 = vadd.f32 %v3733_v58, %v3732_v63  ;;  %v3602_v12 = vrot.slane %v10795_v43, 6  ;;  %v3750_v7 = vadd.f32 %v3749_v41, %v10807_v1  ;;  %v3523_v3 = vsel %vm3459_vm14, %v3422_v47, %v3491_v19 }
 0x52a   : > { %v3728_v53 = vrot.slane %v3727_v28, 1  ;;  %v3741_v29 = vadd.f32 %v3740_v62, %v3739_v6  ;;  %v5244_v61 = vsel %vm5072_vm2, %v4140_v55, %v5243_v39  ;;  %v3756_v26 = vrot.slane %v10813_v24, 1 }
 0x52b   : > { %v3735_v30 = vrot.slane %v3734_v0, 1  ;;  %v10944_v49 = vsel %vm1428_vm7, %v3523_v3, 0.0  ;;  %v3762_v63 = vadd.f32 %v3761_v16, %v10802_v60  ;;  %v3768_v1 = vrot.slane %v10804_v15, 2 }
 0x52c   : > { %v3729_v8 = vadd.f32 %v3728_v53, %v3727_v28  ;;  %v3742_v36 = vrot.slane %v3741_v29, 1  ;;  %v3757_v52 = vadd.f32 %v3756_v26, %v10813_v24  ;;  %v3775_v41 = vrot.slane %v10810_v46, 2 }
 0x52d   : > { %v3736_v2 = vadd.f32 %v3735_v30, %v3734_v0  ;;  %v3763_v31 = vrot.slane %v3762_v63, 1  ;;  %v3779_v53 = vsel %vm3687_vm12, %v3600_v42, 0.0  ;;  %v3769_v47 = vadd.f32 %v3768_v1, %v10804_v15  ;;  %v3386_v30 = vpop.f32.mrf.mxu1 }
 0x52e   : > { %v4141_v54 = vmul.f32 0.25, %v3729_v8  ;;  %v3743_v20 = vadd.f32 %v3742_v36, %v3741_v29  ;;  %v3776_v60 = vadd.f32 %v3775_v41, %v10810_v46  ;;  %v3780_v16 = vrot.slane %v3779_v53, 4 }
 0x52f   : > { %v4142_v24 = vmul.f32 0.25, %v3736_v2  ;;  %v3764_v9 = vadd.f32 %v3763_v31, %v3762_v63  ;;  %v3786_v28 = vsel %vm3687_vm12, %v3601_v18, 0.0  ;;  %v3770_v62 = vrot.slane %v3769_v47, 1  ;;  %v3423_v63 = vpop.f32.mrf.mxu3 }
 0x530   : > { %v5245_v6 = vsel %vm5074_vm3, %v4141_v54, %v5244_v61  ;;  %v4143_v58 = vmul.f32 0.25, %v3743_v20  ;;  %v3777_v55 = vrot.slane %v3776_v60, 1  ;;  %v3781_v42 = vadd.f32 %v3780_v16, %v3779_v53 }
 0x531   : > { %v5246_v15 = vsel %vm5076_vm6, %v4142_v24, %v5245_v6  ;;  %v3787_v39 = vrot.slane %v3786_v28, 4  ;;  %v3793_v46 = vsel %vm3687_vm12, %v3602_v12, 0.0  ;;  %v4144_v19 = vmul.f32 0.25, %v3750_v7 }
 0x532   : > { %v5247_v0 = vsel %vm5078_vm4, %v4143_v58, %v5246_v15  ;;  %v3771_v29 = vadd.f32 %v3770_v62, %v3769_v47  ;;  %v3778_v61 = vadd.f32 %v3777_v55, %v3776_v60  ;;  %v3782_v43 = vrot.slane %v3781_v42, 2 }
 0x533   : > { %v5305_v3 = vadd.f32 %v5247_v0, %v5157_v33  ;;  %v3788_v18 = vadd.f32 %v3787_v39, %v3786_v28  ;;  %v3794_v26 = vrot.slane %v3793_v46, 4  ;;  %v4145_v8 = vmul.f32 0.25, %v3757_v52 }
 0x534   : > { %v3783_v36 = vadd.f32 %v3782_v43, %v3781_v42  ;;  %v4146_v1 = vmul.f32 0.25, %v3764_v9  ;;  %v4147_v41 = vmul.f32 0.25, %v3771_v29  ;;  %v4148_v2 = vmul.f32 0.25, %v3778_v61 }
 0x535   : > { %v5313_v54 = vmul.f32 0.70710677, %v5305_v3  ;;  %v3789_v31 = vrot.slane %v3788_v18, 2  ;;  %v3795_v53 = vadd.f32 %v3794_v26, %v3793_v46  ;;  %v5248_v12 = vsel %vm5066_vm15, %v4145_v8, %v4144_v19 }
 0x536   : > { %v3784_v7 = vrot.slane %v3783_v36, 1  ;;  %v5249_v20 = vsel %vm5068_vm0, %v4146_v1, %v5248_v12  ;;  %v3387_v47 = vadd.f32 %v10752_v17, %v3386_v30  ;;  %v3424_v60 = vadd.f32 %v10752_v17, %v3423_v63 }
 0x537   : > { %5321 = vst.msk [vmem:[%s10971_s14] sm:$0xff] %vm1428_vm7, %v5313_v54  ;;  %v3790_v52 = vadd.f32 %v3789_v31, %v3788_v18  ;;  %v3796_v16 = vrot.slane %v3795_v53, 2  ;;  %v5250_v24 = vsel %vm5070_vm1, %v4147_v41, %v5249_v20  ;;  %v3608_v6 = vrot.slane %v10862_v38, 6 }
 0x538   : > { %v3785_v9 = vadd.f32 %v3784_v7, %v3783_v36  ;;  %v5251_v28 = vsel %vm5072_vm2, %v4148_v2, %v5250_v24  ;;  %vm3445_vm9 = vcmp.ge.f32.partialorder %v3387_v47, 0.0  ;;  %v3477_v58 = vmul.f32 0.2, %v3387_v47 }
 0x539   : > { %v3791_v33 = vrot.slane %v3790_v52, 1  ;;  %v3797_v62 = vadd.f32 %v3796_v16, %v3795_v53  ;;  %vm3460_vm13 = vcmp.ge.f32.partialorder %v3424_v60, 0.0  ;;  %v3492_v55 = vmul.f32 0.2, %v3424_v60 }
 0x53a   : > { %v4149_v42 = vmul.f32 0.25, %v3785_v9  ;;  %v3509_v15 = vsel %vm3445_vm9, %v3387_v47, %v3477_v58  ;;  %v3806_v39 = vadd.f32 %v3805_v59, %v10873_v48  ;;  %v3812_v46 = vrot.slane %v10881_v32, 1 }
 0x53b   : > { %v3792_v19 = vadd.f32 %v3791_v33, %v3790_v52  ;;  %v3798_v0 = vrot.slane %v3797_v62, 1  ;;  %v3546_v29 = vsel %vm1428_vm7, %v3509_v15, 0.0  ;;  %v3524_v61 = vsel %vm3460_vm13, %v3424_v60, %v3492_v55 }
 0x53c   : > { %v5252_v43 = vsel %vm5074_vm3, %v4149_v42, %v5251_v28  ;;  %v3547_v3 = vadd.f32 %v3546_v29, %v10886_v21  ;;  %v10986_v18 = vsel %vm1428_vm7, %v3524_v61, 0.0  ;;  %v3813_v26 = vadd.f32 %v3812_v46, %v10881_v32  ;;  %v5159_v21 = vpop.f32.mrf.mxu2 }
 0x53d   : > { %v3799_v8 = vadd.f32 %v3798_v0, %v3797_v62  ;;  %v4150_v30 = vmul.f32 0.25, %v3792_v19  ;;  %v3818_v48 = vadd.f32 %v3817_v23, %v10864_v4  ;;  %v3824_v59 = vrot.slane %v10866_v45, 2 }
 0x53e   : > { %v3609_v63 = vrot.slane %v3547_v3, 2  ;;  %v3610_v36 = vrot.slane %v3547_v3, 4  ;;  %v3611_v1 = vrot.slane %v3547_v3, 6  ;;  %v3856_v41 = vsel %vm3687_vm12, %v3547_v3, 0.0 }
 0x53f   : > { %v4151_v2 = vmul.f32 0.25, %v3799_v8  ;;  %v5253_v54 = vsel %vm5076_vm6, %v4150_v30, %v5252_v43  ;;  %v3857_v31 = vrot.slane %v3856_v41, 4  ;;  %v3819_v53 = vrot.slane %v3818_v48, 1 }
 0x540   : > { %v3863_v32 = vsel %vm3687_vm12, %v3609_v63, 0.0  ;;  %v3870_v12 = vsel %vm3687_vm12, %v3610_v36, 0.0  ;;  %v3877_v7 = vsel %vm3687_vm12, %v3611_v1, 0.0  ;;  %v3825_v4 = vadd.f32 %v3824_v59, %v10866_v45  ;;  %v3426_v1 = vpop.f32.mrf.mxu3 }
 0x541   : > { %v5254_v23 = vsel %vm5078_vm4, %v4151_v2, %v5253_v54  ;;  %v3858_v20 = vadd.f32 %v3857_v31, %v3856_v41  ;;  %v3864_v47 = vrot.slane %v3863_v32, 4  ;;  %v3871_v60 = vrot.slane %v3870_v12, 4 }
 0x542   : > { %v5306_v52 = vadd.f32 %v5254_v23, %v5159_v21  ;;  %v3878_v16 = vrot.slane %v3877_v7, 4  ;;  %v3820_v24 = vadd.f32 %v3819_v53, %v3818_v48  ;;  %v3826_v9 = vrot.slane %v3825_v4, 1  ;;  %v3388_v48 = vpop.f32.mrf.mxu1 }
 0x543   : > { %v3859_v28 = vrot.slane %v3858_v20, 2  ;;  %v3865_v58 = vadd.f32 %v3864_v47, %v3863_v32  ;;  %v3872_v33 = vadd.f32 %v3871_v60, %v3870_v12  ;;  %v3831_v62 = vrot.slane %v10883_v40, 2 }
 0x544   : > { %v5314_v55 = vmul.f32 0.70710677, %v5306_v52  ;;  %v11001_v42 = vadd.f32 %v3878_v16, %v3877_v7  ;;  %v3827_v15 = vadd.f32 %v3826_v9, %v3825_v4  ;;  %v3835_v45 = vsel %vm3687_vm12, %v3606_v35, 0.0 }
 0x545   : > { %v3860_v46 = vadd.f32 %v3859_v28, %v3858_v20  ;;  %v3866_v19 = vrot.slane %v3865_v58, 2  ;;  %v3873_v0 = vrot.slane %v3872_v33, 2  ;;  %v3832_v29 = vadd.f32 %v3831_v62, %v10883_v40 }
 0x546   : > { %5322 = vst.msk [vmem:[%s10971_s14 + $0x8] sm:$0xff] %vm1428_vm7, %v5314_v55  ;;  %v3836_v61 = vrot.slane %v3835_v45, 4  ;;  %v11802_v43 = vrot.slane %v10862_v38, 4  ;;  %v3849_v8 = vsel %vm3687_vm12, %v3608_v6, 0.0  ;;  %v4152_v30 = vmul.f32 0.25, %v3806_v39 }
 0x547   : > { %v3861_v59 = vrot.slane %v3860_v46, 1  ;;  %v3867_v63 = vadd.f32 %v3866_v19, %v3865_v58  ;;  %v3833_v36 = vrot.slane %v3832_v29, 1  ;;  %v3850_v2 = vrot.slane %v3849_v8, 4 }
 0x548   : > { %v3842_v3 = vsel %vm3687_vm12, %v11802_v43, 0.0  ;;  %v3837_v41 = vadd.f32 %v3836_v61, %v3835_v45  ;;  %v4153_v21 = vmul.f32 0.25, %v3813_v26  ;;  %v4154_v40 = vmul.f32 0.25, %v3820_v24 }
 0x549   : > { %v3843_v35 = vrot.slane %v3842_v3, 4  ;;  %v3834_v54 = vadd.f32 %v3833_v36, %v3832_v29  ;;  %v4155_v53 = vmul.f32 0.25, %v3827_v15  ;;  %v3389_v38 = vadd.f32 %v10752_v17, %v3388_v48 }
 0x54a   : > { %v3838_v32 = vrot.slane %v3837_v41, 2  ;;  %v3851_v12 = vadd.f32 %v3850_v2, %v3849_v8  ;;  %v5255_v6 = vsel %vm5066_vm15, %v4153_v21, %v4152_v30  ;;  %v3427_v39 = vadd.f32 %v10752_v17, %v3426_v1 }
 0x54b   : > { %v3844_v31 = vadd.f32 %v3843_v35, %v3842_v3  ;;  %v4156_v4 = vmul.f32 0.25, %v3834_v54  ;;  %v5256_v23 = vsel %vm5068_vm0, %v4154_v40, %v5255_v6  ;;  %vm3446_vm10 = vcmp.ge.f32.partialorder %v3389_v38, 0.0 }
 0x54c   : > { %v3839_v20 = vadd.f32 %v3838_v32, %v3837_v41  ;;  %v3852_v47 = vrot.slane %v3851_v12, 2  ;;  %v5257_v26 = vsel %vm5070_vm1, %v4155_v53, %v5256_v23  ;;  %v3478_v60 = vmul.f32 0.2, %v3389_v38 }
 0x54d   : > { %v3845_v7 = vrot.slane %v3844_v31, 2  ;;  %v5258_v16 = vsel %vm5072_vm2, %v4156_v4, %v5257_v26  ;;  %vm3461_vm5 = vcmp.ge.f32.partialorder %v3427_v39, 0.0  ;;  %v3493_v24 = vmul.f32 0.2, %v3427_v39 }
 0x54e   : > { %v3840_v9 = vrot.slane %v3839_v20, 1  ;;  %v3853_v28 = vadd.f32 %v3852_v47, %v3851_v12  ;;  %v3510_v58 = vsel %vm3446_vm10, %v3389_v38, %v3478_v60  ;;  %v11019_v62 = vadd.f32 %v3861_v59, %v3860_v46  ;;  %v3391_v47 = vpop.f32.mrf.mxu1 }
 0x54f   : > { %v3846_v52 = vadd.f32 %v3845_v7, %v3844_v31  ;;  %v3549_v15 = vsel %vm1428_vm7, %v3510_v58, 0.0  ;;  %v3525_v45 = vsel %vm3461_vm5, %v3427_v39, %v3493_v24  ;;  %v3868_v19 = vrot.slane %v3867_v63, 1  ;;  %v5162_v31 = vpop.f32.mrf.mxu2 }
 0x550   : > { %v3841_v29 = vadd.f32 %v3840_v9, %v3839_v20  ;;  %v3854_v61 = vrot.slane %v3853_v28, 1  ;;  %v3550_v43 = vadd.f32 %v3549_v15, %v10910_v22  ;;  %v3570_v3 = vsel %vm1428_vm7, %v3525_v45, 0.0 }
 0x551   : > { %v3847_v55 = vrot.slane %v3846_v52, 1  ;;  %v3571_v30 = vadd.f32 %v3570_v3, %v10944_v49  ;;  %v3869_v48 = vadd.f32 %v3868_v19, %v3867_v63  ;;  %v3874_v36 = vadd.f32 %v3873_v0, %v3872_v33 }
 0x552   : > { %v3855_v35 = vadd.f32 %v3854_v61, %v3853_v28  ;;  %v4157_v1 = vmul.f32 0.25, %v3841_v29  ;;  %v3612_v46 = vrot.slane %v3550_v43, 2  ;;  %v3613_v59 = vrot.slane %v3550_v43, 4 }
 0x553   : > { %v3848_v8 = vadd.f32 %v3847_v55, %v3846_v52  ;;  %v3884_v2 = vsel %vm3687_vm12, %v3550_v43, 0.0  ;;  %v3633_v21 = vrot.slane %v3571_v30, 2  ;;  %v3634_v40 = vrot.slane %v3571_v30, 4 }
 0x554   : > { %v4159_v54 = vmul.f32 0.25, %v3855_v35  ;;  %v5259_v22 = vsel %vm5074_vm3, %v4157_v1, %v5258_v16  ;;  %v3885_v53 = vrot.slane %v3884_v2, 4  ;;  %v3635_v38 = vrot.slane %v3571_v30, 6 }
 0x555   : > { %v4158_v41 = vmul.f32 0.25, %v3848_v8  ;;  %v4080_v49 = vsel %vm3687_vm12, %v3571_v30, 0.0  ;;  %v4087_v33 = vsel %vm3687_vm12, %v3633_v21, 0.0  ;;  %v4094_v0 = vsel %vm3687_vm12, %v3634_v40, 0.0 }
 0x556   : > { %v3886_v12 = vadd.f32 %v3885_v53, %v3884_v2  ;;  %v4081_v6 = vrot.slane %v4080_v49, 4  ;;  %v4088_v39 = vrot.slane %v4087_v33, 4  ;;  %v4095_v4 = vrot.slane %v4094_v0, 4 }
 0x557   : > { %v5260_v32 = vsel %vm5076_vm6, %v4158_v41, %v5259_v22  ;;  %v4101_v23 = vsel %vm3687_vm12, %v3635_v38, 0.0  ;;  %v3614_v20 = vrot.slane %v3550_v43, 6  ;;  %v3875_v16 = vrot.slane %v3874_v36, 1 }
 0x558   : > { %v5261_v63 = vsel %vm5078_vm4, %v4159_v54, %v5260_v32  ;;  %v4082_v26 = vadd.f32 %v4081_v6, %v4080_v49  ;;  %v4089_v60 = vadd.f32 %v4088_v39, %v4087_v33  ;;  %v4102_v52 = vrot.slane %v4101_v23, 4 }
 0x559   : > { %v5307_v7 = vadd.f32 %v5261_v63, %v5162_v31  ;;  %v11033_v9 = vadd.f32 %v4095_v4, %v4094_v0  ;;  %v3880_v28 = vrot.slane %v11001_v42, 2  ;;  %v3887_v58 = vrot.slane %v3886_v12, 2  ;;  %v3428_v0 = vpop.f32.mrf.mxu3 }
 0x55a   : > { %v4083_v55 = vrot.slane %v4082_v26, 2  ;;  %v4090_v15 = vrot.slane %v4089_v60, 2  ;;  %v11036_v45 = vadd.f32 %v4102_v52, %v4101_v23  ;;  %v3876_v19 = vadd.f32 %v3875_v16, %v3874_v36 }
 0x55b   : > { %v5315_v24 = vmul.f32 0.70710677, %v5307_v7  ;;  %v4097_v29 = vrot.slane %v11033_v9, 2  ;;  %v3881_v61 = vadd.f32 %v3880_v28, %v11001_v42  ;;  %v3888_v43 = vadd.f32 %v3887_v58, %v3886_v12  ;;  %v3393_v7 = vpop.f32.mrf.mxu1 }
 0x55c   : > { %v3891_v3 = vsel %vm3687_vm12, %v3612_v46, 0.0  ;;  %v11043_v8 = vadd.f32 %v4083_v55, %v4082_v26  ;;  %v11045_v30 = vadd.f32 %v4090_v15, %v4089_v60  ;;  %v3898_v1 = vsel %vm3687_vm12, %v3613_v59, 0.0 }
 0x55d   : > { %5323 = vst.msk [vmem:[%s10971_s14 + $0x10] sm:$0xff] %vm1428_vm7, %v5315_v24  ;;  %v3892_v35 = vrot.slane %v3891_v3, 4  ;;  %v3882_v41 = vrot.slane %v3881_v61, 1  ;;  %v3889_v2 = vrot.slane %v3888_v43, 1  ;;  %v3899_v21 = vrot.slane %v3898_v1, 4 }
 0x55e   : > { %v3905_v36 = vsel %vm3687_vm12, %v3614_v20, 0.0  ;;  %v4085_v40 = vrot.slane %v11043_v8, 1  ;;  %v4160_v42 = vmul.f32 0.25, %v11019_v62  ;;  %v4161_v38 = vmul.f32 0.25, %v3869_v48 }
 0x55f   : > { %v3893_v54 = vadd.f32 %v3892_v35, %v3891_v3  ;;  %v3906_v31 = vrot.slane %v3905_v36, 4  ;;  %v3883_v22 = vadd.f32 %v3882_v41, %v3881_v61  ;;  %v3890_v46 = vadd.f32 %v3889_v2, %v3888_v43 }
 0x560   : > { %v3900_v53 = vadd.f32 %v3899_v21, %v3898_v1  ;;  %v4162_v33 = vmul.f32 0.25, %v3876_v19  ;;  %v3392_v59 = vadd.f32 %v10752_v17, %v3391_v47  ;;  %v5262_v39 = vsel %vm5066_vm15, %v4161_v38, %v4160_v42  ;;  %v6839_v17 = vld [vmem:[%s11227_s4] ss:$0 sm:$0xff] }
 0x561   : > { %v3894_v32 = vrot.slane %v3893_v54, 2  ;;  %v3907_v49 = vadd.f32 %v3906_v31, %v3905_v36  ;;  %v4163_v12 = vmul.f32 0.25, %v3883_v22  ;;  %v4164_v6 = vmul.f32 0.25, %v3890_v46 }
 0x562   : > { %v3901_v63 = vrot.slane %v3900_v53, 2  ;;  %v5263_v62 = vsel %vm5068_vm0, %v4162_v33, %v5262_v39  ;;  %vm3447_vm11 = vcmp.ge.f32.partialorder %v3392_v59, 0.0  ;;  %v3479_v26 = vmul.f32 0.2, %v3392_v59 }
 0x563   : > { %v3895_v4 = vadd.f32 %v3894_v32, %v3893_v54  ;;  %v3908_v23 = vrot.slane %v3907_v49, 2  ;;  %v5264_v48 = vsel %vm5070_vm1, %v4163_v12, %v5263_v62  ;;  %v3429_v47 = vadd.f32 %v6839_v17, %v3428_v0  ;;  %v5164_v0 = vpop.f32.mrf.mxu2 }
 0x564   : > { %v3902_v20 = vadd.f32 %v3901_v63, %v3900_v53  ;;  %v5265_v16 = vsel %vm5072_vm2, %v4164_v6, %v5264_v48  ;;  %v3394_v24 = vadd.f32 %v6839_v17, %v3393_v7  ;;  %v3511_v58 = vsel %vm3447_vm11, %v3392_v59, %v3479_v26 }
 0x565   : > { %v3896_v60 = vrot.slane %v3895_v4, 1  ;;  %v3909_v52 = vadd.f32 %v3908_v23, %v3907_v49  ;;  %vm3462_vm8 = vcmp.ge.f32.partialorder %v3429_v47, 0.0  ;;  %v3494_v55 = vmul.f32 0.2, %v3429_v47 }
 0x566   : > { %v3903_v28 = vrot.slane %v3902_v20, 1  ;;  %v3551_v61 = vsel %vm1428_vm7, %v3511_v58, 0.0  ;;  %vm3448_vm14 = vcmp.ge.f32.partialorder %v3394_v24, 0.0  ;;  %v3480_v1 = vmul.f32 0.2, %v3394_v24 }
 0x567   : > { %v3897_v15 = vadd.f32 %v3896_v60, %v3895_v4  ;;  %v3910_v19 = vrot.slane %v3909_v52, 1  ;;  %v3553_v3 = vadd.f32 %v10663_v37, %v3551_v61  ;;  %v3526_v35 = vsel %vm3462_vm8, %v3429_v47, %v3494_v55 }
 0x568   : > { %v3904_v43 = vadd.f32 %v3903_v28, %v3902_v20  ;;  %v3573_v21 = vsel %vm1428_vm7, %v3526_v35, 0.0  ;;  %v3626_v36 = vrot.slane %v10820_v10, 6  ;;  %v3512_v58 = vsel %vm3448_vm14, %v3394_v24, %v3480_v1 }
 0x569   : > { %v3911_v41 = vadd.f32 %v3910_v19, %v3909_v52  ;;  %v4165_v2 = vmul.f32 0.25, %v3897_v15  ;;  %v3615_v31 = vrot.slane %v3553_v3, 2  ;;  %v3616_v42 = vrot.slane %v3553_v3, 4 }
 0x56a   : > { %v4166_v54 = vmul.f32 0.25, %v3904_v43  ;;  %v3617_v22 = vrot.slane %v3553_v3, 6  ;;  %v3912_v38 = vsel %vm3687_vm12, %v3553_v3, 0.0  ;;  %v11066_v32 = vadd.f32 %v3573_v21, %v10986_v18 }
 0x56b   : > { %v4167_v46 = vmul.f32 0.25, %v3911_v41  ;;  %v5266_v53 = vsel %vm5074_vm3, %v4165_v2, %v5265_v16  ;;  %v3913_v49 = vrot.slane %v3912_v38, 4  ;;  %v3919_v33 = vsel %vm3687_vm12, %v3615_v31, 0.0 }
 0x56c   : > { %v5267_v37 = vsel %vm5076_vm6, %v4166_v54, %v5266_v53  ;;  %v3926_v59 = vsel %vm3687_vm12, %v3616_v42, 0.0  ;;  %v3920_v12 = vrot.slane %v3919_v33, 4  ;;  %v3933_v39 = vsel %vm3687_vm12, %v3617_v22, 0.0 }
 0x56d   : > { %v5268_v63 = vsel %vm5078_vm4, %v4167_v46, %v5267_v37  ;;  %v3927_v6 = vrot.slane %v3926_v59, 4  ;;  %v3914_v4 = vadd.f32 %v3913_v49, %v3912_v38  ;;  %v3934_v23 = vrot.slane %v3933_v39, 4 }
 0x56e   : > { %v5308_v7 = vadd.f32 %v5268_v63, %v5164_v0  ;;  %v3636_v18 = vrot.slane %v11066_v32, 2  ;;  %v3921_v62 = vadd.f32 %v3920_v12, %v3919_v33  ;;  %v3637_v48 = vrot.slane %v11066_v32, 4 }
 0x56f   : > { %v3928_v20 = vadd.f32 %v3927_v6, %v3926_v59  ;;  %v4108_v26 = vsel %vm3687_vm12, %v11066_v32, 0.0  ;;  %v3915_v47 = vrot.slane %v3914_v4, 2  ;;  %v3935_v60 = vadd.f32 %v3934_v23, %v3933_v39 }
 0x570   : > { %v5316_v17 = vmul.f32 0.70710677, %v5308_v7  ;;  %v4109_v52 = vrot.slane %v4108_v26, 4  ;;  %v3922_v16 = vrot.slane %v3921_v62, 2  ;;  %v11803_v55 = vrot.slane %v10835_v56, 1 }
 0x571   : > { %v3929_v28 = vrot.slane %v3928_v20, 2  ;;  %v3916_v19 = vadd.f32 %v3915_v47, %v3914_v4  ;;  %v3936_v61 = vrot.slane %v3935_v60, 2  ;;  %v3554_v3 = vsel %vm1428_vm7, %v3512_v58, 0.0 }
 0x572   : > { %v11081_v15 = vadd.f32 %v11803_v55, %v10835_v56  ;;  %5324 = vst.msk [vmem:[%s10971_s14 + $0x18] sm:$0xff] %vm1428_vm7, %v5316_v17  ;;  %v11085_v43 = vadd.f32 %v4109_v52, %v4108_v26  ;;  %v3923_v35 = vadd.f32 %v3922_v16, %v3921_v62  ;;  %v3556_v2 = vadd.f32 %v10773_v57, %v3554_v3 }
 0x573   : > { %v3930_v41 = vadd.f32 %v3929_v28, %v3928_v20  ;;  %v3980_v21 = vrot.slane %v10837_v44, 1  ;;  %v3917_v24 = vrot.slane %v3916_v19, 1  ;;  %v3937_v1 = vadd.f32 %v3936_v61, %v3935_v60 }
 0x574   : > { %v11804_v56 = vrot.slane %v10825_v13, 2  ;;  %v3992_v31 = vrot.slane %v10827_v25, 2  ;;  %v3924_v42 = vrot.slane %v3923_v35, 1  ;;  %v3618_v46 = vrot.slane %v3556_v2, 2 }
 0x575   : > { %v3931_v22 = vrot.slane %v3930_v41, 1  ;;  %v3619_v53 = vrot.slane %v3556_v2, 4  ;;  %v3918_v38 = vadd.f32 %v3917_v24, %v3916_v19  ;;  %v3938_v37 = vrot.slane %v3937_v1, 1 }
 0x576   : > { %v3986_v54 = vadd.f32 %v11804_v56, %v10825_v13  ;;  %v3620_v49 = vrot.slane %v3556_v2, 6  ;;  %v3940_v33 = vsel %vm3687_vm12, %v3556_v2, 0.0  ;;  %v3925_v57 = vadd.f32 %v3924_v42, %v3923_v35 }
 0x577   : > { %v3932_v59 = vadd.f32 %v3931_v22, %v3930_v41  ;;  %v3941_v0 = vrot.slane %v3940_v33, 4  ;;  %v3947_v63 = vsel %vm3687_vm12, %v3618_v46, 0.0  ;;  %v3939_v12 = vadd.f32 %v3938_v37, %v3937_v1 }
 0x578   : > { %v4168_v6 = vmul.f32 0.25, %v3918_v38  ;;  %v3948_v39 = vrot.slane %v3947_v63, 4  ;;  %v3954_v13 = vsel %vm3687_vm12, %v3619_v53, 0.0  ;;  %v4169_v7 = vmul.f32 0.25, %v3925_v57 }
 0x579   : > { %v4170_v4 = vmul.f32 0.25, %v3932_v59  ;;  %v3942_v23 = vadd.f32 %v3941_v0, %v3940_v33  ;;  %v3955_v62 = vrot.slane %v3954_v13, 4  ;;  %v4171_v20 = vmul.f32 0.25, %v3939_v12 }
 0x57a   : > { %v3949_v26 = vadd.f32 %v3948_v39, %v3947_v63  ;;  %v3961_v17 = vsel %vm3687_vm12, %v3620_v49, 0.0  ;;  %v3981_v47 = vadd.f32 %v3980_v21, %v10837_v44  ;;  %v5269_v60 = vsel %vm5066_vm15, %v4169_v7, %v4168_v6 }
 0x57b   : > { %v3943_v52 = vrot.slane %v3942_v23, 2  ;;  %v3956_v16 = vadd.f32 %v3955_v62, %v3954_v13  ;;  %v3962_v28 = vrot.slane %v3961_v17, 4  ;;  %v5270_v58 = vsel %vm5068_vm0, %v4170_v4, %v5269_v60 }
 0x57c   : > { %v3950_v55 = vrot.slane %v3949_v26, 2  ;;  %v3987_v19 = vrot.slane %v3986_v54, 1  ;;  %v3993_v61 = vadd.f32 %v3992_v31, %v10827_v25  ;;  %v5271_v3 = vsel %vm5070_vm1, %v4171_v20, %v5270_v58 }
 0x57d   : > { %v3944_v35 = vadd.f32 %v3943_v52, %v3942_v23  ;;  %v3957_v41 = vrot.slane %v3956_v16, 2  ;;  %v3963_v2 = vadd.f32 %v3962_v28, %v3961_v17  ;;  %v3999_v44 = vrot.slane %v10839_v27, 2 }
 0x57e   : > { %v3951_v24 = vadd.f32 %v3950_v55, %v3949_v26  ;;  %v3988_v1 = vadd.f32 %v3987_v19, %v3986_v54  ;;  %v3994_v56 = vrot.slane %v3993_v61, 1  ;;  %v11805_v46 = vrot.slane %v10820_v10, 2  ;;  %v5167_v19 = vpop.f32.mrf.mxu2 }
 0x57f   : > { %v3945_v21 = vrot.slane %v3944_v35, 1  ;;  %v3958_v42 = vadd.f32 %v3957_v41, %v3956_v16  ;;  %v3964_v22 = vrot.slane %v3963_v2, 2  ;;  %v4000_v25 = vadd.f32 %v3999_v44, %v10839_v27 }
 0x580   : > { %v4003_v53 = vsel %vm3687_vm12, %v11805_v46, 0.0  ;;  %v3952_v38 = vrot.slane %v3951_v24, 1  ;;  %v3995_v37 = vadd.f32 %v3994_v56, %v3993_v61  ;;  %v11806_v54 = vrot.slane %v10820_v10, 4 }
 0x581   : > { %v4004_v31 = vrot.slane %v4003_v53, 4  ;;  %v3946_v49 = vadd.f32 %v3945_v21, %v3944_v35  ;;  %v3959_v33 = vrot.slane %v3958_v42, 1  ;;  %v3965_v57 = vadd.f32 %v3964_v22, %v3963_v2 }
 0x582   : > { %v4010_v59 = vsel %vm3687_vm12, %v11806_v54, 0.0  ;;  %v3953_v0 = vadd.f32 %v3952_v38, %v3951_v24  ;;  %v4001_v63 = vrot.slane %v4000_v25, 1  ;;  %v4017_v4 = vsel %vm3687_vm12, %v3626_v36, 0.0 }
 0x583   : > { %v4005_v12 = vadd.f32 %v4004_v31, %v4003_v53  ;;  %v4011_v6 = vrot.slane %v4010_v59, 4  ;;  %v3960_v39 = vadd.f32 %v3959_v33, %v3958_v42  ;;  %v3966_v13 = vrot.slane %v3965_v57, 1 }
 0x584   : > { %v4172_v7 = vmul.f32 0.25, %v3946_v49  ;;  %v4173_v27 = vmul.f32 0.25, %v3953_v0  ;;  %v4002_v23 = vadd.f32 %v4001_v63, %v4000_v25  ;;  %v4018_v52 = vrot.slane %v4017_v4, 4 }
 0x585   : > { %v4006_v62 = vrot.slane %v4005_v12, 2  ;;  %v4012_v20 = vadd.f32 %v4011_v6, %v4010_v59  ;;  %v3967_v26 = vadd.f32 %v3966_v13, %v3965_v57  ;;  %v4174_v17 = vmul.f32 0.25, %v3960_v39 }
 0x586   : > { %v5272_v60 = vsel %vm5072_vm2, %v4172_v7, %v5271_v3  ;;  %v4176_v55 = vmul.f32 0.25, %v11081_v15  ;;  %v4019_v36 = vadd.f32 %v4018_v52, %v4017_v4  ;;  %v4177_v35 = vmul.f32 0.25, %v3981_v47 }
 0x587   : > { %v5273_v16 = vsel %vm5074_vm3, %v4173_v27, %v5272_v60  ;;  %v4007_v28 = vadd.f32 %v4006_v62, %v4005_v12  ;;  %v4013_v58 = vrot.slane %v4012_v20, 2  ;;  %v4175_v61 = vmul.f32 0.25, %v3967_v26 }
 0x588   : > { %v5274_v10 = vsel %vm5076_vm6, %v4174_v17, %v5273_v16  ;;  %v4178_v24 = vmul.f32 0.25, %v3988_v1  ;;  %v4179_v56 = vmul.f32 0.25, %v3995_v37  ;;  %v4020_v3 = vrot.slane %v4019_v36, 2  ;;  %v5169_v16 = vpop.f32.mrf.mxu2 }
 0x589   : > { %v4008_v41 = vrot.slane %v4007_v28, 1  ;;  %v4014_v2 = vadd.f32 %v4013_v58, %v4012_v20  ;;  %v5275_v44 = vsel %vm5078_vm4, %v4175_v61, %v5274_v10  ;;  %v4180_v21 = vmul.f32 0.25, %v4002_v23 }
 0x58a   : > { %v5276_v42 = vsel %vm5066_vm15, %v4177_v35, %v4176_v55  ;;  %v5309_v22 = vadd.f32 %v5275_v44, %v5167_v19  ;;  %v4021_v38 = vadd.f32 %v4020_v3, %v4019_v36  ;;  %v3632_v47 = vrot.slane %v10894_v34, 6 }
 0x58b   : > { %v4009_v46 = vadd.f32 %v4008_v41, %v4007_v28  ;;  %v4015_v15 = vrot.slane %v4014_v2, 1  ;;  %v5277_v53 = vsel %vm5068_vm0, %v4178_v24, %v5276_v42  ;;  %v11807_v1 = vrot.slane %v10912_v11, 1 }
 0x58c   : > { %v5278_v25 = vsel %vm5070_vm1, %v4179_v56, %v5277_v53  ;;  %v5317_v31 = vmul.f32 0.70710677, %v5309_v22  ;;  %v4022_v54 = vrot.slane %v4021_v38, 1  ;;  %v4036_v59 = vrot.slane %v10921_v14, 1 }
 0x58d   : > { %v4030_v37 = vadd.f32 %v11807_v1, %v10912_v11  ;;  %v4016_v49 = vadd.f32 %v4015_v15, %v4014_v2  ;;  %v4181_v33 = vmul.f32 0.25, %v4009_v46  ;;  %v5279_v57 = vsel %vm5072_vm2, %v4180_v21, %v5278_v25 }
 0x58e   : > { %v11808_v0 = vrot.slane %v10901_v51, 2  ;;  %v4048_v12 = vrot.slane %v10903_v5, 2  ;;  %5325 = vst.msk [vmem:[%s10971_s14 + $0x20] sm:$0xff] %vm1428_vm7, %v5317_v31  ;;  %v4055_v11 = vrot.slane %v10923_v50, 2  ;;  %v11809_v13 = vrot.slane %v10894_v34, 2 }
 0x58f   : > { %v4182_v6 = vmul.f32 0.25, %v4016_v49  ;;  %v5280_v39 = vsel %vm5074_vm3, %v4181_v33, %v5279_v57  ;;  %v4023_v4 = vadd.f32 %v4022_v54, %v4021_v38  ;;  %v4037_v27 = vadd.f32 %v4036_v59, %v10921_v14 }
 0x590   : > { %v4042_v63 = vadd.f32 %v11808_v0, %v10901_v51  ;;  %v4059_v7 = vsel %vm3687_vm12, %v11809_v13, 0.0  ;;  %v4049_v62 = vadd.f32 %v4048_v12, %v10903_v5  ;;  %v4056_v20 = vadd.f32 %v4055_v11, %v10923_v50 }
 0x591   : > { %v5281_v51 = vsel %vm5076_vm6, %v4182_v6, %v5280_v39  ;;  %v4060_v26 = vrot.slane %v4059_v7, 4  ;;  %v11810_v17 = vrot.slane %v10894_v34, 4  ;;  %v4183_v52 = vmul.f32 0.25, %v4023_v4 }
 0x592   : > { %v4043_v23 = vrot.slane %v4042_v63, 1  ;;  %v4050_v58 = vrot.slane %v4049_v62, 1  ;;  %v4057_v19 = vrot.slane %v4056_v20, 1  ;;  %v4073_v14 = vsel %vm3687_vm12, %v3632_v47, 0.0 }
 0x593   : > { %v4066_v60 = vsel %vm3687_vm12, %v11810_v17, 0.0  ;;  %v4061_v61 = vadd.f32 %v4060_v26, %v4059_v7  ;;  %v4184_v10 = vmul.f32 0.25, %v4030_v37  ;;  %v5282_v5 = vsel %vm5078_vm4, %v4183_v52, %v5281_v51 }
 0x594   : > { %v4044_v28 = vadd.f32 %v4043_v23, %v4042_v63  ;;  %v4067_v55 = vrot.slane %v4066_v60, 4  ;;  %v4051_v36 = vadd.f32 %v4050_v58, %v4049_v62  ;;  %v4074_v50 = vrot.slane %v4073_v14, 4 }
 0x595   : > { %v5310_v41 = vadd.f32 %v5282_v5, %v5169_v16  ;;  %v4058_v34 = vadd.f32 %v4057_v19, %v4056_v20  ;;  %v4062_v2 = vrot.slane %v4061_v61, 2  ;;  %v4185_v24 = vmul.f32 0.25, %v4037_v27 }
 0x596   : > { %v4068_v35 = vadd.f32 %v4067_v55, %v4066_v60  ;;  %v4075_v44 = vadd.f32 %v4074_v50, %v4073_v14  ;;  %v4186_v3 = vmul.f32 0.25, %v4044_v28  ;;  %v4187_v21 = vmul.f32 0.25, %v4051_v36 }
 0x597   : > { %v5318_v42 = vmul.f32 0.70710677, %v5310_v41  ;;  %v4063_v22 = vadd.f32 %v4062_v2, %v4061_v61  ;;  %v4188_v46 = vmul.f32 0.25, %v4058_v34  ;;  %v5283_v15 = vsel %vm5066_vm15, %v4185_v24, %v4184_v10 }
 0x598   : > { %v4069_v56 = vrot.slane %v4068_v35, 2  ;;  %v4076_v38 = vrot.slane %v4075_v44, 2  ;;  %v5284_v25 = vsel %vm5068_vm0, %v4186_v3, %v5283_v15  ;;  %v3638_v47 = vrot.slane %v11066_v32, 6 }
 0x599   : > { %5326 = vst.msk [vmem:[%s10971_s14 + $0x28] sm:$0xff] %vm1428_vm7, %v5318_v42  ;;  %v4064_v1 = vrot.slane %v4063_v22, 1  ;;  %v5285_v37 = vsel %vm5070_vm1, %v4187_v21, %v5284_v25  ;;  %v4086_v31 = vadd.f32 %v4085_v40, %v11043_v8  ;;  %v4092_v49 = vrot.slane %v11045_v30, 1 }
 0x59a   : > { %v4070_v53 = vadd.f32 %v4069_v56, %v4068_v35  ;;  %v4077_v57 = vadd.f32 %v4076_v38, %v4075_v44  ;;  %v5286_v54 = vsel %vm5072_vm2, %v4188_v46, %v5285_v37  ;;  %v4098_v59 = vadd.f32 %v4097_v29, %v11033_v9 }
 0x59b   : > { %v4065_v0 = vadd.f32 %v4064_v1, %v4063_v22  ;;  %v4093_v63 = vadd.f32 %v4092_v49, %v11045_v30  ;;  %v4104_v12 = vrot.slane %v11036_v45, 2  ;;  %v4111_v6 = vrot.slane %v11085_v43, 2 }
 0x59c   : > { %v4071_v33 = vrot.slane %v4070_v53, 1  ;;  %v4078_v11 = vrot.slane %v4077_v57, 1  ;;  %v4099_v8 = vrot.slane %v4098_v59, 1  ;;  %v4115_v40 = vsel %vm3687_vm12, %v3636_v18, 0.0  ;;  %v5172_v18 = vpop.f32.mrf.mxu2 }
 0x59d   : > { %v4189_v13 = vmul.f32 0.25, %v4065_v0  ;;  %v4105_v7 = vadd.f32 %v4104_v12, %v11036_v45  ;;  %v4112_v4 = vadd.f32 %v4111_v6, %v11085_v43  ;;  %v4116_v9 = vrot.slane %v4115_v40, 4 }
 0x59e   : > { %v4072_v39 = vadd.f32 %v4071_v33, %v4070_v53  ;;  %v4079_v29 = vadd.f32 %v4078_v11, %v4077_v57  ;;  %v4100_v30 = vadd.f32 %v4099_v8, %v4098_v59  ;;  %v4122_v23 = vsel %vm3687_vm12, %v3637_v48, 0.0 }
 0x59f   : > { %v5287_v62 = vsel %vm5074_vm3, %v4189_v13, %v5286_v54  ;;  %v4106_v51 = vrot.slane %v4105_v7, 1  ;;  %v4113_v20 = vrot.slane %v4112_v4, 1  ;;  %v4117_v26 = vadd.f32 %v4116_v9, %v4115_v40 }
 0x5a0   : > { %v4190_v27 = vmul.f32 0.25, %v4072_v39  ;;  %v4191_v17 = vmul.f32 0.25, %v4079_v29  ;;  %v4123_v45 = vrot.slane %v4122_v23, 4  ;;  %v4129_v43 = vsel %vm3687_vm12, %v3638_v47, 0.0 }
 0x5a1   : > { %v4107_v52 = vadd.f32 %v4106_v51, %v4105_v7  ;;  %v4114_v16 = vadd.f32 %v4113_v20, %v4112_v4  ;;  %v4118_v28 = vrot.slane %v4117_v26, 2  ;;  %v4130_v58 = vrot.slane %v4129_v43, 4 }
 0x5a2   : > { %v5288_v60 = vsel %vm5076_vm6, %v4190_v27, %v5287_v62  ;;  %v4124_v55 = vadd.f32 %v4123_v45, %v4122_v23  ;;  %v4192_v48 = vmul.f32 0.25, %v4086_v31  ;;  %v4193_v19 = vmul.f32 0.25, %v4093_v63 }
 0x5a3   : > { %v5289_v32 = vsel %vm5078_vm4, %v4191_v17, %v5288_v60  ;;  %v4119_v14 = vadd.f32 %v4118_v28, %v4117_v26  ;;  %v4131_v10 = vadd.f32 %v4130_v58, %v4129_v43  ;;  %v4194_v5 = vmul.f32 0.25, %v4100_v30 }
 0x5a4   : > { %v5311_v61 = vadd.f32 %v5289_v32, %v5172_v18  ;;  %v4125_v36 = vrot.slane %v4124_v55, 2  ;;  %v4195_v35 = vmul.f32 0.25, %v4107_v52  ;;  %v4196_v50 = vmul.f32 0.25, %v4114_v16  ;;  %v5174_v49 = vpop.f32.mrf.mxu2 }
 0x5a5   : > { %v5290_v41 = vsel %vm5066_vm15, %v4193_v19, %v4192_v48  ;;  %v4120_v2 = vrot.slane %v4119_v14, 1  ;;  %v4132_v24 = vrot.slane %v4131_v10, 2 }
 0x5a6   : > { %v5319_v34 = vmul.f32 0.70710677, %v5311_v61  ;;  %v5291_v56 = vsel %vm5068_vm0, %v4194_v5, %v5290_v41  ;;  %v4126_v44 = vadd.f32 %v4125_v36, %v4124_v55 }
 0x5a7   : > { %v4121_v3 = vadd.f32 %v4120_v2, %v4119_v14  ;;  %v4133_v21 = vadd.f32 %v4132_v24, %v4131_v10  ;;  %v5292_v42 = vsel %vm5070_vm1, %v4195_v35, %v5291_v56 }
 0x5a8   : > { %5327 = vst.msk [vmem:[%s10971_s14 + $0x30] sm:$0xff] %vm1428_vm7, %v5319_v34  ;;  %v4127_v22 = vrot.slane %v4126_v44, 1  ;;  %v5293_v46 = vsel %vm5072_vm2, %v4196_v50, %v5292_v42 }
 0x5a9   : > { %v4134_v15 = vrot.slane %v4133_v21, 1  ;;  %v4197_v53 = vmul.f32 0.25, %v4121_v3 }
 0x5aa   : > { %v4128_v38 = vadd.f32 %v4127_v22, %v4126_v44 }
 0x5ab   : > { %v4135_v25 = vadd.f32 %v4134_v15, %v4133_v21  ;;  %v5294_v47 = vsel %vm5074_vm3, %v4197_v53, %v5293_v46 }
 0x5ac   : > { %v4198_v1 = vmul.f32 0.25, %v4128_v38 }
 0x5ad   : > { %v4199_v37 = vmul.f32 0.25, %v4135_v25 }
 0x5ae   : > { %v5295_v31 = vsel %vm5076_vm6, %v4198_v1, %v5294_v47 }
 0x5af   : > { %v5296_v33 = vsel %vm5078_vm4, %v4199_v37, %v5295_v31 }
 0x5b0   : > { %v5312_v57 = vadd.f32 %v5296_v33, %v5174_v49 }
 0x5b2   : > { %v5320_v54 = vmul.f32 0.70710677, %v5312_v57 }
 0x5b4   : > { %5328 = vst.msk [vmem:[%s10971_s14 + $0x38] sm:$0xff] %vm1428_vm7, %v5320_v54 }
 0x5b5   : > { %6867 = shalt.err (!%p6864_p3)
}
 0x5b6   : > { %s6913_s26 = smov 128  }
 0x5b7   : > { %5485 = dma.vmem_to_hbm [thread:$0]  (%p6987_p5), %s5343_s28, 1024, %s5345_s25, %s5330_s13, %s6913_s26, %s6913_s26, %s6905_s15  }
 0x5b8 PF: > { %p5491_p4 = scmp.ge.s32.totalorder %s6902_s24, 2  ;;  %s5359_s14 = sand.u32 1, %s6890_s21  }
 0x5b9   : > { %s5360_s10 = scalar_lea.sflag [#allocation3], %s5359_s14 }
 0x5ba   : > { %p5488_p7 = pnand %p5491_p4, %p6991_p6 }
 0x5bc   : > { %p5489_p8 = pneg %p5488_p7 }
 0x5be   : > { %6885 = dma.done.wait (%p5489_p8), %s5360_s10, 1024  }
 0x5bf   : > { %6887 = vsyncadd (%p5489_p8), %s5360_s10, 4294966272  ;;  %p16_p9 = scmp.ge.s32.totalorder %s6974_s27, 4   ;;  %s11811_s21 = smov %s6894_s22 }
 0x5c0   : > { %s11812_s22 = smov %s6898_s23  ;;  %s11813_s23 = smov %s6985_s30 }
 0x5c1   : > { %s11814_s24 = smov %s6974_s27  ;;  %18 = sbr.rel (!%p16_p9) target bundleno = 3 (0x3), region = 79 }
 0x5c6   :  { %5366 = vsyncpa [#allocation3], 1 }
 0x5c7   :  { %5368 = vsyncpa [#allocation3 + $0x1], 1 }

</bundles_post_ra>
